<compile_context>
chip_gen: v5e
topology: v5e:2x2
jax: 0.10.0
libtpu: 0.0.40
codegen_flags: <defaults>
</compile_context>

<pallas_src>
import functools

import jax
import jax.numpy as jnp
from jax.experimental import pallas as pl
from jax.experimental.pallas import tpu as pltpu

NEG_SLOPE = 0.1  # nn.LeakyReLU(0.1) in ConvBatchNormReLU(leaky=True)


# ---------------------------------------------------------------------------
# In-kernel building blocks (values only; activation layout = (H, C, W))
# ---------------------------------------------------------------------------
def _conv3x3(x, wmat, bias, apply_act):
    """3x3 conv (stride 1, pad 1) + folded-BN bias + optional LeakyReLU.

    x:    (H, Cin, W)    activation (H leading, Cin sublanes, W lanes)
    wmat: (Cout, 9*Cin)  BN-folded weights, tap-major ((dh*3+dw)*Cin + ci)
    bias: (1, Cout, 1)   folded BN bias (or conv bias for the final layer)
    """
    H, Cin, W = x.shape
    Cout = wmat.shape[0]

    # zero padding: H via leading-dim concat, W via lane-dim concat (all in VMEM)
    zh = jnp.zeros((1, Cin, W), jnp.float32)
    xp = jnp.concatenate([zh, x, zh], axis=0)              # (H+2, Cin, W)
    zw = jnp.zeros((H + 2, Cin, 1), jnp.float32)
    xp = jnp.concatenate([zw, xp, zw], axis=2)             # (H+2, Cin, W+2)

    # im2col: 9 shifted taps stacked along the contraction (sublane) axis
    taps = [xp[dh:dh + H, :, dw:dw + W]
            for dh in range(3) for dw in range(3)]         # each (H, Cin, W)
    col = jnp.concatenate(taps, axis=1)                    # (H, 9*Cin, W)

    # single batched matmul: (H, Cout, 9Cin) @ (H, 9Cin, W) -> (H, Cout, W)
    wb = jnp.broadcast_to(wmat[None], (H, Cout, 9 * Cin))
    y = jnp.einsum('hok,hkw->how', wb, col,
                   preferred_element_type=jnp.float32)
    y = y + bias
    if apply_act:
        y = jnp.where(y >= 0.0, y, NEG_SLOPE * y)
    return y


def _upsample2x(x, u_w):
    """Bilinear x2 upsample (align_corners=False), fully in-kernel.

    x:   (H, C, W),  u_w: (W, 2W) constant interpolation matrix  ->  (2H, C, 2W)
    """
    H, C, W = x.shape
    # W (lane) direction: batched matmul against the small constant matrix
    ub = jnp.broadcast_to(u_w[None], (H, W, 2 * W))
    xw = jnp.einsum('hcw,hwk->hck', x, ub,
                    preferred_element_type=jnp.float32)    # (H, C, 2W)
    # H (leading) direction: clamped +-1 shifts + fixed 0.75/0.25 blends
    x_prev = jnp.concatenate([xw[:1], xw[:-1]], axis=0)    # row i-1 (clamped)
    x_next = jnp.concatenate([xw[1:], xw[-1:]], axis=0)    # row i+1 (clamped)
    even = 0.75 * xw + 0.25 * x_prev                       # output row 2i
    odd = 0.75 * xw + 0.25 * x_next                        # output row 2i+1
    out = jnp.stack([even, odd], axis=1)                   # (H, 2, C, 2W)
    return out.reshape(2 * H, C, 2 * W)                    # leading-dim interleave


# ---------------------------------------------------------------------------
# Fused decoder kernel (one grid step = one batch element, everything in VMEM)
# ---------------------------------------------------------------------------
def _decoder_kernel(x_ref, w1_ref, w2_ref, w3_ref, w4_ref, w5_ref, w6_ref,
                    bias_ref, *rest, half, seg_out_stride):
    u_refs = rest[:-1]          # interpolation matrices, in upsample order
    o_ref = rest[-1]

    x = x_ref[0]                # (H0, Cin0, W0)
    ball = bias_ref[...]        # (6, half, 1)

    def b(layer, cout):
        return ball[layer:layer + 1, 0:cout, :]            # (1, Cout, 1)

    act = _conv3x3(x, w1_ref[...], b(0, half), True)
    act = _conv3x3(act, w2_ref[...], b(1, half), True)
    ui = 0
    if seg_out_stride <= 8:
        act = _upsample2x(act, u_refs[ui][...]); ui += 1
        act = _conv3x3(act, w3_ref[...], b(2, half), True)
    if seg_out_stride <= 4:
        act = _upsample2x(act, u_refs[ui][...]); ui += 1
        act = _conv3x3(act, w4_ref[...], b(3, half), True)
    if seg_out_stride <= 2:
        act = _upsample2x(act, u_refs[ui][...]); ui += 1
        act = _conv3x3(act, w5_ref[...], b(4, half), True)
    out = _conv3x3(act, w6_ref[...], b(5, 1), False)       # (Hf, 1, Wf)
    o_ref[0] = out[:, 0, :]


# ---------------------------------------------------------------------------
# Host-side parameter packing (fold eval-mode BN into the conv weights)
# ---------------------------------------------------------------------------
def _upsample_matrix(n):
    """(n, 2n) matrix: u[src, dst] = bilinear x2 weight (align_corners=False)."""
    dst = jnp.arange(2 * n, dtype=jnp.float32)
    src = jnp.clip((dst + 0.5) / 2.0 - 0.5, 0.0, float(n - 1))
    lo = jnp.floor(src).astype(jnp.int32)
    hi = jnp.minimum(lo + 1, n - 1)
    frac = src - lo.astype(jnp.float32)
    rows = jnp.arange(n, dtype=jnp.int32)[:, None]
    m = (jnp.where(rows == lo[None, :], 1.0 - frac[None, :], 0.0)
         + jnp.where(rows == hi[None, :], frac[None, :], 0.0))
    return m.astype(jnp.float32)


def pack_params(params, input_1):
    """Fold BN scale into conv weights; pack weights tap-major and biases."""
    half = input_1 // 2
    names = ["proj1", "proj2", "proj3", "proj4", "proj5", "proj"]
    wmats = []
    bias_all = jnp.zeros((len(names), half, 1), jnp.float32)
    for i, nm in enumerate(names):
        w, scale, bias = params[nm]                        # HWIO, (Cout,), (Cout,)
        cin, cout = w.shape[2], w.shape[3]
        wm = (w * scale[None, None, None, :]).transpose(3, 0, 1, 2)
        wmats.append(wm.reshape(cout, 9 * cin))
        bias_all = bias_all.at[i, :cout, 0].set(bias)
    return wmats, bias_all


def init_params(key, input_1):
    """Deterministic synthetic params; BN uses eval-mode running statistics."""
    half = input_1 // 2
    dims = [("proj1", input_1, half), ("proj2", half, half), ("proj3", half, half),
            ("proj4", half, half), ("proj5", half, half)]
    params = {}
    for name, cin, cout in dims:
        key, k1, k2, k3, k4, k5 = jax.random.split(key, 6)
        w = 0.1 * jax.random.normal(k1, (3, 3, cin, cout), jnp.float32)
        gamma = 1.0 + 0.1 * jax.random.normal(k2, (cout,), jnp.float32)
        beta = 0.1 * jax.random.normal(k3, (cout,), jnp.float32)
        mean = 0.1 * jax.random.normal(k4, (cout,), jnp.float32)
        var = jnp.abs(jax.random.normal(k5, (cout,), jnp.float32)) + 0.5
        scale = gamma / jnp.sqrt(var + 1e-5)
        params[name] = (w, scale, beta - mean * scale)
    key, k1, k2 = jax.random.split(key, 3)
    w = 0.1 * jax.random.normal(k1, (3, 3, half, 1), jnp.float32)
    b = 0.1 * jax.random.normal(k2, (1,), jnp.float32)
    params["proj"] = (w, jnp.ones((1,), jnp.float32), b)   # plain conv + bias
    return params


# ---------------------------------------------------------------------------
# Forward pass (matches mask_decoder.forward; NCHW in, NCHW out)
# ---------------------------------------------------------------------------
def mask_decoder_forward(x_nchw, wmats, bias_all, seg_out_stride=2):
    N, C0, H0, W0 = x_nchw.shape
    half = C0 // 2
    n_up = sum(seg_out_stride <= s for s in (8, 4, 2))
    Hf, Wf = H0 * (2 ** n_up), W0 * (2 ** n_up)

    u_mats = [_upsample_matrix(W0 * (2 ** i)) for i in range(n_up)]
    xt = jnp.transpose(x_nchw, (0, 2, 1, 3))               # (N, H0, C0, W0)

    def const_spec(a):
        nd = a.ndim
        return pl.BlockSpec(a.shape, lambda n, _nd=nd: (0,) * _nd)

    operands = list(wmats) + [bias_all] + u_mats
    in_specs = ([pl.BlockSpec((1, H0, C0, W0), lambda n: (n, 0, 0, 0))]
                + [const_spec(a) for a in operands])

    kernel = functools.partial(_decoder_kernel, half=half,
                               seg_out_stride=seg_out_stride)
    out = pl.pallas_call(
        kernel,
        out_shape=jax.ShapeDtypeStruct((N, Hf, Wf), jnp.float32),
        grid=(N,),
        in_specs=in_specs,
        out_specs=pl.BlockSpec((1, Hf, Wf), lambda n: (n, 0, 0)),
        compiler_params=pltpu.CompilerParams(
            dimension_semantics=("parallel",),
            vmem_limit_bytes=32 * 1024 * 1024),
    )(xt, *operands)
    return out[:, None, :, :]                              # NCHW, 1 channel


# ---------------------------------------------------------------------------
# Pure-JAX reference (for the correctness self-check)
# ---------------------------------------------------------------------------
def _ref_conv_bn_act(x, w, scale, bias, apply_act):
    y = jax.lax.conv_general_dilated(
        x, w, window_strides=(1, 1), padding="SAME",
        dimension_numbers=("NCHW", "HWIO", "NCHW"))
    y = y * scale.reshape(1, -1, 1, 1) + bias.reshape(1, -1, 1, 1)
    if apply_act:
        y = jnp.where(y >= 0.0, y, NEG_SLOPE * y)
    return y


def _ref_upsample2x(x):
    N, C, H, W = x.shape

    def coords(o, i):
        src = (jnp.arange(o, dtype=jnp.float32) + 0.5) / 2.0 - 0.5
        src = jnp.clip(src, 0.0, float(i - 1))
        lo = jnp.floor(src).astype(jnp.int32)
        hi = jnp.minimum(lo + 1, i - 1)
        return lo, hi, src - lo.astype(jnp.float32)

    hl, hh, hf = coords(2 * H, H)
    wl, wh, wf = coords(2 * W, W)
    t = jnp.take(x, hl, axis=2)
    b = jnp.take(x, hh, axis=2)
    rows = t * (1.0 - hf)[None, None, :, None] + b * hf[None, None, :, None]
    l = jnp.take(rows, wl, axis=3)
    r = jnp.take(rows, wh, axis=3)
    return l * (1.0 - wf)[None, None, None, :] + r * wf[None, None, None, :]


def _ref_forward(x, params, seg_out_stride=2):
    x = _ref_conv_bn_act(x, *params["proj1"], True)
    x = _ref_conv_bn_act(x, *params["proj2"], True)
    if seg_out_stride <= 8:
        x = _ref_upsample2x(x)
        x = _ref_conv_bn_act(x, *params["proj3"], True)
    if seg_out_stride <= 4:
        x = _ref_upsample2x(x)
        x = _ref_conv_bn_act(x, *params["proj4"], True)
    if seg_out_stride <= 2:
        x = _ref_upsample2x(x)
        x = _ref_conv_bn_act(x, *params["proj5"], True)
    return _ref_conv_bn_act(x, *params["proj"], False)


if __name__ == "__main__":
    key = jax.random.PRNGKey(0)
    kx, kp = jax.random.split(key)

    input_1 = 16                      # mask_decoder(input_1=16)
    N, H, W = 2, 8, 8                 # NCHW input (2, 16, 8, 8), like PyTorch
    x = jax.random.normal(kx, (N, input_1, H, W), jnp.float32)

    params = init_params(kp, input_1)
    wmats, bias_all = pack_params(params, input_1)

    fwd = jax.jit(functools.partial(mask_decoder_forward, seg_out_stride=2))
    out = jax.block_until_ready(fwd(x, wmats, bias_all))
    assert out.shape == (N, 1, 8 * H, 8 * W), out.shape

    ref = jax.block_until_ready(_ref_forward(x, params, seg_out_stride=2))
    err = float(jnp.max(jnp.abs(out - ref)))
    assert jnp.allclose(out, ref, rtol=2e-3, atol=2e-3), err

    print("KERNEL_OK")
</pallas_src>

<mosaic_0001>
module attributes {stable_mosaic.version = 11 : i64} {
  func.func @_decoder_kernel(%arg0: i32, %arg1: memref<1x8x16x8xf32, #tpu.memory_space<vmem>>, %arg2: memref<8x144xf32, #tpu.memory_space<vmem>>, %arg3: memref<8x72xf32, #tpu.memory_space<vmem>>, %arg4: memref<8x72xf32, #tpu.memory_space<vmem>>, %arg5: memref<8x72xf32, #tpu.memory_space<vmem>>, %arg6: memref<8x72xf32, #tpu.memory_space<vmem>>, %arg7: memref<1x72xf32, #tpu.memory_space<vmem>>, %arg8: memref<6x8x1xf32, #tpu.memory_space<vmem>>, %arg9: memref<8x16xf32, #tpu.memory_space<vmem>>, %arg10: memref<16x32xf32, #tpu.memory_space<vmem>>, %arg11: memref<32x64xf32, #tpu.memory_space<vmem>>, %arg12: memref<1x64x64xf32, #tpu.memory_space<vmem>>) attributes {dimension_semantics = [#tpu.dimension_semantics<parallel>], iteration_bounds = array<i64: 2>, scalar_prefetch = 0 : i64, scratch_operands = 0 : i64, tpu.core_type = #tpu.core_type<tc>, window_params = [{transform_indices = @transform_0, window_bounds = array<i64: 1, 8, 16, 8>}, {pipeline_mode = #tpu.pipeline_mode<synchronous>, transform_indices = @transform_1, window_bounds = array<i64: 8, 144>}, {pipeline_mode = #tpu.pipeline_mode<synchronous>, transform_indices = @transform_2, window_bounds = array<i64: 8, 72>}, {pipeline_mode = #tpu.pipeline_mode<synchronous>, transform_indices = @transform_3, window_bounds = array<i64: 8, 72>}, {pipeline_mode = #tpu.pipeline_mode<synchronous>, transform_indices = @transform_4, window_bounds = array<i64: 8, 72>}, {pipeline_mode = #tpu.pipeline_mode<synchronous>, transform_indices = @transform_5, window_bounds = array<i64: 8, 72>}, {pipeline_mode = #tpu.pipeline_mode<synchronous>, transform_indices = @transform_6, window_bounds = array<i64: 1, 72>}, {pipeline_mode = #tpu.pipeline_mode<synchronous>, transform_indices = @transform_7, window_bounds = array<i64: 6, 8, 1>}, {pipeline_mode = #tpu.pipeline_mode<synchronous>, transform_indices = @transform_8, window_bounds = array<i64: 8, 16>}, {pipeline_mode = #tpu.pipeline_mode<synchronous>, transform_indices = @transform_9, window_bounds = array<i64: 16, 32>}, {pipeline_mode = #tpu.pipeline_mode<synchronous>, transform_indices = @transform_10, window_bounds = array<i64: 32, 64>}, {transform_indices = @transform_11, window_bounds = array<i64: 1, 64, 64>}]} {
    %c0 = arith.constant 0 : index
    %c0_0 = arith.constant 0 : index
    %c0_1 = arith.constant 0 : index
    %c0_2 = arith.constant 0 : index
    %0 = vector.load %arg1[%c0, %c0_0, %c0_1, %c0_2] : memref<1x8x16x8xf32, #tpu.memory_space<vmem>>, vector<1x8x16x8xf32>
    %1 = vector.shape_cast %0 : vector<1x8x16x8xf32> to vector<8x16x8xf32>
    %c0_3 = arith.constant 0 : index
    %c0_4 = arith.constant 0 : index
    %c0_5 = arith.constant 0 : index
    %2 = vector.load %arg8[%c0_3, %c0_4, %c0_5] : memref<6x8x1xf32, #tpu.memory_space<vmem>>, vector<6x8x1xf32>
    %c0_6 = arith.constant 0 : index
    %c0_7 = arith.constant 0 : index
    %3 = vector.load %arg2[%c0_6, %c0_7] : memref<8x144xf32, #tpu.memory_space<vmem>>, vector<8x144xf32>
    %4 = vector.extract_strided_slice %2 {offsets = [0, 0, 0], sizes = [1, 8, 1], strides = [1, 1, 1]} : vector<6x8x1xf32> to vector<1x8x1xf32>
    %cst = arith.constant 0.000000e+00 : f32
    %5 = vector.broadcast %cst : f32 to vector<1x16x8xf32>
    %6 = tpu.concatenate %5, %1, %5 in 0 : vector<1x16x8xf32>, vector<8x16x8xf32>, vector<1x16x8xf32> -> vector<10x16x8xf32>
    %cst_8 = arith.constant 0.000000e+00 : f32
    %7 = vector.broadcast %cst_8 : f32 to vector<10x16x1xf32>
    %8 = tpu.concatenate %7, %6, %7 in 2 : vector<10x16x1xf32>, vector<10x16x8xf32>, vector<10x16x1xf32> -> vector<10x16x10xf32>
    %9 = vector.extract_strided_slice %8 {offsets = [0, 0, 0], sizes = [8, 16, 8], strides = [1, 1, 1]} : vector<10x16x10xf32> to vector<8x16x8xf32>
    %10 = vector.extract_strided_slice %8 {offsets = [0, 0, 1], sizes = [8, 16, 8], strides = [1, 1, 1]} : vector<10x16x10xf32> to vector<8x16x8xf32>
    %11 = vector.extract_strided_slice %8 {offsets = [0, 0, 2], sizes = [8, 16, 8], strides = [1, 1, 1]} : vector<10x16x10xf32> to vector<8x16x8xf32>
    %12 = vector.extract_strided_slice %8 {offsets = [1, 0, 0], sizes = [8, 16, 8], strides = [1, 1, 1]} : vector<10x16x10xf32> to vector<8x16x8xf32>
    %13 = vector.extract_strided_slice %8 {offsets = [1, 0, 1], sizes = [8, 16, 8], strides = [1, 1, 1]} : vector<10x16x10xf32> to vector<8x16x8xf32>
    %14 = vector.extract_strided_slice %8 {offsets = [1, 0, 2], sizes = [8, 16, 8], strides = [1, 1, 1]} : vector<10x16x10xf32> to vector<8x16x8xf32>
    %15 = vector.extract_strided_slice %8 {offsets = [2, 0, 0], sizes = [8, 16, 8], strides = [1, 1, 1]} : vector<10x16x10xf32> to vector<8x16x8xf32>
    %16 = vector.extract_strided_slice %8 {offsets = [2, 0, 1], sizes = [8, 16, 8], strides = [1, 1, 1]} : vector<10x16x10xf32> to vector<8x16x8xf32>
    %17 = vector.extract_strided_slice %8 {offsets = [2, 0, 2], sizes = [8, 16, 8], strides = [1, 1, 1]} : vector<10x16x10xf32> to vector<8x16x8xf32>
    %18 = tpu.concatenate %9, %10, %11, %12, %13, %14, %15, %16, %17 in 1 : vector<8x16x8xf32>, vector<8x16x8xf32>, vector<8x16x8xf32>, vector<8x16x8xf32>, vector<8x16x8xf32>, vector<8x16x8xf32>, vector<8x16x8xf32>, vector<8x16x8xf32>, vector<8x16x8xf32> -> vector<8x144x8xf32>
    %19 = vector.shape_cast %3 : vector<8x144xf32> to vector<1x8x144xf32>
    %20 = vector.shape_cast %19 : vector<1x8x144xf32> to vector<1x8x144xf32>
    %21 = vector.broadcast %20 : vector<1x8x144xf32> to vector<8x8x144xf32>
    "tpu.trace_start"() <{level = 10 : i32, message = "hok,hkw->how"}> : () -> ()
    %cst_9 = arith.constant dense<0.000000e+00> : vector<8x8x8xf32>
    %22 = tpu.matmul %21, %18, %cst_9 {dimension_numbers = #tpu.dot_dimension_numbers<[2], [1], [1], [2], [0, 0, 0, 1, 1, 2], [0], [0]>} : vector<8x8x144xf32>, vector<8x144x8xf32>, vector<8x8x8xf32> -> vector<8x8x8xf32>
    "tpu.trace_stop"() : () -> ()
    %23 = vector.broadcast %4 : vector<1x8x1xf32> to vector<8x8x8xf32>
    %24 = arith.addf %22, %23 : vector<8x8x8xf32>
    %cst_10 = arith.constant 0.000000e+00 : f32
    %25 = vector.broadcast %cst_10 : f32 to vector<8x8x8xf32>
    %26 = arith.cmpf oge, %24, %25 : vector<8x8x8xf32>
    %cst_11 = arith.constant 1.000000e-01 : f32
    %27 = vector.broadcast %cst_11 : f32 to vector<8x8x8xf32>
    %28 = arith.mulf %27, %24 : vector<8x8x8xf32>
    %29 = arith.select %26, %24, %28 : vector<8x8x8xi1>, vector<8x8x8xf32>
    %c0_12 = arith.constant 0 : index
    %c0_13 = arith.constant 0 : index
    %30 = vector.load %arg3[%c0_12, %c0_13] : memref<8x72xf32, #tpu.memory_space<vmem>>, vector<8x72xf32>
    %31 = vector.extract_strided_slice %2 {offsets = [1, 0, 0], sizes = [1, 8, 1], strides = [1, 1, 1]} : vector<6x8x1xf32> to vector<1x8x1xf32>
    %cst_14 = arith.constant 0.000000e+00 : f32
    %32 = vector.broadcast %cst_14 : f32 to vector<1x8x8xf32>
    %33 = tpu.concatenate %32, %29, %32 in 0 : vector<1x8x8xf32>, vector<8x8x8xf32>, vector<1x8x8xf32> -> vector<10x8x8xf32>
    %cst_15 = arith.constant 0.000000e+00 : f32
    %34 = vector.broadcast %cst_15 : f32 to vector<10x8x1xf32>
    %35 = tpu.concatenate %34, %33, %34 in 2 : vector<10x8x1xf32>, vector<10x8x8xf32>, vector<10x8x1xf32> -> vector<10x8x10xf32>
    %36 = vector.extract_strided_slice %35 {offsets = [0, 0, 0], sizes = [8, 8, 8], strides = [1, 1, 1]} : vector<10x8x10xf32> to vector<8x8x8xf32>
    %37 = vector.extract_strided_slice %35 {offsets = [0, 0, 1], sizes = [8, 8, 8], strides = [1, 1, 1]} : vector<10x8x10xf32> to vector<8x8x8xf32>
    %38 = vector.extract_strided_slice %35 {offsets = [0, 0, 2], sizes = [8, 8, 8], strides = [1, 1, 1]} : vector<10x8x10xf32> to vector<8x8x8xf32>
    %39 = vector.extract_strided_slice %35 {offsets = [1, 0, 0], sizes = [8, 8, 8], strides = [1, 1, 1]} : vector<10x8x10xf32> to vector<8x8x8xf32>
    %40 = vector.extract_strided_slice %35 {offsets = [1, 0, 1], sizes = [8, 8, 8], strides = [1, 1, 1]} : vector<10x8x10xf32> to vector<8x8x8xf32>
    %41 = vector.extract_strided_slice %35 {offsets = [1, 0, 2], sizes = [8, 8, 8], strides = [1, 1, 1]} : vector<10x8x10xf32> to vector<8x8x8xf32>
    %42 = vector.extract_strided_slice %35 {offsets = [2, 0, 0], sizes = [8, 8, 8], strides = [1, 1, 1]} : vector<10x8x10xf32> to vector<8x8x8xf32>
    %43 = vector.extract_strided_slice %35 {offsets = [2, 0, 1], sizes = [8, 8, 8], strides = [1, 1, 1]} : vector<10x8x10xf32> to vector<8x8x8xf32>
    %44 = vector.extract_strided_slice %35 {offsets = [2, 0, 2], sizes = [8, 8, 8], strides = [1, 1, 1]} : vector<10x8x10xf32> to vector<8x8x8xf32>
    %45 = tpu.concatenate %36, %37, %38, %39, %40, %41, %42, %43, %44 in 1 : vector<8x8x8xf32>, vector<8x8x8xf32>, vector<8x8x8xf32>, vector<8x8x8xf32>, vector<8x8x8xf32>, vector<8x8x8xf32>, vector<8x8x8xf32>, vector<8x8x8xf32>, vector<8x8x8xf32> -> vector<8x72x8xf32>
    %46 = vector.shape_cast %30 : vector<8x72xf32> to vector<1x8x72xf32>
    %47 = vector.shape_cast %46 : vector<1x8x72xf32> to vector<1x8x72xf32>
    %48 = vector.broadcast %47 : vector<1x8x72xf32> to vector<8x8x72xf32>
    "tpu.trace_start"() <{level = 10 : i32, message = "hok,hkw->how"}> : () -> ()
    %cst_16 = arith.constant dense<0.000000e+00> : vector<8x8x8xf32>
    %49 = tpu.matmul %48, %45, %cst_16 {dimension_numbers = #tpu.dot_dimension_numbers<[2], [1], [1], [2], [0, 0, 0, 1, 1, 2], [0], [0]>} : vector<8x8x72xf32>, vector<8x72x8xf32>, vector<8x8x8xf32> -> vector<8x8x8xf32>
    "tpu.trace_stop"() : () -> ()
    %50 = vector.broadcast %31 : vector<1x8x1xf32> to vector<8x8x8xf32>
    %51 = arith.addf %49, %50 : vector<8x8x8xf32>
    %cst_17 = arith.constant 0.000000e+00 : f32
    %52 = vector.broadcast %cst_17 : f32 to vector<8x8x8xf32>
    %53 = arith.cmpf oge, %51, %52 : vector<8x8x8xf32>
    %cst_18 = arith.constant 1.000000e-01 : f32
    %54 = vector.broadcast %cst_18 : f32 to vector<8x8x8xf32>
    %55 = arith.mulf %54, %51 : vector<8x8x8xf32>
    %56 = arith.select %53, %51, %55 : vector<8x8x8xi1>, vector<8x8x8xf32>
    %c0_19 = arith.constant 0 : index
    %c0_20 = arith.constant 0 : index
    %57 = vector.load %arg9[%c0_19, %c0_20] : memref<8x16xf32, #tpu.memory_space<vmem>>, vector<8x16xf32>
    %58 = vector.shape_cast %57 : vector<8x16xf32> to vector<1x8x16xf32>
    %59 = vector.shape_cast %58 : vector<1x8x16xf32> to vector<1x8x16xf32>
    %60 = vector.broadcast %59 : vector<1x8x16xf32> to vector<8x8x16xf32>
    "tpu.trace_start"() <{level = 10 : i32, message = "hcw,hwk->hck"}> : () -> ()
    %cst_21 = arith.constant dense<0.000000e+00> : vector<8x8x16xf32>
    %61 = tpu.matmul %56, %60, %cst_21 {dimension_numbers = #tpu.dot_dimension_numbers<[2], [1], [1], [2], [0, 0, 0, 1, 1, 2], [0], [0]>} : vector<8x8x8xf32>, vector<8x8x16xf32>, vector<8x8x16xf32> -> vector<8x8x16xf32>
    "tpu.trace_stop"() : () -> ()
    %62 = vector.extract_strided_slice %61 {offsets = [0, 0, 0], sizes = [1, 8, 16], strides = [1, 1, 1]} : vector<8x8x16xf32> to vector<1x8x16xf32>
    %63 = vector.extract_strided_slice %61 {offsets = [0, 0, 0], sizes = [7, 8, 16], strides = [1, 1, 1]} : vector<8x8x16xf32> to vector<7x8x16xf32>
    %64 = tpu.concatenate %62, %63 in 0 : vector<1x8x16xf32>, vector<7x8x16xf32> -> vector<8x8x16xf32>
    %65 = vector.extract_strided_slice %61 {offsets = [1, 0, 0], sizes = [7, 8, 16], strides = [1, 1, 1]} : vector<8x8x16xf32> to vector<7x8x16xf32>
    %66 = vector.extract_strided_slice %61 {offsets = [7, 0, 0], sizes = [1, 8, 16], strides = [1, 1, 1]} : vector<8x8x16xf32> to vector<1x8x16xf32>
    %67 = tpu.concatenate %65, %66 in 0 : vector<7x8x16xf32>, vector<1x8x16xf32> -> vector<8x8x16xf32>
    %cst_22 = arith.constant 7.500000e-01 : f32
    %68 = vector.broadcast %cst_22 : f32 to vector<8x8x16xf32>
    %69 = arith.mulf %68, %61 : vector<8x8x16xf32>
    %cst_23 = arith.constant 2.500000e-01 : f32
    %70 = vector.broadcast %cst_23 : f32 to vector<8x8x16xf32>
    %71 = arith.mulf %70, %64 : vector<8x8x16xf32>
    %72 = arith.addf %69, %71 : vector<8x8x16xf32>
    %cst_24 = arith.constant 7.500000e-01 : f32
    %73 = vector.broadcast %cst_24 : f32 to vector<8x8x16xf32>
    %74 = arith.mulf %73, %61 : vector<8x8x16xf32>
    %cst_25 = arith.constant 2.500000e-01 : f32
    %75 = vector.broadcast %cst_25 : f32 to vector<8x8x16xf32>
    %76 = arith.mulf %75, %67 : vector<8x8x16xf32>
    %77 = arith.addf %74, %76 : vector<8x8x16xf32>
    %78 = vector.shape_cast %72 : vector<8x8x16xf32> to vector<8x1x8x16xf32>
    %79 = vector.shape_cast %77 : vector<8x8x16xf32> to vector<8x1x8x16xf32>
    %80 = tpu.concatenate %78, %79 in 1 : vector<8x1x8x16xf32>, vector<8x1x8x16xf32> -> vector<8x2x8x16xf32>
    %81 = vector.shape_cast %80 : vector<8x2x8x16xf32> to vector<16x8x16xf32>
    %c0_26 = arith.constant 0 : index
    %c0_27 = arith.constant 0 : index
    %82 = vector.load %arg4[%c0_26, %c0_27] : memref<8x72xf32, #tpu.memory_space<vmem>>, vector<8x72xf32>
    %83 = vector.extract_strided_slice %2 {offsets = [2, 0, 0], sizes = [1, 8, 1], strides = [1, 1, 1]} : vector<6x8x1xf32> to vector<1x8x1xf32>
    %cst_28 = arith.constant 0.000000e+00 : f32
    %84 = vector.broadcast %cst_28 : f32 to vector<1x8x16xf32>
    %85 = tpu.concatenate %84, %81, %84 in 0 : vector<1x8x16xf32>, vector<16x8x16xf32>, vector<1x8x16xf32> -> vector<18x8x16xf32>
    %cst_29 = arith.constant 0.000000e+00 : f32
    %86 = vector.broadcast %cst_29 : f32 to vector<18x8x1xf32>
    %87 = tpu.concatenate %86, %85, %86 in 2 : vector<18x8x1xf32>, vector<18x8x16xf32>, vector<18x8x1xf32> -> vector<18x8x18xf32>
    %88 = vector.extract_strided_slice %87 {offsets = [0, 0, 0], sizes = [16, 8, 16], strides = [1, 1, 1]} : vector<18x8x18xf32> to vector<16x8x16xf32>
    %89 = vector.extract_strided_slice %87 {offsets = [0, 0, 1], sizes = [16, 8, 16], strides = [1, 1, 1]} : vector<18x8x18xf32> to vector<16x8x16xf32>
    %90 = vector.extract_strided_slice %87 {offsets = [0, 0, 2], sizes = [16, 8, 16], strides = [1, 1, 1]} : vector<18x8x18xf32> to vector<16x8x16xf32>
    %91 = vector.extract_strided_slice %87 {offsets = [1, 0, 0], sizes = [16, 8, 16], strides = [1, 1, 1]} : vector<18x8x18xf32> to vector<16x8x16xf32>
    %92 = vector.extract_strided_slice %87 {offsets = [1, 0, 1], sizes = [16, 8, 16], strides = [1, 1, 1]} : vector<18x8x18xf32> to vector<16x8x16xf32>
    %93 = vector.extract_strided_slice %87 {offsets = [1, 0, 2], sizes = [16, 8, 16], strides = [1, 1, 1]} : vector<18x8x18xf32> to vector<16x8x16xf32>
    %94 = vector.extract_strided_slice %87 {offsets = [2, 0, 0], sizes = [16, 8, 16], strides = [1, 1, 1]} : vector<18x8x18xf32> to vector<16x8x16xf32>
    %95 = vector.extract_strided_slice %87 {offsets = [2, 0, 1], sizes = [16, 8, 16], strides = [1, 1, 1]} : vector<18x8x18xf32> to vector<16x8x16xf32>
    %96 = vector.extract_strided_slice %87 {offsets = [2, 0, 2], sizes = [16, 8, 16], strides = [1, 1, 1]} : vector<18x8x18xf32> to vector<16x8x16xf32>
    %97 = tpu.concatenate %88, %89, %90, %91, %92, %93, %94, %95, %96 in 1 : vector<16x8x16xf32>, vector<16x8x16xf32>, vector<16x8x16xf32>, vector<16x8x16xf32>, vector<16x8x16xf32>, vector<16x8x16xf32>, vector<16x8x16xf32>, vector<16x8x16xf32>, vector<16x8x16xf32> -> vector<16x72x16xf32>
    %98 = vector.shape_cast %82 : vector<8x72xf32> to vector<1x8x72xf32>
    %99 = vector.shape_cast %98 : vector<1x8x72xf32> to vector<1x8x72xf32>
    %100 = vector.broadcast %99 : vector<1x8x72xf32> to vector<16x8x72xf32>
    "tpu.trace_start"() <{level = 10 : i32, message = "hok,hkw->how"}> : () -> ()
    %cst_30 = arith.constant dense<0.000000e+00> : vector<16x8x16xf32>
    %101 = tpu.matmul %100, %97, %cst_30 {dimension_numbers = #tpu.dot_dimension_numbers<[2], [1], [1], [2], [0, 0, 0, 1, 1, 2], [0], [0]>} : vector<16x8x72xf32>, vector<16x72x16xf32>, vector<16x8x16xf32> -> vector<16x8x16xf32>
    "tpu.trace_stop"() : () -> ()
    %102 = vector.broadcast %83 : vector<1x8x1xf32> to vector<16x8x16xf32>
    %103 = arith.addf %101, %102 : vector<16x8x16xf32>
    %cst_31 = arith.constant 0.000000e+00 : f32
    %104 = vector.broadcast %cst_31 : f32 to vector<16x8x16xf32>
    %105 = arith.cmpf oge, %103, %104 : vector<16x8x16xf32>
    %cst_32 = arith.constant 1.000000e-01 : f32
    %106 = vector.broadcast %cst_32 : f32 to vector<16x8x16xf32>
    %107 = arith.mulf %106, %103 : vector<16x8x16xf32>
    %108 = arith.select %105, %103, %107 : vector<16x8x16xi1>, vector<16x8x16xf32>
    %c0_33 = arith.constant 0 : index
    %c0_34 = arith.constant 0 : index
    %109 = vector.load %arg10[%c0_33, %c0_34] : memref<16x32xf32, #tpu.memory_space<vmem>>, vector<16x32xf32>
    %110 = vector.shape_cast %109 : vector<16x32xf32> to vector<1x16x32xf32>
    %111 = vector.shape_cast %110 : vector<1x16x32xf32> to vector<1x16x32xf32>
    %112 = vector.broadcast %111 : vector<1x16x32xf32> to vector<16x16x32xf32>
    "tpu.trace_start"() <{level = 10 : i32, message = "hcw,hwk->hck"}> : () -> ()
    %cst_35 = arith.constant dense<0.000000e+00> : vector<16x8x32xf32>
    %113 = tpu.matmul %108, %112, %cst_35 {dimension_numbers = #tpu.dot_dimension_numbers<[2], [1], [1], [2], [0, 0, 0, 1, 1, 2], [0], [0]>} : vector<16x8x16xf32>, vector<16x16x32xf32>, vector<16x8x32xf32> -> vector<16x8x32xf32>
    "tpu.trace_stop"() : () -> ()
    %114 = vector.extract_strided_slice %113 {offsets = [0, 0, 0], sizes = [1, 8, 32], strides = [1, 1, 1]} : vector<16x8x32xf32> to vector<1x8x32xf32>
    %115 = vector.extract_strided_slice %113 {offsets = [0, 0, 0], sizes = [15, 8, 32], strides = [1, 1, 1]} : vector<16x8x32xf32> to vector<15x8x32xf32>
    %116 = tpu.concatenate %114, %115 in 0 : vector<1x8x32xf32>, vector<15x8x32xf32> -> vector<16x8x32xf32>
    %117 = vector.extract_strided_slice %113 {offsets = [1, 0, 0], sizes = [15, 8, 32], strides = [1, 1, 1]} : vector<16x8x32xf32> to vector<15x8x32xf32>
    %118 = vector.extract_strided_slice %113 {offsets = [15, 0, 0], sizes = [1, 8, 32], strides = [1, 1, 1]} : vector<16x8x32xf32> to vector<1x8x32xf32>
    %119 = tpu.concatenate %117, %118 in 0 : vector<15x8x32xf32>, vector<1x8x32xf32> -> vector<16x8x32xf32>
    %cst_36 = arith.constant 7.500000e-01 : f32
    %120 = vector.broadcast %cst_36 : f32 to vector<16x8x32xf32>
    %121 = arith.mulf %120, %113 : vector<16x8x32xf32>
    %cst_37 = arith.constant 2.500000e-01 : f32
    %122 = vector.broadcast %cst_37 : f32 to vector<16x8x32xf32>
    %123 = arith.mulf %122, %116 : vector<16x8x32xf32>
    %124 = arith.addf %121, %123 : vector<16x8x32xf32>
    %cst_38 = arith.constant 7.500000e-01 : f32
    %125 = vector.broadcast %cst_38 : f32 to vector<16x8x32xf32>
    %126 = arith.mulf %125, %113 : vector<16x8x32xf32>
    %cst_39 = arith.constant 2.500000e-01 : f32
    %127 = vector.broadcast %cst_39 : f32 to vector<16x8x32xf32>
    %128 = arith.mulf %127, %119 : vector<16x8x32xf32>
    %129 = arith.addf %126, %128 : vector<16x8x32xf32>
    %130 = vector.shape_cast %124 : vector<16x8x32xf32> to vector<16x1x8x32xf32>
    %131 = vector.shape_cast %129 : vector<16x8x32xf32> to vector<16x1x8x32xf32>
    %132 = tpu.concatenate %130, %131 in 1 : vector<16x1x8x32xf32>, vector<16x1x8x32xf32> -> vector<16x2x8x32xf32>
    %133 = vector.shape_cast %132 : vector<16x2x8x32xf32> to vector<32x8x32xf32>
    %c0_40 = arith.constant 0 : index
    %c0_41 = arith.constant 0 : index
    %134 = vector.load %arg5[%c0_40, %c0_41] : memref<8x72xf32, #tpu.memory_space<vmem>>, vector<8x72xf32>
    %135 = vector.extract_strided_slice %2 {offsets = [3, 0, 0], sizes = [1, 8, 1], strides = [1, 1, 1]} : vector<6x8x1xf32> to vector<1x8x1xf32>
    %cst_42 = arith.constant 0.000000e+00 : f32
    %136 = vector.broadcast %cst_42 : f32 to vector<1x8x32xf32>
    %137 = tpu.concatenate %136, %133, %136 in 0 : vector<1x8x32xf32>, vector<32x8x32xf32>, vector<1x8x32xf32> -> vector<34x8x32xf32>
    %cst_43 = arith.constant 0.000000e+00 : f32
    %138 = vector.broadcast %cst_43 : f32 to vector<34x8x1xf32>
    %139 = tpu.concatenate %138, %137, %138 in 2 : vector<34x8x1xf32>, vector<34x8x32xf32>, vector<34x8x1xf32> -> vector<34x8x34xf32>
    %140 = vector.extract_strided_slice %139 {offsets = [0, 0, 0], sizes = [32, 8, 32], strides = [1, 1, 1]} : vector<34x8x34xf32> to vector<32x8x32xf32>
    %141 = vector.extract_strided_slice %139 {offsets = [0, 0, 1], sizes = [32, 8, 32], strides = [1, 1, 1]} : vector<34x8x34xf32> to vector<32x8x32xf32>
    %142 = vector.extract_strided_slice %139 {offsets = [0, 0, 2], sizes = [32, 8, 32], strides = [1, 1, 1]} : vector<34x8x34xf32> to vector<32x8x32xf32>
    %143 = vector.extract_strided_slice %139 {offsets = [1, 0, 0], sizes = [32, 8, 32], strides = [1, 1, 1]} : vector<34x8x34xf32> to vector<32x8x32xf32>
    %144 = vector.extract_strided_slice %139 {offsets = [1, 0, 1], sizes = [32, 8, 32], strides = [1, 1, 1]} : vector<34x8x34xf32> to vector<32x8x32xf32>
    %145 = vector.extract_strided_slice %139 {offsets = [1, 0, 2], sizes = [32, 8, 32], strides = [1, 1, 1]} : vector<34x8x34xf32> to vector<32x8x32xf32>
    %146 = vector.extract_strided_slice %139 {offsets = [2, 0, 0], sizes = [32, 8, 32], strides = [1, 1, 1]} : vector<34x8x34xf32> to vector<32x8x32xf32>
    %147 = vector.extract_strided_slice %139 {offsets = [2, 0, 1], sizes = [32, 8, 32], strides = [1, 1, 1]} : vector<34x8x34xf32> to vector<32x8x32xf32>
    %148 = vector.extract_strided_slice %139 {offsets = [2, 0, 2], sizes = [32, 8, 32], strides = [1, 1, 1]} : vector<34x8x34xf32> to vector<32x8x32xf32>
    %149 = tpu.concatenate %140, %141, %142, %143, %144, %145, %146, %147, %148 in 1 : vector<32x8x32xf32>, vector<32x8x32xf32>, vector<32x8x32xf32>, vector<32x8x32xf32>, vector<32x8x32xf32>, vector<32x8x32xf32>, vector<32x8x32xf32>, vector<32x8x32xf32>, vector<32x8x32xf32> -> vector<32x72x32xf32>
    %150 = vector.shape_cast %134 : vector<8x72xf32> to vector<1x8x72xf32>
    %151 = vector.shape_cast %150 : vector<1x8x72xf32> to vector<1x8x72xf32>
    %152 = vector.broadcast %151 : vector<1x8x72xf32> to vector<32x8x72xf32>
    "tpu.trace_start"() <{level = 10 : i32, message = "hok,hkw->how"}> : () -> ()
    %cst_44 = arith.constant dense<0.000000e+00> : vector<32x8x32xf32>
    %153 = tpu.matmul %152, %149, %cst_44 {dimension_numbers = #tpu.dot_dimension_numbers<[2], [1], [1], [2], [0, 0, 0, 1, 1, 2], [0], [0]>} : vector<32x8x72xf32>, vector<32x72x32xf32>, vector<32x8x32xf32> -> vector<32x8x32xf32>
    "tpu.trace_stop"() : () -> ()
    %154 = vector.broadcast %135 : vector<1x8x1xf32> to vector<32x8x32xf32>
    %155 = arith.addf %153, %154 : vector<32x8x32xf32>
    %cst_45 = arith.constant 0.000000e+00 : f32
    %156 = vector.broadcast %cst_45 : f32 to vector<32x8x32xf32>
    %157 = arith.cmpf oge, %155, %156 : vector<32x8x32xf32>
    %cst_46 = arith.constant 1.000000e-01 : f32
    %158 = vector.broadcast %cst_46 : f32 to vector<32x8x32xf32>
    %159 = arith.mulf %158, %155 : vector<32x8x32xf32>
    %160 = arith.select %157, %155, %159 : vector<32x8x32xi1>, vector<32x8x32xf32>
    %c0_47 = arith.constant 0 : index
    %c0_48 = arith.constant 0 : index
    %161 = vector.load %arg11[%c0_47, %c0_48] : memref<32x64xf32, #tpu.memory_space<vmem>>, vector<32x64xf32>
    %162 = vector.shape_cast %161 : vector<32x64xf32> to vector<1x32x64xf32>
    %163 = vector.shape_cast %162 : vector<1x32x64xf32> to vector<1x32x64xf32>
    %164 = vector.broadcast %163 : vector<1x32x64xf32> to vector<32x32x64xf32>
    "tpu.trace_start"() <{level = 10 : i32, message = "hcw,hwk->hck"}> : () -> ()
    %cst_49 = arith.constant dense<0.000000e+00> : vector<32x8x64xf32>
    %165 = tpu.matmul %160, %164, %cst_49 {dimension_numbers = #tpu.dot_dimension_numbers<[2], [1], [1], [2], [0, 0, 0, 1, 1, 2], [0], [0]>} : vector<32x8x32xf32>, vector<32x32x64xf32>, vector<32x8x64xf32> -> vector<32x8x64xf32>
    "tpu.trace_stop"() : () -> ()
    %166 = vector.extract_strided_slice %165 {offsets = [0, 0, 0], sizes = [1, 8, 64], strides = [1, 1, 1]} : vector<32x8x64xf32> to vector<1x8x64xf32>
    %167 = vector.extract_strided_slice %165 {offsets = [0, 0, 0], sizes = [31, 8, 64], strides = [1, 1, 1]} : vector<32x8x64xf32> to vector<31x8x64xf32>
    %168 = tpu.concatenate %166, %167 in 0 : vector<1x8x64xf32>, vector<31x8x64xf32> -> vector<32x8x64xf32>
    %169 = vector.extract_strided_slice %165 {offsets = [1, 0, 0], sizes = [31, 8, 64], strides = [1, 1, 1]} : vector<32x8x64xf32> to vector<31x8x64xf32>
    %170 = vector.extract_strided_slice %165 {offsets = [31, 0, 0], sizes = [1, 8, 64], strides = [1, 1, 1]} : vector<32x8x64xf32> to vector<1x8x64xf32>
    %171 = tpu.concatenate %169, %170 in 0 : vector<31x8x64xf32>, vector<1x8x64xf32> -> vector<32x8x64xf32>
    %cst_50 = arith.constant 7.500000e-01 : f32
    %172 = vector.broadcast %cst_50 : f32 to vector<32x8x64xf32>
    %173 = arith.mulf %172, %165 : vector<32x8x64xf32>
    %cst_51 = arith.constant 2.500000e-01 : f32
    %174 = vector.broadcast %cst_51 : f32 to vector<32x8x64xf32>
    %175 = arith.mulf %174, %168 : vector<32x8x64xf32>
    %176 = arith.addf %173, %175 : vector<32x8x64xf32>
    %cst_52 = arith.constant 7.500000e-01 : f32
    %177 = vector.broadcast %cst_52 : f32 to vector<32x8x64xf32>
    %178 = arith.mulf %177, %165 : vector<32x8x64xf32>
    %cst_53 = arith.constant 2.500000e-01 : f32
    %179 = vector.broadcast %cst_53 : f32 to vector<32x8x64xf32>
    %180 = arith.mulf %179, %171 : vector<32x8x64xf32>
    %181 = arith.addf %178, %180 : vector<32x8x64xf32>
    %182 = vector.shape_cast %176 : vector<32x8x64xf32> to vector<32x1x8x64xf32>
    %183 = vector.shape_cast %181 : vector<32x8x64xf32> to vector<32x1x8x64xf32>
    %184 = tpu.concatenate %182, %183 in 1 : vector<32x1x8x64xf32>, vector<32x1x8x64xf32> -> vector<32x2x8x64xf32>
    %185 = vector.shape_cast %184 : vector<32x2x8x64xf32> to vector<64x8x64xf32>
    %c0_54 = arith.constant 0 : index
    %c0_55 = arith.constant 0 : index
    %186 = vector.load %arg6[%c0_54, %c0_55] : memref<8x72xf32, #tpu.memory_space<vmem>>, vector<8x72xf32>
    %187 = vector.extract_strided_slice %2 {offsets = [4, 0, 0], sizes = [1, 8, 1], strides = [1, 1, 1]} : vector<6x8x1xf32> to vector<1x8x1xf32>
    %cst_56 = arith.constant 0.000000e+00 : f32
    %188 = vector.broadcast %cst_56 : f32 to vector<1x8x64xf32>
    %189 = tpu.concatenate %188, %185, %188 in 0 : vector<1x8x64xf32>, vector<64x8x64xf32>, vector<1x8x64xf32> -> vector<66x8x64xf32>
    %cst_57 = arith.constant 0.000000e+00 : f32
    %190 = vector.broadcast %cst_57 : f32 to vector<66x8x1xf32>
    %191 = tpu.concatenate %190, %189, %190 in 2 : vector<66x8x1xf32>, vector<66x8x64xf32>, vector<66x8x1xf32> -> vector<66x8x66xf32>
    %192 = vector.extract_strided_slice %191 {offsets = [0, 0, 0], sizes = [64, 8, 64], strides = [1, 1, 1]} : vector<66x8x66xf32> to vector<64x8x64xf32>
    %193 = vector.extract_strided_slice %191 {offsets = [0, 0, 1], sizes = [64, 8, 64], strides = [1, 1, 1]} : vector<66x8x66xf32> to vector<64x8x64xf32>
    %194 = vector.extract_strided_slice %191 {offsets = [0, 0, 2], sizes = [64, 8, 64], strides = [1, 1, 1]} : vector<66x8x66xf32> to vector<64x8x64xf32>
    %195 = vector.extract_strided_slice %191 {offsets = [1, 0, 0], sizes = [64, 8, 64], strides = [1, 1, 1]} : vector<66x8x66xf32> to vector<64x8x64xf32>
    %196 = vector.extract_strided_slice %191 {offsets = [1, 0, 1], sizes = [64, 8, 64], strides = [1, 1, 1]} : vector<66x8x66xf32> to vector<64x8x64xf32>
    %197 = vector.extract_strided_slice %191 {offsets = [1, 0, 2], sizes = [64, 8, 64], strides = [1, 1, 1]} : vector<66x8x66xf32> to vector<64x8x64xf32>
    %198 = vector.extract_strided_slice %191 {offsets = [2, 0, 0], sizes = [64, 8, 64], strides = [1, 1, 1]} : vector<66x8x66xf32> to vector<64x8x64xf32>
    %199 = vector.extract_strided_slice %191 {offsets = [2, 0, 1], sizes = [64, 8, 64], strides = [1, 1, 1]} : vector<66x8x66xf32> to vector<64x8x64xf32>
    %200 = vector.extract_strided_slice %191 {offsets = [2, 0, 2], sizes = [64, 8, 64], strides = [1, 1, 1]} : vector<66x8x66xf32> to vector<64x8x64xf32>
    %201 = tpu.concatenate %192, %193, %194, %195, %196, %197, %198, %199, %200 in 1 : vector<64x8x64xf32>, vector<64x8x64xf32>, vector<64x8x64xf32>, vector<64x8x64xf32>, vector<64x8x64xf32>, vector<64x8x64xf32>, vector<64x8x64xf32>, vector<64x8x64xf32>, vector<64x8x64xf32> -> vector<64x72x64xf32>
    %202 = vector.shape_cast %186 : vector<8x72xf32> to vector<1x8x72xf32>
    %203 = vector.shape_cast %202 : vector<1x8x72xf32> to vector<1x8x72xf32>
    %204 = vector.broadcast %203 : vector<1x8x72xf32> to vector<64x8x72xf32>
    "tpu.trace_start"() <{level = 10 : i32, message = "hok,hkw->how"}> : () -> ()
    %cst_58 = arith.constant dense<0.000000e+00> : vector<64x8x64xf32>
    %205 = tpu.matmul %204, %201, %cst_58 {dimension_numbers = #tpu.dot_dimension_numbers<[2], [1], [1], [2], [0, 0, 0, 1, 1, 2], [0], [0]>} : vector<64x8x72xf32>, vector<64x72x64xf32>, vector<64x8x64xf32> -> vector<64x8x64xf32>
    "tpu.trace_stop"() : () -> ()
    %206 = vector.broadcast %187 : vector<1x8x1xf32> to vector<64x8x64xf32>
    %207 = arith.addf %205, %206 : vector<64x8x64xf32>
    %cst_59 = arith.constant 0.000000e+00 : f32
    %208 = vector.broadcast %cst_59 : f32 to vector<64x8x64xf32>
    %209 = arith.cmpf oge, %207, %208 : vector<64x8x64xf32>
    %cst_60 = arith.constant 1.000000e-01 : f32
    %210 = vector.broadcast %cst_60 : f32 to vector<64x8x64xf32>
    %211 = arith.mulf %210, %207 : vector<64x8x64xf32>
    %212 = arith.select %209, %207, %211 : vector<64x8x64xi1>, vector<64x8x64xf32>
    %c0_61 = arith.constant 0 : index
    %c0_62 = arith.constant 0 : index
    %213 = vector.load %arg7[%c0_61, %c0_62] : memref<1x72xf32, #tpu.memory_space<vmem>>, vector<1x72xf32>
    %214 = vector.extract_strided_slice %2 {offsets = [5, 0, 0], sizes = [1, 1, 1], strides = [1, 1, 1]} : vector<6x8x1xf32> to vector<1x1x1xf32>
    %cst_63 = arith.constant 0.000000e+00 : f32
    %215 = vector.broadcast %cst_63 : f32 to vector<1x8x64xf32>
    %216 = tpu.concatenate %215, %212, %215 in 0 : vector<1x8x64xf32>, vector<64x8x64xf32>, vector<1x8x64xf32> -> vector<66x8x64xf32>
    %cst_64 = arith.constant 0.000000e+00 : f32
    %217 = vector.broadcast %cst_64 : f32 to vector<66x8x1xf32>
    %218 = tpu.concatenate %217, %216, %217 in 2 : vector<66x8x1xf32>, vector<66x8x64xf32>, vector<66x8x1xf32> -> vector<66x8x66xf32>
    %219 = vector.extract_strided_slice %218 {offsets = [0, 0, 0], sizes = [64, 8, 64], strides = [1, 1, 1]} : vector<66x8x66xf32> to vector<64x8x64xf32>
    %220 = vector.extract_strided_slice %218 {offsets = [0, 0, 1], sizes = [64, 8, 64], strides = [1, 1, 1]} : vector<66x8x66xf32> to vector<64x8x64xf32>
    %221 = vector.extract_strided_slice %218 {offsets = [0, 0, 2], sizes = [64, 8, 64], strides = [1, 1, 1]} : vector<66x8x66xf32> to vector<64x8x64xf32>
    %222 = vector.extract_strided_slice %218 {offsets = [1, 0, 0], sizes = [64, 8, 64], strides = [1, 1, 1]} : vector<66x8x66xf32> to vector<64x8x64xf32>
    %223 = vector.extract_strided_slice %218 {offsets = [1, 0, 1], sizes = [64, 8, 64], strides = [1, 1, 1]} : vector<66x8x66xf32> to vector<64x8x64xf32>
    %224 = vector.extract_strided_slice %218 {offsets = [1, 0, 2], sizes = [64, 8, 64], strides = [1, 1, 1]} : vector<66x8x66xf32> to vector<64x8x64xf32>
    %225 = vector.extract_strided_slice %218 {offsets = [2, 0, 0], sizes = [64, 8, 64], strides = [1, 1, 1]} : vector<66x8x66xf32> to vector<64x8x64xf32>
    %226 = vector.extract_strided_slice %218 {offsets = [2, 0, 1], sizes = [64, 8, 64], strides = [1, 1, 1]} : vector<66x8x66xf32> to vector<64x8x64xf32>
    %227 = vector.extract_strided_slice %218 {offsets = [2, 0, 2], sizes = [64, 8, 64], strides = [1, 1, 1]} : vector<66x8x66xf32> to vector<64x8x64xf32>
    %228 = tpu.concatenate %219, %220, %221, %222, %223, %224, %225, %226, %227 in 1 : vector<64x8x64xf32>, vector<64x8x64xf32>, vector<64x8x64xf32>, vector<64x8x64xf32>, vector<64x8x64xf32>, vector<64x8x64xf32>, vector<64x8x64xf32>, vector<64x8x64xf32>, vector<64x8x64xf32> -> vector<64x72x64xf32>
    %229 = vector.shape_cast %213 : vector<1x72xf32> to vector<1x1x72xf32>
    %230 = vector.shape_cast %229 : vector<1x1x72xf32> to vector<1x1x72xf32>
    %231 = vector.broadcast %230 : vector<1x1x72xf32> to vector<64x1x72xf32>
    "tpu.trace_start"() <{level = 10 : i32, message = "hok,hkw->how"}> : () -> ()
    %cst_65 = arith.constant dense<0.000000e+00> : vector<64x1x64xf32>
    %232 = tpu.matmul %231, %228, %cst_65 {dimension_numbers = #tpu.dot_dimension_numbers<[2], [1], [1], [2], [0, 0, 0, 1, 1, 2], [0], [0]>} : vector<64x1x72xf32>, vector<64x72x64xf32>, vector<64x1x64xf32> -> vector<64x1x64xf32>
    "tpu.trace_stop"() : () -> ()
    %233 = vector.broadcast %214 : vector<1x1x1xf32> to vector<64x1x64xf32>
    %234 = arith.addf %232, %233 : vector<64x1x64xf32>
    %235 = vector.shape_cast %234 : vector<64x1x64xf32> to vector<64x64xf32>
    %c0_66 = arith.constant 0 : index
    %c0_67 = arith.constant 0 : index
    %c0_68 = arith.constant 0 : index
    %236 = vector.load %arg12[%c0_66, %c0_67, %c0_68] : memref<1x64x64xf32, #tpu.memory_space<vmem>>, vector<1x64x64xf32>
    %237 = vector.shape_cast %236 : vector<1x64x64xf32> to vector<64x64xf32>
    %238 = vector.shape_cast %235 : vector<64x64xf32> to vector<1x64x64xf32>
    tpu.vector_store %arg12[%c0_66, %c0_67, %c0_68], %238 {strides = array<i32>} : memref<1x64x64xf32, #tpu.memory_space<vmem>>, vector<1x64x64xf32>,
    return
  }
  func.func @transform_0(%arg0: i32) -> (i32, i32, i32, i32) {
    %c0_i32 = arith.constant 0 : i32
    %c0_i32_0 = arith.constant 0 : i32
    %c0_i32_1 = arith.constant 0 : i32
    %c0_i32_2 = arith.constant 0 : i32
    return %arg0, %c0_i32, %c0_i32_0, %c0_i32_1 : i32, i32, i32, i32
  }
  func.func @transform_1(%arg0: i32) -> (i32, i32) {
    %c0_i32 = arith.constant 0 : i32
    %c0_i32_0 = arith.constant 0 : i32
    %c0_i32_1 = arith.constant 0 : i32
    return %c0_i32, %c0_i32_0 : i32, i32
  }
  func.func @transform_2(%arg0: i32) -> (i32, i32) {
    %c0_i32 = arith.constant 0 : i32
    %c0_i32_0 = arith.constant 0 : i32
    %c0_i32_1 = arith.constant 0 : i32
    return %c0_i32, %c0_i32_0 : i32, i32
  }
  func.func @transform_3(%arg0: i32) -> (i32, i32) {
    %c0_i32 = arith.constant 0 : i32
    %c0_i32_0 = arith.constant 0 : i32
    %c0_i32_1 = arith.constant 0 : i32
    return %c0_i32, %c0_i32_0 : i32, i32
  }
  func.func @transform_4(%arg0: i32) -> (i32, i32) {
    %c0_i32 = arith.constant 0 : i32
    %c0_i32_0 = arith.constant 0 : i32
    %c0_i32_1 = arith.constant 0 : i32
    return %c0_i32, %c0_i32_0 : i32, i32
  }
  func.func @transform_5(%arg0: i32) -> (i32, i32) {
    %c0_i32 = arith.constant 0 : i32
    %c0_i32_0 = arith.constant 0 : i32
    %c0_i32_1 = arith.constant 0 : i32
    return %c0_i32, %c0_i32_0 : i32, i32
  }
  func.func @transform_6(%arg0: i32) -> (i32, i32) {
    %c0_i32 = arith.constant 0 : i32
    %c0_i32_0 = arith.constant 0 : i32
    %c0_i32_1 = arith.constant 0 : i32
    return %c0_i32, %c0_i32_0 : i32, i32
  }
  func.func @transform_7(%arg0: i32) -> (i32, i32, i32) {
    %c0_i32 = arith.constant 0 : i32
    %c0_i32_0 = arith.constant 0 : i32
    %c0_i32_1 = arith.constant 0 : i32
    %c0_i32_2 = arith.constant 0 : i32
    return %c0_i32, %c0_i32_0, %c0_i32_1 : i32, i32, i32
  }
  func.func @transform_8(%arg0: i32) -> (i32, i32) {
    %c0_i32 = arith.constant 0 : i32
    %c0_i32_0 = arith.constant 0 : i32
    %c0_i32_1 = arith.constant 0 : i32
    return %c0_i32, %c0_i32_0 : i32, i32
  }
  func.func @transform_9(%arg0: i32) -> (i32, i32) {
    %c0_i32 = arith.constant 0 : i32
    %c0_i32_0 = arith.constant 0 : i32
    %c0_i32_1 = arith.constant 0 : i32
    return %c0_i32, %c0_i32_0 : i32, i32
  }
  func.func @transform_10(%arg0: i32) -> (i32, i32) {
    %c0_i32 = arith.constant 0 : i32
    %c0_i32_0 = arith.constant 0 : i32
    %c0_i32_1 = arith.constant 0 : i32
    return %c0_i32, %c0_i32_0 : i32, i32
  }
  func.func @transform_11(%arg0: i32) -> (i32, i32, i32) {
    %c0_i32 = arith.constant 0 : i32
    %c0_i32_0 = arith.constant 0 : i32
    %c0_i32_1 = arith.constant 0 : i32
    return %arg0, %c0_i32, %c0_i32_0 : i32, i32, i32
  }
}

</mosaic_0001>

<bundles_post_ra>
// kernel: mask_decoder_forward.1
= control target key start
LH: loop header
LB: loop body
LE: loop exit
PB: predicated region body
PF: predicated region fallthrough
CT: control target
= control target key end

     0   :  { %s16945_s0 = inlined_call_operand.vmem [shape: f32[2,8,16,8], index: 0, kind: input, shape index: {}]   ;;  %s16946_s1 = inlined_call_operand.vmem [shape: f32[8,144], index: 1, kind: input, shape index: {}]   ;;  %s16947_s2 = inlined_call_operand.vmem [shape: f32[8,72], index: 2, kind: input, shape index: {}]   ;;  %s16948_s3 = inlined_call_operand.vmem [shape: f32[8,72], index: 3, kind: input, shape index: {}]   ;;  %s16949_s4 = inlined_call_operand.vmem [shape: f32[8,72], index: 4, kind: input, shape index: {}]   ;;  %s16950_s5 = inlined_call_operand.vmem [shape: f32[8,72], index: 5, kind: input, shape index: {}]   ;;  %s16951_s6 = inlined_call_operand.vmem [shape: f32[1,72], index: 6, kind: input, shape index: {}]   ;;  %s16952_s7 = inlined_call_operand.vmem [shape: f32[6,8,1], index: 7, kind: input, shape index: {}]   ;;  %s16953_s8 = inlined_call_operand.vmem [shape: f32[8,16], index: 8, kind: input, shape index: {}]   ;;  %s16954_s9 = inlined_call_operand.vmem [shape: f32[16,32], index: 9, kind: input, shape index: {}]   ;;  %s16955_s10 = inlined_call_operand.vmem [shape: f32[32,64], index: 10, kind: input, shape index: {}]   ;;  %s16956_s11 = inlined_call_operand.hbm [shape: f32[2,64,64], index: 11, kind: output, shape index: {}]  }
   0x1   :  { %17047 = sst [smem:[#allocation32_spill]] %s16945_s0 }
   0x2   :  { %16 = vsyncpa [#allocation3], 0 }
   0x3   :  { %18 = vsyncpa [#allocation3 + $0x1], 0  ;;  %s11334_s17 = smov 0   ;;  %s11336_s18 = smov 0  }
   0x4   :  { %s11338_s19 = smov 0   ;;  %s11340_s20 = smov 0  }
   0x5 LB: > { %s11355_s21 = sadd.s32 4294967295, %s11265_s20   ;;  %s9289_s22 = sadd.s32 4294967294, %s11265_s20   ;;  %s11265_s20 = sphi %s11340_s20, %s17145_s20   ;;  %s11261_s19 = sphi %s11338_s19, %s17144_s19   ;;  %s11257_s18 = sphi %s11336_s18, %s17143_s18   ;;  %s11253_s17 = sphi %s11334_s17, %s17142_s17  }
   0x6   : > { %s11359_s23 = sadd.s32 1, %s11265_s20   ;;  %s267_s24 = sadd.s32 1, %s11261_s19 }
   0x7   : > { %s264_s25 = ssub.s32 %s11265_s20, %s11359_s23  ;;  %p277_p0 = scmp.ne.s32.totalorder %s11261_s19, %s11257_s18 }
   0x8   : > { %p265_p1 = scmp.eq.s32.totalorder %s264_s25, 0  ;;  %p278_p2 = scmp.eq.s32.totalorder %s11355_s21, 1 }
   0x9   : > { %p283_p3 = scmp.ne.s32.totalorder %s11257_s18, %s11253_s17  ;;  %p284_p4 = scmp.eq.s32.totalorder %s9289_s22, 1 }
   0xa   : > { %s11370_s26 = scalar_select %p265_p1, %s11261_s19, %s267_s24  }
   0xb   : > { %p11372_p5 = por %p278_p2, %p277_p0  ;;  %p11376_p6 = por %p284_p4, %p283_p3 }
   0xc   : > { %p9292_p7 = scmp.ge.s32.totalorder %s11265_s20, 1  ;;  %p340_p8 = scmp.lt.s32.totalorder %s11265_s20, 3 }
   0xe   : > { %p341_p9 = pnand %p9292_p7, %p340_p8 }
  0x10   : > { %344 = sbr.rel (%p341_p9) target bundleno = 3511 (0xdb7), region = 64 }
  0x15   : > { %p380_p10 = scmp.lt.s32.totalorder %s11355_s21, 1  ;;  %s17050_s0 = sld [smem:[#allocation32_spill]]  ;;  %v11268_v11 = vmov 0.0   ;;  %vm477_vm0 = vcmask 7168   ;;  %vm495_vm1 = vcmask 72704   ;;  %vm637_vm2 = vcmask 130048  }
  0x16   : > { %s11267_s15 = smov 1   ;;  %s11269_s16 = smov 127   ;;  %vm1095_vm11 = vcmask 588800   ;;  %vm1284_vm13 = vcmask 64512  }
  0x17   : > { %s381_s29 = scalar_select %p380_p10, %s11355_s21, 1 }
  0x18   : > { %s11270_s22 = smov 126   ;;  %s377_s25 = sand.u32 1, %s11257_s18  }
  0x19   : > { %s10149_s30 = sshll.u32 %s381_s29, 7  ;;  %s16411_s29 = sshll.u32 %s377_s25, 6 }
  0x1a   : > { %s10150_s12 = sshll.u32 %s11355_s21, 6  ;;  %s11223_s13 = scalar_lea.hbm %s16956_s11, 128 }
  0x1b   : > { %s11387_s14 = scalar_lea.vmem %s17050_s0, %s10149_s30  ;;  %s16437_s30 = scalar_lea.vmem [#allocation2], %s16411_s29 }
  0x1c   : > { %v390_v0 = vld [vmem:[%s11387_s14 + $0x28] sm:$0xff]  ;;  %v388_v1 = vld [vmem:[%s11387_s14 + $0x18] sm:$0xff]  ;;  %v387_v2 = vld [vmem:[%s11387_s14 + $0x10] sm:$0xff]  ;;  %s9224_s24 = sshll.u32 %s16437_s30, 4  ;;  %s9225_s24 = int_to_ptr.vmem [resolvable:$true] %s9224_s24 }
  0x1d   : > { %438 = vrot.lane.b32.xlu0 %v390_v0, %s11267_s15  ;;  %434 = vrot.lane.b32.xlu1 %v388_v1, %s11267_s15  ;;  %v389_v3 = vld [vmem:[%s11387_s14 + $0x20] sm:$0xff]  ;;  %v394_v4 = vld [vmem:[%s11387_s14 + $0x48] sm:$0xff] }
  0x1e   : > { %432 = vrot.lane.b32.xlu2 %v387_v2, %s11267_s15  ;;  %v393_v5 = vld [vmem:[%s11387_s14 + $0x40] sm:$0xff]  ;;  %v392_v6 = vld [vmem:[%s11387_s14 + $0x38] sm:$0xff]  ;;  %v386_v7 = vld [vmem:[%s11387_s14 + $0x8] sm:$0xff] }
  0x1f   : > { %v385_v8 = vld [vmem:[%s11387_s14] sm:$0xff]  ;;  %v391_v9 = vld [vmem:[%s11387_s14 + $0x30] sm:$0xff]  ;;  %v396_v10 = vld [vmem:[%s11387_s14 + $0x58] sm:$0xff] }
  0x20   : > { %v395_v12 = vld [vmem:[%s11387_s14 + $0x50] sm:$0xff]  ;;  %v398_v13 = vld [vmem:[%s11387_s14 + $0x68] sm:$0xff]  ;;  %v397_v14 = vld [vmem:[%s11387_s14 + $0x60] sm:$0xff] }
  0x21   : > { %v400_v0 = vld [vmem:[%s11387_s14 + $0x78] sm:$0xff] }
  0x25   : > { %436 = vrot.lane.b32.xlu0 %v389_v3, %s11267_s15  ;;  %446 = vrot.lane.b32.xlu1 %v394_v4, %s11267_s15  ;;  %v399_v3 = vld [vmem:[%s11387_s14 + $0x70] sm:$0xff]  ;;  %s9223_s14 = scalar_lea.hbm %s16956_s11, %s10150_s12 }
  0x26   : > { %444 = vrot.lane.b32.xlu2 %v393_v5, %s11267_s15  ;;  %s9226_s21 = sshll.u32 %s9223_s14, 4  ;;  %s9227_s21 = int_to_ptr.hbm [resolvable:$true] %s9226_s21 }
  0x2d   : > { %442 = vrot.lane.b32.xlu1 %v392_v6, %s11267_s15  ;;  %430 = vrot.lane.b32.xlu0 %v386_v7, %s11267_s15 }
  0x2e   : > { %428 = vrot.lane.b32.xlu2 %v385_v8, %s11267_s15 }
  0x35   : > { %426 = vrot.lane.b32.xlu1 %v11268_v11, %s11267_s15  ;;  %440 = vrot.lane.b32.xlu0 %v391_v9, %s11267_s15 }
  0x36   : > { %450 = vrot.lane.b32.xlu2 %v396_v10, %s11267_s15 }
  0x3d   : > { %448 = vrot.lane.b32.xlu1 %v395_v12, %s11267_s15 }
  0x3e   : > { %454 = vrot.lane.b32.xlu2 %v398_v13, %s11267_s15 }
  0x45   : > { %452 = vrot.lane.b32.xlu1 %v397_v14, %s11267_s15 }
  0x78   : > { %v433_v15 = vpop.permute.xlu2 %432 }
  0x79   : > { %v11439_v31 = vsel %vm477_vm0, 0.0, %v433_v15 }
  0x7a   : > { %v499_v36 = vsel %vm495_vm1, %v11439_v31, 0.0 }
  0x80   : > { %v445_v19 = vpop.permute.xlu2 %444 }
  0x81   : > { %v11442_v32 = vsel %vm477_vm0, 0.0, %v445_v19 }
  0x82   : > { %v505_v37 = vsel %vm495_vm1, %v11442_v32, 0.0 }
  0x83   : > { %v10207_v40 = vpack.i.bf16 %v505_v37, %v499_v36 }
  0x88   : > { %v429_v33 = vpop.permute.xlu2 %428 }
  0x89   : > { %v11458_v41 = vsel %vm477_vm0, 0.0, %v429_v33 }
  0x8a   : > { %v497_v44 = vsel %vm495_vm1, %v11458_v41, 0.0 }
  0x8f   : > { %v439_v16 = vpop.permute.xlu0 %438  ;;  %v435_v17 = vpop.permute.xlu1 %434 }
  0x90   : > { %v11419_v18 = vsel %vm477_vm0, 0.0, %v435_v17  ;;  %v11422_v20 = vsel %vm477_vm0, 0.0, %v439_v16  ;;  %v451_v46 = vpop.permute.xlu2 %450  ;;  %v11524_v17 = vld [vmem:[%s16946_s1 + $0x8] sm:$0xff] }
  0x91   : > { %v500_v23 = vsel %vm495_vm1, %v11419_v18, 0.0  ;;  %v502_v27 = vsel %vm495_vm1, %v11422_v20, 0.0  ;;  %v11475_v52 = vsel %vm477_vm0, 0.0, %v451_v46 }
  0x92   : > { %v508_v55 = vsel %vm495_vm1, %v11475_v52, 0.0  ;;  %v10237_v59 = vpack.i.bf16 %v499_v36, %v500_v23 }
  0x93   : > { %v10257_v4 = vpack.i.bf16 %v508_v55, %v505_v37 }
  0x97   : > { %v437_v21 = vpop.permute.xlu0 %436  ;;  %v447_v22 = vpop.permute.xlu1 %446 }
  0x98   : > { %v11427_v24 = vsel %vm477_vm0, 0.0, %v437_v21  ;;  %v11430_v25 = vsel %vm477_vm0, 0.0, %v447_v22  ;;  %v455_v57 = vpop.permute.xlu2 %454 }
  0x99   : > { %v501_v26 = vsel %vm495_vm1, %v11427_v24, 0.0  ;;  %v506_v28 = vsel %vm495_vm1, %v11430_v25, 0.0  ;;  %v11489_v61 = vsel %vm477_vm0, 0.0, %v455_v57 }
  0x9a   : > { %v10212_v29 = vpack.i.bf16 %v501_v26, %v502_v27  ;;  %v10202_v30 = vpack.i.bf16 %v506_v28, %v500_v23  ;;  %v510_v63 = vsel %vm495_vm1, %v11489_v61, 0.0 }
  0x9c   : > { %10213 = vrot.lane.b32.xlu1 %v10212_v29, %s11269_s16  ;;  %10198 = vrot.lane.b32.xlu0 %v10212_v29, %s11270_s22 }
  0x9d   : > { %10203 = vrot.lane.b32.xlu2 %v10202_v30, %s11269_s16 }
  0x9f   : > { %v443_v34 = vpop.permute.xlu1 %442  ;;  %v431_v35 = vpop.permute.xlu0 %430 }
  0xa0   : > { %v11452_v38 = vsel %vm477_vm0, 0.0, %v443_v34  ;;  %v11455_v39 = vsel %vm477_vm0, 0.0, %v431_v35 }
  0xa1   : > { %v498_v42 = vsel %vm495_vm1, %v11455_v39, 0.0  ;;  %v504_v43 = vsel %vm495_vm1, %v11452_v38, 0.0 }
  0xa2   : > { %v10217_v49 = vpack.i.bf16 %v504_v43, %v498_v42 }
  0xa4   : > { %10208 = vrot.lane.b32.xlu0 %v10207_v40, %s11269_s16 }
  0xa7   : > { %v441_v45 = vpop.permute.xlu0 %440  ;;  %v427_v47 = vpop.permute.xlu1 %426 }
  0xa8   : > { %v11468_v48 = vsel %vm477_vm0, 0.0, %v441_v45  ;;  %v11478_v53 = vsel %vm477_vm0, 0.0, %v427_v47 }
  0xa9   : > { %v503_v50 = vsel %vm495_vm1, %v11468_v48, 0.0  ;;  %17051 = vst [vmem:[#allocation5_spill] sm:$0xff] %v11478_v53  ;;  %v496_v54 = vsel %vm495_vm1, %v11478_v53, 0.0 }
  0xaa   : > { %v10222_v51 = vpack.i.bf16 %v503_v50, %v497_v44  ;;  %v10247_v58 = vpack.i.bf16 %v508_v55, %v496_v54  ;;  %v10242_v2 = vpack.i.bf16 %v506_v28, %v496_v54 }
  0xac   : > { %10218 = vrot.lane.b32.xlu0 %v10217_v49, %s11270_s22  ;;  %10223 = vrot.lane.b32.xlu2 %v10222_v51, %s11270_s22 }
  0xad   : > { %10233 = vrot.lane.b32.xlu1 %v10222_v51, %s11269_s16 }
  0xaf   : > { %v449_v56 = vpop.permute.xlu1 %448 }
  0xb0   : > { %v11486_v60 = vsel %vm477_vm0, 0.0, %v449_v56 }
  0xb1   : > { %v507_v62 = vsel %vm495_vm1, %v11486_v60, 0.0 }
  0xb2   : > { %v10252_v1 = vpack.i.bf16 %v510_v63, %v507_v62 }
  0xb4   : > { %10228 = vrot.lane.b32.xlu0 %v10217_v49, %s11269_s16  ;;  %10238 = vrot.lane.b32.xlu2 %v10237_v59, %s11270_s22 }
  0xb5   : > { %10248 = vrot.lane.b32.xlu1 %v10247_v58, %s11269_s16 }
  0xb7   : > { %v453_v7 = vpop.permute.xlu1 %452 }
  0xb8   : > { %v11532_v21 = vsel %vm477_vm0, 0.0, %v453_v7 }
  0xb9   : > { %v509_v27 = vsel %vm495_vm1, %v11532_v21, 0.0 }
  0xbc   : > { %10243 = vrot.lane.b32.xlu0 %v10242_v2, %s11270_s22  ;;  %458 = vrot.lane.b32.xlu2 %v400_v0, %s11267_s15 }
  0xbd   : > { %10253 = vrot.lane.b32.xlu1 %v10252_v1, %s11269_s16 }
  0xc4   : > { %456 = vrot.lane.b32.xlu0 %v399_v3, %s11267_s15  ;;  %10258 = vrot.lane.b32.xlu2 %v10257_v4, %s11270_s22  ;;  %v11271_v3 = vmov 0  }
  0xc5   : > { %10268 = vrot.lane.b32.xlu1 %v10252_v1, %s11270_s22  ;;  %v11663_v1 = vld [vmem:[%s16946_s1] sm:$0xff]  ;;  %10277 = vset.pattern.permute.xlu2 %v11271_v3 }
  0xc6   : > { %10318 = vset.pattern.permute.xlu1 %v11271_v3  ;;  %10409 = vset.pattern.permute.xlu0 %v11271_v3 }
  0xf7   : > { %v10204_v5 = vpop.permute.xlu2 %10203 }
  0xf8   : > { %v11506_v6 = vunpack.i.l.bf16 %v10204_v5  ;;  %v11569_v42 = vunpack.i.h.bf16 %v10204_v5 }
  0xfa   : > { %641 = vmatpush.msra.mxu0 %v11506_v6 }
 0x106   : > { %v10224_v8 = vpop.permute.xlu2 %10223 }
 0x107   : > { %v10225_v37 = vunpack.i.l.bf16 %v10224_v8  ;;  %v11566_v40 = vunpack.i.h.bf16 %v10224_v8 }
 0x10e   : > { %v10214_v9 = vpop.permute.xlu1 %10213  ;;  %v10199_v10 = vpop.permute.xlu0 %10198 }
 0x10f   : > { %v11509_v11 = vunpack.i.l.bf16 %v10214_v9  ;;  %v11511_v12 = vunpack.i.l.bf16 %v10199_v10  ;;  %v10239_v13 = vpop.permute.xlu2 %10238  ;;  %v11515_v15 = vunpack.i.h.bf16 %v10214_v9  ;;  %v11517_v16 = vunpack.i.h.bf16 %v10199_v10 }
 0x110   : > { %v11513_v14 = vunpack.i.l.bf16 %v10239_v13  ;;  %v11526_v19 = vunpack.i.h.bf16 %v10239_v13 }
 0x111   : > { %681 = vmatpush.msra.mxu2 %v11509_v11  ;;  %715 = vmatpush.msra.mxu3 %v11511_v12 }
 0x112   : > { %675 = vmatpush.msra.mxu1 %v11513_v14 }
 0x113   : > { %682 = vmatpush.msra.mxu2 %v11515_v15  ;;  %716 = vmatpush.msra.mxu3 %v11517_v16 }
 0x114   : > { %676 = vmatpush.msra.mxu1 %v11526_v19  ;;  %9309 = vmatmul.msk.f32.vlgmr.msra.gmra.mxu3 %vm637_vm2, %v11524_v17 }
 0x115   : > { %9303 = vmatpush.msk.msra.mxu2 %vm495_vm1, %v11422_v20  ;;  %9302 = vmatmul.msk.f32.vlgmr.msra.gmra.mxu1 %vm637_vm2, %v11524_v17 }
 0x116   : > { %v10209_v22 = vpop.permute.xlu0 %10208 }
 0x117   : > { %v11541_v23 = vunpack.i.l.bf16 %v10209_v22  ;;  %v459_v26 = vpop.permute.xlu2 %458  ;;  %9304 = vmatpush.msk.msra.mxu2 %vm495_vm1, %v11427_v24  ;;  %v11575_v43 = vunpack.i.h.bf16 %v10209_v22 }
 0x118   : > { %v11548_v28 = vsel %vm477_vm0, 0.0, %v459_v26 }
 0x119   : > { %v512_v29 = vsel %vm495_vm1, %v11548_v28, 0.0  ;;  %642 = vmatpush.msra.mxu0 %v11541_v23  ;;  %685 = vmatpush.msra.mxu2 %v11513_v14 }
 0x11a   : > { %v10262_v30 = vpack.i.bf16 %v512_v29, %v509_v27 }
 0x11b   : > { %9296 = vmatpush.msk.msra.mxu0 %vm495_vm1, %v11419_v18  ;;  %686 = vmatpush.msra.mxu2 %v11526_v19 }
 0x11c   : > { %10263 = vrot.lane.b32.xlu0 %v10262_v30, %s11269_s16 }
 0x11d   : > { %9297 = vmatpush.msk.msra.mxu0 %vm495_vm1, %v11439_v31  ;;  %687 = vmatpush.msra.mxu2 %v11506_v6 }
 0x11e   : > { %v10219_v33 = vpop.permute.xlu0 %10218 }
 0x11f   : > { %v11561_v34 = vunpack.i.h.bf16 %v10219_v33  ;;  %v10234_v35 = vpop.permute.xlu1 %10233  ;;  %688 = vmatpush.msra.mxu2 %v11541_v23  ;;  %v10220_v36 = vunpack.i.l.bf16 %v10219_v33  ;;  %v10259_v58 = vpop.permute.xlu2 %10258 }
 0x120   : > { %v10235_v49 = vunpack.i.l.bf16 %v10234_v35  ;;  %v11583_v50 = vunpack.i.h.bf16 %v10234_v35  ;;  %v11642_v0 = vunpack.i.l.bf16 %v10259_v58 }
 0x121   : > { %645 = vmatpush.msra.mxu0 %v10220_v36  ;;  %9305 = vmatpush.msk.msra.mxu2 %vm495_vm1, %v11419_v18 }
 0x122   : > { %755 = vmatpush.msrb.mxu3 %v11561_v34 }
 0x123   : > { %646 = vmatpush.msra.mxu0 %v10225_v37  ;;  %9306 = vmatpush.msk.msra.mxu2 %vm495_vm1, %v11439_v31 }
 0x124   : > { %756 = vmatpush.msrb.mxu3 %v11566_v40  ;;  %10273 = vrot.lane.b32.xlu0 %v10262_v30, %s11270_s22 }
 0x125   : > { %691 = vmatpush.msra.mxu2 %v10220_v36  ;;  %9316 = vmatmul.msk.f32.vlgmr.msrb.gmra.mxu3 %vm637_vm2, %v11524_v17 }
 0x126   : > { %761 = vmatpush.msra.mxu3 %v11569_v42  ;;  %v10229_v44 = vpop.permute.xlu0 %10228 }
 0x127   : > { %v11580_v45 = vunpack.i.h.bf16 %v10229_v44  ;;  %v10249_v46 = vpop.permute.xlu1 %10248  ;;  %692 = vmatpush.msra.mxu2 %v10225_v37  ;;  %v10230_v47 = vunpack.i.l.bf16 %v10229_v44 }
 0x128   : > { %762 = vmatpush.msra.mxu3 %v11575_v43  ;;  %v11591_v51 = vunpack.i.h.bf16 %v10249_v46 }
 0x129   : > { %647 = vmatpush.msra.mxu0 %v10230_v47  ;;  %693 = vmatpush.msra.mxu2 %v10230_v47 }
 0x12a   : > { %9317 = vmatpush.msk.msra.mxu3 %vm495_vm1, %v11430_v25  ;;  %721 = vmatpush.msrb.mxu1 %v11580_v45 }
 0x12b   : > { %648 = vmatpush.msra.mxu0 %v10235_v49  ;;  %694 = vmatpush.msra.mxu2 %v10235_v49 }
 0x12c   : > { %9318 = vmatpush.msk.msra.mxu3 %vm495_vm1, %v11442_v32  ;;  %722 = vmatpush.msrb.mxu1 %v11583_v50 }
 0x12d   : > { %9298 = vmatpush.msk.msra.mxu0 %vm495_vm1, %v11455_v39  ;;  %9307 = vmatpush.msk.msra.mxu2 %vm495_vm1, %v11455_v39  ;;  %v11617_v39 = vunpack.i.l.bf16 %v10249_v46 }
 0x12e   : > { %765 = vmatpush.msra.mxu3 %v11561_v34  ;;  %9310 = vmatpush.msk.msrb.mxu1 %vm495_vm1, %v11452_v38  ;;  %v10244_v54 = vpop.permute.xlu0 %10243 }
 0x12f   : > { %v11600_v55 = vunpack.i.l.bf16 %v10244_v54  ;;  %v10254_v56 = vpop.permute.xlu1 %10253  ;;  %9299 = vmatpush.msk.msra.mxu0 %vm495_vm1, %v11458_v41  ;;  %9308 = vmatpush.msk.msra.mxu2 %vm495_vm1, %v11458_v41  ;;  %v11627_v59 = vunpack.i.h.bf16 %v10244_v54 }
 0x130   : > { %766 = vmatpush.msra.mxu3 %v11566_v40  ;;  %v11605_v57 = vunpack.i.l.bf16 %v10254_v56  ;;  %9311 = vmatpush.msk.msrb.mxu1 %vm495_vm1, %v11468_v48  ;;  %v11675_v2 = vunpack.i.h.bf16 %v10254_v56 }
 0x131   : > { %801 = vmatpush.msrb.mxu2 %v11591_v51  ;;  %651 = vmatpush.msra.mxu0 %v11600_v55 }
 0x132   : > { %767 = vmatpush.msra.mxu3 %v11580_v45  ;;  %725 = vmatpush.msrb.mxu1 %v11511_v12 }
 0x133   : > { %802 = vmatpush.msrb.mxu2 %v11605_v57  ;;  %652 = vmatpush.msra.mxu0 %v11600_v55 }
 0x134   : > { %768 = vmatpush.msra.mxu3 %v11583_v50  ;;  %726 = vmatpush.msrb.mxu1 %v11517_v16 }
 0x135   : > { %9324 = vmatpush.msk.msrb.mxu2 %vm495_vm1, %v11475_v52  ;;  %653 = vmatpush.msra.mxu0 %v11617_v39 }
 0x136   : > { %9319 = vmatpush.msk.msra.mxu3 %vm495_vm1, %v11452_v38  ;;  %727 = vmatpush.msrb.mxu1 %v11509_v11  ;;  %v457_v41 = vpop.permute.xlu0 %456 }
 0x137   : > { %v11630_v62 = vsel %vm477_vm0, 0.0, %v457_v41  ;;  %9325 = vmatpush.msk.msrb.mxu2 %vm495_vm1, %v11486_v60  ;;  %654 = vmatpush.msra.mxu0 %v11617_v39 }
 0x138   : > { %9320 = vmatpush.msk.msra.mxu3 %vm495_vm1, %v11468_v48  ;;  %728 = vmatpush.msrb.mxu1 %v11515_v15  ;;  %v511_v63 = vsel %vm495_vm1, %v11630_v62, 0.0 }
 0x139   : > { %805 = vmatpush.msrb.mxu2 %v11627_v59  ;;  %620 = vrot.lane.b32.xlu2 %v511_v63, %s11269_s16 }
 0x13a   : > { %771 = vmatpush.msra.mxu3 %v11511_v12  ;;  %626 = vrot.lane.b32.xlu1 %v511_v63, %s11270_s22 }
 0x13b   : > { %9300 = vmatpush.msk.msra.mxu0 %vm495_vm1, %v11478_v53  ;;  %9312 = vmatpush.msk.msrb.mxu1 %vm495_vm1, %v11422_v20 }
 0x13c   : > { %772 = vmatpush.msra.mxu3 %v11517_v16  ;;  %806 = vmatpush.msrb.mxu2 %v11642_v0 }
 0x13d   : > { %9301 = vmatpush.msk.msra.mxu0 %vm495_vm1, %v11478_v53  ;;  %9313 = vmatpush.msk.msrb.mxu1 %vm495_vm1, %v11427_v24 }
 0x13e   : > { %773 = vmatpush.msra.mxu3 %v11509_v11  ;;  %807 = vmatpush.msrb.mxu2 %v11569_v42 }
 0x13f   : > { %795 = vmatpush.msrb.mxu0 %v11627_v59  ;;  %731 = vmatpush.msrb.mxu1 %v11513_v14 }
 0x140   : > { %774 = vmatpush.msra.mxu3 %v11515_v15  ;;  %808 = vmatpush.msrb.mxu2 %v11575_v43 }
 0x141   : > { %796 = vmatpush.msrb.mxu0 %v11642_v0  ;;  %732 = vmatpush.msrb.mxu1 %v11526_v19 }
 0x142   : > { %9321 = vmatpush.msk.msra.mxu3 %vm495_vm1, %v11422_v20  ;;  %657 = vmatmul.f32.vlgmr.msra.gmra.mxu0 %v11663_v1  ;;  %v401_v20 = vld [vmem:[%s16952_s7] sm:$0xff] }
 0x143   : > { %9326 = vmatpush.msk.msrb.mxu2 %vm495_vm1, %v11430_v25  ;;  %733 = vmatpush.msrb.mxu1 %v11506_v6 }
 0x144   : > { %9322 = vmatpush.msk.msra.mxu3 %vm495_vm1, %v11427_v24  ;;  %697 = vmatmul.f32.vlgmr.msra.gmra.mxu2 %v11663_v1  ;;  %v10261_v24 = vunpack.i.h.bf16 %v10259_v58 }
 0x145   : > { %9327 = vmatpush.msk.msrb.mxu2 %vm495_vm1, %v11442_v32  ;;  %734 = vmatpush.msrb.mxu1 %v11541_v23 }
 0x146   : > { %777 = vmatmul.f32.vlgmr.msra.gmra.mxu3 %v11663_v1  ;;  %634 = vperm.xlu2 %10277, %v401_v20  }
 0x147   : > { %811 = vmatpush.msrb.mxu2 %v11561_v34  ;;  %9314 = vmatpush.msk.msrb.mxu1 %vm495_vm1, %v11419_v18  ;;  %v10269_v18 = vpop.permute.xlu1 %10268 }
 0x148   : > { %841 = vmatpush.msra.mxu0 %v11675_v2  ;;  %v10270_v4 = vunpack.i.l.bf16 %v10269_v18 }
 0x149   : > { %812 = vmatpush.msrb.mxu2 %v11566_v40  ;;  %9315 = vmatpush.msk.msrb.mxu1 %vm495_vm1, %v11439_v31  ;;  %v11708_v31 = vunpack.i.h.bf16 %v10269_v18 }
 0x14a   : > { %9323 = vmatmul.msk.f32.vlgmr.msrb.gmra.mxu0 %vm637_vm2, %v11524_v17  ;;  %737 = vmatmul.f32.vlgmr.msrb.gmra.mxu1 %v11663_v1 }
 0x14b   : > { %835 = vmatpush.msra.mxu1 %v10261_v24  ;;  %813 = vmatpush.msrb.mxu2 %v11580_v45 }
 0x14d   : > { %814 = vmatpush.msrb.mxu2 %v11583_v50  ;;  %836 = vmatpush.msra.mxu1 %v10270_v4 }
 0x14f   : > { %9328 = vmatpush.msk.msrb.mxu2 %vm495_vm1, %v11452_v38  ;;  %875 = vmatpush.msrb.mxu1 %v11708_v31 }
 0x151   : > { %9329 = vmatpush.msk.msrb.mxu2 %vm495_vm1, %v11468_v48 }
 0x152   : > { %817 = vmatmul.f32.vlgmr.msrb.gmra.mxu2 %v11663_v1  ;;  %9330 = vmatmul.msk.f32.vlgmr.msra.gmra.mxu1 %vm637_vm2, %v11524_v17 }
 0x153   : > { %955 = vmatpush.msra.mxu2 %v11600_v55 }
 0x155   : > { %956 = vmatpush.msra.mxu2 %v11600_v55 }
 0x15a   : > { %9351 = vmatmul.msk.f32.vlgmr.msra.gmra.mxu2 %vm637_vm2, %v11524_v17 }
 0x18e   : > { %v10264_v38 = vpop.permute.xlu0 %10263 }
 0x18f   : > { %v10266_v48 = vunpack.i.h.bf16 %v10264_v38  ;;  %v11713_v5 = vunpack.i.l.bf16 %v10264_v38 }
 0x191   : > { %842 = vmatpush.msra.mxu0 %v11713_v5  ;;  %881 = vmatpush.msrb.mxu3 %v10266_v48 }
 0x192   : > { %v678_v11 = vpop.f32.mrf.mxu1 }
 0x193   : > { %9331 = vmatpush.msk.msra.mxu0 %vm495_vm1, %v11489_v61  ;;  %v621_v6 = vpop.permute.xlu2 %620 }
 0x194   : > { %882 = vmatpush.msrb.mxu3 %v621_v6 }
 0x195   : > { %9332 = vmatpush.msk.msra.mxu0 %vm495_vm1, %v11532_v21 }
 0x196   : > { %v10274_v7 = vpop.permute.xlu0 %10273  ;;  %9338 = vmatpush.msk.msrb.mxu3 %vm495_vm1, %v11548_v28 }
 0x197   : > { %845 = vmatpush.msra.mxu0 %v10261_v24  ;;  %v10275_v8 = vunpack.i.l.bf16 %v10274_v7  ;;  %v10276_v9 = vunpack.i.h.bf16 %v10274_v7 }
 0x198   : > { %9339 = vmatpush.msk.msrb.mxu3 %vm495_vm1, %v11630_v62 }
 0x199   : > { %846 = vmatpush.msra.mxu0 %v10270_v4  ;;  %876 = vmatpush.msrb.mxu1 %v10275_v8 }
 0x19a   : > { %885 = vmatpush.msrb.mxu3 %v11708_v31  ;;  %9337 = vmatmul.msk.f32.vlgmr.msrb.gmra.mxu1 %vm637_vm2, %v11524_v17 }
 0x19b   : > { %847 = vmatpush.msra.mxu0 %v11591_v51  ;;  %915 = vmatpush.msra.mxu1 %v10276_v9 }
 0x19c   : > { %886 = vmatpush.msrb.mxu3 %v10275_v8 }
 0x19d   : > { %848 = vmatpush.msra.mxu0 %v11605_v57 }
 0x19e   : > { %887 = vmatpush.msrb.mxu3 %v11675_v2 }
 0x19f   : > { %9333 = vmatpush.msk.msra.mxu0 %vm495_vm1, %v11475_v52 }
 0x1a0   : > { %888 = vmatpush.msrb.mxu3 %v11713_v5 }
 0x1a1   : > { %9334 = vmatpush.msk.msra.mxu0 %vm495_vm1, %v11486_v60 }
 0x1a2   : > { %9340 = vmatpush.msk.msrb.mxu3 %vm495_vm1, %v11489_v61 }
 0x1a3   : > { %851 = vmatpush.msra.mxu0 %v11627_v59 }
 0x1a4   : > { %9341 = vmatpush.msk.msrb.mxu3 %vm495_vm1, %v11532_v21 }
 0x1a5   : > { %852 = vmatpush.msra.mxu0 %v11642_v0 }
 0x1a6   : > { %891 = vmatpush.msrb.mxu3 %v10261_v24 }
 0x1a7   : > { %853 = vmatpush.msra.mxu0 %v11569_v42 }
 0x1a8   : > { %892 = vmatpush.msrb.mxu3 %v10270_v4 }
 0x1a9   : > { %854 = vmatpush.msra.mxu0 %v11575_v43 }
 0x1aa   : > { %893 = vmatpush.msrb.mxu3 %v11591_v51 }
 0x1ab   : > { %9335 = vmatpush.msk.msra.mxu0 %vm495_vm1, %v11430_v25  ;;  %v718_v25 = vpop.f32.mrf.mxu3 }
 0x1ac   : > { %v627_v10 = vpop.permute.xlu1 %626  ;;  %894 = vmatpush.msrb.mxu3 %v11605_v57 }
 0x1ad   : > { %9336 = vmatpush.msk.msra.mxu0 %vm495_vm1, %v11442_v32  ;;  %916 = vmatpush.msra.mxu1 %v627_v10 }
 0x1ae   : > { %857 = vmatmul.f32.vlgmr.msra.gmra.mxu0 %v11663_v1  ;;  %9342 = vmatpush.msk.msrb.mxu3 %vm495_vm1, %v11475_v52 }
 0x1af   : > { %921 = vmatpush.msrb.mxu1 %v11617_v39 }
 0x1b0   : > { %9344 = vmatmul.msk.f32.vlgmr.msra.gmra.mxu1 %vm637_vm2, %v11524_v17  ;;  %9343 = vmatpush.msk.msrb.mxu3 %vm495_vm1, %v11486_v60  ;;  %v11768_v60 = vpop.permute.xlu2 %634 }
 0x1b1   : > { %922 = vmatpush.msrb.mxu1 %v11617_v39  ;;  %897 = vmatmul.f32.vlgmr.msrb.gmra.mxu3 %v11663_v1 }
 0x1b3   : > { %9345 = vmatpush.msk.msrb.mxu1 %vm495_vm1, %v11478_v53  ;;  %v758_v32 = vpop.f32.mrf.mxu3 }
 0x1b5   : > { %9346 = vmatpush.msk.msrb.mxu1 %vm495_vm1, %v11478_v53 }
 0x1b7   : > { %925 = vmatpush.msrb.mxu1 %v10276_v9 }
 0x1b9   : > { %926 = vmatpush.msrb.mxu1 %v627_v10 }
 0x1bb   : > { %927 = vmatpush.msrb.mxu1 %v10266_v48 }
 0x1bd   : > { %928 = vmatpush.msrb.mxu1 %v621_v6 }
 0x1bf   : > { %9347 = vmatpush.msk.msrb.mxu1 %vm495_vm1, %v11548_v28  ;;  %v658_v52 = vpop.f32.mrf.mxu0 }
 0x1c0   : > { %v659_v23 = vadd.f32 %v658_v52, %v11768_v60 }
 0x1c1   : > { %9348 = vmatpush.msk.msrb.mxu1 %vm495_vm1, %v11630_v62 }
 0x1c2   : > { %v679_v34 = vadd.f32 %v678_v11, %v659_v23 }
 0x1c3   : > { %931 = vmatpush.msrb.mxu1 %v11708_v31 }
 0x1c4   : > { %vm961_vm6 = vcmp.ge.f32.partialorder %v679_v34, 0.0 }
 0x1c5   : > { %932 = vmatpush.msrb.mxu1 %v10275_v8 }
 0x1c7   : > { %933 = vmatpush.msrb.mxu1 %v11675_v2  ;;  %v698_v12 = vpop.f32.mrf.mxu2  ;;  %v738_v14 = vpop.f32.mrf.mxu1 }
 0x1c8   : > { %v699_v13 = vadd.f32 %v698_v12, %v11768_v60  ;;  %v798_v16 = vpop.f32.mrf.mxu0  ;;  %v739_v17 = vadd.f32 %v738_v14, %v11768_v60 }
 0x1c9   : > { %v778_v15 = vpop.f32.mrf.mxu3  ;;  %934 = vmatpush.msrb.mxu1 %v11713_v5 }
 0x1ca   : > { %v719_v19 = vadd.f32 %v718_v25, %v699_v13  ;;  %v779_v22 = vadd.f32 %v778_v15, %v11768_v60  ;;  %v759_v26 = vadd.f32 %v758_v32, %v739_v17 }
 0x1cb   : > { %9349 = vmatpush.msk.msrb.mxu1 %vm495_vm1, %v11489_v61  ;;  %v969_v61 = vmul.f32 0.1, %v679_v34 }
 0x1cc   : > { %v799_v27 = vadd.f32 %v798_v16, %v779_v22  ;;  %vm962_vm3 = vcmp.ge.f32.partialorder %v719_v19, 0.0  ;;  %v970_v28 = vmul.f32 0.1, %v719_v19  ;;  %vm963_vm4 = vcmp.ge.f32.partialorder %v759_v26, 0.0 }
 0x1cd   : > { %9350 = vmatpush.msk.msrb.mxu1 %vm495_vm1, %v11532_v21  ;;  %v971_v29 = vmul.f32 0.1, %v759_v26  ;;  %v977_v37 = vsel %vm961_vm6, %v679_v34, %v969_v61 }
 0x1ce   : > { %937 = vmatmul.f32.vlgmr.msrb.gmra.mxu1 %v11663_v1  ;;  %v978_v30 = vsel %vm962_vm3, %v719_v19, %v970_v28  ;;  %vm964_vm5 = vcmp.ge.f32.partialorder %v799_v27, 0.0  ;;  %v972_v33 = vmul.f32 0.1, %v799_v27 }
 0x1cf   : > { %996 = vrot.lane.b32.xlu1 %v978_v30, %s11267_s15  ;;  %v979_v35 = vsel %vm963_vm4, %v759_v26, %v971_v29  ;;  %v838_v42 = vpop.f32.mrf.mxu1 }
 0x1d0   : > { %v980_v36 = vsel %vm964_vm5, %v799_v27, %v972_v33  ;;  %998 = vrot.lane.b32.xlu2 %v979_v35, %s11267_s15 }
 0x1d1   : > { %1000 = vrot.lane.b32.xlu0 %v980_v36, %s11267_s15 }
 0x1d5   : > { %v818_v21 = vpop.f32.mrf.mxu2 }
 0x1d6   : > { %v819_v40 = vadd.f32 %v818_v21, %v11768_v60 }
 0x1d8   : > { %v839_v43 = vadd.f32 %v838_v42, %v819_v40  ;;  %v11856_v42 = vld [vmem:[%s16947_s2] sm:$0xff] }
 0x1d9   : > { %994 = vrot.lane.b32.xlu0 %v977_v37, %s11267_s15 }
 0x1da   : > { %vm965_vm7 = vcmp.ge.f32.partialorder %v839_v43, 0.0  ;;  %v973_v44 = vmul.f32 0.1, %v839_v43 }
 0x1dc   : > { %v981_v45 = vsel %vm965_vm7, %v839_v43, %v973_v44  ;;  %vm1582_vm7 = vcmask 138240  }
 0x1dd   : > { %1002 = vrot.lane.b32.xlu1 %v981_v45, %s11267_s15  ;;  %v958_v18 = vpop.f32.mrf.mxu2 }
 0x217   : > { %v878_v49 = vpop.f32.mrf.mxu1 }
 0x22a   : > { %v999_v5 = vpop.permute.xlu2 %998 }
 0x22b   : > { %v858_v46 = vpop.f32.mrf.mxu0  ;;  %v11809_v10 = vsel %vm477_vm0, 0.0, %v999_v5 }
 0x22c   : > { %v859_v47 = vadd.f32 %v858_v46, %v11768_v60  ;;  %v1028_v32 = vsel %vm495_vm1, %v11809_v10, 0.0  ;;  %v402_v46 = vld [vmem:[%s16952_s7 + $0x8] sm:$0xff] }
 0x22d   : > { %v918_v57 = vpop.f32.mrf.mxu1 }
 0x22e   : > { %v879_v50 = vadd.f32 %v878_v49, %v859_v47 }
 0x230   : > { %vm966_vm8 = vcmp.ge.f32.partialorder %v879_v50, 0.0  ;;  %v974_v51 = vmul.f32 0.1, %v879_v50 }
 0x232   : > { %v982_v54 = vsel %vm966_vm8, %v879_v50, %v974_v51  ;;  %vm2690_vm8 = vcmask 269312  }
 0x233   : > { %1004 = vrot.lane.b32.xlu2 %v982_v54, %s11267_s15 }
 0x234   : > { %v898_v56 = vpop.f32.mrf.mxu3 }
 0x235   : > { %v899_v41 = vadd.f32 %v898_v56, %v11768_v60 }
 0x237   : > { %v919_v58 = vadd.f32 %v918_v57, %v899_v41  ;;  %v1283_v57 = vld [vmem:[%s16953_s8] sm:$0xff] }
 0x239   : > { %vm967_vm9 = vcmp.ge.f32.partialorder %v919_v58, 0.0  ;;  %v975_v59 = vmul.f32 0.1, %v919_v58 }
 0x23b   : > { %v983_v62 = vsel %vm967_vm9, %v919_v58, %v975_v59 }
 0x23c   : > { %1006 = vrot.lane.b32.xlu0 %v983_v62, %s11267_s15 }
 0x241   : > { %v997_v63 = vpop.permute.xlu1 %996 }
 0x242   : > { %v11792_v0 = vsel %vm477_vm0, 0.0, %v997_v63 }
 0x243   : > { %v1001_v1 = vpop.permute.xlu0 %1000  ;;  %v1027_v2 = vsel %vm495_vm1, %v11792_v0, 0.0 }
 0x244   : > { %v11797_v20 = vsel %vm477_vm0, 0.0, %v1001_v1 }
 0x245   : > { %v1029_v3 = vsel %vm495_vm1, %v11797_v20, 0.0 }
 0x246   : > { %v10283_v24 = vpack.i.bf16 %v1027_v2, %v1029_v3  ;;  %v10288_v11 = vpack.i.bf16 %v1028_v32, %v1029_v3 }
 0x248   : > { %10284 = vrot.lane.b32.xlu0 %v10283_v24, %s11270_s22 }
 0x24b   : > { %v938_v31 = vpop.f32.mrf.mxu1  ;;  %v995_v4 = vpop.permute.xlu0 %994 }
 0x24c   : > { %v939_v38 = vadd.f32 %v938_v31, %v11768_v60  ;;  %v11804_v48 = vsel %vm477_vm0, 0.0, %v995_v4 }
 0x24d   : > { %v1026_v6 = vsel %vm495_vm1, %v11804_v48, 0.0 }
 0x24e   : > { %v959_v7 = vadd.f32 %v958_v18, %v939_v38  ;;  %v10278_v8 = vpack.i.bf16 %v1027_v2, %v1026_v6  ;;  %v10293_v52 = vpack.i.bf16 %v1026_v6, %v1028_v32 }
 0x24f   : > { %v1003_v60 = vpop.permute.xlu1 %1002 }
 0x250   : > { %vm968_vm10 = vcmp.ge.f32.partialorder %v959_v7, 0.0  ;;  %v976_v9 = vmul.f32 0.1, %v959_v7  ;;  %10279 = vrot.lane.b32.xlu2 %v10278_v8, %s11269_s16  ;;  %v11818_v12 = vsel %vm477_vm0, 0.0, %v1003_v60 }
 0x251   : > { %v1030_v15 = vsel %vm495_vm1, %v11818_v12, 0.0 }
 0x252   : > { %v984_v25 = vsel %vm968_vm10, %v959_v7, %v976_v9 }
 0x253   : > { %1008 = vrot.lane.b32.xlu1 %v984_v25, %s11267_s15 }
 0x258   : > { %10294 = vrot.lane.b32.xlu2 %v10293_v52, %s11270_s22 }
 0x25b   : > { %10289 = vrot.lane.b32.xlu1 %v10288_v11, %s11269_s16 }
 0x28d   : > { %v1005_v13 = vpop.permute.xlu2 %1004 }
 0x28e   : > { %v11821_v14 = vsel %vm477_vm0, 0.0, %v1005_v13 }
 0x28f   : > { %v1031_v16 = vsel %vm495_vm1, %v11821_v14, 0.0 }
 0x290   : > { %v10298_v17 = vpack.i.bf16 %v1031_v16, %v1030_v15 }
 0x292   : > { %10299 = vrot.lane.b32.xlu0 %v10298_v17, %s11269_s16  ;;  %10309 = vrot.lane.b32.xlu2 %v10298_v17, %s11270_s22 }
 0x2aa   : > { %v10280_v19 = vpop.permute.xlu2 %10279 }
 0x2ab   : > { %v10282_v28 = vunpack.i.h.bf16 %v10280_v19  ;;  %v10281_v34 = vunpack.i.l.bf16 %v10280_v19 }
 0x2ae   : > { %v1007_v22 = vpop.permute.xlu0 %1006 }
 0x2af   : > { %v11838_v35 = vsel %vm477_vm0, 0.0, %v1007_v22 }
 0x2b0   : > { %v1032_v21 = vsel %vm495_vm1, %v11838_v35, 0.0 }
 0x2b2   : > { %v10295_v23 = vpop.permute.xlu2 %10294 }
 0x2b3   : > { %v11829_v26 = vunpack.i.l.bf16 %v10295_v23  ;;  %v10297_v33 = vunpack.i.h.bf16 %v10295_v23 }
 0x2b5   : > { %1126 = vmatpush.msrb.mxu2 %v11829_v26 }
 0x2ba   : > { %v10285_v27 = vpop.permute.xlu0 %10284 }
 0x2bb   : > { %v10287_v29 = vunpack.i.h.bf16 %v10285_v27  ;;  %v11832_v30 = vunpack.i.l.bf16 %v10285_v27 }
 0x2bd   : > { %1106 = vmatpush.msrb.mxu0 %v10287_v29  ;;  %1146 = vmatpush.msra.mxu3 %v11832_v30 }
 0x2bf   : > { %1107 = vmatpush.msrb.mxu0 %v10282_v28 }
 0x2c1   : > { %9352 = vmatpush.msk.msrb.mxu0 %vm495_vm1, %v11792_v0 }
 0x2c3   : > { %1109 = vmatpush.msrb.mxu0 %v10297_v33 }
 0x2c5   : > { %1110 = vmatpush.msrb.mxu0 %v10281_v34  ;;  %v1009_v36 = vpop.permute.xlu1 %1008 }
 0x2c6   : > { %v11841_v61 = vsel %vm477_vm0, 0.0, %v1009_v36 }
 0x2c7   : > { %v1033_v37 = vsel %vm495_vm1, %v11841_v61, 0.0  ;;  %9353 = vmatpush.msk.msrb.mxu0 %vm495_vm1, %v11804_v48 }
 0x2c8   : > { %v10313_v40 = vpack.i.bf16 %v1033_v37, %v1032_v21 }
 0x2c9   : > { %1112 = vmatpush.msrb.mxu0 %v11600_v55 }
 0x2ca   : > { %10314 = vrot.lane.b32.xlu0 %v10313_v40, %s11270_s22  ;;  %10304 = vrot.lane.b32.xlu1 %v10313_v40, %s11269_s16 }
 0x2cb   : > { %1113 = vmatpush.msrb.mxu0 %v11617_v39 }
 0x2cd   : > { %9354 = vmatpush.msk.msrb.mxu0 %vm495_vm1, %v11478_v53  ;;  %v10290_v43 = vpop.permute.xlu1 %10289 }
 0x2ce   : > { %v10292_v44 = vunpack.i.h.bf16 %v10290_v43  ;;  %v10291_v45 = vunpack.i.l.bf16 %v10290_v43  ;;  %9355 = vmatmul.msk.f32.vlgmr.msrb.gmra.mxu0 %vm1095_vm11, %v11856_v42 }
 0x2d0   : > { %1127 = vmatpush.msrb.mxu2 %v10292_v44  ;;  %1147 = vmatpush.msra.mxu3 %v10291_v45 }
 0x2d2   : > { %9356 = vmatpush.msk.msrb.mxu2 %vm495_vm1, %v11809_v10  ;;  %9360 = vmatpush.msk.msra.mxu3 %vm495_vm1, %v11797_v20 }
 0x2d3   : > { %1092 = vperm.xlu1 %10318, %v402_v46  }
 0x2d4   : > { %1129 = vmatpush.msrb.mxu2 %v10287_v29  ;;  %1149 = vmatpush.msra.mxu3 %v11829_v26 }
 0x2d6   : > { %1130 = vmatpush.msrb.mxu2 %v10282_v28  ;;  %1150 = vmatpush.msra.mxu3 %v10292_v44 }
 0x2d8   : > { %9357 = vmatpush.msk.msrb.mxu2 %vm495_vm1, %v11792_v0  ;;  %9361 = vmatpush.msk.msra.mxu3 %vm495_vm1, %v11809_v10 }
 0x2da   : > { %1132 = vmatpush.msrb.mxu2 %v10297_v33  ;;  %1152 = vmatpush.msra.mxu3 %v10287_v29 }
 0x2dc   : > { %1133 = vmatpush.msrb.mxu2 %v10281_v34  ;;  %1153 = vmatpush.msra.mxu3 %v10282_v28 }
 0x2de   : > { %9358 = vmatpush.msk.msrb.mxu2 %vm495_vm1, %v11804_v48  ;;  %9362 = vmatpush.msk.msra.mxu3 %vm495_vm1, %v11792_v0 }
 0x2df   : > { %9359 = vmatmul.msk.f32.vlgmr.msrb.gmra.mxu2 %vm1095_vm11, %v11856_v42  ;;  %9363 = vmatmul.msk.f32.vlgmr.msra.gmra.mxu3 %vm1095_vm11, %v11856_v42 }
 0x2ec   : > { %v10310_v47 = vpop.permute.xlu2 %10309 }
 0x2ed   : > { %v10312_v49 = vunpack.i.h.bf16 %v10310_v47  ;;  %v10311_v50 = vunpack.i.l.bf16 %v10310_v47 }
 0x2ef   : > { %1166 = vmatpush.msra.mxu0 %v10311_v50  ;;  %1186 = vmatpush.msra.mxu2 %v10312_v49 }
 0x304   : > { %v10300_v51 = vpop.permute.xlu0 %10299 }
 0x305   : > { %v10302_v54 = vunpack.i.h.bf16 %v10300_v51  ;;  %v10301_v56 = vunpack.i.l.bf16 %v10300_v51 }
 0x307   : > { %1167 = vmatpush.msra.mxu0 %v10301_v56  ;;  %1187 = vmatpush.msra.mxu2 %v10302_v54 }
 0x309   : > { %9364 = vmatpush.msk.msra.mxu0 %vm495_vm1, %v11818_v12  ;;  %9368 = vmatpush.msk.msra.mxu2 %vm495_vm1, %v11821_v14 }
 0x30b   : > { %1169 = vmatpush.msra.mxu0 %v11832_v30  ;;  %1189 = vmatpush.msra.mxu2 %v10311_v50 }
 0x30d   : > { %1170 = vmatpush.msra.mxu0 %v10291_v45  ;;  %1190 = vmatpush.msra.mxu2 %v10301_v56 }
 0x30f   : > { %9365 = vmatpush.msk.msra.mxu0 %vm495_vm1, %v11797_v20  ;;  %9369 = vmatpush.msk.msra.mxu2 %vm495_vm1, %v11818_v12 }
 0x311   : > { %1172 = vmatpush.msra.mxu0 %v11829_v26  ;;  %1192 = vmatpush.msra.mxu2 %v11832_v30 }
 0x313   : > { %1173 = vmatpush.msra.mxu0 %v10292_v44  ;;  %1193 = vmatpush.msra.mxu2 %v10291_v45 }
 0x315   : > { %9366 = vmatpush.msk.msra.mxu0 %vm495_vm1, %v11809_v10  ;;  %9370 = vmatpush.msk.msra.mxu2 %vm495_vm1, %v11797_v20 }
 0x316   : > { %9367 = vmatmul.msk.f32.vlgmr.msra.gmra.mxu0 %vm1095_vm11, %v11856_v42  ;;  %9371 = vmatmul.msk.f32.vlgmr.msra.gmra.mxu2 %vm1095_vm11, %v11856_v42 }
 0x317   : > { %1246 = vmatpush.msrb.mxu0 %v11600_v55  ;;  %1303 = vmatpush.msrb.mxu2 %v1283_v57 }
 0x319   : > { %1247 = vmatpush.msrb.mxu0 %v11617_v39  ;;  %1372 = vmatpush.msra.mxu2 %v1283_v57 }
 0x31b   : > { %9380 = vmatpush.msk.msrb.mxu0 %vm495_vm1, %v11478_v53 }
 0x33c   : > { %v10305_v41 = vpop.permute.xlu1 %10304  ;;  %v10315_v58 = vpop.permute.xlu0 %10314 }
 0x33d   : > { %v10317_v59 = vunpack.i.h.bf16 %v10315_v58  ;;  %v10316_v62 = vunpack.i.l.bf16 %v10315_v58  ;;  %v10307_v63 = vunpack.i.h.bf16 %v10305_v41  ;;  %v10306_v0 = vunpack.i.l.bf16 %v10305_v41 }
 0x33f   : > { %1206 = vmatpush.msra.mxu1 %v10316_v62  ;;  %1226 = vmatpush.msrb.mxu3 %v10317_v59 }
 0x340   : > { %1249 = vmatpush.msrb.mxu0 %v10317_v59 }
 0x341   : > { %1207 = vmatpush.msra.mxu1 %v10306_v0  ;;  %1227 = vmatpush.msrb.mxu3 %v10307_v63 }
 0x342   : > { %1250 = vmatpush.msrb.mxu0 %v10307_v63 }
 0x343   : > { %9372 = vmatpush.msk.msra.mxu1 %vm495_vm1, %v11838_v35  ;;  %9376 = vmatpush.msk.msrb.mxu3 %vm495_vm1, %v11841_v61 }
 0x344   : > { %9381 = vmatpush.msk.msrb.mxu0 %vm495_vm1, %v11841_v61 }
 0x345   : > { %1209 = vmatpush.msra.mxu1 %v10312_v49  ;;  %1229 = vmatpush.msrb.mxu3 %v10316_v62  ;;  %v1093_v55 = vpop.permute.xlu1 %1092 }
 0x346   : > { %1252 = vmatpush.msrb.mxu0 %v10316_v62 }
 0x347   : > { %1210 = vmatpush.msra.mxu1 %v10302_v54  ;;  %1230 = vmatpush.msrb.mxu3 %v10306_v0 }
 0x348   : > { %1253 = vmatpush.msrb.mxu0 %v10306_v0 }
 0x349   : > { %9373 = vmatpush.msk.msra.mxu1 %vm495_vm1, %v11821_v14  ;;  %9377 = vmatpush.msk.msrb.mxu3 %vm495_vm1, %v11838_v35 }
 0x34a   : > { %9382 = vmatpush.msk.msrb.mxu0 %vm495_vm1, %v11838_v35 }
 0x34b   : > { %v1116_v39 = vpop.f32.mrf.mxu0  ;;  %9383 = vmatmul.msk.f32.vlgmr.msrb.gmra.mxu0 %vm1095_vm11, %v11856_v42  ;;  %1212 = vmatpush.msra.mxu1 %v10311_v50 }
 0x34c   : > { %v1117_v1 = vadd.f32 %v1116_v39, %v1093_v55  ;;  %1232 = vmatpush.msrb.mxu3 %v10312_v49  ;;  %1464 = vmatpush.msra.mxu0 %v1283_v57 }
 0x34d   : > { %1213 = vmatpush.msra.mxu1 %v10301_v56 }
 0x34e   : > { %vm1259_vm12 = vcmp.ge.f32.partialorder %v1117_v1, 0.0  ;;  %v1267_v2 = vmul.f32 0.1, %v1117_v1  ;;  %1233 = vmatpush.msrb.mxu3 %v10302_v54 }
 0x34f   : > { %9374 = vmatpush.msk.msra.mxu1 %vm495_vm1, %v11818_v12 }
 0x350   : > { %9378 = vmatpush.msk.msrb.mxu3 %vm495_vm1, %v11821_v14  ;;  %9375 = vmatmul.msk.f32.vlgmr.msra.gmra.mxu1 %vm1095_vm11, %v11856_v42  ;;  %v1275_v20 = vsel %vm1259_vm12, %v1117_v1, %v1267_v2 }
 0x351   : > { %9379 = vmatmul.msk.f32.vlgmr.msrb.gmra.mxu3 %vm1095_vm11, %v11856_v42  ;;  %9384 = vmatmul.msk.f32.vlgmr.msrb.gmra.mxu2 %vm1284_vm13, %v1275_v20 }
 0x352   : > { %1326 = vmatpush.msrb.mxu1 %v1283_v57  ;;  %1349 = vmatpush.msra.mxu3 %v1283_v57 }
 0x353   : > { %1441 = vmatpush.msrb.mxu2 %v1283_v57 }
 0x354   : > { %1395 = vmatpush.msra.mxu1 %v1283_v57  ;;  %1418 = vmatpush.msrb.mxu3 %v1283_v57 }
 0x362   : > { %v1136_v3 = vpop.f32.mrf.mxu2  ;;  %v1156_v24 = vpop.f32.mrf.mxu3 }
 0x363   : > { %v1137_v18 = vadd.f32 %v1136_v3, %v1093_v55  ;;  %v1157_v31 = vadd.f32 %v1156_v24, %v1093_v55 }
 0x365   : > { %vm1260_vm14 = vcmp.ge.f32.partialorder %v1137_v18, 0.0  ;;  %v1268_v4 = vmul.f32 0.1, %v1137_v18  ;;  %vm1261_vm15 = vcmp.ge.f32.partialorder %v1157_v31, 0.0  ;;  %v1269_v38 = vmul.f32 0.1, %v1157_v31 }
 0x367   : > { %v1276_v48 = vsel %vm1260_vm14, %v1137_v18, %v1268_v4  ;;  %v1277_v5 = vsel %vm1261_vm15, %v1157_v31, %v1269_v38 }
 0x368   : > { %9385 = vmatmul.msk.f32.vlgmr.msrb.gmra.mxu1 %vm1284_vm13, %v1276_v48  ;;  %9386 = vmatmul.msk.f32.vlgmr.msra.gmra.mxu3 %vm1284_vm13, %v1277_v5 }
 0x393   : > { %v1176_v6 = vpop.f32.mrf.mxu0 }
 0x394   : > { %v1177_v7 = vadd.f32 %v1176_v6, %v1093_v55 }
 0x396   : > { %vm1262_vm1 = vcmp.ge.f32.partialorder %v1177_v7, 0.0  ;;  %v1270_v8 = vmul.f32 0.1, %v1177_v7 }
 0x398   : > { %v1278_v9 = vsel %vm1262_vm1, %v1177_v7, %v1270_v8  ;;  %v1583_v8 = vsel %vm1582_vm7, %v11478_v53, 0.0 }
 0x399   : > { %v1196_v10 = vpop.f32.mrf.mxu2  ;;  %9387 = vmatmul.msk.f32.vlgmr.msra.gmra.mxu2 %vm1284_vm13, %v1278_v9 }
 0x39a   : > { %v1197_v25 = vadd.f32 %v1196_v10, %v1093_v55 }
 0x39c   : > { %vm1263_vm3 = vcmp.ge.f32.partialorder %v1197_v25, 0.0  ;;  %v1271_v32 = vmul.f32 0.1, %v1197_v25 }
 0x39e   : > { %v1279_v52 = vsel %vm1263_vm3, %v1197_v25, %v1271_v32 }
 0x39f   : > { %9388 = vmatmul.msk.f32.vlgmr.msra.gmra.mxu1 %vm1284_vm13, %v1279_v52 }
 0x3c8   : > { %v1256_v11 = vpop.f32.mrf.mxu0 }
 0x3c9   : > { %v1257_v60 = vadd.f32 %v1256_v11, %v1093_v55 }
 0x3cb   : > { %vm1266_vm4 = vcmp.ge.f32.partialorder %v1257_v60, 0.0  ;;  %v1274_v12 = vmul.f32 0.1, %v1257_v60 }
 0x3cd   : > { %v1216_v13 = vpop.f32.mrf.mxu1  ;;  %v1282_v14 = vsel %vm1266_vm4, %v1257_v60, %v1274_v12 }
 0x3ce   : > { %v1217_v15 = vadd.f32 %v1216_v13, %v1093_v55  ;;  %9391 = vmatmul.msk.f32.vlgmr.msra.gmra.mxu0 %vm1284_vm13, %v1282_v14 }
 0x3d0   : > { %vm1264_vm5 = vcmp.ge.f32.partialorder %v1217_v15, 0.0  ;;  %v1272_v16 = vmul.f32 0.1, %v1217_v15 }
 0x3d2   : > { %v1280_v17 = vsel %vm1264_vm5, %v1217_v15, %v1272_v16 }
 0x3d3   : > { %9389 = vmatmul.msk.f32.vlgmr.msrb.gmra.mxu3 %vm1284_vm13, %v1280_v17 }
 0x3d4   : > { %v1236_v19 = vpop.f32.mrf.mxu3  ;;  %v1305_v22 = vpop.f32.mrf.mxu2 }
 0x3d5   : > { %v1237_v23 = vadd.f32 %v1236_v19, %v1093_v55  ;;  %v1469_v26 = vmul.f32 0.75, %v1305_v22  ;;  %v1477_v27 = vmul.f32 0.25, %v1305_v22 }
 0x3d7   : > { %vm1265_vm6 = vcmp.ge.f32.partialorder %v1237_v23, 0.0  ;;  %v1273_v28 = vmul.f32 0.1, %v1237_v23  ;;  %v1484_v29 = vadd.f32 %v1477_v27, %v1469_v26 }
 0x3d9   : > { %1518 = vrot.lane.b32.xlu2 %v1484_v29, %s11267_s15  ;;  %v1281_v30 = vsel %vm1265_vm6, %v1237_v23, %v1273_v28 }
 0x3da   : > { %9390 = vmatmul.msk.f32.vlgmr.msrb.gmra.mxu2 %vm1284_vm13, %v1281_v30 }
 0x3e5   : > { %v1328_v33 = vpop.f32.mrf.mxu1 }
 0x3e6   : > { %v1470_v34 = vmul.f32 0.75, %v1328_v33  ;;  %v1478_v35 = vmul.f32 0.25, %v1328_v33 }
 0x3e8   : > { %v1493_v36 = vadd.f32 %v1478_v35, %v1469_v26  ;;  %v1485_v61 = vadd.f32 %v1477_v27, %v1470_v34 }
 0x3ea   : > { %1520 = vrot.lane.b32.xlu0 %v1493_v36, %s11267_s15  ;;  %1522 = vrot.lane.b32.xlu1 %v1485_v61, %s11267_s15 }
 0x3eb   : > { %v1351_v37 = vpop.f32.mrf.mxu3 }
 0x3ec   : > { %v1471_v21 = vmul.f32 0.75, %v1351_v37  ;;  %v1479_v40 = vmul.f32 0.25, %v1351_v37 }
 0x3ee   : > { %v1486_v42 = vadd.f32 %v1478_v35, %v1471_v21  ;;  %v1494_v43 = vadd.f32 %v1479_v40, %v1470_v34 }
 0x3f0   : > { %1524 = vrot.lane.b32.xlu2 %v1494_v43, %s11267_s15 }
 0x3f2   : > { %1526 = vrot.lane.b32.xlu0 %v1486_v42, %s11267_s15 }
 0x41c   : > { %v1374_v44 = vpop.f32.mrf.mxu2  ;;  %v1397_v45 = vpop.f32.mrf.mxu1 }
 0x41d   : > { %v1472_v46 = vmul.f32 0.75, %v1374_v44  ;;  %v1480_v47 = vmul.f32 0.25, %v1374_v44  ;;  %v1481_v49 = vmul.f32 0.25, %v1397_v45  ;;  %v1473_v56 = vmul.f32 0.75, %v1397_v45 }
 0x41f   : > { %v1495_v50 = vadd.f32 %v1480_v47, %v1471_v21  ;;  %v1496_v51 = vadd.f32 %v1481_v49, %v1472_v46  ;;  %v1487_v54 = vadd.f32 %v1479_v40, %v1472_v46  ;;  %v1488_v57 = vadd.f32 %v1480_v47, %v1473_v56 }
 0x421   : > { %1528 = vrot.lane.b32.xlu1 %v1495_v50, %s11267_s15  ;;  %1532 = vrot.lane.b32.xlu0 %v1496_v51, %s11267_s15 }
 0x422   : > { %1530 = vrot.lane.b32.xlu2 %v1487_v54, %s11267_s15 }
 0x429   : > { %1534 = vrot.lane.b32.xlu1 %v1488_v57, %s11267_s15 }
 0x433   : > { %v1519_v39 = vpop.permute.xlu2 %1518 }
 0x434   : > { %v11950_v38 = vsel %vm477_vm0, 0.0, %v1519_v39 }
 0x435   : > { %v1584_v48 = vsel %vm1582_vm7, %v11950_v38, 0.0 }
 0x436   : > { %v10319_v10 = vpack.i.bf16 %v1584_v48, %v1583_v8  ;;  %v405_v8 = vld [vmem:[%s16952_s7 + $0x20] sm:$0xff] }
 0x44a   : > { %v1525_v5 = vpop.permute.xlu2 %1524 }
 0x44b   : > { %v1466_v0 = vpop.f32.mrf.mxu0  ;;  %v11960_v25 = vsel %vm477_vm0, 0.0, %v1525_v5 }
 0x44c   : > { %v1476_v1 = vmul.f32 0.75, %v1466_v0  ;;  %v1492_v2 = vmul.f32 0.25, %v1466_v0  ;;  %v1587_v12 = vsel %vm1582_vm7, %v11960_v25, 0.0 }
 0x44e   : > { %v1500_v31 = vadd.f32 %v1492_v2, %v1476_v1 }
 0x456   : > { %v1420_v41 = vpop.f32.mrf.mxu3 }
 0x457   : > { %v1474_v58 = vmul.f32 0.75, %v1420_v41  ;;  %v1482_v59 = vmul.f32 0.25, %v1420_v41 }
 0x459   : > { %v1497_v62 = vadd.f32 %v1482_v59, %v1473_v56  ;;  %v1489_v63 = vadd.f32 %v1481_v49, %v1474_v58 }
 0x45b   : > { %1536 = vrot.lane.b32.xlu2 %v1497_v62, %s11267_s15  ;;  %1538 = vrot.lane.b32.xlu0 %v1489_v63, %s11267_s15 }
 0x45c   : > { %v1521_v55 = vpop.permute.xlu0 %1520  ;;  %v1523_v6 = vpop.permute.xlu1 %1522 }
 0x45d   : > { %v1443_v20 = vpop.f32.mrf.mxu2  ;;  %v11963_v32 = vsel %vm477_vm0, 0.0, %v1521_v55  ;;  %v11966_v11 = vsel %vm477_vm0, 0.0, %v1523_v6 }
 0x45e   : > { %v1475_v3 = vmul.f32 0.75, %v1443_v20  ;;  %v1483_v24 = vmul.f32 0.25, %v1443_v20  ;;  %v1585_v14 = vsel %vm1582_vm7, %v11963_v32, 0.0  ;;  %v1586_v15 = vsel %vm1582_vm7, %v11966_v11, 0.0 }
 0x45f   : > { %v10324_v16 = vpack.i.bf16 %v1586_v15, %v1585_v14 }
 0x460   : > { %v1498_v18 = vadd.f32 %v1483_v24, %v1474_v58  ;;  %v1499_v4 = vadd.f32 %v1492_v2, %v1475_v3  ;;  %v1491_v9 = vadd.f32 %v1483_v24, %v1476_v1  ;;  %v1490_v52 = vadd.f32 %v1482_v59, %v1475_v3 }
 0x461   : > { %v2691_v24 = vsel %vm2690_vm8, %v11478_v53, 0.0 }
 0x462   : > { %1540 = vrot.lane.b32.xlu1 %v1498_v18, %s11267_s15 }
 0x463   : > { %1548 = vrot.lane.b32.xlu2 %v1500_v31, %s11267_s15  ;;  %1544 = vrot.lane.b32.xlu0 %v1499_v4, %s11267_s15 }
 0x464   : > { %v1527_v7 = vpop.permute.xlu0 %1526 }
 0x465   : > { %v11969_v60 = vsel %vm477_vm0, 0.0, %v1527_v7 }
 0x466   : > { %v1588_v13 = vsel %vm1582_vm7, %v11969_v60, 0.0 }
 0x467   : > { %v10329_v17 = vpack.i.bf16 %v1588_v13, %v1587_v12 }
 0x46a   : > { %1546 = vrot.lane.b32.xlu1 %v1491_v9, %s11267_s15 }
 0x46b   : > { %1542 = vrot.lane.b32.xlu2 %v1490_v52, %s11267_s15  ;;  %10320 = vrot.lane.b32.xlu0 %v10319_v10, %s11269_s16 }
 0x472   : > { %10325 = vrot.lane.b32.xlu1 %v10324_v16, %s11269_s16 }
 0x473   : > { %10330 = vrot.lane.b32.xlu2 %v10329_v17, %s11269_s16  ;;  %10340 = vrot.lane.b32.xlu0 %v10324_v16, %s11270_s22 }
 0x47b   : > { %10335 = vrot.lane.b32.xlu2 %v10319_v10, %s11270_s22 }
 0x47c   : > { %v1531_v19 = vpop.permute.xlu2 %1530 }
 0x47d   : > { %v11987_v22 = vsel %vm477_vm0, 0.0, %v1531_v19  ;;  %v403_v19 = vld [vmem:[%s16952_s7 + $0x10] sm:$0xff] }
 0x47e   : > { %v1590_v28 = vsel %vm1582_vm7, %v11987_v22, 0.0 }
 0x493   : > { %v1529_v23 = vpop.permute.xlu1 %1528  ;;  %v1533_v30 = vpop.permute.xlu0 %1532 }
 0x494   : > { %v11990_v26 = vsel %vm477_vm0, 0.0, %v1529_v23  ;;  %v11999_v33 = vsel %vm477_vm0, 0.0, %v1533_v30 }
 0x495   : > { %v1589_v27 = vsel %vm1582_vm7, %v11990_v26, 0.0  ;;  %v1591_v36 = vsel %vm1582_vm7, %v11999_v33, 0.0 }
 0x496   : > { %v10359_v29 = vpack.i.bf16 %v1590_v28, %v1589_v27 }
 0x498   : > { %10360 = vrot.lane.b32.xlu2 %v10359_v29, %s11270_s22  ;;  %10345 = vrot.lane.b32.xlu0 %v10359_v29, %s11269_s16 }
 0x49b   : > { %v1535_v34 = vpop.permute.xlu1 %1534 }
 0x49c   : > { %v12002_v35 = vsel %vm477_vm0, 0.0, %v1535_v34 }
 0x49d   : > { %v1592_v61 = vsel %vm1582_vm7, %v12002_v35, 0.0 }
 0x49e   : > { %v10349_v37 = vpack.i.bf16 %v1592_v61, %v1591_v36 }
 0x4a0   : > { %10350 = vrot.lane.b32.xlu1 %v10349_v37, %s11269_s16 }
 0x4a8   : > { %10355 = vrot.lane.b32.xlu1 %v10329_v17, %s11270_s22  ;;  %v12108_v17 = vld [vmem:[%s16948_s3] sm:$0xff] }
 0x4b5   : > { %v1537_v21 = vpop.permute.xlu2 %1536 }
 0x4b6   : > { %v12011_v42 = vsel %vm477_vm0, 0.0, %v1537_v21 }
 0x4b7   : > { %v1593_v45 = vsel %vm1582_vm7, %v12011_v42, 0.0 }
 0x4bd   : > { %v1549_v40 = vpop.permute.xlu2 %1548 }
 0x4be   : > { %v12034_v59 = vsel %vm477_vm0, 0.0, %v1549_v40 }
 0x4bf   : > { %v1599_v0 = vsel %vm1582_vm7, %v12034_v59, 0.0 }
 0x4c0   : > { %v10404_v18 = vpack.i.bf16 %v2691_v24, %v1599_v0 }
 0x4c5   : > { %v1543_v47 = vpop.permute.xlu2 %1542 }
 0x4c6   : > { %v12023_v50 = vsel %vm477_vm0, 0.0, %v1543_v47 }
 0x4c7   : > { %v1596_v41 = vsel %vm1582_vm7, %v12023_v50, 0.0 }
 0x4cd   : > { %v1539_v43 = vpop.permute.xlu0 %1538  ;;  %v12051_v20 = vpop.permute.xlu2 %10330 }
 0x4ce   : > { %v12014_v44 = vsel %vm477_vm0, 0.0, %v1539_v43  ;;  %v10333_v36 = vunpack.i.h.bf16 %v12051_v20  ;;  %v10332_v61 = vunpack.i.l.bf16 %v12051_v20 }
 0x4cf   : > { %v1594_v46 = vsel %vm1582_vm7, %v12014_v44, 0.0 }
 0x4d0   : > { %v10379_v49 = vpack.i.bf16 %v1594_v46, %v1593_v45 }
 0x4d2   : > { %10380 = vrot.lane.b32.xlu1 %v10379_v49, %s11270_s22  ;;  %10365 = vrot.lane.b32.xlu2 %v10379_v49, %s11269_s16 }
 0x4d4   : > { %v1541_v51 = vpop.permute.xlu1 %1540 }
 0x4d5   : > { %v12026_v54 = vsel %vm477_vm0, 0.0, %v1541_v51  ;;  %v1545_v56 = vpop.permute.xlu0 %1544  ;;  %v12071_v9 = vpop.permute.xlu2 %10335 }
 0x4d6   : > { %v1595_v57 = vsel %vm1582_vm7, %v12026_v54, 0.0  ;;  %v12038_v62 = vsel %vm477_vm0, 0.0, %v1545_v56  ;;  %v10338_v10 = vunpack.i.h.bf16 %v12071_v9  ;;  %v10337_v12 = vunpack.i.l.bf16 %v12071_v9 }
 0x4d7   : > { %v10369_v58 = vpack.i.bf16 %v1596_v41, %v1595_v57  ;;  %v1597_v1 = vsel %vm1582_vm7, %v12038_v62, 0.0 }
 0x4d9   : > { %10370 = vrot.lane.b32.xlu0 %v10369_v58, %s11269_s16 }
 0x4da   : > { %10390 = vrot.lane.b32.xlu2 %v10369_v58, %s11270_s22 }
 0x4dc   : > { %v1547_v63 = vpop.permute.xlu1 %1546 }
 0x4dd   : > { %v12043_v55 = vsel %vm477_vm0, 0.0, %v1547_v63  ;;  %v12045_v39 = vpop.permute.xlu0 %10320 }
 0x4de   : > { %v1598_v2 = vsel %vm1582_vm7, %v12043_v55, 0.0  ;;  %v10323_v52 = vunpack.i.h.bf16 %v12045_v39  ;;  %v10322_v13 = vunpack.i.l.bf16 %v12045_v39 }
 0x4df   : > { %v10384_v3 = vpack.i.bf16 %v1598_v2, %v1597_v1 }
 0x4e1   : > { %10375 = vrot.lane.b32.xlu0 %v10349_v37, %s11270_s22  ;;  %10385 = vrot.lane.b32.xlu1 %v10384_v3, %s11269_s16  ;;  %v404_v37 = vld [vmem:[%s16952_s7 + $0x18] sm:$0xff] }
 0x4e2   : > { %10405 = vrot.lane.b32.xlu2 %v10404_v18, %s11270_s22 }
 0x4e4   : > { %v10326_v31 = vpop.permute.xlu1 %10325 }
 0x4e5   : > { %v10341_v4 = vpop.permute.xlu0 %10340  ;;  %v12062_v6 = vunpack.i.l.bf16 %v10326_v31  ;;  %v12064_v7 = vunpack.i.h.bf16 %v10326_v31 }
 0x4e6   : > { %v12058_v48 = vunpack.i.h.bf16 %v10341_v4  ;;  %v12060_v5 = vunpack.i.l.bf16 %v10341_v4 }
 0x4e8   : > { %1734 = vmatpush.msrb.mxu1 %v12060_v5  ;;  %1754 = vmatpush.msra.mxu3 %v12058_v48 }
 0x4e9   : > { %10395 = vrot.lane.b32.xlu0 %v10384_v3, %s11270_s22  ;;  %10400 = vrot.lane.b32.xlu1 %v10404_v18, %s11269_s16 }
 0x4ea   : > { %5412 = vperm.xlu2 %10277, %v405_v8   ;;  %1735 = vmatpush.msrb.mxu1 %v12062_v6 }
 0x4eb   : > { %1755 = vmatpush.msra.mxu3 %v12064_v7 }
 0x4ec   : > { %9392 = vmatpush.msk.msrb.mxu1 %vm1582_vm7, %v11963_v32 }
 0x4ed   : > { %9396 = vmatpush.msk.msra.mxu3 %vm1582_vm7, %v11966_v11 }
 0x4ee   : > { %1737 = vmatpush.msrb.mxu1 %v10338_v10 }
 0x4ef   : > { %1757 = vmatpush.msra.mxu3 %v12060_v5 }
 0x4f0   : > { %1738 = vmatpush.msrb.mxu1 %v10323_v52 }
 0x4f1   : > { %1758 = vmatpush.msra.mxu3 %v12062_v6  ;;  %1721 = vperm.xlu0 %10409, %v403_v19  }
 0x4f2   : > { %9393 = vmatpush.msk.msrb.mxu1 %vm1582_vm7, %v11950_v38  ;;  %v10361_v14 = vpop.permute.xlu2 %10360 }
 0x4f3   : > { %9397 = vmatpush.msk.msra.mxu3 %vm1582_vm7, %v11963_v32  ;;  %v12095_v15 = vunpack.i.l.bf16 %v10361_v14  ;;  %v12097_v16 = vunpack.i.h.bf16 %v10361_v14 }
 0x4f4   : > { %1740 = vmatpush.msrb.mxu1 %v10337_v12 }
 0x4f5   : > { %1760 = vmatpush.msra.mxu3 %v10338_v10 }
 0x4f6   : > { %1741 = vmatpush.msrb.mxu1 %v10322_v13 }
 0x4f7   : > { %1761 = vmatpush.msra.mxu3 %v10323_v52 }
 0x4f8   : > { %9394 = vmatpush.msk.msrb.mxu1 %vm1582_vm7, %v11478_v53 }
 0x4f9   : > { %9398 = vmatpush.msk.msra.mxu3 %vm1582_vm7, %v11950_v38  ;;  %9395 = vmatmul.msk.f32.vlgmr.msrb.gmra.mxu1 %vm1095_vm11, %v12108_v17 }
 0x4fa   : > { %1814 = vmatpush.msra.mxu1 %v12095_v15  ;;  %9399 = vmatmul.msk.f32.vlgmr.msra.gmra.mxu3 %vm1095_vm11, %v12108_v17 }
 0x4fb   : > { %1834 = vmatpush.msrb.mxu3 %v12097_v16  ;;  %2957 = vperm.xlu0 %10409, %v404_v37  }
 0x50a   : > { %v10346_v38 = vpop.permute.xlu0 %10345 }
 0x50b   : > { %v12117_v23 = vunpack.i.h.bf16 %v10346_v38  ;;  %v12119_v27 = vunpack.i.l.bf16 %v10346_v38 }
 0x50d   : > { %1815 = vmatpush.msra.mxu1 %v12119_v27  ;;  %1835 = vmatpush.msrb.mxu3 %v12117_v23 }
 0x50f   : > { %9408 = vmatpush.msk.msra.mxu1 %vm1582_vm7, %v11990_v26  ;;  %9412 = vmatpush.msk.msrb.mxu3 %vm1582_vm7, %v11987_v22 }
 0x511   : > { %1837 = vmatpush.msrb.mxu3 %v12095_v15 }
 0x512   : > { %v10351_v28 = vpop.permute.xlu1 %10350 }
 0x513   : > { %1838 = vmatpush.msrb.mxu3 %v12119_v27  ;;  %v10353_v49 = vunpack.i.h.bf16 %v10351_v28  ;;  %v10352_v51 = vunpack.i.l.bf16 %v10351_v28 }
 0x515   : > { %9413 = vmatpush.msk.msrb.mxu3 %vm1582_vm7, %v11990_v26 }
 0x51a   : > { %v10356_v29 = vpop.permute.xlu1 %10355 }
 0x51b   : > { %v10358_v30 = vunpack.i.h.bf16 %v10356_v29  ;;  %v10357_v34 = vunpack.i.l.bf16 %v10356_v29 }
 0x51d   : > { %1774 = vmatpush.msra.mxu2 %v10357_v34  ;;  %1794 = vmatpush.msrb.mxu0 %v10358_v30 }
 0x51e   : > { %1817 = vmatpush.msra.mxu1 %v10358_v30  ;;  %1840 = vmatpush.msrb.mxu3 %v10358_v30 }
 0x51f   : > { %1775 = vmatpush.msra.mxu2 %v10332_v61  ;;  %1795 = vmatpush.msrb.mxu0 %v10333_v36 }
 0x520   : > { %1818 = vmatpush.msra.mxu1 %v10333_v36  ;;  %1841 = vmatpush.msrb.mxu3 %v10333_v36 }
 0x521   : > { %9400 = vmatpush.msk.msra.mxu2 %vm1582_vm7, %v11960_v25  ;;  %9404 = vmatpush.msk.msrb.mxu0 %vm1582_vm7, %v11969_v60 }
 0x522   : > { %9409 = vmatpush.msk.msra.mxu1 %vm1582_vm7, %v11969_v60  ;;  %9414 = vmatpush.msk.msrb.mxu3 %vm1582_vm7, %v11969_v60 }
 0x523   : > { %1777 = vmatpush.msra.mxu2 %v12058_v48  ;;  %1797 = vmatpush.msrb.mxu0 %v10357_v34 }
 0x524   : > { %1820 = vmatpush.msra.mxu1 %v10357_v34  ;;  %9415 = vmatmul.msk.f32.vlgmr.msrb.gmra.mxu3 %vm1095_vm11, %v12108_v17 }
 0x525   : > { %1798 = vmatpush.msrb.mxu0 %v10332_v61  ;;  %1778 = vmatpush.msra.mxu2 %v12064_v7 }
 0x526   : > { %1821 = vmatpush.msra.mxu1 %v10332_v61 }
 0x527   : > { %9401 = vmatpush.msk.msra.mxu2 %vm1582_vm7, %v11966_v11  ;;  %9405 = vmatpush.msk.msrb.mxu0 %vm1582_vm7, %v11960_v25 }
 0x528   : > { %9410 = vmatpush.msk.msra.mxu1 %vm1582_vm7, %v11960_v25 }
 0x529   : > { %1780 = vmatpush.msra.mxu2 %v12060_v5  ;;  %1800 = vmatpush.msrb.mxu0 %v12058_v48 }
 0x52a   : > { %9411 = vmatmul.msk.f32.vlgmr.msra.gmra.mxu1 %vm1095_vm11, %v12108_v17 }
 0x52b   : > { %1781 = vmatpush.msra.mxu2 %v12062_v6  ;;  %1801 = vmatpush.msrb.mxu0 %v12064_v7 }
 0x52c   : > { %v10366_v25 = vpop.permute.xlu2 %10365 }
 0x52d   : > { %9402 = vmatpush.msk.msra.mxu2 %vm1582_vm7, %v11963_v32  ;;  %9406 = vmatpush.msk.msrb.mxu0 %vm1582_vm7, %v11966_v11  ;;  %v12172_v43 = vunpack.i.h.bf16 %v10366_v25  ;;  %v12174_v45 = vunpack.i.l.bf16 %v10366_v25 }
 0x52e   : > { %9403 = vmatmul.msk.f32.vlgmr.msra.gmra.mxu2 %vm1095_vm11, %v12108_v17  ;;  %9407 = vmatmul.msk.f32.vlgmr.msrb.gmra.mxu0 %vm1095_vm11, %v12108_v17 }
 0x534   : > { %v10391_v0 = vpop.permute.xlu2 %10390 }
 0x535   : > { %v10393_v1 = vunpack.i.h.bf16 %v10391_v0 }
 0x544   : > { %v10381_v60 = vpop.permute.xlu1 %10380 }
 0x545   : > { %v12168_v21 = vunpack.i.h.bf16 %v10381_v60  ;;  %v12170_v40 = vunpack.i.l.bf16 %v10381_v60 }
 0x547   : > { %1894 = vmatpush.msrb.mxu1 %v12170_v40  ;;  %1914 = vmatpush.msra.mxu3 %v12168_v21 }
 0x549   : > { %1895 = vmatpush.msrb.mxu1 %v12174_v45  ;;  %1915 = vmatpush.msra.mxu3 %v12172_v43 }
 0x54b   : > { %v10371_v32 = vpop.permute.xlu0 %10370  ;;  %9424 = vmatpush.msk.msrb.mxu1 %vm1582_vm7, %v12011_v42  ;;  %9428 = vmatpush.msk.msra.mxu3 %vm1582_vm7, %v12014_v44 }
 0x54c   : > { %v10372_v2 = vunpack.i.l.bf16 %v10371_v32  ;;  %v10373_v20 = vunpack.i.h.bf16 %v10371_v32 }
 0x54d   : > { %1917 = vmatpush.msra.mxu3 %v12170_v40 }
 0x54f   : > { %1918 = vmatpush.msra.mxu3 %v12174_v45 }
 0x551   : > { %9429 = vmatpush.msk.msra.mxu3 %vm1582_vm7, %v12011_v42 }
 0x553   : > { %v10376_v11 = vpop.permute.xlu0 %10375  ;;  %v10386_v56 = vpop.permute.xlu1 %10385 }
 0x554   : > { %v10378_v46 = vunpack.i.h.bf16 %v10376_v11  ;;  %v10377_v47 = vunpack.i.l.bf16 %v10376_v11  ;;  %v12201_v58 = vunpack.i.h.bf16 %v10386_v56  ;;  %v12217_v63 = vunpack.i.l.bf16 %v10386_v56 }
 0x556   : > { %1854 = vmatpush.msrb.mxu2 %v10377_v47  ;;  %1874 = vmatpush.msra.mxu0 %v10378_v46 }
 0x557   : > { %1897 = vmatpush.msrb.mxu1 %v10378_v46  ;;  %1920 = vmatpush.msra.mxu3 %v10378_v46 }
 0x558   : > { %1855 = vmatpush.msrb.mxu2 %v10352_v51  ;;  %1875 = vmatpush.msra.mxu0 %v10353_v49 }
 0x559   : > { %1898 = vmatpush.msrb.mxu1 %v10353_v49  ;;  %1921 = vmatpush.msra.mxu3 %v10353_v49 }
 0x55a   : > { %9416 = vmatpush.msk.msrb.mxu2 %vm1582_vm7, %v11999_v33  ;;  %9420 = vmatpush.msk.msra.mxu0 %vm1582_vm7, %v12002_v35 }
 0x55b   : > { %9425 = vmatpush.msk.msrb.mxu1 %vm1582_vm7, %v12002_v35  ;;  %9430 = vmatpush.msk.msra.mxu3 %vm1582_vm7, %v12002_v35  ;;  %v10396_v57 = vpop.permute.xlu0 %10395 }
 0x55c   : > { %v12196_v41 = vunpack.i.h.bf16 %v10396_v57  ;;  %9431 = vmatmul.msk.f32.vlgmr.msra.gmra.mxu3 %vm1095_vm11, %v12108_v17  ;;  %1857 = vmatpush.msrb.mxu2 %v12097_v16  ;;  %v12208_v35 = vunpack.i.l.bf16 %v10396_v57 }
 0x55d   : > { %1877 = vmatpush.msra.mxu0 %v10377_v47  ;;  %1900 = vmatpush.msrb.mxu1 %v10377_v47 }
 0x55e   : > { %1858 = vmatpush.msrb.mxu2 %v12117_v23  ;;  %1994 = vmatpush.msrb.mxu3 %v12196_v41 }
 0x55f   : > { %1878 = vmatpush.msra.mxu0 %v10352_v51  ;;  %1901 = vmatpush.msrb.mxu1 %v10352_v51 }
 0x560   : > { %9417 = vmatpush.msk.msrb.mxu2 %vm1582_vm7, %v11987_v22  ;;  %1995 = vmatpush.msrb.mxu3 %v12201_v58 }
 0x561   : > { %9421 = vmatpush.msk.msra.mxu0 %vm1582_vm7, %v11999_v33  ;;  %9426 = vmatpush.msk.msrb.mxu1 %vm1582_vm7, %v11999_v33  ;;  %v10392_v33 = vunpack.i.l.bf16 %v10391_v0 }
 0x562   : > { %9427 = vmatmul.msk.f32.vlgmr.msrb.gmra.mxu1 %vm1095_vm11, %v12108_v17  ;;  %1860 = vmatpush.msrb.mxu2 %v12095_v15 }
 0x563   : > { %1974 = vmatpush.msra.mxu1 %v12208_v35  ;;  %1880 = vmatpush.msra.mxu0 %v12097_v16  ;;  %v12280_v3 = vpop.permute.xlu0 %1721 }
 0x564   : > { %9444 = vmatpush.msk.msrb.mxu3 %vm1582_vm7, %v12043_v55  ;;  %1861 = vmatpush.msrb.mxu2 %v12119_v27 }
 0x565   : > { %1975 = vmatpush.msra.mxu1 %v12217_v63  ;;  %1881 = vmatpush.msra.mxu0 %v12117_v23 }
 0x566   : > { %1997 = vmatpush.msrb.mxu3 %v12208_v35  ;;  %9418 = vmatpush.msk.msrb.mxu2 %vm1582_vm7, %v11990_v26  ;;  %v12269_v26 = vld [vmem:[%s16954_s9] sm:$0xff] }
 0x567   : > { %9440 = vmatpush.msk.msra.mxu1 %vm1582_vm7, %v12038_v62  ;;  %9422 = vmatpush.msk.msra.mxu0 %vm1582_vm7, %v11987_v22  ;;  %v12257_v22 = vld [vmem:[%s16954_s9 + $0x8] sm:$0xff] }
 0x568   : > { %1998 = vmatpush.msrb.mxu3 %v12217_v63  ;;  %9419 = vmatmul.msk.f32.vlgmr.msrb.gmra.mxu2 %vm1095_vm11, %v12108_v17 }
 0x569   : > { %9423 = vmatmul.msk.f32.vlgmr.msra.gmra.mxu0 %vm1095_vm11, %v12108_v17  ;;  %1934 = vmatpush.msra.mxu2 %v10392_v33 }
 0x56a   : > { %1954 = vmatpush.msrb.mxu0 %v10393_v1  ;;  %1977 = vmatpush.msra.mxu1 %v10393_v1 }
 0x56b   : > { %9445 = vmatpush.msk.msrb.mxu3 %vm1582_vm7, %v12038_v62  ;;  %1935 = vmatpush.msra.mxu2 %v10372_v2 }
 0x56c   : > { %1955 = vmatpush.msrb.mxu0 %v10373_v20  ;;  %1978 = vmatpush.msra.mxu1 %v10373_v20 }
 0x56d   : > { %2000 = vmatpush.msrb.mxu3 %v10393_v1  ;;  %9432 = vmatpush.msk.msra.mxu2 %vm1582_vm7, %v12026_v54 }
 0x56e   : > { %9436 = vmatpush.msk.msrb.mxu0 %vm1582_vm7, %v12023_v50  ;;  %9441 = vmatpush.msk.msra.mxu1 %vm1582_vm7, %v12023_v50 }
 0x56f   : > { %2001 = vmatpush.msrb.mxu3 %v10373_v20  ;;  %1937 = vmatpush.msra.mxu2 %v12168_v21 }
 0x570   : > { %1957 = vmatpush.msrb.mxu0 %v10392_v33  ;;  %1980 = vmatpush.msra.mxu1 %v10392_v33 }
 0x571   : > { %9446 = vmatpush.msk.msrb.mxu3 %vm1582_vm7, %v12023_v50  ;;  %1938 = vmatpush.msra.mxu2 %v12172_v43  ;;  %v12271_v50 = vpop.permute.xlu2 %10405 }
 0x572   : > { %1958 = vmatpush.msrb.mxu0 %v10372_v2  ;;  %1981 = vmatpush.msra.mxu1 %v10372_v2  ;;  %v10407_v24 = vunpack.i.l.bf16 %v12271_v50 }
 0x573   : > { %9447 = vmatmul.msk.f32.vlgmr.msrb.gmra.mxu3 %vm1095_vm11, %v12108_v17  ;;  %9433 = vmatpush.msk.msra.mxu2 %vm1582_vm7, %v12014_v44 }
 0x574   : > { %9437 = vmatpush.msk.msrb.mxu0 %vm1582_vm7, %v12026_v54  ;;  %9442 = vmatpush.msk.msra.mxu1 %vm1582_vm7, %v12026_v54  ;;  %v12277_v54 = vpop.permute.xlu1 %10400 }
 0x575   : > { %9443 = vmatmul.msk.f32.vlgmr.msra.gmra.mxu1 %vm1095_vm11, %v12108_v17  ;;  %1940 = vmatpush.msra.mxu2 %v12170_v40  ;;  %v10402_v4 = vunpack.i.l.bf16 %v12277_v54 }
 0x576   : > { %1960 = vmatpush.msrb.mxu0 %v12168_v21  ;;  %2114 = vmatpush.msrb.mxu1 %v12257_v22  ;;  %v1744_v18 = vpop.f32.mrf.mxu1 }
 0x577   : > { %1941 = vmatpush.msra.mxu2 %v12174_v45  ;;  %2137 = vmatpush.msra.mxu3 %v12257_v22  ;;  %v1745_v31 = vadd.f32 %v1744_v18, %v12280_v3 }
 0x578   : > { %1961 = vmatpush.msrb.mxu0 %v12172_v43  ;;  %2115 = vmatpush.msrb.mxu1 %v12269_v26 }
 0x579   : > { %9434 = vmatpush.msk.msra.mxu2 %vm1582_vm7, %v12011_v42  ;;  %2138 = vmatpush.msra.mxu3 %v12269_v26  ;;  %vm2047_vm9 = vcmp.ge.f32.partialorder %v1745_v31, 0.0  ;;  %v2063_v42 = vmul.f32 0.1, %v1745_v31 }
 0x57a   : > { %9438 = vmatpush.msk.msrb.mxu0 %vm1582_vm7, %v12014_v44  ;;  %9435 = vmatmul.msk.f32.vlgmr.msra.gmra.mxu2 %vm1095_vm11, %v12108_v17 }
 0x57b   : > { %9439 = vmatmul.msk.f32.vlgmr.msrb.gmra.mxu0 %vm1095_vm11, %v12108_v17  ;;  %2014 = vmatpush.msrb.mxu2 %v10407_v24  ;;  %v2079_v44 = vsel %vm2047_vm9, %v1745_v31, %v2063_v42 }
 0x57c   : > { %2034 = vmatpush.msra.mxu0 %v10337_v12  ;;  %2229 = vmatpush.msrb.mxu3 %v12257_v22 }
 0x57d   : > { %2015 = vmatpush.msrb.mxu2 %v10402_v4  ;;  %2206 = vmatpush.msra.mxu1 %v12257_v22  ;;  %v1764_v48 = vpop.f32.mrf.mxu3 }
 0x57e   : > { %2035 = vmatpush.msra.mxu0 %v10322_v13  ;;  %2230 = vmatpush.msrb.mxu3 %v12269_v26  ;;  %v1765_v5 = vadd.f32 %v1764_v48, %v12280_v3 }
 0x57f   : > { %9448 = vmatpush.msk.msrb.mxu2 %vm1582_vm7, %v12034_v59  ;;  %9456 = vmatmul.msk.f32.vlgmr.msrb.gmra.mxu1 %vm637_vm2, %v2079_v44 }
 0x580   : > { %9452 = vmatpush.msk.msra.mxu0 %vm1582_vm7, %v11478_v53  ;;  %2207 = vmatpush.msra.mxu1 %v12269_v26  ;;  %vm2048_vm10 = vcmp.ge.f32.partialorder %v1765_v5, 0.0  ;;  %v2064_v39 = vmul.f32 0.1, %v1765_v5 }
 0x581   : > { %2017 = vmatpush.msrb.mxu2 %v12196_v41 }
 0x582   : > { %2298 = vmatpush.msrb.mxu1 %v12257_v22  ;;  %2037 = vmatpush.msra.mxu0 %v10407_v24  ;;  %v2080_v6 = vsel %vm2048_vm10, %v1765_v5, %v2064_v39 }
 0x583   : > { %2018 = vmatpush.msrb.mxu2 %v12201_v58  ;;  %9457 = vmatmul.msk.f32.vlgmr.msra.gmra.mxu3 %vm637_vm2, %v2080_v6 }
 0x584   : > { %2299 = vmatpush.msrb.mxu1 %v12269_v26  ;;  %2038 = vmatpush.msra.mxu0 %v10402_v4 }
 0x585   : > { %9449 = vmatpush.msk.msrb.mxu2 %vm1582_vm7, %v12043_v55  ;;  %2321 = vmatpush.msra.mxu3 %v12257_v22 }
 0x586   : > { %9453 = vmatpush.msk.msra.mxu0 %vm1582_vm7, %v12034_v59 }
 0x587   : > { %2020 = vmatpush.msrb.mxu2 %v12208_v35  ;;  %2322 = vmatpush.msra.mxu3 %v12269_v26 }
 0x588   : > { %2040 = vmatpush.msra.mxu0 %v12196_v41 }
 0x589   : > { %2021 = vmatpush.msrb.mxu2 %v12217_v63 }
 0x58a   : > { %2041 = vmatpush.msra.mxu0 %v12201_v58 }
 0x58b   : > { %9450 = vmatpush.msk.msrb.mxu2 %vm1582_vm7, %v12038_v62 }
 0x58c   : > { %9454 = vmatpush.msk.msra.mxu0 %vm1582_vm7, %v12043_v55  ;;  %9451 = vmatmul.msk.f32.vlgmr.msrb.gmra.mxu2 %vm1095_vm11, %v12108_v17 }
 0x58d   : > { %9455 = vmatmul.msk.f32.vlgmr.msra.gmra.mxu0 %vm1095_vm11, %v12108_v17  ;;  %2160 = vmatpush.msra.mxu2 %v12257_v22 }
 0x58e   : > { %2183 = vmatpush.msrb.mxu0 %v12257_v22 }
 0x58f   : > { %2161 = vmatpush.msra.mxu2 %v12269_v26 }
 0x590   : > { %2184 = vmatpush.msrb.mxu0 %v12269_v26 }
 0x591   : > { %2252 = vmatpush.msrb.mxu2 %v12257_v22 }
 0x592   : > { %2275 = vmatpush.msra.mxu0 %v12257_v22 }
 0x593   : > { %2253 = vmatpush.msrb.mxu2 %v12269_v26 }
 0x594   : > { %2276 = vmatpush.msra.mxu0 %v12269_v26 }
 0x5a7   : > { %v1844_v59 = vpop.f32.mrf.mxu3  ;;  %v1824_v62 = vpop.f32.mrf.mxu1 }
 0x5a8   : > { %v1845_v55 = vadd.f32 %v1844_v59, %v12280_v3  ;;  %v1825_v7 = vadd.f32 %v1824_v62, %v12280_v3 }
 0x5aa   : > { %vm2052_vm12 = vcmp.ge.f32.partialorder %v1845_v55, 0.0  ;;  %v2068_v8 = vmul.f32 0.1, %v1845_v55  ;;  %vm2051_vm13 = vcmp.ge.f32.partialorder %v1825_v7, 0.0  ;;  %v2067_v9 = vmul.f32 0.1, %v1825_v7 }
 0x5ab   : > { %v1804_v10 = vpop.f32.mrf.mxu0 }
 0x5ac   : > { %v1805_v52 = vadd.f32 %v1804_v10, %v12280_v3  ;;  %v2084_v12 = vsel %vm2052_vm12, %v1845_v55, %v2068_v8  ;;  %v2083_v13 = vsel %vm2051_vm13, %v1825_v7, %v2067_v9 }
 0x5ad   : > { %9461 = vmatmul.msk.f32.vlgmr.msrb.gmra.mxu3 %vm637_vm2, %v2084_v12  ;;  %9460 = vmatmul.msk.f32.vlgmr.msra.gmra.mxu1 %vm637_vm2, %v2083_v13 }
 0x5ae   : > { %vm2050_vm14 = vcmp.ge.f32.partialorder %v1805_v52, 0.0  ;;  %v2066_v14 = vmul.f32 0.1, %v1805_v52  ;;  %2390 = vmatpush.msra.mxu1 %v12257_v22  ;;  %2413 = vmatpush.msrb.mxu3 %v12257_v22 }
 0x5b0   : > { %v2082_v15 = vsel %vm2050_vm14, %v1805_v52, %v2066_v14  ;;  %2391 = vmatpush.msra.mxu1 %v12269_v26  ;;  %2414 = vmatpush.msrb.mxu3 %v12269_v26  ;;  %vm3703_vm14 = vcmask 261120  }
 0x5b1   : > { %v1784_v16 = vpop.f32.mrf.mxu2  ;;  %9459 = vmatmul.msk.f32.vlgmr.msrb.gmra.mxu0 %vm637_vm2, %v2082_v15 }
 0x5b2   : > { %v1785_v17 = vadd.f32 %v1784_v16, %v12280_v3  ;;  %2367 = vmatpush.msrb.mxu0 %v12257_v22 }
 0x5b4   : > { %vm2049_vm15 = vcmp.ge.f32.partialorder %v1785_v17, 0.0  ;;  %v2065_v19 = vmul.f32 0.1, %v1785_v17  ;;  %2368 = vmatpush.msrb.mxu0 %v12269_v26 }
 0x5b6   : > { %v2081_v38 = vsel %vm2049_vm15, %v1785_v17, %v2065_v19 }
 0x5b7   : > { %9458 = vmatmul.msk.f32.vlgmr.msra.gmra.mxu2 %vm637_vm2, %v2081_v38 }
 0x5b8   : > { %2344 = vmatpush.msra.mxu2 %v12257_v22 }
 0x5ba   : > { %2345 = vmatpush.msra.mxu2 %v12269_v26 }
 0x5df   : > { %v1904_v23 = vpop.f32.mrf.mxu1  ;;  %v1924_v27 = vpop.f32.mrf.mxu3 }
 0x5e0   : > { %v1905_v28 = vadd.f32 %v1904_v23, %v12280_v3  ;;  %v1925_v29 = vadd.f32 %v1924_v27, %v12280_v3 }
 0x5e2   : > { %vm2055_vm1 = vcmp.ge.f32.partialorder %v1905_v28, 0.0  ;;  %v2071_v30 = vmul.f32 0.1, %v1905_v28  ;;  %vm2056_vm3 = vcmp.ge.f32.partialorder %v1925_v29, 0.0  ;;  %v2072_v34 = vmul.f32 0.1, %v1925_v29 }
 0x5e4   : > { %v2087_v36 = vsel %vm2055_vm1, %v1905_v28, %v2071_v30  ;;  %v2088_v61 = vsel %vm2056_vm3, %v1925_v29, %v2072_v34 }
 0x5e5   : > { %9464 = vmatmul.msk.f32.vlgmr.msrb.gmra.mxu1 %vm637_vm2, %v2087_v36  ;;  %9465 = vmatmul.msk.f32.vlgmr.msra.gmra.mxu3 %vm637_vm2, %v2088_v61 }
 0x5e6   : > { %v1884_v37 = vpop.f32.mrf.mxu0 }
 0x5e7   : > { %v1885_v25 = vadd.f32 %v1884_v37, %v12280_v3 }
 0x5e9   : > { %vm2054_vm4 = vcmp.ge.f32.partialorder %v1885_v25, 0.0  ;;  %v2070_v60 = vmul.f32 0.1, %v1885_v25 }
 0x5eb   : > { %v1864_v21 = vpop.f32.mrf.mxu2  ;;  %v2086_v40 = vsel %vm2054_vm4, %v1885_v25, %v2070_v60 }
 0x5ec   : > { %v1865_v43 = vadd.f32 %v1864_v21, %v12280_v3  ;;  %9463 = vmatmul.msk.f32.vlgmr.msra.gmra.mxu0 %vm637_vm2, %v2086_v40 }
 0x5ed   : > { %2459 = vmatpush.msra.mxu0 %v12257_v22 }
 0x5ee   : > { %vm2053_vm5 = vcmp.ge.f32.partialorder %v1865_v43, 0.0  ;;  %v2069_v45 = vmul.f32 0.1, %v1865_v43 }
 0x5ef   : > { %2460 = vmatpush.msra.mxu0 %v12269_v26 }
 0x5f0   : > { %v2085_v32 = vsel %vm2053_vm5, %v1865_v43, %v2069_v45 }
 0x5f1   : > { %9462 = vmatmul.msk.f32.vlgmr.msrb.gmra.mxu2 %vm637_vm2, %v2085_v32 }
 0x5f2   : > { %v1984_v11 = vpop.f32.mrf.mxu1  ;;  %2436 = vmatpush.msrb.mxu2 %v12257_v22 }
 0x5f3   : > { %v1985_v46 = vadd.f32 %v1984_v11, %v12280_v3 }
 0x5f4   : > { %2437 = vmatpush.msrb.mxu2 %v12269_v26 }
 0x5f5   : > { %vm2059_vm6 = vcmp.ge.f32.partialorder %v1985_v46, 0.0  ;;  %v2075_v47 = vmul.f32 0.1, %v1985_v46 }
 0x5f6   : > { %v2004_v49 = vpop.f32.mrf.mxu3 }
 0x5f7   : > { %v2005_v51 = vadd.f32 %v2004_v49, %v12280_v3  ;;  %v2091_v56 = vsel %vm2059_vm6, %v1985_v46, %v2075_v47 }
 0x5f8   : > { %v1964_v57 = vpop.f32.mrf.mxu0  ;;  %9468 = vmatmul.msk.f32.vlgmr.msra.gmra.mxu1 %vm637_vm2, %v2091_v56 }
 0x5f9   : > { %vm2060_vm7 = vcmp.ge.f32.partialorder %v2005_v51, 0.0  ;;  %v2076_v41 = vmul.f32 0.1, %v2005_v51  ;;  %v1965_v58 = vadd.f32 %v1964_v57, %v12280_v3 }
 0x5fb   : > { %vm2058_vm9 = vcmp.ge.f32.partialorder %v1965_v58, 0.0  ;;  %v2074_v35 = vmul.f32 0.1, %v1965_v58  ;;  %v2092_v63 = vsel %vm2060_vm7, %v2005_v51, %v2076_v41 }
 0x5fc   : > { %9469 = vmatmul.msk.f32.vlgmr.msrb.gmra.mxu3 %vm637_vm2, %v2092_v63  ;;  %v2117_v0 = vpop.f32.mrf.mxu1 }
 0x5fd   : > { %v1944_v33 = vpop.f32.mrf.mxu2  ;;  %v2090_v1 = vsel %vm2058_vm9, %v1965_v58, %v2074_v35  ;;  %v2465_v2 = vmul.f32 0.75, %v2117_v0  ;;  %v2481_v20 = vmul.f32 0.25, %v2117_v0 }
 0x5fe   : > { %v1945_v22 = vadd.f32 %v1944_v33, %v12280_v3  ;;  %9467 = vmatmul.msk.f32.vlgmr.msrb.gmra.mxu0 %vm637_vm2, %v2090_v1 }
 0x5ff   : > { %v2496_v26 = vadd.f32 %v2481_v20, %v2465_v2 }
 0x600   : > { %vm2057_vm10 = vcmp.ge.f32.partialorder %v1945_v22, 0.0  ;;  %v2073_v24 = vmul.f32 0.1, %v1945_v22 }
 0x601   : > { %2562 = vrot.lane.b32.xlu1 %v2496_v26, %s11267_s15 }
 0x602   : > { %v2089_v18 = vsel %vm2057_vm10, %v1945_v22, %v2073_v24 }
 0x603   : > { %9466 = vmatmul.msk.f32.vlgmr.msra.gmra.mxu2 %vm637_vm2, %v2089_v18 }
 0x606   : > { %v2140_v44 = vpop.f32.mrf.mxu3 }
 0x607   : > { %v2482_v39 = vmul.f32 0.25, %v2140_v44 }
 0x609   : > { %v2513_v62 = vadd.f32 %v2482_v39, %v2465_v2 }
 0x60a   : > { %v2044_v31 = vpop.f32.mrf.mxu0 }
 0x60b   : > { %v2045_v4 = vadd.f32 %v2044_v31, %v12280_v3  ;;  %2564 = vrot.lane.b32.xlu2 %v2513_v62, %s11267_s15  ;;  %v12400_v31 = vpop.permute.xlu2 %5412 }
 0x60c   : > { %17052 = vst [vmem:[#allocation6_spill] sm:$0xff] %v12400_v31 }
 0x60d   : > { %vm2062_vm12 = vcmp.ge.f32.partialorder %v2045_v4, 0.0  ;;  %v2078_v42 = vmul.f32 0.1, %v2045_v4 }
 0x60f   : > { %v2024_v48 = vpop.f32.mrf.mxu2  ;;  %v2094_v5 = vsel %vm2062_vm12, %v2045_v4, %v2078_v42 }
 0x610   : > { %v2025_v6 = vadd.f32 %v2024_v48, %v12280_v3  ;;  %9471 = vmatmul.msk.f32.vlgmr.msra.gmra.mxu0 %vm637_vm2, %v2094_v5  ;;  %v2466_v3 = vmul.f32 0.75, %v2140_v44 }
 0x612   : > { %vm2061_vm13 = vcmp.ge.f32.partialorder %v2025_v6, 0.0  ;;  %v2077_v59 = vmul.f32 0.1, %v2025_v6  ;;  %v2497_v15 = vadd.f32 %v2481_v20, %v2466_v3 }
 0x614   : > { %v2093_v55 = vsel %vm2061_vm13, %v2025_v6, %v2077_v59 }
 0x615   : > { %9470 = vmatmul.msk.f32.vlgmr.msrb.gmra.mxu2 %vm637_vm2, %v2093_v55 }
 0x62a   : > { %v2209_v7 = vpop.f32.mrf.mxu1 }
 0x62b   : > { %v2469_v8 = vmul.f32 0.75, %v2209_v7  ;;  %v2485_v9 = vmul.f32 0.25, %v2209_v7 }
 0x62e   : > { %v2186_v10 = vpop.f32.mrf.mxu0 }
 0x62f   : > { %v2468_v52 = vmul.f32 0.75, %v2186_v10  ;;  %v2484_v12 = vmul.f32 0.25, %v2186_v10 }
 0x630   : > { %v2232_v27 = vpop.f32.mrf.mxu3 }
 0x631   : > { %v2516_v13 = vadd.f32 %v2485_v9, %v2468_v52  ;;  %v2500_v14 = vadd.f32 %v2484_v12, %v2469_v8  ;;  %v2470_v28 = vmul.f32 0.75, %v2232_v27  ;;  %v2486_v36 = vmul.f32 0.25, %v2232_v27 }
 0x633   : > { %2576 = vrot.lane.b32.xlu0 %v2516_v13, %s11267_s15  ;;  %2578 = vrot.lane.b32.xlu1 %v2500_v14, %s11267_s15  ;;  %v2501_v34 = vadd.f32 %v2485_v9, %v2470_v28  ;;  %v2517_v61 = vadd.f32 %v2486_v36, %v2469_v8 }
 0x63a   : > { %v2163_v16 = vpop.f32.mrf.mxu2 }
 0x63b   : > { %v2467_v17 = vmul.f32 0.75, %v2163_v16  ;;  %v2483_v19 = vmul.f32 0.25, %v2163_v16  ;;  %2566 = vrot.lane.b32.xlu1 %v2497_v15, %s11267_s15  ;;  %v12408_v16 = vpop.permute.xlu0 %2957 }
 0x63d   : > { %v2514_v38 = vadd.f32 %v2483_v19, %v2466_v3  ;;  %v2498_v23 = vadd.f32 %v2482_v39, %v2467_v17  ;;  %v2515_v29 = vadd.f32 %v2484_v12, %v2467_v17  ;;  %v2499_v30 = vadd.f32 %v2483_v19, %v2468_v52 }
 0x63f   : > { %2568 = vrot.lane.b32.xlu2 %v2514_v38, %s11267_s15  ;;  %2570 = vrot.lane.b32.xlu0 %v2498_v23, %s11267_s15 }
 0x643   : > { %2572 = vrot.lane.b32.xlu1 %v2515_v29, %s11267_s15 }
 0x647   : > { %2574 = vrot.lane.b32.xlu2 %v2499_v30, %s11267_s15  ;;  %2582 = vrot.lane.b32.xlu0 %v2501_v34, %s11267_s15 }
 0x64f   : > { %2580 = vrot.lane.b32.xlu2 %v2517_v61, %s11267_s15 }
 0x662   : > { %v2301_v37 = vpop.f32.mrf.mxu1 }
 0x663   : > { %v2473_v60 = vmul.f32 0.75, %v2301_v37  ;;  %v2489_v21 = vmul.f32 0.25, %v2301_v37 }
 0x665   : > { %v2565_v62 = vpop.permute.xlu2 %2564 }
 0x666   : > { %v12413_v23 = vsel %vm477_vm0, 0.0, %v2565_v62 }
 0x667   : > { %v2693_v61 = vsel %vm2690_vm8, %v12413_v23, 0.0 }
 0x668   : > { %v2324_v57 = vpop.f32.mrf.mxu3 }
 0x669   : > { %v2278_v25 = vpop.f32.mrf.mxu0  ;;  %v2474_v41 = vmul.f32 0.75, %v2324_v57  ;;  %v2490_v33 = vmul.f32 0.25, %v2324_v57 }
 0x66a   : > { %v2472_v40 = vmul.f32 0.75, %v2278_v25  ;;  %v2488_v43 = vmul.f32 0.25, %v2278_v25 }
 0x66b   : > { %v2505_v35 = vadd.f32 %v2489_v21, %v2474_v41  ;;  %v2521_v20 = vadd.f32 %v2490_v33, %v2473_v60 }
 0x66c   : > { %v2520_v45 = vadd.f32 %v2489_v21, %v2472_v40  ;;  %v2504_v32 = vadd.f32 %v2488_v43, %v2473_v60 }
 0x66e   : > { %2592 = vrot.lane.b32.xlu2 %v2520_v45, %s11267_s15  ;;  %2594 = vrot.lane.b32.xlu0 %v2504_v32, %s11267_s15 }
 0x673   : > { %v2563_v13 = vpop.permute.xlu1 %2562 }
 0x674   : > { %v2255_v11 = vpop.f32.mrf.mxu2  ;;  %v12416_v27 = vsel %vm477_vm0, 0.0, %v2563_v13 }
 0x675   : > { %v2471_v46 = vmul.f32 0.75, %v2255_v11  ;;  %v2487_v47 = vmul.f32 0.25, %v2255_v11  ;;  %v2393_v0 = vpop.f32.mrf.mxu1  ;;  %v2692_v30 = vsel %vm2690_vm8, %v12416_v27, 0.0 }
 0x676   : > { %v2477_v2 = vmul.f32 0.75, %v2393_v0  ;;  %v2493_v4 = vmul.f32 0.25, %v2393_v0  ;;  %v10415_v25 = vpack.i.bf16 %v2693_v61, %v2692_v30 }
 0x677   : > { %v2518_v49 = vadd.f32 %v2487_v47, %v2470_v28  ;;  %v2502_v51 = vadd.f32 %v2486_v36, %v2471_v46  ;;  %v2519_v56 = vadd.f32 %v2488_v43, %v2471_v46  ;;  %v2503_v58 = vadd.f32 %v2487_v47, %v2472_v40 }
 0x679   : > { %2584 = vrot.lane.b32.xlu1 %v2518_v49, %s11267_s15  ;;  %2586 = vrot.lane.b32.xlu2 %v2502_v51, %s11267_s15 }
 0x67a   : > { %2588 = vrot.lane.b32.xlu0 %v2519_v56, %s11267_s15 }
 0x67b   : > { %v2370_v63 = vpop.f32.mrf.mxu0 }
 0x67c   : > { %v2492_v1 = vmul.f32 0.25, %v2370_v63  ;;  %v2476_v24 = vmul.f32 0.75, %v2370_v63 }
 0x67e   : > { %v2508_v22 = vadd.f32 %v2492_v1, %v2477_v2  ;;  %v2524_v5 = vadd.f32 %v2493_v4, %v2476_v24 }
 0x67f   : > { %v2416_v55 = vpop.f32.mrf.mxu3 }
 0x680   : > { %v2478_v10 = vmul.f32 0.75, %v2416_v55  ;;  %v2494_v38 = vmul.f32 0.25, %v2416_v55 }
 0x681   : > { %2590 = vrot.lane.b32.xlu1 %v2503_v58, %s11267_s15  ;;  %2598 = vrot.lane.b32.xlu2 %v2505_v35, %s11267_s15 }
 0x682   : > { %v2509_v3 = vadd.f32 %v2493_v4, %v2478_v10  ;;  %v2525_v36 = vadd.f32 %v2494_v38, %v2477_v2 }
 0x686   : > { %v2347_v26 = vpop.f32.mrf.mxu2 }
 0x687   : > { %v2475_v18 = vmul.f32 0.75, %v2347_v26  ;;  %v2491_v59 = vmul.f32 0.25, %v2347_v26 }
 0x689   : > { %2596 = vrot.lane.b32.xlu1 %v2521_v20, %s11267_s15  ;;  %2610 = vrot.lane.b32.xlu2 %v2508_v22, %s11267_s15  ;;  %v2523_v39 = vadd.f32 %v2492_v1, %v2475_v18  ;;  %v2506_v7 = vadd.f32 %v2490_v33, %v2475_v18  ;;  %v2522_v9 = vadd.f32 %v2491_v59, %v2474_v41 }
 0x68a   : > { %v2507_v15 = vadd.f32 %v2491_v59, %v2476_v24 }
 0x68d   : > { %v2462_v42 = vpop.f32.mrf.mxu0 }
 0x68e   : > { %v2480_v44 = vmul.f32 0.75, %v2462_v42  ;;  %v2512_v48 = vmul.f32 0.25, %v2462_v42 }
 0x690   : > { %v2528_v6 = vadd.f32 %v2512_v48, %v2480_v44 }
 0x691   : > { %2608 = vrot.lane.b32.xlu1 %v2524_v5, %s11267_s15  ;;  %2604 = vrot.lane.b32.xlu2 %v2523_v39, %s11267_s15 }
 0x692   : > { %2624 = vrot.lane.b32.xlu0 %v2528_v6, %s11267_s15 }
 0x698   : > { %v2439_v8 = vpop.f32.mrf.mxu2 }
 0x699   : > { %v2495_v52 = vmul.f32 0.25, %v2439_v8  ;;  %2602 = vrot.lane.b32.xlu1 %v2506_v7, %s11267_s15  ;;  %v2569_v14 = vpop.permute.xlu2 %2568  ;;  %v2479_v17 = vmul.f32 0.75, %v2439_v8 }
 0x69a   : > { %2600 = vrot.lane.b32.xlu0 %v2522_v9, %s11267_s15  ;;  %v12426_v60 = vsel %vm477_vm0, 0.0, %v2569_v14 }
 0x69b   : > { %v2526_v12 = vadd.f32 %v2495_v52, %v2478_v10  ;;  %v2511_v19 = vadd.f32 %v2495_v52, %v2480_v44  ;;  %v2527_v29 = vadd.f32 %v2512_v48, %v2479_v17  ;;  %v2510_v45 = vadd.f32 %v2494_v38, %v2479_v17 }
 0x69c   : > { %v2695_v32 = vsel %vm2690_vm8, %v12426_v60, 0.0 }
 0x69d   : > { %2616 = vrot.lane.b32.xlu2 %v2526_v12, %s11267_s15 }
 0x6a1   : > { %2614 = vrot.lane.b32.xlu1 %v2509_v3, %s11267_s15  ;;  %v2575_v34 = vpop.permute.xlu2 %2574 }
 0x6a2   : > { %2606 = vrot.lane.b32.xlu0 %v2507_v15, %s11267_s15  ;;  %v12442_v51 = vsel %vm477_vm0, 0.0, %v2575_v34 }
 0x6a3   : > { %v2698_v0 = vsel %vm2690_vm8, %v12442_v51, 0.0 }
 0x6a5   : > { %2622 = vrot.lane.b32.xlu2 %v2511_v19, %s11267_s15  ;;  %v2579_v28 = vpop.permute.xlu1 %2578  ;;  %v2577_v37 = vpop.permute.xlu0 %2576 }
 0x6a6   : > { %v12437_v11 = vsel %vm477_vm0, 0.0, %v2577_v37  ;;  %v12450_v41 = vsel %vm477_vm0, 0.0, %v2579_v28 }
 0x6a7   : > { %v2699_v57 = vsel %vm2690_vm8, %v12437_v11, 0.0  ;;  %v2700_v22 = vsel %vm2690_vm8, %v12450_v41, 0.0 }
 0x6a8   : > { %v10430_v33 = vpack.i.bf16 %v2699_v57, %v2698_v0 }
 0x6a9   : > { %2620 = vrot.lane.b32.xlu1 %v2527_v29, %s11267_s15  ;;  %v2581_v49 = vpop.permute.xlu2 %2580 }
 0x6aa   : > { %2612 = vrot.lane.b32.xlu0 %v2525_v36, %s11267_s15  ;;  %v12453_v58 = vsel %vm477_vm0, 0.0, %v2581_v49 }
 0x6ab   : > { %v2701_v26 = vsel %vm2690_vm8, %v12453_v58, 0.0 }
 0x6ac   : > { %v10435_v24 = vpack.i.bf16 %v2701_v26, %v2700_v22 }
 0x6ad   : > { %10416 = vrot.lane.b32.xlu2 %v10415_v25, %s11270_s22  ;;  %v2567_v21 = vpop.permute.xlu1 %2566 }
 0x6ae   : > { %v12430_v40 = vsel %vm477_vm0, 0.0, %v2567_v21 }
 0x6af   : > { %v2694_v43 = vsel %vm2690_vm8, %v12430_v40, 0.0 }
 0x6b0   : > { %v10420_v47 = vpack.i.bf16 %v2695_v32, %v2694_v43 }
 0x6b1   : > { %10411 = vrot.lane.b32.xlu1 %v10415_v25, %s11269_s16  ;;  %v2571_v46 = vpop.permute.xlu0 %2570 }
 0x6b2   : > { %2618 = vrot.lane.b32.xlu0 %v2510_v45, %s11267_s15  ;;  %v12445_v56 = vsel %vm477_vm0, 0.0, %v2571_v46 }
 0x6b3   : > { %v2696_v1 = vsel %vm2690_vm8, %v12445_v56, 0.0 }
 0x6b5   : > { %10421 = vrot.lane.b32.xlu2 %v10420_v47, %s11269_s16  ;;  %v2573_v35 = vpop.permute.xlu1 %2572 }
 0x6b6   : > { %v12457_v63 = vsel %vm477_vm0, 0.0, %v2573_v35 }
 0x6b7   : > { %v2697_v2 = vsel %vm2690_vm8, %v12457_v63, 0.0 }
 0x6b8   : > { %v10425_v20 = vpack.i.bf16 %v2697_v2, %v2696_v1 }
 0x6b9   : > { %10431 = vrot.lane.b32.xlu1 %v10430_v33, %s11269_s16  ;;  %v2583_v44 = vpop.permute.xlu0 %2582 }
 0x6ba   : > { %10426 = vrot.lane.b32.xlu0 %v10425_v20, %s11269_s16  ;;  %v12479_v39 = vsel %vm477_vm0, 0.0, %v2583_v44 }
 0x6bb   : > { %v2702_v8 = vsel %vm2690_vm8, %v12479_v39, 0.0 }
 0x6bd   : > { %10436 = vrot.lane.b32.xlu2 %v10435_v24, %s11269_s16 }
 0x6c1   : > { %10446 = vrot.lane.b32.xlu1 %v10425_v20, %s11270_s22 }
 0x6c2   : > { %10441 = vrot.lane.b32.xlu0 %v10420_v47, %s11270_s22 }
 0x6c5   : > { %10451 = vrot.lane.b32.xlu2 %v10430_v33, %s11270_s22 }
 0x6c8   : > { %v2593_v18 = vpop.permute.xlu2 %2592 }
 0x6c9   : > { %v12501_v3 = vsel %vm477_vm0, 0.0, %v2593_v18 }
 0x6ca   : > { %10456 = vrot.lane.b32.xlu0 %v10435_v24, %s11270_s22  ;;  %v2707_v38 = vsel %vm2690_vm8, %v12501_v3, 0.0 }
 0x6d3   : > { %v2587_v4 = vpop.permute.xlu2 %2586 }
 0x6d4   : > { %v12482_v6 = vsel %vm477_vm0, 0.0, %v2587_v4 }
 0x6d5   : > { %v2704_v10 = vsel %vm2690_vm8, %v12482_v6, 0.0 }
 0x6db   : > { %v2599_v42 = vpop.permute.xlu2 %2598 }
 0x6dc   : > { %v12538_v49 = vsel %vm477_vm0, 0.0, %v2599_v42 }
 0x6dd   : > { %v2710_v20 = vsel %vm2690_vm8, %v12538_v49, 0.0 }
 0x6e0   : > { %v2595_v48 = vpop.permute.xlu0 %2594 }
 0x6e1   : > { %v12513_v30 = vsel %vm477_vm0, 0.0, %v2595_v48 }
 0x6e2   : > { %v2708_v61 = vsel %vm2690_vm8, %v12513_v30, 0.0 }
 0x6e3   : > { %v12476_v5 = vpop.permute.xlu2 %2610 }
 0x6eb   : > { %v2585_v59 = vpop.permute.xlu1 %2584  ;;  %v2605_v13 = vpop.permute.xlu2 %2604 }
 0x6ec   : > { %v12485_v62 = vsel %vm477_vm0, 0.0, %v2585_v59  ;;  %v2589_v55 = vpop.permute.xlu0 %2588  ;;  %v12534_v47 = vsel %vm477_vm0, 0.0, %v2605_v13 }
 0x6ed   : > { %v12488_v7 = vsel %vm477_vm0, 0.0, %v2589_v55  ;;  %v2703_v9 = vsel %vm2690_vm8, %v12485_v62, 0.0  ;;  %v2713_v2 = vsel %vm2690_vm8, %v12534_v47, 0.0 }
 0x6ee   : > { %v2705_v52 = vsel %vm2690_vm8, %v12488_v7, 0.0  ;;  %v10460_v12 = vpack.i.bf16 %v2703_v9, %v2702_v8  ;;  %v12570_v8 = vsel %vm477_vm0, 0.0, %v12476_v5 }
 0x6ef   : > { %v10465_v14 = vpack.i.bf16 %v2705_v52, %v2704_v10 }
 0x6f0   : > { %10461 = vrot.lane.b32.xlu0 %v10460_v12, %s11269_s16 }
 0x6f1   : > { %10466 = vrot.lane.b32.xlu1 %v10465_v14, %s11269_s16 }
 0x6f3   : > { %v2591_v15 = vpop.permute.xlu1 %2590 }
 0x6f4   : > { %v12504_v17 = vsel %vm477_vm0, 0.0, %v2591_v15 }
 0x6f5   : > { %v2706_v19 = vsel %vm2690_vm8, %v12504_v17, 0.0 }
 0x6f6   : > { %v10470_v28 = vpack.i.bf16 %v2707_v38, %v2706_v19 }
 0x6f7   : > { %v2617_v29 = vpop.permute.xlu2 %2616 }
 0x6f8   : > { %10471 = vrot.lane.b32.xlu2 %v10470_v28, %s11269_s16  ;;  %v12591_v38 = vsel %vm477_vm0, 0.0, %v2617_v29 }
 0x6f9   : > { %10481 = vrot.lane.b32.xlu1 %v10460_v12, %s11270_s22  ;;  %v2716_v12 = vsel %vm2690_vm8, %v12570_v8, 0.0  ;;  %v2719_v29 = vsel %vm2690_vm8, %v12591_v38, 0.0 }
 0x6fb   : > { %v2597_v34 = vpop.permute.xlu1 %2596 }
 0x6fc   : > { %v12516_v36 = vsel %vm477_vm0, 0.0, %v2597_v34 }
 0x6fd   : > { %v2709_v37 = vsel %vm2690_vm8, %v12516_v36, 0.0 }
 0x6fe   : > { %v10495_v25 = vpack.i.bf16 %v2709_v37, %v2708_v61 }
 0x6ff   : > { %v12522_v21 = vpop.permute.xlu2 %2622 }
 0x700   : > { %10476 = vrot.lane.b32.xlu0 %v10495_v25, %s11269_s16  ;;  %10486 = vrot.lane.b32.xlu2 %v10465_v14, %s11270_s22 }
 0x701   : > { %10496 = vrot.lane.b32.xlu1 %v10495_v25, %s11270_s22 }
 0x703   : > { %v2609_v43 = vpop.permute.xlu1 %2608 }
 0x704   : > { %v2625_v45 = vpop.permute.xlu0 %2624  ;;  %v12557_v18 = vsel %vm477_vm0, 0.0, %v2609_v43 }
 0x705   : > { %v2715_v59 = vsel %vm2690_vm8, %v12557_v18, 0.0 }
 0x707   : > { %v12527_v32 = vpop.permute.xlu2 %10416 }
 0x708   : > { %v12530_v46 = vunpack.i.h.bf16 %v12527_v32  ;;  %10491 = vrot.lane.b32.xlu0 %v10470_v28, %s11270_s22 }
 0x70a   : > { %2970 = vmatpush.msrb.mxu1 %v12530_v46 }
 0x70b   : > { %v2603_v57 = vpop.permute.xlu1 %2602 }
 0x70c   : > { %v2601_v35 = vpop.permute.xlu0 %2600  ;;  %v12541_v0 = vsel %vm477_vm0, 0.0, %v2603_v57 }
 0x70d   : > { %v12544_v33 = vsel %vm477_vm0, 0.0, %v2601_v35  ;;  %v2712_v1 = vsel %vm2690_vm8, %v12541_v0, 0.0  ;;  %v10418_v35 = vunpack.i.l.bf16 %v12527_v32 }
 0x70e   : > { %v2711_v22 = vsel %vm2690_vm8, %v12544_v33, 0.0  ;;  %v10505_v26 = vpack.i.bf16 %v2713_v2, %v2712_v1  ;;  %v12612_v2 = vsel %vm477_vm0, 0.0, %v2625_v45 }
 0x70f   : > { %v10500_v24 = vpack.i.bf16 %v2711_v22, %v2710_v20  ;;  %v12622_v22 = vsel %vm477_vm0, 0.0, %v12522_v21  ;;  %v2723_v45 = vsel %vm2690_vm8, %v12612_v2, 0.0  ;;  %v10403_v21 = vunpack.i.h.bf16 %v12277_v54 }
 0x710   : > { %10506 = vrot.lane.b32.xlu2 %v10505_v26, %s11269_s16 }
 0x711   : > { %10501 = vrot.lane.b32.xlu1 %v10500_v24, %s11269_s16 }
 0x713   : > { %v2615_v4 = vpop.permute.xlu1 %2614 }
 0x714   : > { %v2607_v42 = vpop.permute.xlu0 %2606  ;;  %v12582_v15 = vsel %vm477_vm0, 0.0, %v2615_v4  ;;  %v10408_v4 = vunpack.i.h.bf16 %v12271_v50  ;;  %v13064_v50 = vld [vmem:[%s16955_s10] sm:$0xff] }
 0x715   : > { %v12560_v44 = vsel %vm477_vm0, 0.0, %v2607_v42  ;;  %v2718_v61 = vsel %vm2690_vm8, %v12582_v15, 0.0  ;;  %v2722_v42 = vsel %vm2690_vm8, %v12622_v22, 0.0 }
 0x716   : > { %v2714_v48 = vsel %vm2690_vm8, %v12560_v44, 0.0  ;;  %v10540_v1 = vpack.i.bf16 %v2719_v29, %v2718_v61 }
 0x717   : > { %v10510_v55 = vpack.i.bf16 %v2715_v59, %v2714_v48  ;;  %v10550_v48 = vpack.i.bf16 %v2723_v45, %v2722_v42  ;;  %v12646_v59 = vld [vmem:[%s16949_s4] sm:$0xff] }
 0x718   : > { %10521 = vrot.lane.b32.xlu2 %v10500_v24, %s11270_s22 }
 0x719   : > { %10511 = vrot.lane.b32.xlu0 %v10510_v55, %s11269_s16 }
 0x71b   : > { %v2621_v9 = vpop.permute.xlu1 %2620 }
 0x71c   : > { %v2613_v10 = vpop.permute.xlu0 %2612  ;;  %v12586_v5 = vsel %vm477_vm0, 0.0, %v2621_v9 }
 0x71d   : > { %v12573_v52 = vsel %vm477_vm0, 0.0, %v2613_v10  ;;  %v2721_v25 = vsel %vm2690_vm8, %v12586_v5, 0.0 }
 0x71e   : > { %v2717_v13 = vsel %vm2690_vm8, %v12573_v52, 0.0 }
 0x71f   : > { %v10515_v14 = vpack.i.bf16 %v2717_v13, %v2716_v12 }
 0x721   : > { %10516 = vrot.lane.b32.xlu1 %v10515_v14, %s11269_s16  ;;  %10526 = vrot.lane.b32.xlu0 %v10505_v26, %s11270_s22 }
 0x722   : > { %10536 = vrot.lane.b32.xlu2 %v10515_v14, %s11270_s22 }
 0x723   : > { %v12588_v19 = vpop.permute.xlu1 %10411 }
 0x724   : > { %v2619_v28 = vpop.permute.xlu0 %2618  ;;  %v12594_v34 = vunpack.i.h.bf16 %v12588_v19  ;;  %v10413_v20 = vunpack.i.l.bf16 %v12588_v19 }
 0x725   : > { %v12599_v37 = vsel %vm477_vm0, 0.0, %v2619_v28 }
 0x726   : > { %v2720_v43 = vsel %vm2690_vm8, %v12599_v37, 0.0  ;;  %2971 = vmatpush.msrb.mxu1 %v12594_v34 }
 0x727   : > { %v10545_v57 = vpack.i.bf16 %v2721_v25, %v2720_v43 }
 0x728   : > { %9472 = vmatpush.msk.msrb.mxu1 %vm2690_vm8, %v12413_v23 }
 0x729   : > { %10531 = vrot.lane.b32.xlu1 %v10510_v55, %s11270_s22  ;;  %10546 = vrot.lane.b32.xlu0 %v10545_v57, %s11269_s16  ;;  %v10422_v55 = vpop.permute.xlu2 %10421 }
 0x72a   : > { %10541 = vrot.lane.b32.xlu2 %v10540_v1, %s11269_s16  ;;  %2973 = vmatpush.msrb.mxu1 %v10418_v35  ;;  %v10423_v43 = vunpack.i.l.bf16 %v10422_v55  ;;  %v10424_v29 = vunpack.i.h.bf16 %v10422_v55 }
 0x72b   : > { %v12624_v26 = vpop.permute.xlu1 %10431 }
 0x72c   : > { %2974 = vmatpush.msrb.mxu1 %v10413_v20  ;;  %v10427_v24 = vpop.permute.xlu0 %10426  ;;  %v10433_v19 = vunpack.i.l.bf16 %v12624_v26 }
 0x72d   : > { %v12656_v61 = vunpack.i.h.bf16 %v10427_v24  ;;  %v12658_v25 = vunpack.i.l.bf16 %v10427_v24 }
 0x72e   : > { %9473 = vmatpush.msk.msrb.mxu1 %vm2690_vm8, %v12416_v27 }
 0x730   : > { %2976 = vmatpush.msrb.mxu1 %v10408_v4 }
 0x731   : > { %10556 = vrot.lane.b32.xlu0 %v10540_v1, %s11270_s22  ;;  %10551 = vrot.lane.b32.xlu1 %v10550_v48, %s11269_s16  ;;  %v10437_v1 = vpop.permute.xlu2 %10436 }
 0x732   : > { %10566 = vrot.lane.b32.xlu2 %v10550_v48, %s11270_s22  ;;  %2977 = vmatpush.msrb.mxu1 %v10403_v21  ;;  %v12702_v32 = vunpack.i.h.bf16 %v10437_v1 }
 0x733   : > { %v10447_v9 = vpop.permute.xlu1 %10446 }
 0x734   : > { %v12648_v10 = vunpack.i.h.bf16 %v10447_v9  ;;  %v12650_v12 = vunpack.i.l.bf16 %v10447_v9  ;;  %9474 = vmatpush.msk.msrb.mxu1 %vm2690_vm8, %v11478_v53  ;;  %v10442_v13 = vpop.permute.xlu0 %10441 }
 0x735   : > { %9475 = vmatmul.msk.f32.vlgmr.msrb.gmra.mxu1 %vm1095_vm11, %v12646_v59  ;;  %v10444_v14 = vunpack.i.h.bf16 %v10442_v13  ;;  %v10443_v28 = vunpack.i.l.bf16 %v10442_v13 }
 0x736   : > { %3030 = vmatpush.msrb.mxu0 %v12650_v12  ;;  %3050 = vmatpush.msra.mxu1 %v12648_v10 }
 0x737   : > { %2990 = vmatpush.msra.mxu3 %v10443_v28  ;;  %3010 = vmatpush.msra.mxu2 %v10444_v14 }
 0x738   : > { %3031 = vmatpush.msrb.mxu0 %v12658_v25  ;;  %3051 = vmatpush.msra.mxu1 %v12656_v61 }
 0x739   : > { %10561 = vrot.lane.b32.xlu1 %v10545_v57, %s11270_s22  ;;  %2991 = vmatpush.msra.mxu3 %v10423_v43  ;;  %v10452_v42 = vpop.permute.xlu2 %10451 }
 0x73a   : > { %9484 = vmatpush.msk.msrb.mxu0 %vm2690_vm8, %v12445_v56  ;;  %9488 = vmatpush.msk.msra.mxu1 %vm2690_vm8, %v12457_v63 }
 0x73b   : > { %3011 = vmatpush.msra.mxu2 %v10424_v29  ;;  %9476 = vmatpush.msk.msra.mxu3 %vm2690_vm8, %v12430_v40 }
 0x73c   : > { %3033 = vmatpush.msrb.mxu0 %v10444_v14  ;;  %3053 = vmatpush.msra.mxu1 %v12650_v12  ;;  %v10457_v57 = vpop.permute.xlu0 %10456 }
 0x73d   : > { %9480 = vmatpush.msk.msra.mxu2 %vm2690_vm8, %v12426_v60  ;;  %2993 = vmatpush.msra.mxu3 %v12530_v46  ;;  %v12690_v45 = vunpack.i.h.bf16 %v10457_v57  ;;  %v12692_v24 = vunpack.i.l.bf16 %v10457_v57 }
 0x73e   : > { %3034 = vmatpush.msrb.mxu0 %v10424_v29  ;;  %3054 = vmatpush.msra.mxu1 %v12658_v25 }
 0x73f   : > { %3013 = vmatpush.msra.mxu2 %v10443_v28  ;;  %2994 = vmatpush.msra.mxu3 %v12594_v34 }
 0x740   : > { %9485 = vmatpush.msk.msrb.mxu0 %vm2690_vm8, %v12426_v60  ;;  %9489 = vmatpush.msk.msra.mxu1 %vm2690_vm8, %v12445_v56 }
 0x741   : > { %3014 = vmatpush.msra.mxu2 %v10423_v43  ;;  %9477 = vmatpush.msk.msra.mxu3 %vm2690_vm8, %v12413_v23 }
 0x742   : > { %3036 = vmatpush.msrb.mxu0 %v10443_v28  ;;  %3056 = vmatpush.msra.mxu1 %v10444_v14 }
 0x743   : > { %9481 = vmatpush.msk.msra.mxu2 %vm2690_vm8, %v12430_v40  ;;  %2996 = vmatpush.msra.mxu3 %v10418_v35 }
 0x744   : > { %3037 = vmatpush.msrb.mxu0 %v10423_v43  ;;  %3057 = vmatpush.msra.mxu1 %v10424_v29 }
 0x745   : > { %3016 = vmatpush.msra.mxu2 %v12530_v46  ;;  %2997 = vmatpush.msra.mxu3 %v10413_v20  ;;  %v12704_v46 = vunpack.i.l.bf16 %v10437_v1 }
 0x746   : > { %9486 = vmatpush.msk.msrb.mxu0 %vm2690_vm8, %v12430_v40  ;;  %9490 = vmatpush.msk.msra.mxu1 %vm2690_vm8, %v12426_v60  ;;  %v10453_v60 = vunpack.i.l.bf16 %v10452_v42  ;;  %v10454_v40 = vunpack.i.h.bf16 %v10452_v42 }
 0x747   : > { %9487 = vmatmul.msk.f32.vlgmr.msrb.gmra.mxu0 %vm1095_vm11, %v12646_v59  ;;  %9491 = vmatmul.msk.f32.vlgmr.msra.gmra.mxu1 %vm1095_vm11, %v12646_v59 }
 0x748   : > { %3110 = vmatpush.msra.mxu0 %v12692_v24  ;;  %3130 = vmatpush.msrb.mxu1 %v12690_v45 }
 0x749   : > { %3017 = vmatpush.msra.mxu2 %v12594_v34  ;;  %9478 = vmatpush.msk.msra.mxu3 %vm2690_vm8, %v12416_v27  ;;  %v10434_v27 = vunpack.i.h.bf16 %v12624_v26 }
 0x74a   : > { %3111 = vmatpush.msra.mxu0 %v12704_v46  ;;  %3131 = vmatpush.msrb.mxu1 %v12702_v32 }
 0x74b   : > { %9482 = vmatpush.msk.msra.mxu2 %vm2690_vm8, %v12413_v23  ;;  %9479 = vmatmul.msk.f32.vlgmr.msra.gmra.mxu3 %vm1095_vm11, %v12646_v59 }
 0x74c   : > { %9483 = vmatmul.msk.f32.vlgmr.msra.gmra.mxu2 %vm1095_vm11, %v12646_v59  ;;  %3070 = vmatpush.msrb.mxu3 %v10453_v60 }
 0x74d   : > { %3090 = vmatpush.msrb.mxu2 %v10454_v40  ;;  %9500 = vmatpush.msk.msra.mxu0 %vm2690_vm8, %v12450_v41 }
 0x74e   : > { %9504 = vmatpush.msk.msrb.mxu1 %vm2690_vm8, %v12453_v58  ;;  %3071 = vmatpush.msrb.mxu3 %v10433_v19 }
 0x74f   : > { %3091 = vmatpush.msrb.mxu2 %v10434_v27  ;;  %3113 = vmatpush.msra.mxu0 %v10454_v40 }
 0x750   : > { %3133 = vmatpush.msrb.mxu1 %v12692_v24  ;;  %9492 = vmatpush.msk.msrb.mxu3 %vm2690_vm8, %v12442_v51 }
 0x751   : > { %9496 = vmatpush.msk.msrb.mxu2 %vm2690_vm8, %v12437_v11  ;;  %3114 = vmatpush.msra.mxu0 %v10434_v27 }
 0x752   : > { %3134 = vmatpush.msrb.mxu1 %v12704_v46  ;;  %3073 = vmatpush.msrb.mxu3 %v12648_v10  ;;  %v12732_v23 = vpop.permute.xlu2 %10471 }
 0x753   : > { %3093 = vmatpush.msrb.mxu2 %v10453_v60  ;;  %9501 = vmatpush.msk.msra.mxu0 %vm2690_vm8, %v12437_v11  ;;  %v10474_v29 = vunpack.i.h.bf16 %v12732_v23  ;;  %v10473_v1 = vunpack.i.l.bf16 %v12732_v23 }
 0x754   : > { %9505 = vmatpush.msk.msrb.mxu1 %vm2690_vm8, %v12450_v41  ;;  %3074 = vmatpush.msrb.mxu3 %v12656_v61 }
 0x755   : > { %3094 = vmatpush.msrb.mxu2 %v10433_v19  ;;  %3116 = vmatpush.msra.mxu0 %v10453_v60 }
 0x756   : > { %3136 = vmatpush.msrb.mxu1 %v10454_v40  ;;  %9493 = vmatpush.msk.msrb.mxu3 %vm2690_vm8, %v12457_v63 }
 0x757   : > { %9497 = vmatpush.msk.msrb.mxu2 %vm2690_vm8, %v12442_v51  ;;  %3117 = vmatpush.msra.mxu0 %v10433_v19 }
 0x758   : > { %3137 = vmatpush.msrb.mxu1 %v10434_v27  ;;  %3076 = vmatpush.msrb.mxu3 %v12650_v12 }
 0x759   : > { %3096 = vmatpush.msrb.mxu2 %v12648_v10  ;;  %9502 = vmatpush.msk.msra.mxu0 %vm2690_vm8, %v12442_v51 }
 0x75a   : > { %9506 = vmatpush.msk.msrb.mxu1 %vm2690_vm8, %v12437_v11  ;;  %9503 = vmatmul.msk.f32.vlgmr.msra.gmra.mxu0 %vm1095_vm11, %v12646_v59  ;;  %v10487_v34 = vpop.permute.xlu2 %10486 }
 0x75b   : > { %9507 = vmatmul.msk.f32.vlgmr.msrb.gmra.mxu1 %vm1095_vm11, %v12646_v59  ;;  %3077 = vmatpush.msrb.mxu3 %v12658_v25  ;;  %v12754_v35 = vunpack.i.h.bf16 %v10487_v34  ;;  %v12756_v20 = vunpack.i.l.bf16 %v10487_v34 }
 0x75c   : > { %3097 = vmatpush.msrb.mxu2 %v12656_v61 }
 0x75d   : > { %9494 = vmatpush.msk.msrb.mxu3 %vm2690_vm8, %v12445_v56  ;;  %3190 = vmatpush.msrb.mxu0 %v12756_v20 }
 0x75e   : > { %9498 = vmatpush.msk.msrb.mxu2 %vm2690_vm8, %v12457_v63  ;;  %9495 = vmatmul.msk.f32.vlgmr.msrb.gmra.mxu3 %vm1095_vm11, %v12646_v59 }
 0x75f   : > { %9499 = vmatmul.msk.f32.vlgmr.msrb.gmra.mxu2 %vm1095_vm11, %v12646_v59  ;;  %3210 = vmatpush.msra.mxu1 %v12754_v35 }
 0x762   : > { %v10462_v56 = vpop.permute.xlu0 %10461 }
 0x763   : > { %v10467_v11 = vpop.permute.xlu1 %10466  ;;  %v10464_v9 = vunpack.i.h.bf16 %v10462_v56  ;;  %v10463_v10 = vunpack.i.l.bf16 %v10462_v56 }
 0x764   : > { %v12769_v51 = vunpack.i.h.bf16 %v10467_v11  ;;  %v12771_v26 = vunpack.i.l.bf16 %v10467_v11 }
 0x766   : > { %3191 = vmatpush.msrb.mxu0 %v12771_v26  ;;  %3211 = vmatpush.msra.mxu1 %v12769_v51 }
 0x768   : > { %9516 = vmatpush.msk.msrb.mxu0 %vm2690_vm8, %v12482_v6  ;;  %9520 = vmatpush.msk.msra.mxu1 %vm2690_vm8, %v12488_v7 }
 0x76a   : > { %3213 = vmatpush.msra.mxu1 %v12756_v20 }
 0x76b   : > { %v10482_v63 = vpop.permute.xlu1 %10481 }
 0x76c   : > { %v10484_v48 = vunpack.i.h.bf16 %v10482_v63  ;;  %v10483_v55 = vunpack.i.l.bf16 %v10482_v63  ;;  %3214 = vmatpush.msra.mxu1 %v12771_v26 }
 0x76e   : > { %3150 = vmatpush.msra.mxu3 %v10483_v55  ;;  %3170 = vmatpush.msra.mxu2 %v10484_v48 }
 0x76f   : > { %3193 = vmatpush.msrb.mxu0 %v10484_v48  ;;  %9521 = vmatpush.msk.msra.mxu1 %vm2690_vm8, %v12482_v6 }
 0x770   : > { %3151 = vmatpush.msra.mxu3 %v10463_v10  ;;  %3171 = vmatpush.msra.mxu2 %v10464_v9 }
 0x771   : > { %3194 = vmatpush.msrb.mxu0 %v10464_v9  ;;  %3216 = vmatpush.msra.mxu1 %v10484_v48 }
 0x772   : > { %9508 = vmatpush.msk.msra.mxu3 %vm2690_vm8, %v12479_v39  ;;  %9512 = vmatpush.msk.msra.mxu2 %vm2690_vm8, %v12485_v62  ;;  %v10477_v12 = vpop.permute.xlu0 %10476 }
 0x773   : > { %9517 = vmatpush.msk.msrb.mxu0 %vm2690_vm8, %v12485_v62  ;;  %3217 = vmatpush.msra.mxu1 %v10464_v9  ;;  %v10497_v13 = vpop.permute.xlu1 %10496  ;;  %v12797_v28 = vunpack.i.h.bf16 %v10477_v12 }
 0x774   : > { %v12789_v14 = vunpack.i.h.bf16 %v10497_v13  ;;  %3153 = vmatpush.msra.mxu3 %v12690_v45  ;;  %3173 = vmatpush.msra.mxu2 %v10483_v55  ;;  %v12802_v61 = vunpack.i.l.bf16 %v10497_v13 }
 0x775   : > { %3196 = vmatpush.msrb.mxu0 %v10483_v55  ;;  %9522 = vmatpush.msk.msra.mxu1 %vm2690_vm8, %v12485_v62  ;;  %v12811_v62 = vunpack.i.l.bf16 %v10477_v12 }
 0x776   : > { %9523 = vmatmul.msk.f32.vlgmr.msra.gmra.mxu1 %vm1095_vm11, %v12646_v59  ;;  %3154 = vmatpush.msra.mxu3 %v12702_v32 }
 0x777   : > { %3174 = vmatpush.msra.mxu2 %v10463_v10  ;;  %3197 = vmatpush.msrb.mxu0 %v10463_v10 }
 0x778   : > { %3290 = vmatpush.msrb.mxu1 %v12789_v14  ;;  %9509 = vmatpush.msk.msra.mxu3 %vm2690_vm8, %v12453_v58 }
 0x779   : > { %9513 = vmatpush.msk.msra.mxu2 %vm2690_vm8, %v12479_v39  ;;  %9518 = vmatpush.msk.msrb.mxu0 %vm2690_vm8, %v12479_v39 }
 0x77a   : > { %3291 = vmatpush.msrb.mxu1 %v12797_v28  ;;  %9519 = vmatmul.msk.f32.vlgmr.msrb.gmra.mxu0 %vm1095_vm11, %v12646_v59  ;;  %v10492_v25 = vpop.permute.xlu0 %10491 }
 0x77b   : > { %3270 = vmatpush.msra.mxu0 %v12802_v61  ;;  %3156 = vmatpush.msra.mxu3 %v12692_v24  ;;  %v10494_v39 = vunpack.i.h.bf16 %v10492_v25  ;;  %v10493_v43 = vunpack.i.l.bf16 %v10492_v25 }
 0x77c   : > { %3176 = vmatpush.msra.mxu2 %v12690_v45  ;;  %9536 = vmatpush.msk.msrb.mxu1 %vm2690_vm8, %v12516_v36 }
 0x77d   : > { %3271 = vmatpush.msra.mxu0 %v12811_v62  ;;  %3157 = vmatpush.msra.mxu3 %v12704_v46 }
 0x77e   : > { %3177 = vmatpush.msra.mxu2 %v12702_v32  ;;  %3293 = vmatpush.msrb.mxu1 %v12802_v61 }
 0x77f   : > { %9532 = vmatpush.msk.msra.mxu0 %vm2690_vm8, %v12513_v30  ;;  %9510 = vmatpush.msk.msra.mxu3 %vm2690_vm8, %v12450_v41  ;;  %v10507_v41 = vpop.permute.xlu2 %10506 }
 0x780   : > { %9514 = vmatpush.msk.msra.mxu2 %vm2690_vm8, %v12453_v58  ;;  %3294 = vmatpush.msrb.mxu1 %v12811_v62 }
 0x781   : > { %9511 = vmatmul.msk.f32.vlgmr.msra.gmra.mxu3 %vm1095_vm11, %v12646_v59  ;;  %9515 = vmatmul.msk.f32.vlgmr.msra.gmra.mxu2 %vm1095_vm11, %v12646_v59 }
 0x782   : > { %3230 = vmatpush.msrb.mxu3 %v10493_v43  ;;  %3250 = vmatpush.msrb.mxu2 %v10494_v39 }
 0x783   : > { %3273 = vmatpush.msra.mxu0 %v10494_v39  ;;  %9537 = vmatpush.msk.msrb.mxu1 %vm2690_vm8, %v12513_v30  ;;  %v10502_v57 = vpop.permute.xlu1 %10501 }
 0x784   : > { %3231 = vmatpush.msrb.mxu3 %v10473_v1  ;;  %3251 = vmatpush.msrb.mxu2 %v10474_v29  ;;  %v10503_v42 = vunpack.i.l.bf16 %v10502_v57  ;;  %v10504_v60 = vunpack.i.h.bf16 %v10502_v57 }
 0x785   : > { %3274 = vmatpush.msra.mxu0 %v10474_v29  ;;  %3296 = vmatpush.msrb.mxu1 %v10494_v39 }
 0x786   : > { %9524 = vmatpush.msk.msrb.mxu3 %vm2690_vm8, %v12504_v17  ;;  %9528 = vmatpush.msk.msrb.mxu2 %vm2690_vm8, %v12501_v3 }
 0x787   : > { %9533 = vmatpush.msk.msra.mxu0 %vm2690_vm8, %v12501_v3  ;;  %3297 = vmatpush.msrb.mxu1 %v10474_v29 }
 0x788   : > { %3233 = vmatpush.msrb.mxu3 %v12754_v35  ;;  %3253 = vmatpush.msrb.mxu2 %v10493_v43 }
 0x789   : > { %3276 = vmatpush.msra.mxu0 %v10493_v43  ;;  %9538 = vmatpush.msk.msrb.mxu1 %vm2690_vm8, %v12501_v3  ;;  %v10522_v3 = vpop.permute.xlu2 %10521 }
 0x78a   : > { %3234 = vmatpush.msrb.mxu3 %v12769_v51  ;;  %3254 = vmatpush.msrb.mxu2 %v10473_v1  ;;  %v10523_v45 = vunpack.i.l.bf16 %v10522_v3  ;;  %v10524_v24 = vunpack.i.h.bf16 %v10522_v3 }
 0x78b   : > { %3277 = vmatpush.msra.mxu0 %v10473_v1  ;;  %9539 = vmatmul.msk.f32.vlgmr.msrb.gmra.mxu1 %vm1095_vm11, %v12646_v59  ;;  %v12849_v58 = vpop.permute.xlu0 %10511 }
 0x78c   : > { %9525 = vmatpush.msk.msrb.mxu3 %vm2690_vm8, %v12488_v7  ;;  %9529 = vmatpush.msk.msrb.mxu2 %vm2690_vm8, %v12504_v17  ;;  %v10513_v34 = vunpack.i.l.bf16 %v12849_v58 }
 0x78d   : > { %9534 = vmatpush.msk.msra.mxu0 %vm2690_vm8, %v12504_v17 }
 0x78e   : > { %9535 = vmatmul.msk.f32.vlgmr.msra.gmra.mxu0 %vm1095_vm11, %v12646_v59  ;;  %3236 = vmatpush.msrb.mxu3 %v12756_v20  ;;  %v10514_v20 = vunpack.i.h.bf16 %v12849_v58 }
 0x78f   : > { %3256 = vmatpush.msrb.mxu2 %v12754_v35 }
 0x790   : > { %3237 = vmatpush.msrb.mxu3 %v12771_v26 }
 0x791   : > { %3257 = vmatpush.msrb.mxu2 %v12769_v51  ;;  %v10537_v35 = vpop.permute.xlu2 %10536 }
 0x792   : > { %9526 = vmatpush.msk.msrb.mxu3 %vm2690_vm8, %v12482_v6  ;;  %v12875_v6 = vunpack.i.l.bf16 %v10507_v41 }
 0x793   : > { %9530 = vmatpush.msk.msrb.mxu2 %vm2690_vm8, %v12488_v7  ;;  %9527 = vmatmul.msk.f32.vlgmr.msrb.gmra.mxu3 %vm1095_vm11, %v12646_v59  ;;  %v10527_v17 = vpop.permute.xlu0 %10526  ;;  %v12878_v7 = vunpack.i.h.bf16 %v10507_v41  ;;  %v10517_v40 = vpop.permute.xlu1 %10516 }
 0x794   : > { %9531 = vmatmul.msk.f32.vlgmr.msrb.gmra.mxu2 %vm1095_vm11, %v12646_v59  ;;  %3310 = vmatpush.msra.mxu3 %v10523_v45  ;;  %v12871_v32 = vunpack.i.h.bf16 %v10527_v17  ;;  %v12873_v46 = vunpack.i.l.bf16 %v10527_v17 }
 0x795   : > { %3330 = vmatpush.msra.mxu2 %v10524_v24 }
 0x796   : > { %3311 = vmatpush.msra.mxu3 %v10503_v42  ;;  %3350 = vmatpush.msrb.mxu0 %v12873_v46 }
 0x797   : > { %3331 = vmatpush.msra.mxu2 %v10504_v60  ;;  %3370 = vmatpush.msra.mxu1 %v12871_v32 }
 0x798   : > { %9540 = vmatpush.msk.msra.mxu3 %vm2690_vm8, %v12538_v49  ;;  %3351 = vmatpush.msrb.mxu0 %v12875_v6 }
 0x799   : > { %9544 = vmatpush.msk.msra.mxu2 %vm2690_vm8, %v12544_v33  ;;  %3371 = vmatpush.msra.mxu1 %v12878_v7  ;;  %v10542_v56 = vpop.permute.xlu2 %10541 }
 0x79a   : > { %3313 = vmatpush.msra.mxu3 %v12789_v14  ;;  %9548 = vmatpush.msk.msrb.mxu0 %vm2690_vm8, %v12541_v0  ;;  %v10544_v55 = vunpack.i.h.bf16 %v10542_v56  ;;  %v10543_v9 = vunpack.i.l.bf16 %v10542_v56 }
 0x79b   : > { %3333 = vmatpush.msra.mxu2 %v10523_v45  ;;  %9552 = vmatpush.msk.msra.mxu1 %vm2690_vm8, %v12534_v47  ;;  %v10532_v19 = vpop.permute.xlu1 %10531  ;;  %v10547_v11 = vpop.permute.xlu0 %10546 }
 0x79c   : > { %3314 = vmatpush.msra.mxu3 %v12797_v28  ;;  %3353 = vmatpush.msrb.mxu0 %v10524_v24  ;;  %v10533_v27 = vunpack.i.l.bf16 %v10532_v19  ;;  %v10534_v23 = vunpack.i.h.bf16 %v10532_v19  ;;  %v12989_v12 = vunpack.i.l.bf16 %v10547_v11 }
 0x79d   : > { %3334 = vmatpush.msra.mxu2 %v10503_v42  ;;  %3373 = vmatpush.msra.mxu1 %v12873_v46 }
 0x79e   : > { %9541 = vmatpush.msk.msra.mxu3 %vm2690_vm8, %v12516_v36  ;;  %3354 = vmatpush.msrb.mxu0 %v10504_v60 }
 0x79f   : > { %9545 = vmatpush.msk.msra.mxu2 %vm2690_vm8, %v12538_v49  ;;  %3374 = vmatpush.msra.mxu1 %v12875_v6 }
 0x7a0   : > { %3316 = vmatpush.msra.mxu3 %v12802_v61  ;;  %9549 = vmatpush.msk.msrb.mxu0 %vm2690_vm8, %v12544_v33 }
 0x7a1   : > { %3336 = vmatpush.msra.mxu2 %v12789_v14  ;;  %9553 = vmatpush.msk.msra.mxu1 %vm2690_vm8, %v12541_v0 }
 0x7a2   : > { %3317 = vmatpush.msra.mxu3 %v12811_v62  ;;  %3356 = vmatpush.msrb.mxu0 %v10523_v45 }
 0x7a3   : > { %3337 = vmatpush.msra.mxu2 %v12797_v28  ;;  %3376 = vmatpush.msra.mxu1 %v10524_v24  ;;  %v12947_v51 = vpop.permute.xlu1 %10551  ;;  %v10557_v26 = vpop.permute.xlu0 %10556 }
 0x7a4   : > { %9542 = vmatpush.msk.msra.mxu3 %vm2690_vm8, %v12513_v30  ;;  %3357 = vmatpush.msrb.mxu0 %v10503_v42  ;;  %v12921_v30 = vunpack.i.h.bf16 %v10537_v35  ;;  %v10559_v63 = vunpack.i.h.bf16 %v10557_v26  ;;  %v10558_v48 = vunpack.i.l.bf16 %v10557_v26  ;;  %v10554_v28 = vunpack.i.h.bf16 %v12947_v51 }
 0x7a5   : > { %9546 = vmatpush.msk.msra.mxu2 %vm2690_vm8, %v12516_v36  ;;  %9543 = vmatmul.msk.f32.vlgmr.msra.gmra.mxu3 %vm1095_vm11, %v12646_v59  ;;  %v12923_v36 = vunpack.i.l.bf16 %v10537_v35  ;;  %v10553_v61 = vunpack.i.l.bf16 %v12947_v51 }
 0x7a6   : > { %9547 = vmatmul.msk.f32.vlgmr.msra.gmra.mxu2 %vm1095_vm11, %v12646_v59  ;;  %3390 = vmatpush.msrb.mxu3 %v10533_v27 }
 0x7a7   : > { %3410 = vmatpush.msrb.mxu2 %v10534_v23  ;;  %3377 = vmatpush.msra.mxu1 %v10504_v60 }
 0x7a8   : > { %3391 = vmatpush.msrb.mxu3 %v10513_v34  ;;  %9550 = vmatpush.msk.msrb.mxu0 %vm2690_vm8, %v12538_v49  ;;  %v12933_v49 = vunpack.i.h.bf16 %v10517_v40 }
 0x7a9   : > { %3411 = vmatpush.msrb.mxu2 %v10514_v20  ;;  %9554 = vmatpush.msk.msra.mxu1 %vm2690_vm8, %v12544_v33  ;;  %v12935_v33 = vunpack.i.l.bf16 %v10517_v40 }
 0x7aa   : > { %9551 = vmatmul.msk.f32.vlgmr.msrb.gmra.mxu0 %vm1095_vm11, %v12646_v59  ;;  %9555 = vmatmul.msk.f32.vlgmr.msra.gmra.mxu1 %vm1095_vm11, %v12646_v59 }
 0x7ab   : > { %9556 = vmatpush.msk.msrb.mxu3 %vm2690_vm8, %v12560_v44  ;;  %9560 = vmatpush.msk.msrb.mxu2 %vm2690_vm8, %v12557_v18  ;;  %v10562_v10 = vpop.permute.xlu1 %10561 }
 0x7ac   : > { %3430 = vmatpush.msra.mxu0 %v12923_v36  ;;  %3450 = vmatpush.msrb.mxu1 %v12921_v30 }
 0x7ad   : > { %3393 = vmatpush.msrb.mxu3 %v12871_v32  ;;  %3413 = vmatpush.msrb.mxu2 %v10533_v27 }
 0x7ae   : > { %3431 = vmatpush.msra.mxu0 %v12935_v33  ;;  %3451 = vmatpush.msrb.mxu1 %v12933_v49 }
 0x7af   : > { %3394 = vmatpush.msrb.mxu3 %v12878_v7  ;;  %3414 = vmatpush.msrb.mxu2 %v10513_v34 }
 0x7b0   : > { %9564 = vmatpush.msk.msra.mxu0 %vm2690_vm8, %v12570_v8  ;;  %9568 = vmatpush.msk.msrb.mxu1 %vm2690_vm8, %v12573_v52 }
 0x7b1   : > { %9557 = vmatpush.msk.msrb.mxu3 %vm2690_vm8, %v12534_v47  ;;  %9561 = vmatpush.msk.msrb.mxu2 %vm2690_vm8, %v12560_v44 }
 0x7b2   : > { %3433 = vmatpush.msra.mxu0 %v10534_v23  ;;  %3453 = vmatpush.msrb.mxu1 %v12923_v36 }
 0x7b3   : > { %3396 = vmatpush.msrb.mxu3 %v12873_v46  ;;  %3416 = vmatpush.msrb.mxu2 %v12871_v32 }
 0x7b4   : > { %3434 = vmatpush.msra.mxu0 %v10514_v20  ;;  %3454 = vmatpush.msrb.mxu1 %v12935_v33 }
 0x7b5   : > { %3397 = vmatpush.msrb.mxu3 %v12875_v6  ;;  %3417 = vmatpush.msrb.mxu2 %v12878_v7 }
 0x7b6   : > { %9565 = vmatpush.msk.msra.mxu0 %vm2690_vm8, %v12557_v18  ;;  %9569 = vmatpush.msk.msrb.mxu1 %vm2690_vm8, %v12570_v8 }
 0x7b7   : > { %9558 = vmatpush.msk.msrb.mxu3 %vm2690_vm8, %v12541_v0  ;;  %9562 = vmatpush.msk.msrb.mxu2 %vm2690_vm8, %v12534_v47  ;;  %v12975_v47 = vunpack.i.h.bf16 %v10562_v10  ;;  %v12977_v0 = vunpack.i.l.bf16 %v10562_v10 }
 0x7b8   : > { %3436 = vmatpush.msra.mxu0 %v10533_v27  ;;  %3456 = vmatpush.msrb.mxu1 %v10534_v23 }
 0x7b9   : > { %9559 = vmatmul.msk.f32.vlgmr.msrb.gmra.mxu3 %vm1095_vm11, %v12646_v59  ;;  %9563 = vmatmul.msk.f32.vlgmr.msrb.gmra.mxu2 %vm1095_vm11, %v12646_v59 }
 0x7ba   : > { %3470 = vmatpush.msra.mxu3 %v10558_v48  ;;  %3490 = vmatpush.msra.mxu2 %v10559_v63 }
 0x7bb   : > { %3437 = vmatpush.msra.mxu0 %v10513_v34  ;;  %3457 = vmatpush.msrb.mxu1 %v10514_v20 }
 0x7bc   : > { %3471 = vmatpush.msra.mxu3 %v10543_v9  ;;  %3491 = vmatpush.msra.mxu2 %v10544_v55 }
 0x7bd   : > { %9566 = vmatpush.msk.msra.mxu0 %vm2690_vm8, %v12560_v44  ;;  %9570 = vmatpush.msk.msrb.mxu1 %vm2690_vm8, %v12557_v18  ;;  %v12987_v44 = vunpack.i.h.bf16 %v10547_v11  ;;  %v10567_v18 = vpop.permute.xlu2 %10566 }
 0x7be   : > { %9567 = vmatmul.msk.f32.vlgmr.msra.gmra.mxu0 %vm1095_vm11, %v12646_v59  ;;  %9571 = vmatmul.msk.f32.vlgmr.msrb.gmra.mxu1 %vm1095_vm11, %v12646_v59  ;;  %v10569_v13 = vunpack.i.h.bf16 %v10567_v18  ;;  %v10568_v14 = vunpack.i.l.bf16 %v10567_v18 }
 0x7bf   : > { %9572 = vmatpush.msk.msra.mxu3 %vm2690_vm8, %v12582_v15  ;;  %9576 = vmatpush.msk.msra.mxu2 %vm2690_vm8, %v12591_v38 }
 0x7c0   : > { %3510 = vmatpush.msrb.mxu0 %v12977_v0  ;;  %3530 = vmatpush.msra.mxu1 %v12975_v47 }
 0x7c1   : > { %3473 = vmatpush.msra.mxu3 %v12921_v30  ;;  %3493 = vmatpush.msra.mxu2 %v10558_v48 }
 0x7c2   : > { %3511 = vmatpush.msrb.mxu0 %v12989_v12  ;;  %3531 = vmatpush.msra.mxu1 %v12987_v44 }
 0x7c3   : > { %3474 = vmatpush.msra.mxu3 %v12933_v49  ;;  %3494 = vmatpush.msra.mxu2 %v10543_v9 }
 0x7c4   : > { %9580 = vmatpush.msk.msrb.mxu0 %vm2690_vm8, %v12599_v37  ;;  %9584 = vmatpush.msk.msra.mxu1 %vm2690_vm8, %v12586_v5  ;;  %v3040_v1 = vpop.f32.mrf.mxu0 }
 0x7c5   : > { %9573 = vmatpush.msk.msra.mxu3 %vm2690_vm8, %v12573_v52  ;;  %9577 = vmatpush.msk.msra.mxu2 %vm2690_vm8, %v12582_v15 }
 0x7c6   : > { %3513 = vmatpush.msrb.mxu0 %v10559_v63  ;;  %3533 = vmatpush.msra.mxu1 %v12977_v0 }
 0x7c7   : > { %3476 = vmatpush.msra.mxu3 %v12923_v36  ;;  %3496 = vmatpush.msra.mxu2 %v12921_v30 }
 0x7c8   : > { %3514 = vmatpush.msrb.mxu0 %v10544_v55  ;;  %3534 = vmatpush.msra.mxu1 %v12989_v12 }
 0x7c9   : > { %3477 = vmatpush.msra.mxu3 %v12935_v33  ;;  %3497 = vmatpush.msra.mxu2 %v12933_v49 }
 0x7ca   : > { %9581 = vmatpush.msk.msrb.mxu0 %vm2690_vm8, %v12591_v38  ;;  %9585 = vmatpush.msk.msra.mxu1 %vm2690_vm8, %v12599_v37 }
 0x7cb   : > { %9574 = vmatpush.msk.msra.mxu3 %vm2690_vm8, %v12570_v8  ;;  %9578 = vmatpush.msk.msra.mxu2 %vm2690_vm8, %v12573_v52  ;;  %v2980_v8 = vpop.f32.mrf.mxu1  ;;  %v13032_v52 = vld [vmem:[%s16955_s10 + $0x18] sm:$0xff] }
 0x7cc   : > { %3516 = vmatpush.msrb.mxu0 %v10558_v48  ;;  %3536 = vmatpush.msra.mxu1 %v10559_v63  ;;  %v2981_v62 = vadd.f32 %v2980_v8, %v12408_v16 }
 0x7cd   : > { %9575 = vmatmul.msk.f32.vlgmr.msra.gmra.mxu3 %vm1095_vm11, %v12646_v59  ;;  %9579 = vmatmul.msk.f32.vlgmr.msra.gmra.mxu2 %vm1095_vm11, %v12646_v59 }
 0x7ce   : > { %3550 = vmatpush.msrb.mxu3 %v10568_v14  ;;  %3570 = vmatpush.msrb.mxu2 %v10569_v13  ;;  %v3635_v25 = vmul.f32 0.1, %v2981_v62  ;;  %vm3603_vm2 = vcmp.ge.f32.partialorder %v2981_v62, 0.0  ;;  %v3000_v39 = vpop.f32.mrf.mxu3 }
 0x7cf   : > { %3517 = vmatpush.msrb.mxu0 %v10543_v9  ;;  %3537 = vmatpush.msra.mxu1 %v10544_v55  ;;  %v3020_v43 = vpop.f32.mrf.mxu2 }
 0x7d0   : > { %3551 = vmatpush.msrb.mxu3 %v10553_v61  ;;  %3571 = vmatpush.msrb.mxu2 %v10554_v28  ;;  %v3021_v41 = vadd.f32 %v3020_v43, %v12408_v16 }
 0x7d1   : > { %9582 = vmatpush.msk.msrb.mxu0 %vm2690_vm8, %v12582_v15  ;;  %9586 = vmatpush.msk.msra.mxu1 %vm2690_vm8, %v12591_v38  ;;  %v13046_v15 = vld [vmem:[%s16955_s10 + $0x10] sm:$0xff]  ;;  %v13055_v38 = vld [vmem:[%s16955_s10 + $0x8] sm:$0xff] }
 0x7d2   : > { %9583 = vmatmul.msk.f32.vlgmr.msrb.gmra.mxu0 %vm1095_vm11, %v12646_v59  ;;  %9587 = vmatmul.msk.f32.vlgmr.msra.gmra.mxu1 %vm1095_vm11, %v12646_v59  ;;  %v3637_v57 = vmul.f32 0.1, %v3021_v41  ;;  %vm3605_vm3 = vcmp.ge.f32.partialorder %v3021_v41, 0.0 }
 0x7d3   : > { %9588 = vmatpush.msk.msrb.mxu3 %vm2690_vm8, %v12622_v22  ;;  %9592 = vmatpush.msk.msrb.mxu2 %vm2690_vm8, %v12612_v2  ;;  %v3060_v54 = vpop.f32.mrf.mxu1 }
 0x7d4   : > { %3590 = vmatpush.msra.mxu0 %v10408_v4  ;;  %3719 = vmatpush.msrb.mxu1 %v13032_v52  ;;  %v3667_v4 = vsel %vm3603_vm2, %v2981_v62, %v3635_v25  ;;  %v3669_v32 = vsel %vm3605_vm3, %v3021_v41, %v3637_v57 }
 0x7d5   : > { %3553 = vmatpush.msrb.mxu3 %v12975_v47  ;;  %3573 = vmatpush.msrb.mxu2 %v10568_v14 }
 0x7d6   : > { %3591 = vmatpush.msra.mxu0 %v10403_v21  ;;  %3720 = vmatpush.msrb.mxu1 %v13046_v15  ;;  %v3061_v21 = vadd.f32 %v3060_v54, %v12408_v16 }
 0x7d7   : > { %3554 = vmatpush.msrb.mxu3 %v12987_v44  ;;  %3574 = vmatpush.msrb.mxu2 %v10553_v61  ;;  %v3120_v6 = vpop.f32.mrf.mxu0 }
 0x7d8   : > { %9596 = vmatpush.msk.msra.mxu0 %vm2690_vm8, %v11478_v53  ;;  %3721 = vmatpush.msrb.mxu1 %v13055_v38  ;;  %v3639_v29 = vmul.f32 0.1, %v3061_v21  ;;  %vm3607_vm15 = vcmp.ge.f32.partialorder %v3061_v21, 0.0  ;;  %v3121_v27 = vadd.f32 %v3120_v6, %v12408_v16 }
 0x7d9   : > { %9589 = vmatpush.msk.msrb.mxu3 %vm2690_vm8, %v12586_v5  ;;  %9593 = vmatpush.msk.msrb.mxu2 %vm2690_vm8, %v12622_v22 }
 0x7da   : > { %3593 = vmatpush.msra.mxu0 %v10569_v13  ;;  %3722 = vmatpush.msrb.mxu1 %v13064_v50  ;;  %v3671_v58 = vsel %vm3607_vm15, %v3061_v21, %v3639_v29  ;;  %v3642_v35 = vmul.f32 0.1, %v3121_v27  ;;  %vm3610_vm7 = vcmp.ge.f32.partialorder %v3121_v27, 0.0 }
 0x7db   : > { %3556 = vmatpush.msrb.mxu3 %v12977_v0  ;;  %3576 = vmatpush.msrb.mxu2 %v12975_v47 }
 0x7dc   : > { %3594 = vmatpush.msra.mxu0 %v10554_v28  ;;  %9600 = vmatmul.msk.f32.vlgmr.msrb.gmra.mxu1 %vm3703_vm14, %v3667_v4  ;;  %v3674_v49 = vsel %vm3610_vm7, %v3121_v27, %v3642_v35 }
 0x7dd   : > { %3811 = vmatpush.msra.mxu1 %v13032_v52  ;;  %3557 = vmatpush.msrb.mxu3 %v12989_v12 }
 0x7de   : > { %3577 = vmatpush.msrb.mxu2 %v12987_v44  ;;  %9597 = vmatpush.msk.msra.mxu0 %vm2690_vm8, %v12612_v2  ;;  %v3001_v2 = vadd.f32 %v3000_v39, %v12408_v16 }
 0x7df   : > { %3812 = vmatpush.msra.mxu1 %v13046_v15  ;;  %9590 = vmatpush.msk.msrb.mxu3 %vm2690_vm8, %v12599_v37  ;;  %v3041_v37 = vadd.f32 %v3040_v1, %v12408_v16 }
 0x7e0   : > { %9594 = vmatpush.msk.msrb.mxu2 %vm2690_vm8, %v12586_v5  ;;  %3596 = vmatpush.msra.mxu0 %v10568_v14  ;;  %v3140_v5 = vpop.f32.mrf.mxu1  ;;  %v3636_v3 = vmul.f32 0.1, %v3001_v2  ;;  %vm3604_vm1 = vcmp.ge.f32.partialorder %v3001_v2, 0.0 }
 0x7e1   : > { %9591 = vmatmul.msk.f32.vlgmr.msrb.gmra.mxu3 %vm1095_vm11, %v12646_v59  ;;  %9595 = vmatmul.msk.f32.vlgmr.msrb.gmra.mxu2 %vm1095_vm11, %v12646_v59  ;;  %v3141_v45 = vadd.f32 %v3140_v5, %v12408_v16  ;;  %v3638_v17 = vmul.f32 0.1, %v3041_v37 }
 0x7e2   : > { %3813 = vmatpush.msra.mxu1 %v13055_v38  ;;  %3597 = vmatpush.msra.mxu0 %v10553_v61  ;;  %v3100_v24 = vpop.f32.mrf.mxu2  ;;  %v3668_v42 = vsel %vm3604_vm1, %v3001_v2, %v3636_v3 }
 0x7e3   : > { %3742 = vmatpush.msra.mxu3 %v13032_v52  ;;  %3765 = vmatpush.msra.mxu2 %v13032_v52  ;;  %vm3611_vm4 = vcmp.ge.f32.partialorder %v3141_v45, 0.0  ;;  %v3101_v60 = vadd.f32 %v3100_v24, %v12408_v16 }
 0x7e4   : > { %3814 = vmatpush.msra.mxu1 %v13064_v50  ;;  %9598 = vmatpush.msk.msra.mxu0 %vm2690_vm8, %v12622_v22  ;;  %v3080_v22 = vpop.f32.mrf.mxu3  ;;  %vm3606_vm8 = vcmp.ge.f32.partialorder %v3041_v37, 0.0 }
 0x7e5   : > { %3743 = vmatpush.msra.mxu3 %v13046_v15  ;;  %3766 = vmatpush.msra.mxu2 %v13046_v15  ;;  %v3081_v46 = vadd.f32 %v3080_v22, %v12408_v16  ;;  %v3670_v19 = vsel %vm3606_vm8, %v3041_v37, %v3638_v17  ;;  %v3641_v23 = vmul.f32 0.1, %v3101_v60  ;;  %vm3609_vm6 = vcmp.ge.f32.partialorder %v3101_v60, 0.0 }
 0x7e6   : > { %9604 = vmatmul.msk.f32.vlgmr.msra.gmra.mxu1 %vm3703_vm14, %v3671_v58  ;;  %9599 = vmatmul.msk.f32.vlgmr.msra.gmra.mxu0 %vm1095_vm11, %v12646_v59  ;;  %v3643_v59 = vmul.f32 0.1, %v3141_v45 }
 0x7e7   : > { %3903 = vmatpush.msrb.mxu1 %v13032_v52  ;;  %3744 = vmatpush.msra.mxu3 %v13055_v38  ;;  %v3640_v40 = vmul.f32 0.1, %v3081_v46  ;;  %vm3608_vm5 = vcmp.ge.f32.partialorder %v3081_v46, 0.0  ;;  %v3673_v20 = vsel %vm3609_vm6, %v3101_v60, %v3641_v23 }
 0x7e8   : > { %3767 = vmatpush.msra.mxu2 %v13055_v38  ;;  %3788 = vmatpush.msrb.mxu0 %v13032_v52  ;;  %v3675_v7 = vsel %vm3611_vm4, %v3141_v45, %v3643_v59 }
 0x7e9   : > { %3904 = vmatpush.msrb.mxu1 %v13046_v15  ;;  %3745 = vmatpush.msra.mxu3 %v13064_v50  ;;  %v3672_v34 = vsel %vm3608_vm5, %v3081_v46, %v3640_v40 }
 0x7ea   : > { %3768 = vmatpush.msra.mxu2 %v13064_v50  ;;  %3789 = vmatpush.msrb.mxu0 %v13046_v15 }
 0x7eb   : > { %9601 = vmatmul.msk.f32.vlgmr.msra.gmra.mxu3 %vm3703_vm14, %v3668_v42  ;;  %9602 = vmatmul.msk.f32.vlgmr.msra.gmra.mxu2 %vm3703_vm14, %v3669_v32 }
 0x7ec   : > { %3905 = vmatpush.msrb.mxu1 %v13055_v38  ;;  %3790 = vmatpush.msrb.mxu0 %v13055_v38 }
 0x7ed   : > { %3834 = vmatpush.msrb.mxu3 %v13032_v52  ;;  %3857 = vmatpush.msrb.mxu2 %v13032_v52 }
 0x7ee   : > { %3906 = vmatpush.msrb.mxu1 %v13064_v50  ;;  %3791 = vmatpush.msrb.mxu0 %v13064_v50 }
 0x7ef   : > { %9608 = vmatmul.msk.f32.vlgmr.msrb.gmra.mxu1 %vm3703_vm14, %v3675_v7  ;;  %9603 = vmatmul.msk.f32.vlgmr.msrb.gmra.mxu0 %vm3703_vm14, %v3670_v19 }
 0x7f0   : > { %3835 = vmatpush.msrb.mxu3 %v13046_v15  ;;  %3858 = vmatpush.msrb.mxu2 %v13046_v15 }
 0x7f1   : > { %3880 = vmatpush.msra.mxu0 %v13032_v52  ;;  %3995 = vmatpush.msra.mxu1 %v13032_v52 }
 0x7f2   : > { %3836 = vmatpush.msrb.mxu3 %v13055_v38  ;;  %3859 = vmatpush.msrb.mxu2 %v13055_v38 }
 0x7f3   : > { %3881 = vmatpush.msra.mxu0 %v13046_v15  ;;  %v3220_v30 = vpop.f32.mrf.mxu1  ;;  %3996 = vmatpush.msra.mxu1 %v13046_v15 }
 0x7f4   : > { %3837 = vmatpush.msrb.mxu3 %v13064_v50  ;;  %3860 = vmatpush.msrb.mxu2 %v13064_v50  ;;  %v3221_v36 = vadd.f32 %v3220_v30, %v12408_v16 }
 0x7f5   : > { %3882 = vmatpush.msra.mxu0 %v13055_v38  ;;  %9605 = vmatmul.msk.f32.vlgmr.msrb.gmra.mxu3 %vm3703_vm14, %v3672_v34 }
 0x7f6   : > { %9606 = vmatmul.msk.f32.vlgmr.msrb.gmra.mxu2 %vm3703_vm14, %v3673_v20  ;;  %vm3615_vm9 = vcmp.ge.f32.partialorder %v3221_v36, 0.0  ;;  %v3647_v11 = vmul.f32 0.1, %v3221_v36  ;;  %3997 = vmatpush.msra.mxu1 %v13055_v38 }
 0x7f7   : > { %3883 = vmatpush.msra.mxu0 %v13064_v50  ;;  %v3200_v33 = vpop.f32.mrf.mxu0  ;;  %3926 = vmatpush.msra.mxu3 %v13032_v52 }
 0x7f8   : > { %9607 = vmatmul.msk.f32.vlgmr.msra.gmra.mxu0 %vm3703_vm14, %v3674_v49  ;;  %v3679_v51 = vsel %vm3615_vm9, %v3221_v36, %v3647_v11  ;;  %v3201_v26 = vadd.f32 %v3200_v33, %v12408_v16  ;;  %3998 = vmatpush.msra.mxu1 %v13064_v50 }
 0x7f9   : > { %3972 = vmatpush.msrb.mxu0 %v13032_v52  ;;  %9612 = vmatmul.msk.f32.vlgmr.msra.gmra.mxu1 %vm3703_vm14, %v3679_v51 }
 0x7fa   : > { %vm3614_vm10 = vcmp.ge.f32.partialorder %v3201_v26, 0.0  ;;  %v3646_v56 = vmul.f32 0.1, %v3201_v26  ;;  %3949 = vmatpush.msra.mxu2 %v13032_v52  ;;  %3927 = vmatpush.msra.mxu3 %v13046_v15 }
 0x7fb   : > { %3973 = vmatpush.msrb.mxu0 %v13046_v15  ;;  %4087 = vmatpush.msrb.mxu1 %v13032_v52 }
 0x7fc   : > { %3950 = vmatpush.msra.mxu2 %v13046_v15  ;;  %3928 = vmatpush.msra.mxu3 %v13055_v38  ;;  %v3678_v63 = vsel %vm3614_vm10, %v3201_v26, %v3646_v56 }
 0x7fd   : > { %3974 = vmatpush.msrb.mxu0 %v13055_v38  ;;  %4088 = vmatpush.msrb.mxu1 %v13046_v15 }
 0x7fe   : > { %3951 = vmatpush.msra.mxu2 %v13055_v38  ;;  %3929 = vmatpush.msra.mxu3 %v13064_v50 }
 0x7ff   : > { %3975 = vmatpush.msrb.mxu0 %v13064_v50  ;;  %4089 = vmatpush.msrb.mxu1 %v13055_v38 }
 0x800   : > { %9611 = vmatmul.msk.f32.vlgmr.msrb.gmra.mxu0 %vm3703_vm14, %v3678_v63  ;;  %3952 = vmatpush.msra.mxu2 %v13064_v50 }
 0x801   : > { %4064 = vmatpush.msra.mxu0 %v13032_v52  ;;  %4090 = vmatpush.msrb.mxu1 %v13064_v50 }
 0x802   : > { %4018 = vmatpush.msrb.mxu3 %v13032_v52  ;;  %4041 = vmatpush.msrb.mxu2 %v13032_v52 }
 0x803   : > { %4065 = vmatpush.msra.mxu0 %v13046_v15  ;;  %4179 = vmatpush.msra.mxu1 %v13032_v52 }
 0x804   : > { %v3160_v48 = vpop.f32.mrf.mxu3  ;;  %v3180_v55 = vpop.f32.mrf.mxu2  ;;  %4019 = vmatpush.msrb.mxu3 %v13046_v15  ;;  %4042 = vmatpush.msrb.mxu2 %v13046_v15 }
 0x805   : > { %v3161_v9 = vadd.f32 %v3160_v48, %v12408_v16  ;;  %v3181_v10 = vadd.f32 %v3180_v55, %v12408_v16  ;;  %4066 = vmatpush.msra.mxu0 %v13055_v38  ;;  %4180 = vmatpush.msra.mxu1 %v13046_v15 }
 0x806   : > { %4020 = vmatpush.msrb.mxu3 %v13055_v38  ;;  %4043 = vmatpush.msrb.mxu2 %v13055_v38 }
 0x807   : > { %vm3612_vm12 = vcmp.ge.f32.partialorder %v3161_v9, 0.0  ;;  %v3644_v47 = vmul.f32 0.1, %v3161_v9  ;;  %vm3613_vm13 = vcmp.ge.f32.partialorder %v3181_v10, 0.0  ;;  %v3645_v0 = vmul.f32 0.1, %v3181_v10  ;;  %4067 = vmatpush.msra.mxu0 %v13064_v50  ;;  %4181 = vmatpush.msra.mxu1 %v13055_v38 }
 0x808   : > { %v3300_v44 = vpop.f32.mrf.mxu1  ;;  %4021 = vmatpush.msrb.mxu3 %v13064_v50  ;;  %4044 = vmatpush.msrb.mxu2 %v13064_v50 }
 0x809   : > { %v3676_v12 = vsel %vm3612_vm12, %v3161_v9, %v3644_v47  ;;  %v3677_v18 = vsel %vm3613_vm13, %v3181_v10, %v3645_v0  ;;  %v3301_v13 = vadd.f32 %v3300_v44, %v12408_v16  ;;  %4156 = vmatpush.msrb.mxu0 %v13032_v52  ;;  %4182 = vmatpush.msra.mxu1 %v13064_v50 }
 0x80a   : > { %9609 = vmatmul.msk.f32.vlgmr.msra.gmra.mxu3 %vm3703_vm14, %v3676_v12  ;;  %9610 = vmatmul.msk.f32.vlgmr.msra.gmra.mxu2 %vm3703_vm14, %v3677_v18 }
 0x80b   : > { %vm3619_vm2 = vcmp.ge.f32.partialorder %v3301_v13, 0.0  ;;  %v3651_v14 = vmul.f32 0.1, %v3301_v13  ;;  %v3280_v28 = vpop.f32.mrf.mxu0  ;;  %4110 = vmatpush.msra.mxu3 %v13032_v52  ;;  %4133 = vmatpush.msra.mxu2 %v13032_v52 }
 0x80c   : > { %v3281_v61 = vadd.f32 %v3280_v28, %v12408_v16  ;;  %4157 = vmatpush.msrb.mxu0 %v13046_v15 }
 0x80d   : > { %v3683_v8 = vsel %vm3619_vm2, %v3301_v13, %v3651_v14  ;;  %4111 = vmatpush.msra.mxu3 %v13046_v15  ;;  %4134 = vmatpush.msra.mxu2 %v13046_v15 }
 0x80e   : > { %vm3618_vm15 = vcmp.ge.f32.partialorder %v3281_v61, 0.0  ;;  %v3650_v62 = vmul.f32 0.1, %v3281_v61  ;;  %9616 = vmatmul.msk.f32.vlgmr.msrb.gmra.mxu1 %vm3703_vm14, %v3683_v8  ;;  %4158 = vmatpush.msrb.mxu0 %v13055_v38 }
 0x80f   : > { %4112 = vmatpush.msra.mxu3 %v13055_v38  ;;  %4135 = vmatpush.msra.mxu2 %v13055_v38 }
 0x810   : > { %v3682_v25 = vsel %vm3618_vm15, %v3281_v61, %v3650_v62  ;;  %4159 = vmatpush.msrb.mxu0 %v13064_v50  ;;  %4271 = vmatpush.msrb.mxu1 %v13032_v52 }
 0x811   : > { %9615 = vmatmul.msk.f32.vlgmr.msra.gmra.mxu0 %vm3703_vm14, %v3682_v25  ;;  %4113 = vmatpush.msra.mxu3 %v13064_v50 }
 0x812   : > { %4136 = vmatpush.msra.mxu2 %v13064_v50  ;;  %4248 = vmatpush.msra.mxu0 %v13032_v52 }
 0x813   : > { %4272 = vmatpush.msrb.mxu1 %v13046_v15 }
 0x814   : > { %4249 = vmatpush.msra.mxu0 %v13046_v15 }
 0x815   : > { %4273 = vmatpush.msrb.mxu1 %v13055_v38 }
 0x816   : > { %v3240_v54 = vpop.f32.mrf.mxu3  ;;  %4250 = vmatpush.msra.mxu0 %v13055_v38 }
 0x817   : > { %v3241_v4 = vadd.f32 %v3240_v54, %v12408_v16  ;;  %v3260_v21 = vpop.f32.mrf.mxu2  ;;  %4274 = vmatpush.msrb.mxu1 %v13064_v50 }
 0x818   : > { %v3261_v39 = vadd.f32 %v3260_v21, %v12408_v16  ;;  %4251 = vmatpush.msra.mxu0 %v13064_v50 }
 0x819   : > { %vm3616_vm1 = vcmp.ge.f32.partialorder %v3241_v4, 0.0  ;;  %v3648_v43 = vmul.f32 0.1, %v3241_v4 }
 0x81a   : > { %vm3617_vm3 = vcmp.ge.f32.partialorder %v3261_v39, 0.0  ;;  %v3649_v29 = vmul.f32 0.1, %v3261_v39 }
 0x81b   : > { %v3680_v1 = vsel %vm3616_vm1, %v3241_v4, %v3648_v43 }
 0x81c   : > { %v3681_v2 = vsel %vm3617_vm3, %v3261_v39, %v3649_v29  ;;  %9613 = vmatmul.msk.f32.vlgmr.msrb.gmra.mxu3 %vm3703_vm14, %v3680_v1 }
 0x81d   : > { %9614 = vmatmul.msk.f32.vlgmr.msrb.gmra.mxu2 %vm3703_vm14, %v3681_v2  ;;  %4202 = vmatpush.msrb.mxu3 %v13032_v52 }
 0x81e   : > { %4225 = vmatpush.msrb.mxu2 %v13032_v52 }
 0x81f   : > { %4203 = vmatpush.msrb.mxu3 %v13046_v15 }
 0x820   : > { %4226 = vmatpush.msrb.mxu2 %v13046_v15 }
 0x821   : > { %4204 = vmatpush.msrb.mxu3 %v13055_v38 }
 0x822   : > { %4227 = vmatpush.msrb.mxu2 %v13055_v38 }
 0x823   : > { %4205 = vmatpush.msrb.mxu3 %v13064_v50 }
 0x824   : > { %4228 = vmatpush.msrb.mxu2 %v13064_v50 }
 0x827   : > { %v3360_v41 = vpop.f32.mrf.mxu0  ;;  %v3380_v5 = vpop.f32.mrf.mxu1 }
 0x828   : > { %v3361_v37 = vadd.f32 %v3360_v41, %v12408_v16  ;;  %v3381_v58 = vadd.f32 %v3380_v5, %v12408_v16  ;;  %v3320_v3 = vpop.f32.mrf.mxu3 }
 0x829   : > { %v3321_v57 = vadd.f32 %v3320_v3, %v12408_v16  ;;  %v3340_v45 = vpop.f32.mrf.mxu2 }
 0x82a   : > { %vm3622_vm8 = vcmp.ge.f32.partialorder %v3361_v37, 0.0  ;;  %v3654_v22 = vmul.f32 0.1, %v3361_v37  ;;  %vm3623_vm4 = vcmp.ge.f32.partialorder %v3381_v58, 0.0  ;;  %v3655_v24 = vmul.f32 0.1, %v3381_v58 }
 0x82b   : > { %vm3620_vm5 = vcmp.ge.f32.partialorder %v3321_v57, 0.0  ;;  %v3652_v17 = vmul.f32 0.1, %v3321_v57  ;;  %v3341_v42 = vadd.f32 %v3340_v45, %v12408_v16 }
 0x82c   : > { %v3686_v32 = vsel %vm3622_vm8, %v3361_v37, %v3654_v22  ;;  %v3687_v59 = vsel %vm3623_vm4, %v3381_v58, %v3655_v24 }
 0x82d   : > { %v3684_v46 = vsel %vm3620_vm5, %v3321_v57, %v3652_v17  ;;  %vm3621_vm6 = vcmp.ge.f32.partialorder %v3341_v42, 0.0  ;;  %v3653_v60 = vmul.f32 0.1, %v3341_v42  ;;  %9619 = vmatmul.msk.f32.vlgmr.msrb.gmra.mxu0 %vm3703_vm14, %v3686_v32  ;;  %9620 = vmatmul.msk.f32.vlgmr.msra.gmra.mxu1 %vm3703_vm14, %v3687_v59 }
 0x82e   : > { %9617 = vmatmul.msk.f32.vlgmr.msra.gmra.mxu3 %vm3703_vm14, %v3684_v46  ;;  %4340 = vmatpush.msrb.mxu0 %v13032_v52 }
 0x82f   : > { %v3685_v6 = vsel %vm3621_vm6, %v3341_v42, %v3653_v60  ;;  %4363 = vmatpush.msra.mxu1 %v13032_v52  ;;  %4294 = vmatpush.msra.mxu3 %v13032_v52 }
 0x830   : > { %9618 = vmatmul.msk.f32.vlgmr.msra.gmra.mxu2 %vm3703_vm14, %v3685_v6  ;;  %4341 = vmatpush.msrb.mxu0 %v13046_v15 }
 0x831   : > { %4317 = vmatpush.msra.mxu2 %v13032_v52  ;;  %4364 = vmatpush.msra.mxu1 %v13046_v15 }
 0x832   : > { %4295 = vmatpush.msra.mxu3 %v13046_v15  ;;  %4342 = vmatpush.msrb.mxu0 %v13055_v38 }
 0x833   : > { %4318 = vmatpush.msra.mxu2 %v13046_v15  ;;  %4365 = vmatpush.msra.mxu1 %v13055_v38 }
 0x834   : > { %4296 = vmatpush.msra.mxu3 %v13055_v38  ;;  %4343 = vmatpush.msrb.mxu0 %v13064_v50 }
 0x835   : > { %4319 = vmatpush.msra.mxu2 %v13055_v38  ;;  %4366 = vmatpush.msra.mxu1 %v13064_v50 }
 0x836   : > { %4297 = vmatpush.msra.mxu3 %v13064_v50 }
 0x837   : > { %4320 = vmatpush.msra.mxu2 %v13064_v50 }
 0x83b   : > { %v3440_v7 = vpop.f32.mrf.mxu0  ;;  %v3460_v40 = vpop.f32.mrf.mxu1 }
 0x83c   : > { %v3441_v19 = vadd.f32 %v3440_v7, %v12408_v16  ;;  %v3461_v27 = vadd.f32 %v3460_v40, %v12408_v16  ;;  %v3400_v23 = vpop.f32.mrf.mxu3  ;;  %v3420_v34 = vpop.f32.mrf.mxu2 }
 0x83d   : > { %v3401_v35 = vadd.f32 %v3400_v23, %v12408_v16  ;;  %v3421_v20 = vadd.f32 %v3420_v34, %v12408_v16 }
 0x83e   : > { %vm3626_vm7 = vcmp.ge.f32.partialorder %v3441_v19, 0.0  ;;  %v3658_v30 = vmul.f32 0.1, %v3441_v19  ;;  %vm3627_vm9 = vcmp.ge.f32.partialorder %v3461_v27, 0.0  ;;  %v3659_v36 = vmul.f32 0.1, %v3461_v27 }
 0x83f   : > { %vm3624_vm10 = vcmp.ge.f32.partialorder %v3401_v35, 0.0  ;;  %v3656_v11 = vmul.f32 0.1, %v3401_v35  ;;  %vm3625_vm12 = vcmp.ge.f32.partialorder %v3421_v20, 0.0  ;;  %v3657_v49 = vmul.f32 0.1, %v3421_v20 }
 0x840   : > { %v3690_v33 = vsel %vm3626_vm7, %v3441_v19, %v3658_v30  ;;  %v3691_v51 = vsel %vm3627_vm9, %v3461_v27, %v3659_v36 }
 0x841   : > { %v3688_v26 = vsel %vm3624_vm10, %v3401_v35, %v3656_v11  ;;  %v3689_v56 = vsel %vm3625_vm12, %v3421_v20, %v3657_v49  ;;  %9623 = vmatmul.msk.f32.vlgmr.msra.gmra.mxu0 %vm3703_vm14, %v3690_v33  ;;  %9624 = vmatmul.msk.f32.vlgmr.msrb.gmra.mxu1 %vm3703_vm14, %v3691_v51 }
 0x842   : > { %9621 = vmatmul.msk.f32.vlgmr.msrb.gmra.mxu3 %vm3703_vm14, %v3688_v26  ;;  %9622 = vmatmul.msk.f32.vlgmr.msrb.gmra.mxu2 %vm3703_vm14, %v3689_v56 }
 0x843   : > { %4432 = vmatpush.msra.mxu0 %v13032_v52  ;;  %4386 = vmatpush.msrb.mxu3 %v13032_v52 }
 0x844   : > { %4409 = vmatpush.msrb.mxu2 %v13032_v52 }
 0x845   : > { %4433 = vmatpush.msra.mxu0 %v13046_v15  ;;  %4387 = vmatpush.msrb.mxu3 %v13046_v15 }
 0x846   : > { %4410 = vmatpush.msrb.mxu2 %v13046_v15 }
 0x847   : > { %4434 = vmatpush.msra.mxu0 %v13055_v38  ;;  %4388 = vmatpush.msrb.mxu3 %v13055_v38 }
 0x848   : > { %4411 = vmatpush.msrb.mxu2 %v13055_v38 }
 0x849   : > { %4435 = vmatpush.msra.mxu0 %v13064_v50  ;;  %4389 = vmatpush.msrb.mxu3 %v13064_v50 }
 0x84a   : > { %4412 = vmatpush.msrb.mxu2 %v13064_v50 }
 0x84f   : > { %v3520_v63 = vpop.f32.mrf.mxu0  ;;  %v3540_v52 = vpop.f32.mrf.mxu1 }
 0x850   : > { %v3521_v48 = vadd.f32 %v3520_v63, %v12408_v16  ;;  %v3541_v55 = vadd.f32 %v3540_v52, %v12408_v16  ;;  %v3480_v9 = vpop.f32.mrf.mxu3  ;;  %v3500_v15 = vpop.f32.mrf.mxu2 }
 0x851   : > { %v3481_v10 = vadd.f32 %v3480_v9, %v12408_v16  ;;  %v3501_v47 = vadd.f32 %v3500_v15, %v12408_v16 }
 0x852   : > { %vm3630_vm13 = vcmp.ge.f32.partialorder %v3521_v48, 0.0  ;;  %v3662_v38 = vmul.f32 0.1, %v3521_v48  ;;  %vm3631_vm2 = vcmp.ge.f32.partialorder %v3541_v55, 0.0  ;;  %v3663_v0 = vmul.f32 0.1, %v3541_v55 }
 0x853   : > { %vm3628_vm15 = vcmp.ge.f32.partialorder %v3481_v10, 0.0  ;;  %v3660_v44 = vmul.f32 0.1, %v3481_v10  ;;  %vm3629_vm1 = vcmp.ge.f32.partialorder %v3501_v47, 0.0  ;;  %v3661_v50 = vmul.f32 0.1, %v3501_v47 }
 0x854   : > { %v3694_v12 = vsel %vm3630_vm13, %v3521_v48, %v3662_v38  ;;  %v3695_v18 = vsel %vm3631_vm2, %v3541_v55, %v3663_v0 }
 0x855   : > { %v3692_v13 = vsel %vm3628_vm15, %v3481_v10, %v3660_v44  ;;  %v3693_v14 = vsel %vm3629_vm1, %v3501_v47, %v3661_v50  ;;  %9627 = vmatmul.msk.f32.vlgmr.msrb.gmra.mxu0 %vm3703_vm14, %v3694_v12  ;;  %9628 = vmatmul.msk.f32.vlgmr.msra.gmra.mxu1 %vm3703_vm14, %v3695_v18 }
 0x856   : > { %9625 = vmatmul.msk.f32.vlgmr.msra.gmra.mxu3 %vm3703_vm14, %v3692_v13  ;;  %9626 = vmatmul.msk.f32.vlgmr.msra.gmra.mxu2 %vm3703_vm14, %v3693_v14 }
 0x859   : > { %v3724_v28 = vpop.f32.mrf.mxu1 }
 0x85a   : > { %v4440_v61 = vmul.f32 0.75, %v3724_v28  ;;  %v4472_v8 = vmul.f32 0.25, %v3724_v28 }
 0x85c   : > { %v4503_v62 = vadd.f32 %v4472_v8, %v4440_v61 }
 0x85e   : > { %4633 = vrot.lane.b32.xlu1 %v4503_v62, %s11267_s15 }
 0x863   : > { %v3600_v25 = vpop.f32.mrf.mxu0  ;;  %v3816_v5 = vpop.f32.mrf.mxu1 }
 0x864   : > { %v3601_v54 = vadd.f32 %v3600_v25, %v12408_v16  ;;  %v3560_v4 = vpop.f32.mrf.mxu3  ;;  %v3580_v21 = vpop.f32.mrf.mxu2  ;;  %v4444_v57 = vmul.f32 0.75, %v3816_v5  ;;  %v4476_v45 = vmul.f32 0.25, %v3816_v5 }
 0x865   : > { %v3561_v39 = vadd.f32 %v3560_v4, %v12408_v16  ;;  %v3581_v43 = vadd.f32 %v3580_v21, %v12408_v16 }
 0x866   : > { %vm3634_vm3 = vcmp.ge.f32.partialorder %v3601_v54, 0.0  ;;  %v3666_v29 = vmul.f32 0.1, %v3601_v54 }
 0x867   : > { %vm3632_vm8 = vcmp.ge.f32.partialorder %v3561_v39, 0.0  ;;  %v3664_v1 = vmul.f32 0.1, %v3561_v39  ;;  %vm3633_vm4 = vcmp.ge.f32.partialorder %v3581_v43, 0.0  ;;  %v3665_v2 = vmul.f32 0.1, %v3581_v43 }
 0x868   : > { %v3698_v41 = vsel %vm3634_vm3, %v3601_v54, %v3666_v29 }
 0x869   : > { %v3696_v37 = vsel %vm3632_vm8, %v3561_v39, %v3664_v1  ;;  %v3697_v58 = vsel %vm3633_vm4, %v3581_v43, %v3665_v2  ;;  %9631 = vmatmul.msk.f32.vlgmr.msra.gmra.mxu0 %vm3703_vm14, %v3698_v41 }
 0x86a   : > { %9629 = vmatmul.msk.f32.vlgmr.msrb.gmra.mxu3 %vm3703_vm14, %v3696_v37  ;;  %9630 = vmatmul.msk.f32.vlgmr.msrb.gmra.mxu2 %vm3703_vm14, %v3697_v58  ;;  %vm4889_vm14 = vcmask 531456  }
 0x86c   : > { %v3793_v3 = vpop.f32.mrf.mxu0  ;;  %v3908_v32 = vpop.f32.mrf.mxu1 }
 0x86d   : > { %v4443_v16 = vmul.f32 0.75, %v3793_v3  ;;  %v4475_v22 = vmul.f32 0.25, %v3793_v3  ;;  %v13282_v6 = vmul.f32 0.25, %v3908_v32  ;;  %v4448_v30 = vmul.f32 0.75, %v3908_v32 }
 0x86e   : > { %v3747_v42 = vpop.f32.mrf.mxu3  ;;  %v3770_v27 = vpop.f32.mrf.mxu2 }
 0x86f   : > { %v4507_v24 = vadd.f32 %v4475_v22, %v4444_v57  ;;  %v4539_v17 = vadd.f32 %v4476_v45, %v4443_v16  ;;  %v4441_v59 = vmul.f32 0.75, %v3747_v42  ;;  %v4473_v46 = vmul.f32 0.25, %v3747_v42 }
 0x870   : > { %v4442_v34 = vmul.f32 0.75, %v3770_v27  ;;  %v4474_v20 = vmul.f32 0.25, %v3770_v27 }
 0x871   : > { %4647 = vrot.lane.b32.xlu2 %v4539_v17, %s11267_s15  ;;  %4649 = vrot.lane.b32.xlu0 %v4507_v24, %s11267_s15  ;;  %v4504_v40 = vadd.f32 %v4472_v8, %v4441_v59  ;;  %v4536_v19 = vadd.f32 %v4473_v46, %v4440_v61 }
 0x872   : > { %v4538_v11 = vadd.f32 %v4475_v22, %v4442_v34  ;;  %v4537_v33 = vadd.f32 %v4474_v20, %v4441_v59  ;;  %v4505_v52 = vadd.f32 %v4473_v46, %v4442_v34  ;;  %v4506_v48 = vadd.f32 %v4474_v20, %v4443_v16 }
 0x875   : > { %v3885_v60 = vpop.f32.mrf.mxu0 }
 0x876   : > { %v4447_v7 = vmul.f32 0.75, %v3885_v60  ;;  %v4479_v35 = vmul.f32 0.25, %v3885_v60  ;;  %v4000_v51 = vpop.f32.mrf.mxu1 }
 0x877   : > { %v13291_v56 = vmul.f32 0.25, %v4000_v51  ;;  %v4452_v18 = vmul.f32 0.75, %v4000_v51 }
 0x878   : > { %v4543_v23 = vadd.f32 %v13282_v6, %v4447_v7  ;;  %v4511_v49 = vadd.f32 %v4479_v35, %v4448_v30  ;;  %v3839_v55 = vpop.f32.mrf.mxu3 }
 0x879   : > { %4635 = vrot.lane.b32.xlu2 %v4536_v19, %s11267_s15  ;;  %4637 = vrot.lane.b32.xlu0 %v4504_v40, %s11267_s15  ;;  %v3862_v9 = vpop.f32.mrf.mxu2  ;;  %v4445_v15 = vmul.f32 0.75, %v3839_v55  ;;  %v4477_v47 = vmul.f32 0.25, %v3839_v55 }
 0x87a   : > { %4663 = vrot.lane.b32.xlu1 %v4543_v23, %s11267_s15  ;;  %v4478_v10 = vmul.f32 0.25, %v3862_v9  ;;  %v4446_v50 = vmul.f32 0.75, %v3862_v9 }
 0x87b   : > { %v4508_v38 = vadd.f32 %v4476_v45, %v4445_v15  ;;  %v4540_v44 = vadd.f32 %v4477_v47, %v4444_v57 }
 0x87c   : > { %v4541_v0 = vadd.f32 %v4478_v10, %v4445_v15  ;;  %v4510_v13 = vadd.f32 %v4478_v10, %v4447_v7  ;;  %v4542_v14 = vadd.f32 %v4479_v35, %v4446_v50  ;;  %v4509_v43 = vadd.f32 %v4477_v47, %v4446_v50 }
 0x87d   : > { %v3977_v36 = vpop.f32.mrf.mxu0 }
 0x87e   : > { %v4451_v26 = vmul.f32 0.75, %v3977_v36  ;;  %v4483_v12 = vmul.f32 0.25, %v3977_v36 }
 0x880   : > { %v4547_v63 = vadd.f32 %v13291_v56, %v4451_v26  ;;  %v4515_v28 = vadd.f32 %v4483_v12, %v4452_v18 }
 0x881   : > { %4643 = vrot.lane.b32.xlu0 %v4538_v11, %s11267_s15  ;;  %4665 = vrot.lane.b32.xlu2 %v4511_v49, %s11267_s15 }
 0x882   : > { %4639 = vrot.lane.b32.xlu1 %v4537_v33, %s11267_s15 }
 0x889   : > { %4641 = vrot.lane.b32.xlu2 %v4505_v52, %s11267_s15  ;;  %4679 = vrot.lane.b32.xlu0 %v4547_v63, %s11267_s15 }
 0x88a   : > { %4645 = vrot.lane.b32.xlu1 %v4506_v48, %s11267_s15 }
 0x88b   : > { %v4092_v62 = vpop.f32.mrf.mxu1 }
 0x88c   : > { %v13303_v4 = vmul.f32 0.25, %v4092_v62  ;;  %v4456_v5 = vmul.f32 0.75, %v4092_v62 }
 0x88d   : > { %v3931_v8 = vpop.f32.mrf.mxu3  ;;  %v3954_v29 = vpop.f32.mrf.mxu2 }
 0x88e   : > { %v4069_v61 = vpop.f32.mrf.mxu0  ;;  %v4481_v54 = vmul.f32 0.25, %v3931_v8  ;;  %v4449_v2 = vmul.f32 0.75, %v3931_v8  ;;  %v4482_v41 = vmul.f32 0.25, %v3954_v29  ;;  %v4450_v57 = vmul.f32 0.75, %v3954_v29 }
 0x88f   : > { %v4455_v25 = vmul.f32 0.75, %v4069_v61  ;;  %v4487_v1 = vmul.f32 0.25, %v4069_v61 }
 0x890   : > { %v4544_v39 = vadd.f32 %v4481_v54, %v4448_v30  ;;  %v4545_v58 = vadd.f32 %v4482_v41, %v4449_v2  ;;  %v4512_v3 = vadd.f32 %v13282_v6, %v4449_v2  ;;  %v4513_v45 = vadd.f32 %v4481_v54, %v4450_v57 }
 0x891   : > { %4653 = vrot.lane.b32.xlu2 %v4508_v38, %s11267_s15  ;;  %4655 = vrot.lane.b32.xlu0 %v4541_v0, %s11267_s15  ;;  %v4551_v21 = vadd.f32 %v13303_v4, %v4455_v25  ;;  %v4519_v37 = vadd.f32 %v4487_v1, %v4456_v5  ;;  %v4514_v16 = vadd.f32 %v4482_v41, %v4451_v26 }
 0x892   : > { %4651 = vrot.lane.b32.xlu1 %v4540_v44, %s11267_s15  ;;  %v4546_v17 = vadd.f32 %v4483_v12, %v4450_v57 }
 0x899   : > { %4659 = vrot.lane.b32.xlu2 %v4542_v14, %s11267_s15  ;;  %4661 = vrot.lane.b32.xlu0 %v4510_v13, %s11267_s15 }
 0x89a   : > { %4681 = vrot.lane.b32.xlu1 %v4515_v28, %s11267_s15 }
 0x89f   : > { %v4023_v42 = vpop.f32.mrf.mxu3 }
 0x8a0   : > { %v4453_v46 = vmul.f32 0.75, %v4023_v42  ;;  %v4485_v60 = vmul.f32 0.25, %v4023_v42  ;;  %v4046_v19 = vpop.f32.mrf.mxu2 }
 0x8a1   : > { %4695 = vrot.lane.b32.xlu2 %v4551_v21, %s11267_s15  ;;  %4667 = vrot.lane.b32.xlu0 %v4544_v39, %s11267_s15  ;;  %v4454_v27 = vmul.f32 0.75, %v4046_v19  ;;  %v4486_v35 = vmul.f32 0.25, %v4046_v19 }
 0x8a2   : > { %4657 = vrot.lane.b32.xlu1 %v4509_v43, %s11267_s15  ;;  %v4516_v7 = vadd.f32 %v13291_v56, %v4453_v46  ;;  %v4548_v40 = vadd.f32 %v4485_v60, %v4452_v18 }
 0x8a3   : > { %v4550_v20 = vadd.f32 %v4487_v1, %v4454_v27  ;;  %v4549_v36 = vadd.f32 %v4486_v35, %v4453_v46  ;;  %v4517_v26 = vadd.f32 %v4485_v60, %v4454_v27  ;;  %v4518_v63 = vadd.f32 %v4486_v35, %v4455_v25 }
 0x8a9   : > { %4671 = vrot.lane.b32.xlu2 %v4545_v58, %s11267_s15  ;;  %4697 = vrot.lane.b32.xlu0 %v4519_v37, %s11267_s15 }
 0x8aa   : > { %4669 = vrot.lane.b32.xlu1 %v4512_v3, %s11267_s15  ;;  %v4161_v22 = vpop.f32.mrf.mxu0  ;;  %v4184_v24 = vpop.f32.mrf.mxu1 }
 0x8ab   : > { %v4459_v32 = vmul.f32 0.75, %v4161_v22  ;;  %v13316_v59 = vmul.f32 0.25, %v4184_v24  ;;  %v4491_v23 = vmul.f32 0.25, %v4161_v22  ;;  %v4460_v34 = vmul.f32 0.75, %v4184_v24 }
 0x8ad   : > { %v4555_v6 = vadd.f32 %v13316_v59, %v4459_v32  ;;  %v4523_v30 = vadd.f32 %v4491_v23, %v4460_v34 }
 0x8b1   : > { %4677 = vrot.lane.b32.xlu2 %v4514_v16, %s11267_s15  ;;  %4673 = vrot.lane.b32.xlu0 %v4513_v45, %s11267_s15  ;;  %v4115_v52 = vpop.f32.mrf.mxu3 }
 0x8b2   : > { %4675 = vrot.lane.b32.xlu1 %v4546_v17, %s11267_s15  ;;  %v4457_v55 = vmul.f32 0.75, %v4115_v52  ;;  %v4489_v10 = vmul.f32 0.25, %v4115_v52 }
 0x8b3   : > { %v4138_v48 = vpop.f32.mrf.mxu2 }
 0x8b4   : > { %v4490_v9 = vmul.f32 0.25, %v4138_v48  ;;  %v4520_v47 = vadd.f32 %v13303_v4, %v4457_v55  ;;  %v4552_v0 = vadd.f32 %v4489_v10, %v4456_v5  ;;  %v4458_v44 = vmul.f32 0.75, %v4138_v48 }
 0x8b6   : > { %v4553_v38 = vadd.f32 %v4490_v9, %v4457_v55  ;;  %v4522_v13 = vadd.f32 %v4490_v9, %v4459_v32  ;;  %v4554_v14 = vadd.f32 %v4491_v23, %v4458_v44  ;;  %v4521_v29 = vadd.f32 %v4489_v10, %v4458_v44 }
 0x8b9   : > { %4683 = vrot.lane.b32.xlu2 %v4548_v40, %s11267_s15  ;;  %4685 = vrot.lane.b32.xlu0 %v4516_v7, %s11267_s15 }
 0x8ba   : > { %4711 = vrot.lane.b32.xlu1 %v4555_v6, %s11267_s15 }
 0x8be   : > { %v4253_v11 = vpop.f32.mrf.mxu0  ;;  %v4276_v49 = vpop.f32.mrf.mxu1 }
 0x8bf   : > { %v4463_v33 = vmul.f32 0.75, %v4253_v11  ;;  %v13326_v51 = vmul.f32 0.25, %v4276_v49  ;;  %v4495_v12 = vmul.f32 0.25, %v4253_v11  ;;  %v4464_v18 = vmul.f32 0.75, %v4276_v49 }
 0x8c1   : > { %4713 = vrot.lane.b32.xlu2 %v4523_v30, %s11267_s15  ;;  %4691 = vrot.lane.b32.xlu0 %v4550_v20, %s11267_s15  ;;  %v4559_v56 = vadd.f32 %v13326_v51, %v4463_v33  ;;  %v4527_v61 = vadd.f32 %v4495_v12, %v4464_v18 }
 0x8c2   : > { %4687 = vrot.lane.b32.xlu1 %v4549_v36, %s11267_s15 }
 0x8c5   : > { %v4207_v28 = vpop.f32.mrf.mxu3  ;;  %v4230_v1 = vpop.f32.mrf.mxu2 }
 0x8c6   : > { %v4493_v25 = vmul.f32 0.25, %v4207_v28  ;;  %v4461_v2 = vmul.f32 0.75, %v4207_v28  ;;  %v4494_v41 = vmul.f32 0.25, %v4230_v1  ;;  %v4462_v24 = vmul.f32 0.75, %v4230_v1 }
 0x8c8   : > { %v4556_v39 = vadd.f32 %v4493_v25, %v4460_v34  ;;  %v4557_v45 = vadd.f32 %v4494_v41, %v4461_v2  ;;  %v4524_v22 = vadd.f32 %v13316_v59, %v4461_v2  ;;  %v4525_v46 = vadd.f32 %v4493_v25, %v4462_v24 }
 0x8c9   : > { %4689 = vrot.lane.b32.xlu2 %v4517_v26, %s11267_s15  ;;  %4727 = vrot.lane.b32.xlu0 %v4559_v56, %s11267_s15  ;;  %v4526_v60 = vadd.f32 %v4494_v41, %v4463_v33  ;;  %v4558_v6 = vadd.f32 %v4495_v12, %v4462_v24 }
 0x8ca   : > { %4693 = vrot.lane.b32.xlu1 %v4518_v63, %s11267_s15 }
 0x8cb   : > { %v13332_v15 = vpop.permute.xlu2 %4647 }
 0x8cc   : > { %v13424_v1 = vsel %vm477_vm0, 0.0, %v13332_v15 }
 0x8d0   : > { %v13360_v57 = vpop.permute.xlu1 %4633 }
 0x8d1   : > { %4701 = vrot.lane.b32.xlu2 %v4520_v47, %s11267_s15  ;;  %4703 = vrot.lane.b32.xlu0 %v4553_v38, %s11267_s15 }
 0x8d2   : > { %4699 = vrot.lane.b32.xlu1 %v4552_v0, %s11267_s15  ;;  %v4345_v8 = vpop.f32.mrf.mxu0  ;;  %v4368_v62 = vpop.f32.mrf.mxu1 }
 0x8d3   : > { %v13338_v50 = vpop.permute.xlu2 %4635  ;;  %v13343_v54 = vmul.f32 0.75, %v4345_v8  ;;  %v13345_v4 = vmul.f32 0.25, %v4368_v62  ;;  %v4499_v5 = vmul.f32 0.25, %v4345_v8  ;;  %v13354_v37 = vmul.f32 0.75, %v4368_v62 }
 0x8d5   : > { %v4563_v43 = vadd.f32 %v13345_v4, %v13343_v54  ;;  %v4531_v16 = vadd.f32 %v4499_v5, %v13354_v37 }
 0x8d9   : > { %4707 = vrot.lane.b32.xlu2 %v4554_v14, %s11267_s15  ;;  %4709 = vrot.lane.b32.xlu0 %v4522_v13, %s11267_s15  ;;  %v4299_v7 = vpop.f32.mrf.mxu3  ;;  %v4322_v11 = vpop.f32.mrf.mxu2 }
 0x8da   : > { %4729 = vrot.lane.b32.xlu1 %v4527_v61, %s11267_s15  ;;  %v4465_v59 = vmul.f32 0.75, %v4299_v7  ;;  %v4497_v19 = vmul.f32 0.25, %v4299_v7  ;;  %v4466_v33 = vmul.f32 0.75, %v4322_v11  ;;  %v4498_v63 = vmul.f32 0.25, %v4322_v11 }
 0x8db   : > { %v13347_v21 = vpop.permute.xlu2 %4665 }
 0x8dc   : > { %v4528_v30 = vadd.f32 %v13326_v51, %v4465_v59  ;;  %v4560_v36 = vadd.f32 %v4497_v19, %v4464_v18  ;;  %v4529_v48 = vadd.f32 %v4497_v19, %v4466_v33  ;;  %v4562_v55 = vadd.f32 %v4499_v5, %v4466_v33 }
 0x8dd   : > { %v4561_v51 = vadd.f32 %v4498_v63, %v4465_v59  ;;  %v4530_v14 = vadd.f32 %v4498_v63, %v13343_v54  ;;  %v13413_v54 = vsel %vm477_vm0, 0.0, %v13360_v57  ;;  %v4898_v57 = vsel %vm4889_vm14, %v13424_v1, 0.0 }
 0x8de   : > { %v4891_v5 = vsel %vm4889_vm14, %v13413_v54, 0.0 }
 0x8e1   : > { %4743 = vrot.lane.b32.xlu2 %v4563_v43, %s11267_s15  ;;  %4715 = vrot.lane.b32.xlu0 %v4556_v39, %s11267_s15 }
 0x8e2   : > { %4705 = vrot.lane.b32.xlu1 %v4521_v29, %s11267_s15 }
 0x8e3   : > { %v13356_v58 = vpop.permute.xlu0 %4649  ;;  %v13358_v3 = vpop.permute.xlu2 %4641 }
 0x8e4   : > { %v13417_v29 = vsel %vm477_vm0, 0.0, %v13356_v58  ;;  %v13491_v33 = vsel %vm477_vm0, 0.0, %v13358_v3 }
 0x8e5   : > { %v4895_v3 = vsel %vm4889_vm14, %v13491_v33, 0.0 }
 0x8e6   : > { %v4437_v40 = vpop.f32.mrf.mxu0 }
 0x8e7   : > { %v4471_v34 = vmul.f32 0.75, %v4437_v40  ;;  %v4535_v35 = vmul.f32 0.25, %v4437_v40 }
 0x8e9   : > { %4719 = vrot.lane.b32.xlu2 %v4557_v45, %s11267_s15  ;;  %4745 = vrot.lane.b32.xlu0 %v4531_v16, %s11267_s15  ;;  %v4567_v49 = vadd.f32 %v4535_v35, %v4471_v34  ;;  %v4890_v45 = vsel %vm4889_vm14, %v11478_v53, 0.0 }
 0x8ea   : > { %4717 = vrot.lane.b32.xlu1 %v4524_v22, %s11267_s15  ;;  %v10570_v16 = vpack.i.bf16 %v4891_v5, %v4890_v45 }
 0x8eb   : > { %v13367_v17 = vpop.permute.xlu0 %4637  ;;  %v13369_v42 = vpop.permute.xlu2 %4653 }
 0x8ec   : > { %v13371_v32 = vpop.permute.xlu1 %4663  ;;  %v13440_v24 = vsel %vm477_vm0, 0.0, %v13367_v17 }
 0x8ed   : > { %v4391_v9 = vpop.f32.mrf.mxu3  ;;  %v4414_v10 = vpop.f32.mrf.mxu2  ;;  %v4893_v7 = vsel %vm4889_vm14, %v13440_v24, 0.0  ;;  %v13459_v19 = vsel %vm477_vm0, 0.0, %v13371_v32 }
 0x8ee   : > { %v4469_v47 = vmul.f32 0.75, %v4391_v9  ;;  %v4502_v38 = vmul.f32 0.25, %v4414_v10  ;;  %v4470_v28 = vmul.f32 0.75, %v4414_v10  ;;  %v4501_v62 = vmul.f32 0.25, %v4391_v9 }
 0x8f0   : > { %v4532_v18 = vadd.f32 %v13345_v4, %v4469_v47  ;;  %v4565_v13 = vadd.f32 %v4502_v38, %v4469_v47  ;;  %v4534_v39 = vadd.f32 %v4502_v38, %v4471_v34  ;;  %v4566_v43 = vadd.f32 %v4535_v35, %v4470_v28 }
 0x8f1   : > { %4725 = vrot.lane.b32.xlu2 %v4526_v60, %s11267_s15  ;;  %4721 = vrot.lane.b32.xlu0 %v4525_v46, %s11267_s15  ;;  %v4564_v4 = vadd.f32 %v4501_v62, %v13354_v37  ;;  %v4899_v37 = vsel %vm4889_vm14, %v13417_v29, 0.0  ;;  %v4533_v22 = vadd.f32 %v4501_v62, %v4470_v28  ;;  %v13447_v46 = vsel %vm477_vm0, 0.0, %v13338_v50 }
 0x8f2   : > { %4723 = vrot.lane.b32.xlu1 %v4558_v6, %s11267_s15  ;;  %v10580_v15 = vpack.i.bf16 %v4899_v37, %v4898_v57  ;;  %v4892_v17 = vsel %vm4889_vm14, %v13447_v46, 0.0  ;;  %v13466_v50 = vsel %vm477_vm0, 0.0, %v13347_v21 }
 0x8f3   : > { %v13376_v27 = vpop.permute.xlu0 %4643  ;;  %v13378_v23 = vpop.permute.xlu2 %4659  ;;  %v10590_v59 = vpack.i.bf16 %v4893_v7, %v4892_v17  ;;  %v4907_v32 = vsel %vm4889_vm14, %v13466_v50, 0.0 }
 0x8f4   : > { %v13380_v20 = vpop.permute.xlu1 %4639  ;;  %v13495_v63 = vsel %vm477_vm0, 0.0, %v13376_v27  ;;  %v13555_v37 = vsel %vm477_vm0, 0.0, %v13378_v23 }
 0x8f5   : > { %v4896_v9 = vsel %vm4889_vm14, %v13495_v63, 0.0  ;;  %v4904_v23 = vsel %vm4889_vm14, %v13555_v37, 0.0 }
 0x8f9   : > { %4731 = vrot.lane.b32.xlu2 %v4560_v36, %s11267_s15  ;;  %4733 = vrot.lane.b32.xlu0 %v4528_v30, %s11267_s15  ;;  %v4906_v30 = vsel %vm4889_vm14, %v13459_v19, 0.0 }
 0x8fa   : > { %4759 = vrot.lane.b32.xlu1 %v4567_v49, %s11267_s15  ;;  %v10605_v11 = vpack.i.bf16 %v4907_v32, %v4906_v30  ;;  %v13480_v49 = vsel %vm477_vm0, 0.0, %v13380_v20 }
 0x8fb   : > { %v13386_v26 = vpop.permute.xlu2 %4695  ;;  %v13388_v56 = vpop.permute.xlu0 %4679 }
 0x8fc   : > { %v13390_v52 = vpop.permute.xlu1 %4645  ;;  %v13587_v30 = vsel %vm477_vm0, 0.0, %v13386_v26 }
 0x8fd   : > { %v13484_v21 = vsel %vm477_vm0, 0.0, %v13390_v52  ;;  %v4894_v52 = vsel %vm4889_vm14, %v13480_v49, 0.0  ;;  %17054 = vst [vmem:[#allocation8_spill] sm:$0xff] %v13587_v30  ;;  %v4922_v26 = vsel %vm4889_vm14, %v13587_v30, 0.0 }
 0x8fe   : > { %v10625_v27 = vpack.i.bf16 %v4895_v3, %v4894_v52 }
 0x901   : > { %4737 = vrot.lane.b32.xlu2 %v4529_v48, %s11267_s15  ;;  %4739 = vrot.lane.b32.xlu0 %v4562_v55, %s11267_s15  ;;  %v4897_v55 = vsel %vm4889_vm14, %v13484_v21, 0.0 }
 0x902   : > { %4735 = vrot.lane.b32.xlu1 %v4561_v51, %s11267_s15  ;;  %v10615_v10 = vpack.i.bf16 %v4897_v55, %v4896_v9 }
 0x903   : > { %v13395_v0 = vpop.permute.xlu2 %4671  ;;  %v13397_v44 = vpop.permute.xlu0 %4655 }
 0x904   : > { %v13399_v12 = vpop.permute.xlu1 %4651  ;;  %v13559_v57 = vsel %vm477_vm0, 0.0, %v13397_v44 }
 0x905   : > { %v13513_v47 = vsel %vm477_vm0, 0.0, %v13399_v12 }
 0x906   : > { %v4900_v28 = vsel %vm4889_vm14, %v13513_v47, 0.0 }
 0x909   : > { %4749 = vrot.lane.b32.xlu2 %v4532_v18, %s11267_s15  ;;  %4751 = vrot.lane.b32.xlu0 %v4565_v13, %s11267_s15  ;;  %v13523_v18 = vsel %vm477_vm0, 0.0, %v13369_v42  ;;  %v13527_v13 = vsel %vm477_vm0, 0.0, %v13388_v56 }
 0x90a   : > { %4741 = vrot.lane.b32.xlu1 %v4530_v14, %s11267_s15  ;;  %v4901_v42 = vsel %vm4889_vm14, %v13523_v18, 0.0 }
 0x90b   : > { %v13406_v61 = vpop.permute.xlu2 %4677  ;;  %v13408_v8 = vpop.permute.xlu0 %4661  ;;  %v10635_v56 = vpack.i.bf16 %v4901_v42, %v4900_v28 }
 0x90c   : > { %v4682_v25 = vpop.permute.xlu1 %4681 }
 0x90d   : > { %v13516_v38 = vsel %vm477_vm0, 0.0, %v4682_v25 }
 0x90e   : > { %v4915_v62 = vsel %vm4889_vm14, %v13516_v38, 0.0 }
 0x911   : > { %4755 = vrot.lane.b32.xlu2 %v4566_v43, %s11267_s15  ;;  %4757 = vrot.lane.b32.xlu0 %v4534_v39, %s11267_s15  ;;  %v4914_v39 = vsel %vm4889_vm14, %v13527_v13, 0.0 }
 0x912   : > { %4747 = vrot.lane.b32.xlu1 %v4564_v4, %s11267_s15  ;;  %v10640_v43 = vpack.i.bf16 %v4915_v62, %v4914_v39  ;;  %v13545_v4 = vsel %vm477_vm0, 0.0, %v13408_v8 }
 0x913   : > { %v13426_v2 = vpop.permute.xlu2 %4683  ;;  %v13428_v41 = vpop.permute.xlu0 %4667 }
 0x914   : > { %v4658_v58 = vpop.permute.xlu1 %4657  ;;  %v13591_v32 = vsel %vm477_vm0, 0.0, %v13428_v41 }
 0x915   : > { %v13548_v5 = vsel %vm477_vm0, 0.0, %v4658_v58  ;;  %v4905_v58 = vsel %vm4889_vm14, %v13545_v4, 0.0  ;;  %v4908_v3 = vsel %vm4889_vm14, %v13591_v32, 0.0 }
 0x916   : > { %v10655_v44 = vpack.i.bf16 %v4905_v58, %v4904_v23 }
 0x919   : > { %10571 = vrot.lane.b32.xlu2 %v10570_v16, %s11269_s16  ;;  %10581 = vrot.lane.b32.xlu0 %v10580_v15, %s11269_s16 }
 0x91a   : > { %4753 = vrot.lane.b32.xlu1 %v4533_v22, %s11267_s15  ;;  %v4902_v22 = vsel %vm4889_vm14, %v13559_v57, 0.0 }
 0x91b   : > { %v13449_v60 = vpop.permute.xlu2 %4713  ;;  %v13451_v6 = vpop.permute.xlu0 %4697 }
 0x91c   : > { %v4670_v40 = vpop.permute.xlu1 %4669 }
 0x91d   : > { %v13576_v17 = vsel %vm477_vm0, 0.0, %v4670_v40 }
 0x921   : > { %10586 = vrot.lane.b32.xlu2 %v10580_v15, %s11270_s22  ;;  %10591 = vrot.lane.b32.xlu0 %v10590_v59, %s11269_s16 }
 0x922   : > { %10576 = vrot.lane.b32.xlu1 %v10570_v16, %s11270_s22  ;;  %v4903_v16 = vsel %vm4889_vm14, %v13548_v5, 0.0 }
 0x923   : > { %v13468_v34 = vpop.permute.xlu2 %4689  ;;  %v13470_v35 = vpop.permute.xlu0 %4673  ;;  %v10650_v7 = vpack.i.bf16 %v4903_v16, %v4902_v22 }
 0x924   : > { %v13474_v36 = vpop.permute.xlu1 %4675 }
 0x929   : > { %10596 = vrot.lane.b32.xlu2 %v10590_v59, %s11270_s22  ;;  %10606 = vrot.lane.b32.xlu0 %v10605_v11, %s11270_s22  ;;  %v13580_v59 = vsel %vm477_vm0, 0.0, %v13451_v6  ;;  %v4909_v6 = vsel %vm4889_vm14, %v13576_v17, 0.0 }
 0x92a   : > { %10601 = vrot.lane.b32.xlu1 %v10605_v11, %s11269_s16  ;;  %17053 = vst [vmem:[#allocation7_spill] sm:$0xff] %v13580_v59  ;;  %v4923_v52 = vsel %vm4889_vm14, %v13580_v59, 0.0  ;;  %v10660_v41 = vpack.i.bf16 %v4909_v6, %v4908_v3  ;;  %v13647_v6 = vsel %vm477_vm0, 0.0, %v13474_v36 }
 0x92b   : > { %v13497_v20 = vpop.permute.xlu2 %4701  ;;  %v13499_v48 = vpop.permute.xlu0 %4685  ;;  %v10680_v9 = vpack.i.bf16 %v4923_v52, %v4922_v26  ;;  %v4912_v26 = vsel %vm4889_vm14, %v13647_v6, 0.0 }
 0x92c   : > { %v13505_v51 = vpop.permute.xlu1 %4711  ;;  %v13628_v58 = vsel %vm477_vm0, 0.0, %v13499_v48  ;;  %v13730_v30 = vsel %vm477_vm0, 0.0, %v13497_v20 }
 0x92d   : > { %v4917_v23 = vsel %vm4889_vm14, %v13628_v58, 0.0  ;;  %17061 = vst [vmem:[#allocation15_spill] sm:$0xff] %v13730_v30  ;;  %v4925_v20 = vsel %vm4889_vm14, %v13730_v30, 0.0 }
 0x931   : > { %10616 = vrot.lane.b32.xlu2 %v10615_v10, %s11269_s16  ;;  %10626 = vrot.lane.b32.xlu0 %v10625_v27, %s11270_s22 }
 0x932   : > { %10611 = vrot.lane.b32.xlu1 %v10625_v27, %s11269_s16  ;;  %v13609_v27 = vsel %vm477_vm0, 0.0, %v13470_v35 }
 0x933   : > { %v13529_v14 = vpop.permute.xlu2 %4707  ;;  %v13531_v12 = vpop.permute.xlu0 %4691  ;;  %v4911_v42 = vsel %vm4889_vm14, %v13609_v27, 0.0 }
 0x934   : > { %v13537_v25 = vpop.permute.xlu1 %4687 }
 0x939   : > { %10641 = vrot.lane.b32.xlu2 %v10640_v43, %s11269_s16  ;;  %10636 = vrot.lane.b32.xlu0 %v10635_v56, %s11270_s22 }
 0x93a   : > { %10621 = vrot.lane.b32.xlu1 %v10635_v56, %s11269_s16 }
 0x93b   : > { %v13561_v45 = vpop.permute.xlu2 %4743  ;;  %v13563_v8 = vpop.permute.xlu0 %4727 }
 0x93c   : > { %v13569_v15 = vpop.permute.xlu1 %4693 }
 0x941   : > { %10651 = vrot.lane.b32.xlu2 %v10650_v7, %s11269_s16  ;;  %10656 = vrot.lane.b32.xlu0 %v10655_v44, %s11269_s16 }
 0x942   : > { %10631 = vrot.lane.b32.xlu1 %v10615_v10, %s11270_s22  ;;  %v13616_v10 = vsel %vm477_vm0, 0.0, %v13395_v0  ;;  %v13635_v0 = vsel %vm477_vm0, 0.0, %v13426_v2  ;;  %v13654_v2 = vsel %vm477_vm0, 0.0, %v13406_v61  ;;  %v13673_v61 = vsel %vm477_vm0, 0.0, %v13449_v60 }
 0x943   : > { %v13593_v40 = vpop.permute.xlu2 %4719  ;;  %v13595_v11 = vpop.permute.xlu0 %4703  ;;  %v4910_v35 = vsel %vm4889_vm14, %v13616_v10, 0.0  ;;  %v4916_v48 = vsel %vm4889_vm14, %v13635_v0, 0.0  ;;  %v4913_v36 = vsel %vm4889_vm14, %v13654_v2, 0.0  ;;  %17056 = vst [vmem:[#allocation10_spill] sm:$0xff] %v13673_v61  ;;  %v13691_v60 = vsel %vm477_vm0, 0.0, %v13569_v15 }
 0x944   : > { %v13601_v55 = vpop.permute.xlu1 %4699  ;;  %v10690_v56 = vpack.i.bf16 %v4911_v42, %v4910_v35  ;;  %v13666_v42 = vsel %vm477_vm0, 0.0, %v13505_v51  ;;  %v4931_v51 = vsel %vm4889_vm14, %v13673_v61, 0.0  ;;  %17057 = vst [vmem:[#allocation11_spill] sm:$0xff] %v13691_v60 }
 0x945   : > { %17055 = vst [vmem:[#allocation9_spill] sm:$0xff] %v13666_v42 }
 0x949   : > { %10661 = vrot.lane.b32.xlu2 %v10660_v41, %s11269_s16  ;;  %10681 = vrot.lane.b32.xlu0 %v10680_v9, %s11269_s16 }
 0x94a   : > { %10646 = vrot.lane.b32.xlu1 %v10640_v43, %s11270_s22 }
 0x94b   : > { %v13618_v28 = vpop.permute.xlu2 %4725  ;;  %v13620_v62 = vpop.permute.xlu0 %4709 }
 0x94c   : > { %v4730_v39 = vpop.permute.xlu1 %4729 }
 0x94d   : > { %v13723_v59 = vsel %vm477_vm0, 0.0, %v4730_v39 }
 0x94e   : > { %17060 = vst [vmem:[#allocation14_spill] sm:$0xff] %v13723_v59 }
 0x951   : > { %10671 = vrot.lane.b32.xlu2 %v10655_v44, %s11270_s22  ;;  %10691 = vrot.lane.b32.xlu0 %v10690_v56, %s11269_s16  ;;  %v10700_v44 = vpack.i.bf16 %v4917_v23, %v4916_v48  ;;  %v4930_v23 = vsel %vm4889_vm14, %v13666_v42, 0.0  ;;  %v13720_v42 = vsel %vm477_vm0, 0.0, %v13601_v55 }
 0x952   : > { %10666 = vrot.lane.b32.xlu1 %v10650_v7, %s11270_s22  ;;  %17059 = vst [vmem:[#allocation13_spill] sm:$0xff] %v13720_v42  ;;  %v4924_v39 = vsel %vm4889_vm14, %v13720_v42, 0.0 }
 0x953   : > { %v13637_v43 = vpop.permute.xlu2 %4731  ;;  %v13639_v16 = vpop.permute.xlu0 %4715 }
 0x954   : > { %v4706_v22 = vpop.permute.xlu1 %4705 }
 0x959   : > { %10686 = vrot.lane.b32.xlu2 %v10680_v9, %s11270_s22  ;;  %10701 = vrot.lane.b32.xlu0 %v10700_v44, %s11269_s16  ;;  %v10710_v9 = vpack.i.bf16 %v4913_v36, %v4912_v26  ;;  %v13687_v26 = vsel %vm477_vm0, 0.0, %v13537_v25  ;;  %v13698_v36 = vsel %vm477_vm0, 0.0, %v13468_v34 }
 0x95a   : > { %10676 = vrot.lane.b32.xlu1 %v10660_v41, %s11270_s22  ;;  %v4918_v15 = vsel %vm4889_vm14, %v13687_v26, 0.0  ;;  %v4919_v34 = vsel %vm4889_vm14, %v13698_v36, 0.0 }
 0x95b   : > { %v13656_v7 = vpop.permute.xlu2 %4737  ;;  %v13658_v52 = vpop.permute.xlu0 %4745 }
 0x95c   : > { %v4718_v3 = vpop.permute.xlu1 %4717  ;;  %v13787_v42 = vsel %vm477_vm0, 0.0, %v13658_v52 }
 0x95d   : > { %v13783_v30 = vsel %vm477_vm0, 0.0, %v4718_v3  ;;  %17067 = vst [vmem:[#allocation21_spill] sm:$0xff] %v13787_v42 }
 0x95e   : > { %17066 = vst [vmem:[#allocation20_spill] sm:$0xff] %v13783_v30  ;;  %v4933_v52 = vsel %vm4889_vm14, %v13783_v30, 0.0 }
 0x961   : > { %10706 = vrot.lane.b32.xlu2 %v10690_v56, %s11270_s22  ;;  %10711 = vrot.lane.b32.xlu0 %v10710_v9, %s11270_s22  ;;  %v10725_v56 = vpack.i.bf16 %v4931_v51, %v4930_v23 }
 0x962   : > { %10696 = vrot.lane.b32.xlu1 %v10710_v9, %s11269_s16  ;;  %v13702_v9 = vsel %vm477_vm0, 0.0, %v13531_v12  ;;  %v10745_v12 = vpack.i.bf16 %v4919_v34, %v4918_v15  ;;  %v13734_v15 = vsel %vm477_vm0, 0.0, %v13563_v8  ;;  %v4939_v34 = vsel %vm4889_vm14, %v13723_v59, 0.0 }
 0x963   : > { %v13675_v41 = vpop.permute.xlu2 %4749  ;;  %v13677_v35 = vpop.permute.xlu0 %4721  ;;  %17058 = vst [vmem:[#allocation12_spill] sm:$0xff] %v13702_v9  ;;  %v10755_v8 = vpack.i.bf16 %v4925_v20, %v4924_v39  ;;  %v13762_v59 = vsel %vm477_vm0, 0.0, %v13529_v14  ;;  %v13766_v39 = vsel %vm477_vm0, 0.0, %v13595_v11 }
 0x964   : > { %v13681_v48 = vpop.permute.xlu1 %4723  ;;  %17062 = vst [vmem:[#allocation16_spill] sm:$0xff] %v13734_v15  ;;  %v4928_v14 = vsel %vm4889_vm14, %v13762_v59, 0.0 }
 0x965   : > { %17065 = vst [vmem:[#allocation19_spill] sm:$0xff] %v13762_v59 }
 0x969   : > { %10716 = vrot.lane.b32.xlu2 %v10700_v44, %s11270_s22  ;;  %10726 = vrot.lane.b32.xlu0 %v10725_v56, %s11270_s22  ;;  %v4921_v44 = vsel %vm4889_vm14, %v13691_v60, 0.0  ;;  %v13752_v60 = vsel %vm477_vm0, 0.0, %v13620_v62 }
 0x96a   : > { %10721 = vrot.lane.b32.xlu1 %v10725_v56, %s11269_s16  ;;  %v4920_v56 = vsel %vm4889_vm14, %v13702_v9, 0.0  ;;  %17063 = vst [vmem:[#allocation17_spill] sm:$0xff] %v13752_v60  ;;  %v13755_v9 = vsel %vm477_vm0, 0.0, %v4706_v22  ;;  %v4929_v22 = vsel %vm4889_vm14, %v13752_v60, 0.0  ;;  %v13794_v60 = vsel %vm477_vm0, 0.0, %v13561_v45 }
 0x96b   : > { %v13704_v25 = vpop.permute.xlu2 %4755  ;;  %v13706_v23 = vpop.permute.xlu0 %4733  ;;  %v10735_v61 = vpack.i.bf16 %v4921_v44, %v4920_v56  ;;  %17064 = vst [vmem:[#allocation18_spill] sm:$0xff] %v13755_v9  ;;  %v4927_v20 = vsel %vm4889_vm14, %v13755_v9, 0.0  ;;  %v10775_v11 = vpack.i.bf16 %v4929_v22, %v4928_v14  ;;  %v13798_v22 = vsel %vm477_vm0, 0.0, %v13639_v16 }
 0x96c   : > { %v13712_v51 = vpop.permute.xlu1 %4759  ;;  %17068 = vst [vmem:[#allocation22_spill] sm:$0xff] %v13794_v60  ;;  %v4947_v14 = vsel %vm4889_vm14, %v13787_v42, 0.0  ;;  %v4946_v45 = vsel %vm4889_vm14, %v13794_v60, 0.0  ;;  %v4932_v16 = vsel %vm4889_vm14, %v13798_v22, 0.0  ;;  %v13820_v42 = vsel %vm477_vm0, 0.0, %v13677_v35 }
 0x96d   : > { %v10780_v30 = vpack.i.bf16 %v4933_v52, %v4932_v16  ;;  %v10800_v9 = vpack.i.bf16 %v4947_v14, %v4946_v45  ;;  %17069 = vst [vmem:[#allocation23_spill] sm:$0xff] %v13820_v42  ;;  %v4935_v52 = vsel %vm4889_vm14, %v13820_v42, 0.0  ;;  %v13839_v16 = vsel %vm477_vm0, 0.0, %v13706_v23 }
 0x96e   : > { %17071 = vst [vmem:[#allocation25_spill] sm:$0xff] %v13839_v16  ;;  %v4941_v42 = vsel %vm4889_vm14, %v13839_v16, 0.0 }
 0x971   : > { %10736 = vrot.lane.b32.xlu2 %v10735_v61, %s11269_s16  ;;  %10746 = vrot.lane.b32.xlu0 %v10745_v12, %s11270_s22 }
 0x972   : > { %10731 = vrot.lane.b32.xlu1 %v10745_v12, %s11269_s16  ;;  %v4938_v12 = vsel %vm4889_vm14, %v13734_v15, 0.0 }
 0x973   : > { %v13736_v44 = vpop.permute.xlu2 %10571  ;;  %v13738_v55 = vpop.permute.xlu0 %4739  ;;  %v10760_v31 = vpack.i.bf16 %v4939_v34, %v4938_v12 }
 0x974   : > { %v13744_v56 = vpop.permute.xlu1 %4735 }
 0x979   : > { %10761 = vrot.lane.b32.xlu2 %v10760_v31, %s11269_s16  ;;  %10756 = vrot.lane.b32.xlu0 %v10755_v8, %s11270_s22 }
 0x97a   : > { %10741 = vrot.lane.b32.xlu1 %v10755_v8, %s11269_s16  ;;  %v4926_v8 = vsel %vm4889_vm14, %v13766_v39, 0.0 }
 0x97b   : > { %v13768_v34 = vpop.permute.xlu2 %10586  ;;  %v13770_v62 = vpop.permute.xlu0 %4751  ;;  %v10770_v15 = vpack.i.bf16 %v4927_v20, %v4926_v8 }
 0x97c   : > { %v13776_v12 = vpop.permute.xlu1 %4741 }
 0x981   : > { %10771 = vrot.lane.b32.xlu2 %v10770_v15, %s11269_s16  ;;  %10776 = vrot.lane.b32.xlu0 %v10775_v11, %s11269_s16 }
 0x982   : > { %10751 = vrot.lane.b32.xlu1 %v10735_v61, %s11270_s22 }
 0x983   : > { %v10597_v3 = vpop.permute.xlu2 %10596  ;;  %v13800_v20 = vpop.permute.xlu0 %4757 }
 0x984   : > { %v13806_v8 = vunpack.i.h.bf16 %v10597_v3  ;;  %v13808_v61 = vunpack.i.l.bf16 %v10597_v3  ;;  %v13810_v59 = vpop.permute.xlu1 %4747  ;;  %v13827_v3 = vsel %vm477_vm0, 0.0, %v13593_v40 }
 0x985   : > { %17070 = vst [vmem:[#allocation24_spill] sm:$0xff] %v13827_v3  ;;  %v4934_v35 = vsel %vm4889_vm14, %v13827_v3, 0.0 }
 0x986   : > { %5425 = vmatpush.msrb.mxu1 %v13808_v61  ;;  %5445 = vmatpush.msra.mxu3 %v13806_v8  ;;  %v10810_v45 = vpack.i.bf16 %v4935_v52, %v4934_v35 }
 0x989   : > { %10781 = vrot.lane.b32.xlu2 %v10780_v30, %s11269_s16  ;;  %10801 = vrot.lane.b32.xlu0 %v10800_v9, %s11269_s16 }
 0x98a   : > { %10766 = vrot.lane.b32.xlu1 %v10760_v31, %s11270_s22  ;;  %v13846_v31 = vsel %vm477_vm0, 0.0, %v13637_v43  ;;  %v13866_v43 = vsel %vm477_vm0, 0.0, %v13681_v48 }
 0x98b   : > { %v13829_v60 = vpop.permute.xlu0 %10581  ;;  %17072 = vst [vmem:[#allocation26_spill] sm:$0xff] %v13846_v31  ;;  %v4940_v23 = vsel %vm4889_vm14, %v13846_v31, 0.0  ;;  %v4936_v48 = vsel %vm4889_vm14, %v13866_v43, 0.0  ;;  %v13892_v31 = vunpack.i.l.bf16 %v13736_v44 }
 0x98c   : > { %v13833_v14 = vpop.permute.xlu1 %4753 }
 0x98d   : > { %17074 = vst [vmem:[#allocation28_spill] sm:$0xff] %v13892_v31 }
 0x991   : > { %10791 = vrot.lane.b32.xlu2 %v10775_v11, %s11270_s22  ;;  %10811 = vrot.lane.b32.xlu0 %v10810_v45, %s11269_s16 }
 0x992   : > { %10786 = vrot.lane.b32.xlu1 %v10770_v15, %s11270_s22  ;;  %v10820_v15 = vpack.i.bf16 %v4941_v42, %v4940_v23  ;;  %v13875_v23 = vsel %vm477_vm0, 0.0, %v13618_v28 }
 0x993   : > { %v10592_v40 = vpop.permute.xlu0 %10591 }
 0x994   : > { %v10577_v3 = vpop.permute.xlu1 %10576  ;;  %v13850_v52 = vunpack.i.h.bf16 %v10592_v40  ;;  %v13852_v35 = vunpack.i.l.bf16 %v10592_v40  ;;  %v10574_v40 = vunpack.i.h.bf16 %v13736_v44 }
 0x995   : > { %v10579_v11 = vunpack.i.h.bf16 %v10577_v3  ;;  %v13882_v16 = vunpack.i.l.bf16 %v10577_v3 }
 0x996   : > { %5426 = vmatpush.msrb.mxu1 %v13852_v35  ;;  %5446 = vmatpush.msra.mxu3 %v13850_v52 }
 0x997   : > { %17073 = vst [vmem:[#allocation27_spill] sm:$0xff] %v13882_v16 }
 0x998   : > { %9632 = vmatpush.msk.msrb.mxu1 %vm4889_vm14, %v13447_v46  ;;  %9636 = vmatpush.msk.msra.mxu3 %vm4889_vm14, %v13440_v24 }
 0x999   : > { %10806 = vrot.lane.b32.xlu2 %v10800_v9, %s11270_s22  ;;  %10821 = vrot.lane.b32.xlu0 %v10820_v15, %s11269_s16 }
 0x99a   : > { %10796 = vrot.lane.b32.xlu1 %v10780_v30, %s11270_s22  ;;  %5428 = vmatpush.msrb.mxu1 %v10579_v11  ;;  %v4937_v30 = vsel %vm4889_vm14, %v13875_v23, 0.0 }
 0x99b   : > { %5448 = vmatpush.msra.mxu3 %v13808_v61  ;;  %v13871_v42 = vpop.permute.xlu0 %10606  ;;  %v10830_v28 = vpack.i.bf16 %v4937_v30, %v4936_v48  ;;  %v13901_v48 = vld [vmem:[%s16950_s5] sm:$0xff] }
 0x99c   : > { %v13877_v9 = vpop.permute.xlu1 %10601  ;;  %5429 = vmatpush.msrb.mxu1 %v10574_v40 }
 0x99d   : > { %5449 = vmatpush.msra.mxu3 %v13852_v35 }
 0x99e   : > { %9633 = vmatpush.msk.msrb.mxu1 %vm4889_vm14, %v13413_v54 }
 0x99f   : > { %9637 = vmatpush.msk.msra.mxu3 %vm4889_vm14, %v13447_v46 }
 0x9a0   : > { %5431 = vmatpush.msrb.mxu1 %v13882_v16 }
 0x9a1   : > { %10826 = vrot.lane.b32.xlu2 %v10810_v45, %s11270_s22  ;;  %5451 = vmatpush.msra.mxu3 %v10579_v11  ;;  %v13913_v45 = vsel %vm477_vm0, 0.0, %v13712_v51 }
 0x9a2   : > { %10816 = vrot.lane.b32.xlu1 %v10830_v28, %s11269_s16  ;;  %10831 = vrot.lane.b32.xlu0 %v10830_v28, %s11270_s22  ;;  %17075 = vst [vmem:[#allocation29_spill] sm:$0xff] %v13913_v45  ;;  %v4954_v51 = vsel %vm4889_vm14, %v13913_v45, 0.0  ;;  %v13935_v28 = vsel %vm477_vm0, 0.0, %v13744_v56  ;;  %v13974_v45 = vsel %vm477_vm0, 0.0, %v13810_v59  ;;  %v13991_v59 = vsel %vm477_vm0, 0.0, %v13770_v62 }
 0x9a3   : > { %5432 = vmatpush.msrb.mxu1 %v13892_v31  ;;  %5452 = vmatpush.msra.mxu3 %v10574_v40  ;;  %v10627_v3 = vpop.permute.xlu0 %10626  ;;  %17076 = vst [vmem:[#allocation30_spill] sm:$0xff] %v13974_v45  ;;  %v13978_v31 = vsel %vm477_vm0, 0.0, %v13833_v14  ;;  %v4950_v62 = vsel %vm4889_vm14, %v13991_v59, 0.0 }
 0x9a4   : > { %v10612_v30 = vpop.permute.xlu1 %10611  ;;  %v13903_v16 = vunpack.i.h.bf16 %v10627_v3  ;;  %v13905_v44 = vunpack.i.l.bf16 %v10627_v3  ;;  %v13941_v3 = vsel %vm477_vm0, 0.0, %v13738_v55  ;;  %v4942_v55 = vsel %vm4889_vm14, %v13935_v28, 0.0  ;;  %17077 = vst [vmem:[#allocation31_spill] sm:$0xff] %v13978_v31 }
 0x9a5   : > { %9634 = vmatpush.msk.msrb.mxu1 %vm4889_vm14, %v11478_v53  ;;  %9638 = vmatpush.msk.msra.mxu3 %vm4889_vm14, %v13413_v54  ;;  %v13919_v11 = vunpack.i.l.bf16 %v10612_v30  ;;  %v13923_v40 = vunpack.i.h.bf16 %v10612_v30  ;;  %v13927_v54 = vsel %vm477_vm0, 0.0, %v13776_v12  ;;  %v13948_v12 = vsel %vm477_vm0, 0.0, %v13656_v7 }
 0x9a6   : > { %9635 = vmatmul.msk.f32.vlgmr.msrb.gmra.mxu1 %vm1095_vm11, %v13901_v48  ;;  %9639 = vmatmul.msk.f32.vlgmr.msra.gmra.mxu3 %vm1095_vm11, %v13901_v48  ;;  %v4945_v56 = vsel %vm4889_vm14, %v13927_v54, 0.0  ;;  %v4944_v30 = vsel %vm4889_vm14, %v13941_v3, 0.0  ;;  %v4943_v7 = vsel %vm4889_vm14, %v13948_v12, 0.0 }
 0x9a7   : > { %5465 = vmatpush.msra.mxu2 %v13905_v44  ;;  %5485 = vmatpush.msrb.mxu0 %v13903_v16  ;;  %v10840_v53 = vpack.i.bf16 %v4943_v7, %v4942_v55  ;;  %v10617_v55 = vpop.permute.xlu2 %10616 }
 0x9a9   : > { %10836 = vrot.lane.b32.xlu2 %v10820_v15, %s11270_s22  ;;  %5466 = vmatpush.msra.mxu2 %v13919_v11 }
 0x9aa   : > { %5407 = vrot.lane.b32.xlu1 %v4954_v51, %s11270_s22  ;;  %5486 = vmatpush.msrb.mxu0 %v13923_v40 }
 0x9ab   : > { %5404 = vrot.lane.b32.xlu0 %v4954_v51, %s11269_s16  ;;  %9640 = vmatpush.msk.msra.mxu2 %vm4889_vm14, %v13480_v49  ;;  %v13964_v51 = vpack.i.bf16 %v4945_v56, %v4944_v30  ;;  %v13987_v56 = vsel %vm477_vm0, 0.0, %v13675_v41  ;;  %v4948_v30 = vsel %vm4889_vm14, %v13974_v45, 0.0  ;;  %v14010_v45 = vunpack.i.l.bf16 %v10617_v55 }
 0x9ac   : > { %v13952_v15 = vpop.permute.xlu1 %10621  ;;  %9644 = vmatpush.msk.msrb.mxu0 %vm4889_vm14, %v13491_v33  ;;  %v4949_v41 = vsel %vm4889_vm14, %v13987_v56, 0.0 }
 0x9ad   : > { %5468 = vmatpush.msra.mxu2 %v13806_v8 }
 0x9ae   : > { %5488 = vmatpush.msrb.mxu0 %v13905_v44 }
 0x9af   : > { %5469 = vmatpush.msra.mxu2 %v13850_v52 }
 0x9b0   : > { %5489 = vmatpush.msrb.mxu0 %v13919_v11 }
 0x9b1   : > { %10846 = vrot.lane.b32.xlu2 %v13964_v51, %s11269_s16  ;;  %9641 = vmatpush.msk.msra.mxu2 %vm4889_vm14, %v13440_v24 }
 0x9b2   : > { %10841 = vrot.lane.b32.xlu1 %v10840_v53, %s11269_s16  ;;  %9645 = vmatpush.msk.msrb.mxu0 %vm4889_vm14, %v13480_v49 }
 0x9b3   : > { %10856 = vrot.lane.b32.xlu0 %v10840_v53, %s11270_s22  ;;  %5471 = vmatpush.msra.mxu2 %v13808_v61  ;;  %v4951_v53 = vsel %vm4889_vm14, %v13978_v31, 0.0 }
 0x9b4   : > { %v10632_v14 = vpop.permute.xlu1 %10631  ;;  %5491 = vmatpush.msrb.mxu0 %v13806_v8  ;;  %v14008_v8 = vunpack.i.h.bf16 %v10617_v55  ;;  %v10870_v31 = vpack.i.bf16 %v4951_v53, %v4950_v62  ;;  %v14052_v55 = vpop.permute.xlu2 %10641 }
 0x9b5   : > { %v13998_v7 = vunpack.i.h.bf16 %v10632_v14  ;;  %v14000_v61 = vunpack.i.l.bf16 %v10632_v14  ;;  %5472 = vmatpush.msra.mxu2 %v13852_v35  ;;  %v10850_v14 = vpack.i.bf16 %v4949_v41, %v4948_v30  ;;  %v14026_v35 = vunpack.i.l.bf16 %v13768_v34 }
 0x9b6   : > { %5492 = vmatpush.msrb.mxu0 %v13850_v52  ;;  %v14023_v52 = vunpack.i.h.bf16 %v13768_v34  ;;  %v14047_v34 = vsel %vm477_vm0, 0.0, %v13704_v25 }
 0x9b7   : > { %5505 = vmatpush.msra.mxu1 %v14000_v61  ;;  %5525 = vmatpush.msrb.mxu3 %v13998_v7 }
 0x9b8   : > { %9642 = vmatpush.msk.msra.mxu2 %vm4889_vm14, %v13447_v46  ;;  %9646 = vmatpush.msk.msrb.mxu0 %vm4889_vm14, %v13440_v24  ;;  %v14034_v24 = vsel %vm477_vm0, 0.0, %v13800_v20  ;;  %v14041_v46 = vunpack.i.l.bf16 %v13829_v60  ;;  %v14050_v20 = vunpack.i.h.bf16 %v13829_v60  ;;  %v4952_v60 = vsel %vm4889_vm14, %v14047_v34, 0.0 }
 0x9b9   : > { %5506 = vmatpush.msra.mxu1 %v14010_v45  ;;  %5526 = vmatpush.msrb.mxu3 %v14008_v8  ;;  %v4953_v30 = vsel %vm4889_vm14, %v14034_v24, 0.0 }
 0x9ba   : > { %10851 = vrot.lane.b32.xlu1 %v10850_v14, %s11269_s16  ;;  %10871 = vrot.lane.b32.xlu2 %v10870_v31, %s11269_s16  ;;  %v10885_v25 = vpack.i.bf16 %v4953_v30, %v4952_v60 }
 0x9bb   : > { %9648 = vmatpush.msk.msra.mxu1 %vm4889_vm14, %v13495_v63  ;;  %9652 = vmatpush.msk.msrb.mxu3 %vm4889_vm14, %v13484_v21 }
 0x9bc   : > { %9643 = vmatmul.msk.f32.vlgmr.msra.gmra.mxu2 %vm1095_vm11, %v13901_v48  ;;  %9647 = vmatmul.msk.f32.vlgmr.msrb.gmra.mxu0 %vm1095_vm11, %v13901_v48  ;;  %v14075_v53 = vpop.permute.xlu1 %10646  ;;  %v10652_v41 = vpop.permute.xlu2 %10651 }
 0x9bd   : > { %5545 = vmatpush.msrb.mxu2 %v14026_v35  ;;  %5565 = vmatpush.msra.mxu0 %v14023_v52 }
 0x9be   : > { %5508 = vmatpush.msra.mxu1 %v13903_v16  ;;  %5528 = vmatpush.msrb.mxu3 %v14000_v61 }
 0x9bf   : > { %10866 = vrot.lane.b32.xlu0 %v10850_v14, %s11270_s22  ;;  %5546 = vmatpush.msrb.mxu2 %v14041_v46 }
 0x9c0   : > { %5566 = vmatpush.msra.mxu0 %v14050_v20  ;;  %5509 = vmatpush.msra.mxu1 %v13923_v40 }
 0x9c1   : > { %5529 = vmatpush.msrb.mxu3 %v14010_v45  ;;  %9656 = vmatpush.msk.msrb.mxu2 %vm4889_vm14, %v13424_v1 }
 0x9c2   : > { %9660 = vmatpush.msk.msra.mxu0 %vm4889_vm14, %v13417_v29  ;;  %9649 = vmatpush.msk.msra.mxu1 %vm4889_vm14, %v13491_v33 }
 0x9c3   : > { %9653 = vmatpush.msk.msrb.mxu3 %vm4889_vm14, %v13495_v63  ;;  %10861 = vrot.lane.b32.xlu1 %v13964_v51, %s11270_s22  ;;  %v10637_v51 = vpop.permute.xlu0 %10636 }
 0x9c4   : > { %10886 = vrot.lane.b32.xlu2 %v10885_v25, %s11270_s22  ;;  %5548 = vmatpush.msrb.mxu2 %v13998_v7 }
 0x9c5   : > { %5568 = vmatpush.msra.mxu0 %v14026_v35  ;;  %5511 = vmatpush.msra.mxu1 %v13905_v44  ;;  %v10638_v44 = vunpack.i.l.bf16 %v10637_v51 }
 0x9c6   : > { %5531 = vmatpush.msrb.mxu3 %v13903_v16  ;;  %5549 = vmatpush.msrb.mxu2 %v14008_v8  ;;  %v10639_v16 = vunpack.i.h.bf16 %v10637_v51 }
 0x9c7   : > { %5569 = vmatpush.msra.mxu0 %v14041_v46  ;;  %5512 = vmatpush.msra.mxu1 %v13919_v11  ;;  %v10623_v11 = vunpack.i.l.bf16 %v13952_v15 }
 0x9c8   : > { %5532 = vmatpush.msrb.mxu3 %v13923_v40  ;;  %10876 = vrot.lane.b32.xlu0 %v10885_v25, %s11269_s16  ;;  %v10667_v40 = vpop.permute.xlu1 %10666 }
 0x9c9   : > { %9657 = vmatpush.msk.msrb.mxu2 %vm4889_vm14, %v13484_v21  ;;  %9661 = vmatpush.msk.msra.mxu0 %vm4889_vm14, %v13424_v1 }
 0x9ca   : > { %9650 = vmatpush.msk.msra.mxu1 %vm4889_vm14, %v13480_v49  ;;  %9654 = vmatpush.msk.msrb.mxu3 %vm4889_vm14, %v13491_v33  ;;  %v10624_v49 = vunpack.i.h.bf16 %v13952_v15  ;;  %v14108_v33 = vunpack.i.l.bf16 %v10667_v40  ;;  %v14114_v15 = vpop.permute.xlu2 %10661 }
 0x9cb   : > { %9651 = vmatmul.msk.f32.vlgmr.msra.gmra.mxu1 %vm1095_vm11, %v13901_v48  ;;  %9655 = vmatmul.msk.f32.vlgmr.msrb.gmra.mxu3 %vm1095_vm11, %v13901_v48  ;;  %v10663_v30 = vunpack.i.l.bf16 %v14114_v15  ;;  %v10664_v60 = vunpack.i.h.bf16 %v14114_v15 }
 0x9cc   : > { %5551 = vmatpush.msrb.mxu2 %v14000_v61  ;;  %5571 = vmatpush.msra.mxu0 %v13998_v7  ;;  %v10657_v7 = vpop.permute.xlu0 %10656 }
 0x9cd   : > { %5585 = vmatpush.msrb.mxu1 %v10638_v44  ;;  %5605 = vmatpush.msra.mxu3 %v10639_v16  ;;  %v10659_v14 = vunpack.i.h.bf16 %v10657_v7 }
 0x9ce   : > { %10881 = vrot.lane.b32.xlu1 %v10870_v31, %s11270_s22  ;;  %5552 = vmatpush.msrb.mxu2 %v14010_v45  ;;  %v14116_v31 = vunpack.i.h.bf16 %v10667_v40  ;;  %v14122_v45 = vunpack.i.l.bf16 %v10652_v41 }
 0x9cf   : > { %5572 = vmatpush.msra.mxu0 %v14008_v8  ;;  %5586 = vmatpush.msrb.mxu1 %v10623_v11  ;;  %v10658_v8 = vunpack.i.l.bf16 %v10657_v7 }
 0x9d0   : > { %5606 = vmatpush.msra.mxu3 %v10624_v49  ;;  %9658 = vmatpush.msk.msrb.mxu2 %vm4889_vm14, %v13495_v63 }
 0x9d1   : > { %9662 = vmatpush.msk.msra.mxu0 %vm4889_vm14, %v13484_v21  ;;  %9664 = vmatpush.msk.msrb.mxu1 %vm4889_vm14, %v13513_v47  ;;  %v14127_v21 = vunpack.i.h.bf16 %v10652_v41 }
 0x9d2   : > { %9668 = vmatpush.msk.msra.mxu3 %vm4889_vm14, %v13523_v18  ;;  %9659 = vmatmul.msk.f32.vlgmr.msrb.gmra.mxu2 %vm1095_vm11, %v13901_v48  ;;  %v10672_v63 = vpop.permute.xlu2 %10671 }
 0x9d3   : > { %9663 = vmatmul.msk.f32.vlgmr.msra.gmra.mxu0 %vm1095_vm11, %v13901_v48  ;;  %5625 = vmatpush.msra.mxu2 %v14108_v33  ;;  %v10673_v61 = vunpack.i.l.bf16 %v10672_v63  ;;  %v10674_v62 = vunpack.i.h.bf16 %v10672_v63 }
 0x9d4   : > { %5645 = vmatpush.msrb.mxu0 %v14116_v31  ;;  %5588 = vmatpush.msrb.mxu1 %v14023_v52 }
 0x9d5   : > { %5608 = vmatpush.msra.mxu3 %v10638_v44  ;;  %5626 = vmatpush.msra.mxu2 %v14122_v45 }
 0x9d6   : > { %5646 = vmatpush.msrb.mxu0 %v14127_v21  ;;  %5589 = vmatpush.msrb.mxu1 %v14050_v20 }
 0x9d7   : > { %5609 = vmatpush.msra.mxu3 %v10623_v11  ;;  %9672 = vmatpush.msk.msra.mxu2 %vm4889_vm14, %v13559_v57 }
 0x9d8   : > { %9676 = vmatpush.msk.msrb.mxu0 %vm4889_vm14, %v13548_v5  ;;  %9665 = vmatpush.msk.msrb.mxu1 %vm4889_vm14, %v13417_v29 }
 0x9d9   : > { %9669 = vmatpush.msk.msra.mxu3 %vm4889_vm14, %v13513_v47  ;;  %5628 = vmatpush.msra.mxu2 %v10639_v16 }
 0x9da   : > { %5648 = vmatpush.msrb.mxu0 %v14108_v33  ;;  %5591 = vmatpush.msrb.mxu1 %v14026_v35  ;;  %v10677_v35 = vpop.permute.xlu1 %10676 }
 0x9db   : > { %5611 = vmatpush.msra.mxu3 %v14023_v52  ;;  %5629 = vmatpush.msra.mxu2 %v10624_v49  ;;  %v14172_v52 = vpop.permute.xlu0 %10681 }
 0x9dc   : > { %5649 = vmatpush.msrb.mxu0 %v14122_v45  ;;  %5592 = vmatpush.msrb.mxu1 %v14041_v46  ;;  %v10678_v46 = vunpack.i.l.bf16 %v10677_v35 }
 0x9dd   : > { %5612 = vmatpush.msra.mxu3 %v14050_v20  ;;  %9673 = vmatpush.msk.msra.mxu2 %vm4889_vm14, %v13523_v18  ;;  %v10679_v20 = vunpack.i.h.bf16 %v10677_v35  ;;  %v17079_v35 = vld [vmem:[#allocation11_spill] sm:$0xff] }
 0x9de   : > { %9677 = vmatpush.msk.msrb.mxu0 %vm4889_vm14, %v13559_v57  ;;  %9666 = vmatpush.msk.msrb.mxu1 %vm4889_vm14, %v13424_v1  ;;  %v14170_v1 = vunpack.i.h.bf16 %v13871_v42 }
 0x9df   : > { %9670 = vmatpush.msk.msra.mxu3 %vm4889_vm14, %v13417_v29  ;;  %9667 = vmatmul.msk.f32.vlgmr.msrb.gmra.mxu1 %vm1095_vm11, %v13901_v48  ;;  %v14163_v29 = vunpack.i.l.bf16 %v13871_v42  ;;  %v14194_v42 = vpop.permute.xlu2 %10686 }
 0x9e0   : > { %9671 = vmatmul.msk.f32.vlgmr.msra.gmra.mxu3 %vm1095_vm11, %v13901_v48  ;;  %5631 = vmatpush.msra.mxu2 %v10638_v44 }
 0x9e1   : > { %5651 = vmatpush.msrb.mxu0 %v10639_v16  ;;  %5665 = vmatpush.msra.mxu1 %v10673_v61 }
 0x9e2   : > { %5685 = vmatpush.msrb.mxu3 %v10674_v62  ;;  %5632 = vmatpush.msra.mxu2 %v10623_v11 }
 0x9e3   : > { %5652 = vmatpush.msrb.mxu0 %v10624_v49  ;;  %5666 = vmatpush.msra.mxu1 %v10658_v8 }
 0x9e4   : > { %5686 = vmatpush.msrb.mxu3 %v10659_v14  ;;  %9674 = vmatpush.msk.msra.mxu2 %vm4889_vm14, %v13513_v47  ;;  %v14179_v47 = vunpack.i.l.bf16 %v13877_v9 }
 0x9e5   : > { %9678 = vmatpush.msk.msrb.mxu0 %vm4889_vm14, %v13523_v18  ;;  %9680 = vmatpush.msk.msra.mxu1 %vm4889_vm14, %v13555_v37  ;;  %v14185_v18 = vunpack.i.h.bf16 %v13877_v9  ;;  %v10692_v9 = vpop.permute.xlu0 %10691 }
 0x9e6   : > { %9684 = vmatpush.msk.msrb.mxu3 %vm4889_vm14, %v13545_v4  ;;  %9675 = vmatmul.msk.f32.vlgmr.msra.gmra.mxu2 %vm1095_vm11, %v13901_v48  ;;  %v14238_v51 = vunpack.i.l.bf16 %v10692_v9 }
 0x9e7   : > { %9679 = vmatmul.msk.f32.vlgmr.msrb.gmra.mxu0 %vm1095_vm11, %v13901_v48  ;;  %5705 = vmatpush.msrb.mxu2 %v14163_v29  ;;  %v10707_v25 = vpop.permute.xlu2 %10706 }
 0x9e8   : > { %5725 = vmatpush.msra.mxu0 %v14170_v1  ;;  %5668 = vmatpush.msra.mxu1 %v14116_v31 }
 0x9e9   : > { %5688 = vmatpush.msrb.mxu3 %v10673_v61  ;;  %5706 = vmatpush.msrb.mxu2 %v14179_v47 }
 0x9ea   : > { %5726 = vmatpush.msra.mxu0 %v14185_v18  ;;  %5669 = vmatpush.msra.mxu1 %v14127_v21 }
 0x9eb   : > { %5689 = vmatpush.msrb.mxu3 %v10658_v8  ;;  %9688 = vmatpush.msk.msrb.mxu2 %vm4889_vm14, %v13459_v19 }
 0x9ec   : > { %9692 = vmatpush.msk.msra.mxu0 %vm4889_vm14, %v13466_v50  ;;  %9681 = vmatpush.msk.msra.mxu1 %vm4889_vm14, %v13548_v5 }
 0x9ed   : > { %9685 = vmatpush.msk.msrb.mxu3 %vm4889_vm14, %v13555_v37  ;;  %5708 = vmatpush.msrb.mxu2 %v10674_v62  ;;  %v14232_v41 = vpop.permute.xlu0 %10701 }
 0x9ee   : > { %5728 = vmatpush.msra.mxu0 %v14163_v29  ;;  %5671 = vmatpush.msra.mxu1 %v14108_v33  ;;  %v10704_v63 = vunpack.i.h.bf16 %v14232_v41 }
 0x9ef   : > { %5691 = vmatpush.msrb.mxu3 %v14116_v31  ;;  %5709 = vmatpush.msrb.mxu2 %v10659_v14 }
 0x9f0   : > { %5729 = vmatpush.msra.mxu0 %v14179_v47  ;;  %5672 = vmatpush.msra.mxu1 %v14122_v45 }
 0x9f1   : > { %5692 = vmatpush.msrb.mxu3 %v14127_v21  ;;  %9689 = vmatpush.msk.msrb.mxu2 %vm4889_vm14, %v13545_v4  ;;  %v10703_v21 = vunpack.i.l.bf16 %v14232_v41 }
 0x9f2   : > { %9693 = vmatpush.msk.msra.mxu0 %vm4889_vm14, %v13459_v19  ;;  %9682 = vmatpush.msk.msra.mxu1 %vm4889_vm14, %v13559_v57  ;;  %v14230_v57 = vunpack.i.h.bf16 %v10707_v25 }
 0x9f3   : > { %9686 = vmatpush.msk.msrb.mxu3 %vm4889_vm14, %v13548_v5  ;;  %9683 = vmatmul.msk.f32.vlgmr.msra.gmra.mxu1 %vm1095_vm11, %v13901_v48  ;;  %v14224_v5 = vunpack.i.l.bf16 %v10707_v25 }
 0x9f4   : > { %9687 = vmatmul.msk.f32.vlgmr.msrb.gmra.mxu3 %vm1095_vm11, %v13901_v48  ;;  %5711 = vmatpush.msrb.mxu2 %v10673_v61 }
 0x9f5   : > { %5731 = vmatpush.msra.mxu0 %v10674_v62  ;;  %5745 = vmatpush.msrb.mxu1 %v10678_v46  ;;  %v10712_v16 = vpop.permute.xlu0 %10711 }
 0x9f6   : > { %5765 = vmatpush.msra.mxu3 %v10679_v20  ;;  %5712 = vmatpush.msrb.mxu2 %v10658_v8  ;;  %v10713_v44 = vunpack.i.l.bf16 %v10712_v16  ;;  %v10714_v11 = vunpack.i.h.bf16 %v10712_v16 }
 0x9f7   : > { %5732 = vmatpush.msra.mxu0 %v10659_v14  ;;  %5746 = vmatpush.msrb.mxu1 %v10663_v30 }
 0x9f8   : > { %5766 = vmatpush.msra.mxu3 %v10664_v60  ;;  %9690 = vmatpush.msk.msrb.mxu2 %vm4889_vm14, %v13555_v37  ;;  %v10697_v37 = vpop.permute.xlu1 %10696 }
 0x9f9   : > { %9694 = vmatpush.msk.msra.mxu0 %vm4889_vm14, %v13545_v4  ;;  %9696 = vmatpush.msk.msrb.mxu1 %vm4889_vm14, %v13591_v32  ;;  %v14243_v4 = vunpack.i.h.bf16 %v10692_v9  ;;  %v10698_v49 = vunpack.i.l.bf16 %v10697_v37  ;;  %v10699_v40 = vunpack.i.h.bf16 %v10697_v37  ;;  %v14414_v9 = vunpack.i.h.bf16 %v14194_v42 }
 0x9fa   : > { %9700 = vmatpush.msk.msra.mxu3 %vm4889_vm14, %v13576_v17  ;;  %9691 = vmatmul.msk.f32.vlgmr.msrb.gmra.mxu2 %vm1095_vm11, %v13901_v48 }
 0x9fb   : > { %9695 = vmatmul.msk.f32.vlgmr.msra.gmra.mxu0 %vm1095_vm11, %v13901_v48  ;;  %5785 = vmatpush.msra.mxu2 %v14224_v5 }
 0x9fc   : > { %5805 = vmatpush.msrb.mxu0 %v14230_v57  ;;  %5748 = vmatpush.msrb.mxu1 %v14170_v1 }
 0x9fd   : > { %5768 = vmatpush.msra.mxu3 %v10678_v46  ;;  %5786 = vmatpush.msra.mxu2 %v14238_v51 }
 0x9fe   : > { %5806 = vmatpush.msrb.mxu0 %v14243_v4  ;;  %5749 = vmatpush.msrb.mxu1 %v14185_v18 }
 0x9ff   : > { %5769 = vmatpush.msra.mxu3 %v10663_v30  ;;  %9704 = vmatpush.msk.msra.mxu2 %vm4889_vm14, %v13616_v10 }
 0xa00   : > { %9708 = vmatpush.msk.msrb.mxu0 %vm4889_vm14, %v13609_v27  ;;  %9697 = vmatpush.msk.msrb.mxu1 %vm4889_vm14, %v13466_v50  ;;  %v14288_v33 = vpop.permute.xlu1 %10721 }
 0xa01   : > { %9701 = vmatpush.msk.msra.mxu3 %vm4889_vm14, %v13591_v32  ;;  %5788 = vmatpush.msra.mxu2 %v10679_v20 }
 0xa02   : > { %5808 = vmatpush.msrb.mxu0 %v14224_v5  ;;  %5751 = vmatpush.msrb.mxu1 %v14163_v29 }
 0xa03   : > { %5771 = vmatpush.msra.mxu3 %v14170_v1  ;;  %5789 = vmatpush.msra.mxu2 %v10664_v60 }
 0xa04   : > { %5809 = vmatpush.msrb.mxu0 %v14238_v51  ;;  %5752 = vmatpush.msrb.mxu1 %v14179_v47  ;;  %v14407_v47 = vunpack.i.l.bf16 %v14194_v42 }
 0xa05   : > { %5772 = vmatpush.msra.mxu3 %v14185_v18  ;;  %9705 = vmatpush.msk.msra.mxu2 %vm4889_vm14, %v13576_v17  ;;  %v17078_v18 = vld [vmem:[#allocation12_spill] sm:$0xff] }
 0xa06   : > { %9709 = vmatpush.msk.msrb.mxu0 %vm4889_vm14, %v13616_v10  ;;  %9698 = vmatpush.msk.msrb.mxu1 %vm4889_vm14, %v13459_v19  ;;  %v14279_v19 = vunpack.i.l.bf16 %v14075_v53 }
 0xa07   : > { %9702 = vmatpush.msk.msra.mxu3 %vm4889_vm14, %v13466_v50  ;;  %9699 = vmatmul.msk.f32.vlgmr.msrb.gmra.mxu1 %vm1095_vm11, %v13901_v48  ;;  %v14286_v50 = vunpack.i.h.bf16 %v14075_v53  ;;  %v14310_v53 = vpop.permute.xlu0 %10726 }
 0xa08   : > { %9703 = vmatmul.msk.f32.vlgmr.msra.gmra.mxu3 %vm1095_vm11, %v13901_v48  ;;  %5791 = vmatpush.msra.mxu2 %v10678_v46  ;;  %v10732_v15 = vpop.permute.xlu1 %10731 }
 0xa09   : > { %5811 = vmatpush.msrb.mxu0 %v10679_v20  ;;  %5825 = vmatpush.msra.mxu1 %v10713_v44  ;;  %v14354_v62 = vunpack.i.l.bf16 %v10732_v15  ;;  %v14428_v20 = vunpack.i.h.bf16 %v14172_v52 }
 0xa0a   : > { %5845 = vmatpush.msrb.mxu3 %v10714_v11  ;;  %5792 = vmatpush.msra.mxu2 %v10663_v30  ;;  %v17081_v30 = vld [vmem:[#allocation8_spill] sm:$0xff] }
 0xa0b   : > { %5812 = vmatpush.msrb.mxu0 %v10664_v60  ;;  %5826 = vmatpush.msra.mxu1 %v10698_v49  ;;  %v17082_v60 = vld [vmem:[#allocation7_spill] sm:$0xff] }
 0xa0c   : > { %5846 = vmatpush.msrb.mxu3 %v10699_v40  ;;  %9706 = vmatpush.msk.msra.mxu2 %vm4889_vm14, %v13591_v32  ;;  %v14295_v32 = vunpack.i.l.bf16 %v14052_v55 }
 0xa0d   : > { %9710 = vmatpush.msk.msrb.mxu0 %vm4889_vm14, %v13576_v17  ;;  %9712 = vmatpush.msk.msra.mxu1 %vm4889_vm14, %v13647_v6  ;;  %v14301_v17 = vunpack.i.h.bf16 %v14052_v55  ;;  %v10717_v55 = vpop.permute.xlu2 %10716 }
 0xa0e   : > { %9716 = vmatpush.msk.msrb.mxu3 %vm4889_vm14, %v13654_v2  ;;  %9707 = vmatmul.msk.f32.vlgmr.msra.gmra.mxu2 %vm1095_vm11, %v13901_v48  ;;  %v10718_v31 = vunpack.i.l.bf16 %v10717_v55  ;;  %v10719_v45 = vunpack.i.h.bf16 %v10717_v55 }
 0xa0f   : > { %9711 = vmatmul.msk.f32.vlgmr.msrb.gmra.mxu0 %vm1095_vm11, %v13901_v48  ;;  %5865 = vmatpush.msrb.mxu2 %v14279_v19  ;;  %v10747_v7 = vpop.permute.xlu0 %10746 }
 0xa10   : > { %5885 = vmatpush.msra.mxu0 %v14286_v50  ;;  %5828 = vmatpush.msra.mxu1 %v14230_v57  ;;  %v14348_v61 = vpop.permute.xlu1 %10741 }
 0xa11   : > { %5848 = vmatpush.msrb.mxu3 %v10713_v44  ;;  %5866 = vmatpush.msrb.mxu2 %v14295_v32 }
 0xa12   : > { %5886 = vmatpush.msra.mxu0 %v14301_v17  ;;  %5829 = vmatpush.msra.mxu1 %v14243_v4 }
 0xa13   : > { %5849 = vmatpush.msrb.mxu3 %v10698_v49  ;;  %9720 = vmatpush.msk.msrb.mxu2 %vm4889_vm14, %v13527_v13 }
 0xa14   : > { %9724 = vmatpush.msk.msra.mxu0 %vm4889_vm14, %v13516_v38  ;;  %9713 = vmatpush.msk.msra.mxu1 %vm4889_vm14, %v13609_v27 }
 0xa15   : > { %9717 = vmatpush.msk.msrb.mxu3 %vm4889_vm14, %v13647_v6  ;;  %5868 = vmatpush.msrb.mxu2 %v10714_v11  ;;  %v10737_v8 = vpop.permute.xlu2 %10736 }
 0xa16   : > { %5888 = vmatpush.msra.mxu0 %v14279_v19  ;;  %5831 = vmatpush.msra.mxu1 %v14224_v5  ;;  %v14396_v1 = vunpack.i.l.bf16 %v10737_v8 }
 0xa17   : > { %5851 = vmatpush.msrb.mxu3 %v14230_v57  ;;  %5869 = vmatpush.msrb.mxu2 %v10699_v40 }
 0xa18   : > { %5889 = vmatpush.msra.mxu0 %v14295_v32  ;;  %5832 = vmatpush.msra.mxu1 %v14238_v51  ;;  %v10757_v51 = vpop.permute.xlu0 %10756 }
 0xa19   : > { %5852 = vmatpush.msrb.mxu3 %v14243_v4  ;;  %9721 = vmatpush.msk.msrb.mxu2 %vm4889_vm14, %v13654_v2  ;;  %v14467_v37 = vunpack.i.h.bf16 %v10757_v51  ;;  %v14469_v16 = vunpack.i.l.bf16 %v10757_v51 }
 0xa1a   : > { %9725 = vmatpush.msk.msra.mxu0 %vm4889_vm14, %v13527_v13  ;;  %9714 = vmatpush.msk.msra.mxu1 %vm4889_vm14, %v13616_v10  ;;  %v14346_v10 = vunpack.i.h.bf16 %v10747_v7 }
 0xa1b   : > { %9718 = vmatpush.msk.msrb.mxu3 %vm4889_vm14, %v13609_v27  ;;  %9715 = vmatmul.msk.f32.vlgmr.msra.gmra.mxu1 %vm1095_vm11, %v13901_v48  ;;  %v14340_v27 = vunpack.i.l.bf16 %v10747_v7 }
 0xa1c   : > { %9719 = vmatmul.msk.f32.vlgmr.msrb.gmra.mxu3 %vm1095_vm11, %v13901_v48  ;;  %5871 = vmatpush.msrb.mxu2 %v10713_v44 }
 0xa1d   : > { %5891 = vmatpush.msra.mxu0 %v10714_v11  ;;  %5905 = vmatpush.msrb.mxu1 %v10718_v31  ;;  %v14430_v42 = vpop.permute.xlu2 %10761 }
 0xa1e   : > { %5925 = vmatpush.msra.mxu3 %v10719_v45  ;;  %5872 = vmatpush.msrb.mxu2 %v10698_v49 }
 0xa1f   : > { %5892 = vmatpush.msra.mxu0 %v10699_v40  ;;  %5906 = vmatpush.msrb.mxu1 %v10703_v21 }
 0xa20   : > { %5926 = vmatpush.msra.mxu3 %v10704_v63  ;;  %9722 = vmatpush.msk.msrb.mxu2 %vm4889_vm14, %v13647_v6  ;;  %v14359_v6 = vunpack.i.h.bf16 %v10732_v15 }
 0xa21   : > { %9726 = vmatpush.msk.msra.mxu0 %vm4889_vm14, %v13654_v2  ;;  %9728 = vmatpush.msk.msrb.mxu1 %vm4889_vm14, %v13635_v0  ;;  %v10752_v2 = vpop.permute.xlu1 %10751 }
 0xa22   : > { %9732 = vmatpush.msk.msra.mxu3 %vm4889_vm14, %v13628_v58  ;;  %9723 = vmatmul.msk.f32.vlgmr.msrb.gmra.mxu2 %vm1095_vm11, %v13901_v48  ;;  %v14386_v14 = vunpack.i.l.bf16 %v10752_v2  ;;  %v14392_v29 = vunpack.i.h.bf16 %v10752_v2 }
 0xa23   : > { %9727 = vmatmul.msk.f32.vlgmr.msra.gmra.mxu0 %vm1095_vm11, %v13901_v48  ;;  %5945 = vmatpush.msra.mxu2 %v14340_v27 }
 0xa24   : > { %5965 = vmatpush.msrb.mxu0 %v14346_v10  ;;  %5908 = vmatpush.msrb.mxu1 %v14286_v50 }
 0xa25   : > { %5928 = vmatpush.msra.mxu3 %v10718_v31  ;;  %5946 = vmatpush.msra.mxu2 %v14354_v62  ;;  %v10772_v4 = vpop.permute.xlu2 %10771 }
 0xa26   : > { %5966 = vmatpush.msrb.mxu0 %v14359_v6  ;;  %5909 = vmatpush.msrb.mxu1 %v14301_v17  ;;  %v14504_v55 = vunpack.i.l.bf16 %v10772_v4 }
 0xa27   : > { %5929 = vmatpush.msra.mxu3 %v10703_v21  ;;  %9736 = vmatpush.msk.msra.mxu2 %vm4889_vm14, %v13687_v26 }
 0xa28   : > { %9740 = vmatpush.msk.msrb.mxu0 %vm4889_vm14, %v13698_v36  ;;  %9729 = vmatpush.msk.msrb.mxu1 %vm4889_vm14, %v13516_v38 }
 0xa29   : > { %9733 = vmatpush.msk.msra.mxu3 %vm4889_vm14, %v13635_v0  ;;  %5948 = vmatpush.msra.mxu2 %v10719_v45  ;;  %v14445_v25 = vpop.permute.xlu1 %10766  ;;  %v5455_v5 = vpop.f32.mrf.mxu3 }
 0xa2a   : > { %5968 = vmatpush.msrb.mxu0 %v14340_v27  ;;  %5911 = vmatpush.msrb.mxu1 %v14279_v19  ;;  %v17083_v19 = vld [vmem:[#allocation13_spill] sm:$0xff] }
 0xa2b   : > { %5931 = vmatpush.msra.mxu3 %v14286_v50  ;;  %5949 = vmatpush.msra.mxu2 %v10704_v63  ;;  %v17084_v50 = vld [vmem:[#allocation15_spill] sm:$0xff] }
 0xa2c   : > { %5969 = vmatpush.msrb.mxu0 %v14354_v62  ;;  %5912 = vmatpush.msrb.mxu1 %v14295_v32 }
 0xa2d   : > { %5932 = vmatpush.msra.mxu3 %v14301_v17  ;;  %9737 = vmatpush.msk.msra.mxu2 %vm4889_vm14, %v13628_v58  ;;  %v14506_v15 = vpop.permute.xlu2 %10781 }
 0xa2e   : > { %9741 = vmatpush.msk.msrb.mxu0 %vm4889_vm14, %v13687_v26  ;;  %9730 = vmatpush.msk.msrb.mxu1 %vm4889_vm14, %v13527_v13  ;;  %v14399_v13 = vunpack.i.h.bf16 %v10737_v8 }
 0xa2f   : > { %9734 = vmatpush.msk.msra.mxu3 %vm4889_vm14, %v13516_v38  ;;  %9731 = vmatmul.msk.f32.vlgmr.msrb.gmra.mxu1 %vm1095_vm11, %v13901_v48  ;;  %v5435_v38 = vpop.f32.mrf.mxu1 }
 0xa30   : > { %9735 = vmatmul.msk.f32.vlgmr.msra.gmra.mxu3 %vm1095_vm11, %v13901_v48  ;;  %5951 = vmatpush.msra.mxu2 %v10718_v31  ;;  %v14511_v31 = vunpack.i.h.bf16 %v10772_v4 }
 0xa31   : > { %5971 = vmatpush.msrb.mxu0 %v10719_v45  ;;  %5985 = vmatpush.msra.mxu1 %v14386_v14  ;;  %v10787_v11 = vpop.permute.xlu1 %10786 }
 0xa32   : > { %6005 = vmatpush.msrb.mxu3 %v14392_v29  ;;  %5952 = vmatpush.msra.mxu2 %v10703_v21  ;;  %v14493_v40 = vunpack.i.l.bf16 %v10787_v11  ;;  %v14499_v17 = vunpack.i.h.bf16 %v10787_v11  ;;  %v17085_v21 = vld [vmem:[#allocation18_spill] sm:$0xff] }
 0xa33   : > { %5972 = vmatpush.msrb.mxu0 %v10704_v63  ;;  %5986 = vmatpush.msra.mxu1 %v14396_v1 }
 0xa34   : > { %6006 = vmatpush.msrb.mxu3 %v14399_v13  ;;  %9738 = vmatpush.msk.msra.mxu2 %vm4889_vm14, %v13635_v0  ;;  %v14421_v0 = vunpack.i.l.bf16 %v14172_v52 }
 0xa35   : > { %9742 = vmatpush.msk.msrb.mxu0 %vm4889_vm14, %v13628_v58  ;;  %9744 = vmatpush.msk.msra.mxu1 %vm4889_vm14, %v17078_v18  ;;  %v17080_v58 = vld [vmem:[#allocation6_spill] sm:$0xff] }
 0xa36   : > { %9748 = vmatpush.msk.msrb.mxu3 %vm4889_vm14, %v17079_v35  ;;  %9739 = vmatmul.msk.f32.vlgmr.msra.gmra.mxu2 %vm1095_vm11, %v13901_v48  ;;  %v5436_v46 = vadd.f32 %v5435_v38, %v17080_v58  ;;  %v5456_v41 = vadd.f32 %v5455_v5, %v17080_v58  ;;  %v14576_v38 = vunpack.i.l.bf16 %v14310_v53 }
 0xa37   : > { %9743 = vmatmul.msk.f32.vlgmr.msrb.gmra.mxu0 %vm1095_vm11, %v13901_v48  ;;  %6025 = vmatpush.msrb.mxu2 %v14407_v47 }
 0xa38   : > { %6045 = vmatpush.msra.mxu0 %v14414_v9  ;;  %5988 = vmatpush.msra.mxu1 %v14346_v10  ;;  %v6762_v52 = vmul.f32 0.1, %v5436_v46  ;;  %vm6698_vm5 = vcmp.ge.f32.partialorder %v5436_v46, 0.0  ;;  %v6763_v44 = vmul.f32 0.1, %v5456_v41  ;;  %vm6699_vm6 = vcmp.ge.f32.partialorder %v5456_v41, 0.0 }
 0xa39   : > { %6008 = vmatpush.msrb.mxu3 %v14386_v14  ;;  %6026 = vmatpush.msrb.mxu2 %v14421_v0  ;;  %v5495_v32 = vpop.f32.mrf.mxu0  ;;  %v10797_v51 = vpop.permute.xlu1 %10796 }
 0xa3a   : > { %6046 = vmatpush.msra.mxu0 %v14428_v20  ;;  %5989 = vmatpush.msra.mxu1 %v14359_v6  ;;  %v6826_v57 = vsel %vm6698_vm5, %v5436_v46, %v6762_v52  ;;  %v6827_v49 = vsel %vm6699_vm6, %v5456_v41, %v6763_v44  ;;  %v5496_v45 = vadd.f32 %v5495_v32, %v17080_v58  ;;  %v14597_v46 = vunpack.i.h.bf16 %v14288_v33 }
 0xa3b   : > { %6009 = vmatpush.msrb.mxu3 %v14396_v1  ;;  %9752 = vmatpush.msk.msrb.mxu2 %vm4889_vm14, %v17081_v30 }
 0xa3c   : > { %9756 = vmatpush.msk.msra.mxu0 %vm4889_vm14, %v17082_v60  ;;  %9745 = vmatpush.msk.msra.mxu1 %vm4889_vm14, %v13698_v36  ;;  %v6765_v63 = vmul.f32 0.1, %v5496_v45  ;;  %vm6701_vm7 = vcmp.ge.f32.partialorder %v5496_v45, 0.0 }
 0xa3d   : > { %9749 = vmatpush.msk.msrb.mxu3 %vm4889_vm14, %v17078_v18  ;;  %6028 = vmatpush.msrb.mxu2 %v14392_v29 }
 0xa3e   : > { %6048 = vmatpush.msra.mxu0 %v14407_v47  ;;  %5991 = vmatpush.msra.mxu1 %v14340_v27  ;;  %v6829_v27 = vsel %vm6701_vm7, %v5496_v45, %v6765_v63 }
 0xa3f   : > { %6011 = vmatpush.msrb.mxu3 %v14346_v10  ;;  %6029 = vmatpush.msrb.mxu2 %v14399_v13  ;;  %v5475_v7 = vpop.f32.mrf.mxu2  ;;  %v10792_v10 = vpop.permute.xlu2 %10791 }
 0xa40   : > { %6049 = vmatpush.msra.mxu0 %v14421_v0  ;;  %5992 = vmatpush.msra.mxu1 %v14354_v62  ;;  %v10777_v62 = vpop.permute.xlu0 %10776  ;;  %v14549_v2 = vunpack.i.l.bf16 %v10792_v10 }
 0xa41   : > { %6012 = vmatpush.msrb.mxu3 %v14359_v6  ;;  %9753 = vmatpush.msk.msrb.mxu2 %vm4889_vm14, %v17079_v35  ;;  %v14547_v6 = vunpack.i.h.bf16 %v10792_v10 }
 0xa42   : > { %9757 = vmatpush.msk.msra.mxu0 %vm4889_vm14, %v17081_v30  ;;  %6955 = vrot.lane.b32.xlu0 %v6826_v57, %s11267_s15 }
 0xa43   : > { %9746 = vmatpush.msk.msra.mxu1 %vm4889_vm14, %v13687_v26  ;;  %9750 = vmatpush.msk.msrb.mxu3 %vm4889_vm14, %v13698_v36  ;;  %v14478_v26 = vunpack.i.h.bf16 %v14348_v61  ;;  %v14481_v36 = vunpack.i.l.bf16 %v14348_v61  ;;  %v5476_v61 = vadd.f32 %v5475_v7, %v17080_v58 }
 0xa44   : > { %9747 = vmatmul.msk.f32.vlgmr.msra.gmra.mxu1 %vm1095_vm11, %v13901_v48  ;;  %9751 = vmatmul.msk.f32.vlgmr.msrb.gmra.mxu3 %vm1095_vm11, %v13901_v48 }
 0xa45   : > { %6031 = vmatpush.msrb.mxu2 %v14386_v14  ;;  %6051 = vmatpush.msra.mxu0 %v14392_v29  ;;  %v14557_v14 = vunpack.i.h.bf16 %v10777_v62  ;;  %v14559_v29 = vunpack.i.l.bf16 %v10777_v62  ;;  %vm6700_vm9 = vcmp.ge.f32.partialorder %v5476_v61, 0.0 }
 0xa46   : > { %6065 = vmatpush.msrb.mxu1 %v14469_v16  ;;  %6085 = vmatpush.msra.mxu3 %v14467_v37 }
 0xa47   : > { %6032 = vmatpush.msrb.mxu2 %v14396_v1  ;;  %6052 = vmatpush.msra.mxu0 %v14399_v13  ;;  %v6764_v1 = vmul.f32 0.1, %v5476_v61  ;;  %v14573_v13 = vunpack.i.h.bf16 %v14310_v53  ;;  %v14592_v53 = vunpack.i.l.bf16 %v14288_v33  ;;  %v17088_v33 = vld [vmem:[#allocation9_spill] sm:$0xff]  ;;  %v14618_v41 = vpop.permute.xlu2 %10806 }
 0xa48   : > { %6066 = vmatpush.msrb.mxu1 %v14481_v36  ;;  %6086 = vmatpush.msra.mxu3 %v14478_v26  ;;  %v5515_v8 = vpop.f32.mrf.mxu1 }
 0xa49   : > { %9754 = vmatpush.msk.msrb.mxu2 %vm4889_vm14, %v17078_v18  ;;  %9758 = vmatpush.msk.msra.mxu0 %vm4889_vm14, %v17079_v35  ;;  %v17087_v18 = vld [vmem:[#allocation17_spill] sm:$0xff] }
 0xa4a   : > { %9760 = vmatpush.msk.msrb.mxu1 %vm4889_vm14, %v17083_v19  ;;  %9764 = vmatpush.msk.msra.mxu3 %vm4889_vm14, %v17084_v50  ;;  %v14585_v35 = vld [vmem:[%s16950_s5] sm:$0xff] }
 0xa4b   : > { %6957 = vrot.lane.b32.xlu1 %v6827_v49, %s11267_s15  ;;  %9755 = vmatmul.msk.f32.vlgmr.msrb.gmra.mxu2 %vm1095_vm11, %v13901_v48 }
 0xa4c   : > { %9759 = vmatmul.msk.f32.vlgmr.msra.gmra.mxu0 %vm1095_vm11, %v13901_v48  ;;  %6105 = vmatpush.msra.mxu2 %v14493_v40 }
 0xa4d   : > { %6125 = vmatpush.msrb.mxu0 %v14499_v17  ;;  %6068 = vmatpush.msrb.mxu1 %v14414_v9 }
 0xa4e   : > { %6088 = vmatpush.msra.mxu3 %v14469_v16  ;;  %6106 = vmatpush.msra.mxu2 %v14504_v55 }
 0xa4f   : > { %6126 = vmatpush.msrb.mxu0 %v14511_v31  ;;  %6069 = vmatpush.msrb.mxu1 %v14428_v20  ;;  %v10827_v32 = vpop.permute.xlu2 %10826 }
 0xa50   : > { %6089 = vmatpush.msra.mxu3 %v14481_v36  ;;  %9768 = vmatpush.msk.msra.mxu2 %vm4889_vm14, %v13766_v39  ;;  %v5575_v57 = vpop.f32.mrf.mxu0  ;;  %v14669_v45 = vunpack.i.l.bf16 %v10827_v32 }
 0xa51   : > { %9772 = vmatpush.msk.msrb.mxu0 %vm4889_vm14, %v17085_v21  ;;  %9761 = vmatpush.msk.msrb.mxu1 %vm4889_vm14, %v17082_v60  ;;  %v5576_v4 = vadd.f32 %v5575_v57, %v17080_v58 }
 0xa52   : > { %9765 = vmatpush.msk.msra.mxu3 %vm4889_vm14, %v17083_v19  ;;  %6108 = vmatpush.msra.mxu2 %v14467_v37 }
 0xa53   : > { %6128 = vmatpush.msrb.mxu0 %v14493_v40  ;;  %6071 = vmatpush.msrb.mxu1 %v14407_v47  ;;  %v17086_v47 = vld [vmem:[#allocation19_spill] sm:$0xff]  ;;  %v6769_v11 = vmul.f32 0.1, %v5576_v4  ;;  %vm6705_vm13 = vcmp.ge.f32.partialorder %v5576_v4, 0.0 }
 0xa54   : > { %6091 = vmatpush.msra.mxu3 %v14414_v9  ;;  %6109 = vmatpush.msra.mxu2 %v14478_v26  ;;  %v6828_v9 = vsel %vm6700_vm9, %v5476_v61, %v6764_v1 }
 0xa55   : > { %6129 = vmatpush.msrb.mxu0 %v14504_v55  ;;  %6072 = vmatpush.msrb.mxu1 %v14421_v0 }
 0xa56   : > { %6092 = vmatpush.msra.mxu3 %v14428_v20  ;;  %9769 = vmatpush.msk.msra.mxu2 %vm4889_vm14, %v17084_v50  ;;  %v14599_v20 = vpop.permute.xlu0 %10801 }
 0xa57   : > { %9773 = vmatpush.msk.msrb.mxu0 %vm4889_vm14, %v13766_v39  ;;  %9762 = vmatpush.msk.msrb.mxu1 %vm4889_vm14, %v17081_v30  ;;  %v5535_v30 = vpop.f32.mrf.mxu3 }
 0xa58   : > { %9766 = vmatpush.msk.msra.mxu3 %vm4889_vm14, %v17082_v60  ;;  %6961 = vrot.lane.b32.xlu0 %v6829_v27, %s11267_s15  ;;  %v17089_v60 = vld [vmem:[#allocation10_spill] sm:$0xff]  ;;  %v5536_v5 = vadd.f32 %v5535_v30, %v17080_v58 }
 0xa59   : > { %9763 = vmatmul.msk.f32.vlgmr.msrb.gmra.mxu1 %vm1095_vm11, %v13901_v48  ;;  %9767 = vmatmul.msk.f32.vlgmr.msra.gmra.mxu3 %vm1095_vm11, %v13901_v48  ;;  %v5516_v48 = vadd.f32 %v5515_v8, %v17080_v58 }
 0xa5a   : > { %6111 = vmatpush.msra.mxu2 %v14469_v16  ;;  %6131 = vmatpush.msrb.mxu0 %v14467_v37  ;;  %v6767_v37 = vmul.f32 0.1, %v5536_v5  ;;  %v5555_v16 = vpop.f32.mrf.mxu2  ;;  %vm6703_vm12 = vcmp.ge.f32.partialorder %v5536_v5, 0.0 }
 0xa5b   : > { %6145 = vmatpush.msra.mxu1 %v14549_v2  ;;  %6165 = vmatpush.msrb.mxu3 %v14547_v6  ;;  %v6766_v0 = vmul.f32 0.1, %v5516_v48  ;;  %vm6702_vm10 = vcmp.ge.f32.partialorder %v5516_v48, 0.0  ;;  %v5556_v49 = vadd.f32 %v5555_v16, %v17080_v58 }
 0xa5c   : > { %6112 = vmatpush.msra.mxu2 %v14481_v36  ;;  %6132 = vmatpush.msrb.mxu0 %v14478_v26  ;;  %v14633_v26 = vunpack.i.h.bf16 %v10797_v51  ;;  %v14639_v36 = vunpack.i.l.bf16 %v10797_v51  ;;  %v14750_v51 = vunpack.i.h.bf16 %v14445_v25 }
 0xa5d   : > { %6146 = vmatpush.msra.mxu1 %v14559_v29  ;;  %6166 = vmatpush.msrb.mxu3 %v14557_v14  ;;  %v6830_v52 = vsel %vm6702_vm10, %v5516_v48, %v6766_v0  ;;  %vm6704_vm2 = vcmp.ge.f32.partialorder %v5556_v49, 0.0 }
 0xa5e   : > { %9770 = vmatpush.msk.msra.mxu2 %vm4889_vm14, %v17083_v19  ;;  %9774 = vmatpush.msk.msrb.mxu0 %vm4889_vm14, %v17084_v50  ;;  %v10812_v44 = vpop.permute.xlu0 %10811  ;;  %v14654_v19 = vunpack.i.h.bf16 %v14506_v15  ;;  %v5595_v50 = vpop.f32.mrf.mxu1 }
 0xa5f   : > { %9776 = vmatpush.msk.msra.mxu1 %vm4889_vm14, %v17086_v47  ;;  %9780 = vmatpush.msk.msrb.mxu3 %vm4889_vm14, %v17087_v18  ;;  %v14681_v27 = vunpack.i.l.bf16 %v10812_v44  ;;  %v14685_v10 = vunpack.i.h.bf16 %v10812_v44 }
 0xa60   : > { %9771 = vmatmul.msk.f32.vlgmr.msra.gmra.mxu2 %vm1095_vm11, %v14585_v35  ;;  %9775 = vmatmul.msk.f32.vlgmr.msrb.gmra.mxu0 %vm1095_vm11, %v14585_v35 }
 0xa61   : > { %6185 = vmatpush.msrb.mxu2 %v14576_v38  ;;  %6205 = vmatpush.msra.mxu0 %v14573_v13 }
 0xa62   : > { %6959 = vrot.lane.b32.xlu2 %v6828_v9, %s11267_s15  ;;  %6148 = vmatpush.msra.mxu1 %v14499_v17 }
 0xa63   : > { %6168 = vmatpush.msrb.mxu3 %v14549_v2  ;;  %6186 = vmatpush.msrb.mxu2 %v14592_v53  ;;  %v5615_v62 = vpop.f32.mrf.mxu3 }
 0xa64   : > { %6206 = vmatpush.msra.mxu0 %v14597_v46  ;;  %6149 = vmatpush.msra.mxu1 %v14511_v31  ;;  %v5616_v8 = vadd.f32 %v5615_v62, %v17080_v58 }
 0xa65   : > { %6169 = vmatpush.msrb.mxu3 %v14559_v29  ;;  %9784 = vmatpush.msk.msrb.mxu2 %vm4889_vm14, %v17088_v33 }
 0xa66   : > { %9788 = vmatpush.msk.msra.mxu0 %vm4889_vm14, %v17089_v60  ;;  %9777 = vmatpush.msk.msra.mxu1 %vm4889_vm14, %v17085_v21  ;;  %v14675_v63 = vpop.permute.xlu0 %10821  ;;  %vm6707_vm1 = vcmp.ge.f32.partialorder %v5616_v8, 0.0 }
 0xa67   : > { %9781 = vmatpush.msk.msrb.mxu3 %vm4889_vm14, %v17086_v47  ;;  %6188 = vmatpush.msrb.mxu2 %v14547_v6 }
 0xa68   : > { %6208 = vmatpush.msra.mxu0 %v14576_v38  ;;  %6963 = vrot.lane.b32.xlu1 %v6830_v52, %s11267_s15 }
 0xa69   : > { %6151 = vmatpush.msra.mxu1 %v14493_v40  ;;  %6171 = vmatpush.msrb.mxu3 %v14499_v17  ;;  %v6831_v40 = vsel %vm6703_vm12, %v5536_v5, %v6767_v37  ;;  %v6768_v17 = vmul.f32 0.1, %v5556_v49  ;;  %v14764_v37 = vunpack.i.l.bf16 %v14430_v42 }
 0xa6a   : > { %6189 = vmatpush.msrb.mxu2 %v14557_v14  ;;  %6209 = vmatpush.msra.mxu0 %v14592_v53 }
 0xa6b   : > { %6152 = vmatpush.msra.mxu1 %v14504_v55  ;;  %6172 = vmatpush.msrb.mxu3 %v14511_v31  ;;  %v6833_v55 = vsel %vm6705_vm13, %v5576_v4, %v6769_v11  ;;  %v14667_v31 = vunpack.i.h.bf16 %v10827_v32  ;;  %v6832_v7 = vsel %vm6704_vm2, %v5556_v49, %v6768_v17  ;;  %v14753_v4 = vunpack.i.l.bf16 %v14445_v25 }
 0xa6c   : > { %9785 = vmatpush.msk.msrb.mxu2 %vm4889_vm14, %v17087_v18  ;;  %9789 = vmatpush.msk.msra.mxu0 %vm4889_vm14, %v17088_v33  ;;  %v14769_v25 = vunpack.i.h.bf16 %v14430_v42  ;;  %v17093_v42 = vld [vmem:[#allocation16_spill] sm:$0xff] }
 0xa6d   : > { %9778 = vmatpush.msk.msra.mxu1 %vm4889_vm14, %v13766_v39  ;;  %9782 = vmatpush.msk.msrb.mxu3 %vm4889_vm14, %v17085_v21  ;;  %v14649_v39 = vunpack.i.l.bf16 %v14506_v15  ;;  %v5596_v15 = vadd.f32 %v5595_v50, %v17080_v58  ;;  %v17090_v21 = vld [vmem:[#allocation20_spill] sm:$0xff] }
 0xa6e   : > { %9779 = vmatmul.msk.f32.vlgmr.msra.gmra.mxu1 %vm1095_vm11, %v14585_v35  ;;  %9783 = vmatmul.msk.f32.vlgmr.msrb.gmra.mxu3 %vm1095_vm11, %v14585_v35  ;;  %v10832_v1 = vpop.permute.xlu0 %10831 }
 0xa6f   : > { %6191 = vmatpush.msrb.mxu2 %v14549_v2  ;;  %6211 = vmatpush.msra.mxu0 %v14547_v6  ;;  %v6770_v61 = vmul.f32 0.1, %v5596_v15  ;;  %vm6706_vm15 = vcmp.ge.f32.partialorder %v5596_v15, 0.0  ;;  %v17091_v6 = vld [vmem:[#allocation24_spill] sm:$0xff]  ;;  %v17092_v2 = vld [vmem:[#allocation23_spill] sm:$0xff]  ;;  %v14723_v9 = vunpack.i.l.bf16 %v10832_v1 }
 0xa70   : > { %6225 = vmatpush.msrb.mxu1 %v14639_v36  ;;  %6245 = vmatpush.msra.mxu3 %v14633_v26  ;;  %v5675_v52 = vpop.f32.mrf.mxu1 }
 0xa71   : > { %6965 = vrot.lane.b32.xlu2 %v6831_v40, %s11267_s15  ;;  %6192 = vmatpush.msrb.mxu2 %v14559_v29  ;;  %v5655_v29 = vpop.f32.mrf.mxu0  ;;  %v5676_v57 = vadd.f32 %v5675_v52, %v17080_v58 }
 0xa72   : > { %6212 = vmatpush.msra.mxu0 %v14557_v14  ;;  %6226 = vmatpush.msrb.mxu1 %v14649_v39  ;;  %v6834_v14 = vsel %vm6706_vm15, %v5596_v15, %v6770_v61  ;;  %v5656_v48 = vadd.f32 %v5655_v29, %v17080_v58  ;;  %v17095_v29 = vld [vmem:[#allocation26_spill] sm:$0xff] }
 0xa73   : > { %6246 = vmatpush.msra.mxu3 %v14654_v19  ;;  %6969 = vrot.lane.b32.xlu1 %v6833_v55, %s11267_s15  ;;  %v6774_v44 = vmul.f32 0.1, %v5676_v57  ;;  %vm6710_vm4 = vcmp.ge.f32.partialorder %v5676_v57, 0.0 }
 0xa74   : > { %9786 = vmatpush.msk.msrb.mxu2 %vm4889_vm14, %v17086_v47  ;;  %9790 = vmatpush.msk.msra.mxu0 %vm4889_vm14, %v17087_v18  ;;  %v6771_v47 = vmul.f32 0.1, %v5616_v8  ;;  %v5635_v18 = vpop.f32.mrf.mxu2  ;;  %vm6709_vm3 = vcmp.ge.f32.partialorder %v5656_v48, 0.0 }
 0xa75   : > { %9792 = vmatpush.msk.msrb.mxu1 %vm4889_vm14, %v13798_v22  ;;  %9796 = vmatpush.msk.msra.mxu3 %vm4889_vm14, %v17090_v21  ;;  %v5636_v0 = vadd.f32 %v5635_v18, %v17080_v58  ;;  %v6838_v49 = vsel %vm6710_vm4, %v5676_v57, %v6774_v44 }
 0xa76   : > { %9787 = vmatmul.msk.f32.vlgmr.msrb.gmra.mxu2 %vm1095_vm11, %v14585_v35  ;;  %9791 = vmatmul.msk.f32.vlgmr.msra.gmra.mxu0 %vm1095_vm11, %v14585_v35 }
 0xa77   : > { %6265 = vmatpush.msra.mxu2 %v14669_v45  ;;  %6285 = vmatpush.msrb.mxu0 %v14667_v31  ;;  %vm6708_vm8 = vcmp.ge.f32.partialorder %v5636_v0, 0.0 }
 0xa78   : > { %6228 = vmatpush.msrb.mxu1 %v14573_v13  ;;  %6248 = vmatpush.msra.mxu3 %v14639_v36 }
 0xa79   : > { %6967 = vrot.lane.b32.xlu0 %v6832_v7, %s11267_s15  ;;  %6266 = vmatpush.msra.mxu2 %v14681_v27  ;;  %v5735_v40 = vpop.f32.mrf.mxu0 }
 0xa7a   : > { %6286 = vmatpush.msrb.mxu0 %v14685_v10  ;;  %6229 = vmatpush.msrb.mxu1 %v14597_v46  ;;  %v5736_v50 = vadd.f32 %v5735_v40, %v17080_v58  ;;  %v14936_v40 = vunpack.i.l.bf16 %v14599_v20 }
 0xa7b   : > { %6249 = vmatpush.msra.mxu3 %v14649_v39  ;;  %9800 = vmatpush.msk.msra.mxu2 %vm4889_vm14, %v17091_v6 }
 0xa7c   : > { %9804 = vmatpush.msk.msrb.mxu0 %vm4889_vm14, %v17092_v2  ;;  %9793 = vmatpush.msk.msrb.mxu1 %vm4889_vm14, %v17089_v60  ;;  %vm6713_vm6 = vcmp.ge.f32.partialorder %v5736_v50, 0.0 }
 0xa7d   : > { %9797 = vmatpush.msk.msra.mxu3 %vm4889_vm14, %v13798_v22  ;;  %6268 = vmatpush.msra.mxu2 %v14633_v26  ;;  %v5715_v17 = vpop.f32.mrf.mxu2 }
 0xa7e   : > { %6288 = vmatpush.msrb.mxu0 %v14669_v45  ;;  %6231 = vmatpush.msrb.mxu1 %v14576_v38  ;;  %v14717_v38 = vunpack.i.h.bf16 %v10832_v1  ;;  %v17096_v1 = vld [vmem:[#allocation25_spill] sm:$0xff] }
 0xa7f   : > { %6251 = vmatpush.msra.mxu3 %v14573_v13  ;;  %6971 = vrot.lane.b32.xlu2 %v6834_v14, %s11267_s15  ;;  %v10817_v13 = vpop.permute.xlu1 %10816 }
 0xa80   : > { %6269 = vmatpush.msra.mxu2 %v14654_v19  ;;  %6289 = vmatpush.msrb.mxu0 %v14681_v27  ;;  %v14732_v30 = vunpack.i.l.bf16 %v10817_v13 }
 0xa81   : > { %6232 = vmatpush.msrb.mxu1 %v14592_v53  ;;  %6252 = vmatpush.msra.mxu3 %v14597_v46  ;;  %v6773_v53 = vmul.f32 0.1, %v5656_v48  ;;  %v6835_v46 = vsel %vm6707_vm1, %v5616_v8, %v6771_v47 }
 0xa82   : > { %9801 = vmatpush.msk.msra.mxu2 %vm4889_vm14, %v17090_v21  ;;  %9805 = vmatpush.msk.msrb.mxu0 %vm4889_vm14, %v17091_v6 }
 0xa83   : > { %9794 = vmatpush.msk.msrb.mxu1 %vm4889_vm14, %v17088_v33  ;;  %9798 = vmatpush.msk.msra.mxu3 %vm4889_vm14, %v17089_v60  ;;  %v14736_v33 = vunpack.i.h.bf16 %v10817_v13  ;;  %v6772_v60 = vmul.f32 0.1, %v5636_v0  ;;  %v6837_v5 = vsel %vm6709_vm3, %v5656_v48, %v6773_v53 }
 0xa84   : > { %9795 = vmatmul.msk.f32.vlgmr.msrb.gmra.mxu1 %vm1095_vm11, %v14585_v35  ;;  %9799 = vmatmul.msk.f32.vlgmr.msra.gmra.mxu3 %vm1095_vm11, %v14585_v35  ;;  %v5755_v61 = vpop.f32.mrf.mxu1 }
 0xa85   : > { %6271 = vmatpush.msra.mxu2 %v14639_v36  ;;  %6291 = vmatpush.msrb.mxu0 %v14633_v26  ;;  %v5695_v26 = vpop.f32.mrf.mxu3  ;;  %v17094_v36 = vld [vmem:[#allocation14_spill] sm:$0xff] }
 0xa86   : > { %6305 = vmatpush.msra.mxu1 %v14723_v9  ;;  %6325 = vmatpush.msrb.mxu3 %v14717_v38  ;;  %v5696_v11 = vadd.f32 %v5695_v26, %v17080_v58 }
 0xa87   : > { %6973 = vrot.lane.b32.xlu0 %v6835_v46, %s11267_s15  ;;  %6272 = vmatpush.msra.mxu2 %v14649_v39  ;;  %v14771_v16 = vpop.permute.xlu1 %5407  ;;  %v14790_v39 = vpop.permute.xlu0 %5404 }
 0xa88   : > { %6292 = vmatpush.msrb.mxu0 %v14654_v19  ;;  %6306 = vmatpush.msra.mxu1 %v14732_v30  ;;  %v10837_v19 = vpop.permute.xlu2 %10836  ;;  %v6775_v32 = vmul.f32 0.1, %v5696_v11  ;;  %vm6711_vm5 = vcmp.ge.f32.partialorder %v5696_v11, 0.0 }
 0xa89   : > { %6326 = vmatpush.msrb.mxu3 %v14736_v33  ;;  %6977 = vrot.lane.b32.xlu2 %v6837_v5, %s11267_s15  ;;  %v14805_v15 = vunpack.i.h.bf16 %v10837_v19 }
 0xa8a   : > { %9802 = vmatpush.msk.msra.mxu2 %vm4889_vm14, %v13798_v22  ;;  %9806 = vmatpush.msk.msrb.mxu0 %vm4889_vm14, %v17090_v21  ;;  %v6836_v22 = vsel %vm6708_vm8, %v5636_v0, %v6772_v60  ;;  %v5716_v21 = vadd.f32 %v5715_v17, %v17080_v58  ;;  %v6839_v7 = vsel %vm6711_vm5, %v5696_v11, %v6775_v32  ;;  %v14925_v11 = vunpack.i.l.bf16 %v14618_v41  ;;  %v17097_v32 = vld [vmem:[#allocation22_spill] sm:$0xff] }
 0xa8b   : > { %9808 = vmatpush.msk.msra.mxu1 %vm4889_vm14, %v13866_v43  ;;  %9812 = vmatpush.msk.msrb.mxu3 %vm4889_vm14, %v13875_v23 }
 0xa8c   : > { %9803 = vmatmul.msk.f32.vlgmr.msra.gmra.mxu2 %vm1095_vm11, %v14585_v35  ;;  %9807 = vmatmul.msk.f32.vlgmr.msrb.gmra.mxu0 %vm1095_vm11, %v14585_v35  ;;  %vm6712_vm7 = vcmp.ge.f32.partialorder %v5716_v21, 0.0  ;;  %v5815_v53 = vpop.f32.mrf.mxu0 }
 0xa8d   : > { %6345 = vmatpush.msrb.mxu2 %v14753_v4  ;;  %6365 = vmatpush.msra.mxu0 %v14750_v51  ;;  %v5775_v13 = vpop.f32.mrf.mxu3  ;;  %v5816_v46 = vadd.f32 %v5815_v53, %v17080_v58 }
 0xa8e   : > { %6308 = vmatpush.msra.mxu1 %v14667_v31  ;;  %6328 = vmatpush.msrb.mxu3 %v14723_v9 }
 0xa8f   : > { %6975 = vrot.lane.b32.xlu1 %v6836_v22, %s11267_s15  ;;  %6346 = vmatpush.msrb.mxu2 %v14764_v37  ;;  %v10842_v55 = vpop.permute.xlu1 %10841  ;;  %v10857_v62 = vpop.permute.xlu0 %10856  ;;  %v6781_v57 = vmul.f32 0.1, %v5816_v46  ;;  %vm6717_vm12 = vcmp.ge.f32.partialorder %v5816_v46, 0.0 }
 0xa90   : > { %6366 = vmatpush.msra.mxu0 %v14769_v25  ;;  %6309 = vmatpush.msra.mxu1 %v14685_v10  ;;  %v14839_v8 = vunpack.i.h.bf16 %v10857_v62  ;;  %v14841_v14 = vunpack.i.l.bf16 %v10857_v62  ;;  %v14857_v47 = vunpack.i.h.bf16 %v10842_v55  ;;  %v10847_v52 = vpop.permute.xlu2 %10846 }
 0xa91   : > { %6329 = vmatpush.msrb.mxu3 %v14732_v30  ;;  %9816 = vmatpush.msk.msrb.mxu2 %vm4889_vm14, %v17093_v42  ;;  %v14904_v22 = vunpack.i.l.bf16 %v10847_v52  ;;  %v6845_v26 = vsel %vm6717_vm12, %v5816_v46, %v6781_v57 }
 0xa92   : > { %9820 = vmatpush.msk.msra.mxu0 %vm4889_vm14, %v17094_v36  ;;  %9809 = vmatpush.msk.msra.mxu1 %vm4889_vm14, %v17092_v2 }
 0xa93   : > { %9813 = vmatpush.msk.msrb.mxu3 %vm4889_vm14, %v13866_v43  ;;  %6348 = vmatpush.msrb.mxu2 %v14717_v38 }
 0xa94   : > { %6368 = vmatpush.msra.mxu0 %v14753_v4  ;;  %6311 = vmatpush.msra.mxu1 %v14669_v45  ;;  %v6777_v45 = vmul.f32 0.1, %v5736_v50 }
 0xa95   : > { %6331 = vmatpush.msrb.mxu3 %v14667_v31  ;;  %6979 = vrot.lane.b32.xlu0 %v6838_v49, %s11267_s15  ;;  %v14811_v31 = vunpack.i.l.bf16 %v10837_v19 }
 0xa96   : > { %6349 = vmatpush.msrb.mxu2 %v14736_v33  ;;  %6369 = vmatpush.msra.mxu0 %v14764_v37 }
 0xa97   : > { %6312 = vmatpush.msra.mxu1 %v14681_v27  ;;  %6332 = vmatpush.msrb.mxu3 %v14685_v10  ;;  %v14821_v27 = vunpack.i.l.bf16 %v14675_v63  ;;  %v14826_v10 = vunpack.i.h.bf16 %v14675_v63  ;;  %v5756_v63 = vadd.f32 %v5755_v61, %v17080_v58  ;;  %v14847_v48 = vpop.permute.xlu1 %10851 }
 0xa98   : > { %9817 = vmatpush.msk.msrb.mxu2 %vm4889_vm14, %v13875_v23  ;;  %9821 = vmatpush.msk.msra.mxu0 %vm4889_vm14, %v17093_v42 }
 0xa99   : > { %9810 = vmatpush.msk.msra.mxu1 %vm4889_vm14, %v17091_v6  ;;  %9814 = vmatpush.msk.msrb.mxu3 %vm4889_vm14, %v17092_v2  ;;  %v6776_v6 = vmul.f32 0.1, %v5716_v21  ;;  %v6841_v2 = vsel %vm6713_vm6, %v5736_v50, %v6777_v45  ;;  %v6778_v18 = vmul.f32 0.1, %v5756_v63  ;;  %vm6714_vm9 = vcmp.ge.f32.partialorder %v5756_v63, 0.0 }
 0xa9a   : > { %9811 = vmatmul.msk.f32.vlgmr.msra.gmra.mxu1 %vm1095_vm11, %v14585_v35  ;;  %9815 = vmatmul.msk.f32.vlgmr.msrb.gmra.mxu3 %vm1095_vm11, %v14585_v35 }
 0xa9b   : > { %6351 = vmatpush.msrb.mxu2 %v14723_v9  ;;  %6371 = vmatpush.msra.mxu0 %v14717_v38  ;;  %v5776_v38 = vadd.f32 %v5775_v13, %v17080_v58  ;;  %v6842_v9 = vsel %vm6714_vm9, %v5756_v63, %v6778_v18 }
 0xa9c   : > { %6385 = vmatpush.msrb.mxu1 %v14811_v31  ;;  %6405 = vmatpush.msra.mxu3 %v14805_v15 }
 0xa9d   : > { %6981 = vrot.lane.b32.xlu1 %v6839_v7, %s11267_s15  ;;  %6352 = vmatpush.msrb.mxu2 %v14732_v30  ;;  %v6779_v30 = vmul.f32 0.1, %v5776_v38  ;;  %vm6715_vm10 = vcmp.ge.f32.partialorder %v5776_v38, 0.0 }
 0xa9e   : > { %6372 = vmatpush.msra.mxu0 %v14736_v33  ;;  %6386 = vmatpush.msrb.mxu1 %v14821_v27  ;;  %v5795_v33 = vpop.f32.mrf.mxu2 }
 0xa9f   : > { %6406 = vmatpush.msra.mxu3 %v14826_v10  ;;  %6985 = vrot.lane.b32.xlu0 %v6841_v2, %s11267_s15  ;;  %v10862_v0 = vpop.permute.xlu1 %10861  ;;  %v5855_v50 = vpop.f32.mrf.mxu3 }
 0xaa0   : > { %9818 = vmatpush.msk.msrb.mxu2 %vm4889_vm14, %v13866_v43  ;;  %9822 = vmatpush.msk.msra.mxu0 %vm4889_vm14, %v13875_v23  ;;  %v6840_v43 = vsel %vm6712_vm7, %v5716_v21, %v6776_v6  ;;  %v14853_v23 = vunpack.i.l.bf16 %v10842_v55  ;;  %v14889_v60 = vunpack.i.h.bf16 %v10862_v0  ;;  %v14895_v5 = vunpack.i.l.bf16 %v10862_v0 }
 0xaa1   : > { %9824 = vmatpush.msk.msrb.mxu1 %vm4889_vm14, %v17095_v29  ;;  %9828 = vmatpush.msk.msra.mxu3 %vm4889_vm14, %v17096_v1  ;;  %v5856_v17 = vadd.f32 %v5855_v50, %v17080_v58 }
 0xaa2   : > { %9819 = vmatmul.msk.f32.vlgmr.msrb.gmra.mxu2 %vm1095_vm11, %v14585_v35  ;;  %9823 = vmatmul.msk.f32.vlgmr.msra.gmra.mxu0 %vm1095_vm11, %v14585_v35 }
 0xaa3   : > { %6425 = vmatpush.msra.mxu2 %v14841_v14  ;;  %6445 = vmatpush.msrb.mxu0 %v14839_v8  ;;  %v6783_v21 = vmul.f32 0.1, %v5856_v17  ;;  %vm6719_vm15 = vcmp.ge.f32.partialorder %v5856_v17, 0.0 }
 0xaa4   : > { %6388 = vmatpush.msrb.mxu1 %v14750_v51  ;;  %6408 = vmatpush.msra.mxu3 %v14811_v31 }
 0xaa5   : > { %6983 = vrot.lane.b32.xlu2 %v6840_v43, %s11267_s15  ;;  %6426 = vmatpush.msra.mxu2 %v14853_v23  ;;  %v6847_v6 = vsel %vm6719_vm15, %v5856_v17, %v6783_v21  ;;  %v17104_v17 = vld [vmem:[#allocation5_spill] sm:$0xff] }
 0xaa6   : > { %6446 = vmatpush.msrb.mxu0 %v14857_v47  ;;  %6389 = vmatpush.msrb.mxu1 %v14769_v25  ;;  %v5875_v7 = vpop.f32.mrf.mxu2 }
 0xaa7   : > { %6409 = vmatpush.msra.mxu3 %v14821_v27  ;;  %9832 = vmatpush.msk.msra.mxu2 %vm4889_vm14, %v13935_v28  ;;  %v5876_v62 = vadd.f32 %v5875_v7, %v17080_v58  ;;  %v10882_v63 = vpop.permute.xlu1 %10881 }
 0xaa8   : > { %9836 = vmatpush.msk.msrb.mxu0 %vm4889_vm14, %v13948_v12  ;;  %9825 = vmatpush.msk.msrb.mxu1 %vm4889_vm14, %v17094_v36  ;;  %v15009_v43 = vunpack.i.l.bf16 %v10882_v63 }
 0xaa9   : > { %9829 = vmatpush.msk.msra.mxu3 %vm4889_vm14, %v17095_v29  ;;  %6428 = vmatpush.msra.mxu2 %v14805_v15  ;;  %vm6720_vm3 = vcmp.ge.f32.partialorder %v5876_v62, 0.0 }
 0xaaa   : > { %6448 = vmatpush.msrb.mxu0 %v14841_v14  ;;  %6391 = vmatpush.msrb.mxu1 %v14753_v4  ;;  %v6843_v4 = vsel %vm6715_vm10, %v5776_v38, %v6779_v30  ;;  %v17100_v38 = vld [vmem:[#allocation31_spill] sm:$0xff] }
 0xaab   : > { %6411 = vmatpush.msra.mxu3 %v14750_v51  ;;  %6987 = vrot.lane.b32.xlu1 %v6842_v9, %s11267_s15  ;;  %v5796_v51 = vadd.f32 %v5795_v33, %v17080_v58 }
 0xaac   : > { %6429 = vmatpush.msra.mxu2 %v14826_v10  ;;  %6449 = vmatpush.msrb.mxu0 %v14853_v23 }
 0xaad   : > { %6392 = vmatpush.msrb.mxu1 %v14764_v37  ;;  %6412 = vmatpush.msra.mxu3 %v14769_v25  ;;  %v14908_v37 = vunpack.i.h.bf16 %v10847_v52  ;;  %v5835_v25 = vpop.f32.mrf.mxu1  ;;  %v6780_v44 = vmul.f32 0.1, %v5796_v51  ;;  %vm6716_vm13 = vcmp.ge.f32.partialorder %v5796_v51, 0.0 }
 0xaae   : > { %9833 = vmatpush.msk.msra.mxu2 %vm4889_vm14, %v17096_v1  ;;  %9837 = vmatpush.msk.msrb.mxu0 %vm4889_vm14, %v13935_v28 }
 0xaaf   : > { %9826 = vmatpush.msk.msrb.mxu1 %vm4889_vm14, %v17093_v42  ;;  %9830 = vmatpush.msk.msra.mxu3 %vm4889_vm14, %v17094_v36  ;;  %v5836_v42 = vadd.f32 %v5835_v25, %v17080_v58  ;;  %v14922_v36 = vunpack.i.h.bf16 %v14618_v41  ;;  %v6844_v49 = vsel %vm6716_vm13, %v5796_v51, %v6780_v44  ;;  %v14941_v41 = vunpack.i.h.bf16 %v14599_v20  ;;  %v17098_v20 = vld [vmem:[#allocation21_spill] sm:$0xff] }
 0xab0   : > { %9827 = vmatmul.msk.f32.vlgmr.msrb.gmra.mxu1 %vm1095_vm11, %v14585_v35  ;;  %9831 = vmatmul.msk.f32.vlgmr.msra.gmra.mxu3 %vm1095_vm11, %v14585_v35 }
 0xab1   : > { %6431 = vmatpush.msra.mxu2 %v14811_v31  ;;  %6451 = vmatpush.msrb.mxu0 %v14805_v15  ;;  %v6782_v19 = vmul.f32 0.1, %v5836_v42  ;;  %vm6718_vm2 = vcmp.ge.f32.partialorder %v5836_v42, 0.0  ;;  %v5895_v15 = vpop.f32.mrf.mxu0  ;;  %v10867_v31 = vpop.permute.xlu0 %10866 }
 0xab2   : > { %6465 = vmatpush.msra.mxu1 %v14895_v5  ;;  %6485 = vmatpush.msrb.mxu3 %v14889_v60  ;;  %v5896_v45 = vadd.f32 %v5895_v15, %v17080_v58 }
 0xab3   : > { %6989 = vrot.lane.b32.xlu2 %v6843_v4, %s11267_s15  ;;  %6432 = vmatpush.msra.mxu2 %v14821_v27  ;;  %v6846_v55 = vsel %vm6718_vm2, %v5836_v42, %v6782_v19  ;;  %v14973_v27 = vunpack.i.h.bf16 %v10867_v31  ;;  %v5935_v13 = vpop.f32.mrf.mxu3  ;;  %v17102_v19 = vld [vmem:[#allocation28_spill] sm:$0xff] }
 0xab4   : > { %6452 = vmatpush.msrb.mxu0 %v14826_v10  ;;  %6466 = vmatpush.msra.mxu1 %v14904_v22  ;;  %v14979_v10 = vunpack.i.l.bf16 %v10867_v31  ;;  %v6785_v61 = vmul.f32 0.1, %v5896_v45  ;;  %vm6721_vm1 = vcmp.ge.f32.partialorder %v5896_v45, 0.0  ;;  %v5936_v9 = vadd.f32 %v5935_v13, %v17080_v58 }
 0xab5   : > { %6486 = vmatpush.msrb.mxu3 %v14908_v37  ;;  %6993 = vrot.lane.b32.xlu1 %v6845_v26, %s11267_s15  ;;  %v5915_v2 = vpop.f32.mrf.mxu1 }
 0xab6   : > { %9834 = vmatpush.msk.msra.mxu2 %vm4889_vm14, %v17095_v29  ;;  %9838 = vmatpush.msk.msrb.mxu0 %vm4889_vm14, %v17096_v1  ;;  %v10872_v29 = vpop.permute.xlu2 %10871  ;;  %v5916_v1 = vadd.f32 %v5915_v2, %v17080_v58  ;;  %v6787_v33 = vmul.f32 0.1, %v5936_v9  ;;  %vm6723_vm4 = vcmp.ge.f32.partialorder %v5936_v9, 0.0 }
 0xab7   : > { %9840 = vmatpush.msk.msra.mxu1 %vm4889_vm14, %v13941_v3  ;;  %9844 = vmatpush.msk.msrb.mxu3 %vm4889_vm14, %v13927_v54 }
 0xab8   : > { %9835 = vmatmul.msk.f32.vlgmr.msra.gmra.mxu2 %vm1095_vm11, %v14585_v35  ;;  %9839 = vmatmul.msk.f32.vlgmr.msrb.gmra.mxu0 %vm1095_vm11, %v14585_v35  ;;  %v6786_v18 = vmul.f32 0.1, %v5916_v1  ;;  %vm6722_vm8 = vcmp.ge.f32.partialorder %v5916_v1, 0.0 }
 0xab9   : > { %6505 = vmatpush.msrb.mxu2 %v14925_v11  ;;  %6525 = vmatpush.msra.mxu0 %v14922_v36  ;;  %v5975_v0 = vpop.f32.mrf.mxu0  ;;  %v5955_v52 = vpop.f32.mrf.mxu2 }
 0xaba   : > { %6468 = vmatpush.msra.mxu1 %v14839_v8  ;;  %6488 = vmatpush.msrb.mxu3 %v14895_v5  ;;  %v6850_v53 = vsel %vm6722_vm8, %v5916_v1, %v6786_v18  ;;  %v5976_v30 = vadd.f32 %v5975_v0, %v17080_v58  ;;  %v5956_v4 = vadd.f32 %v5955_v52, %v17080_v58 }
 0xabb   : > { %6991 = vrot.lane.b32.xlu0 %v6844_v49, %s11267_s15  ;;  %6506 = vmatpush.msrb.mxu2 %v14936_v40  ;;  %v17101_v49 = vld [vmem:[#allocation27_spill] sm:$0xff] }
 0xabc   : > { %6526 = vmatpush.msra.mxu0 %v14941_v41  ;;  %6469 = vmatpush.msra.mxu1 %v14857_v47  ;;  %v6789_v51 = vmul.f32 0.1, %v5976_v30  ;;  %vm6725_vm5 = vcmp.ge.f32.partialorder %v5976_v30, 0.0  ;;  %v6788_v26 = vmul.f32 0.1, %v5956_v4  ;;  %vm6724_vm6 = vcmp.ge.f32.partialorder %v5956_v4, 0.0 }
 0xabd   : > { %6489 = vmatpush.msrb.mxu3 %v14904_v22  ;;  %9848 = vmatpush.msk.msrb.mxu2 %vm4889_vm14, %v17097_v32 }
 0xabe   : > { %9852 = vmatpush.msk.msra.mxu0 %vm4889_vm14, %v17098_v20  ;;  %9841 = vmatpush.msk.msra.mxu1 %vm4889_vm14, %v13948_v12  ;;  %v10887_v46 = vpop.permute.xlu2 %10886  ;;  %v6853_v42 = vsel %vm6725_vm5, %v5976_v30, %v6789_v51 }
 0xabf   : > { %9845 = vmatpush.msk.msrb.mxu3 %vm4889_vm14, %v13941_v3  ;;  %6508 = vmatpush.msrb.mxu2 %v14889_v60  ;;  %v15061_v57 = vunpack.i.l.bf16 %v10887_v46 }
 0xac0   : > { %6528 = vmatpush.msra.mxu0 %v14925_v11  ;;  %6471 = vmatpush.msra.mxu1 %v14841_v14  ;;  %v6849_v14 = vsel %vm6721_vm1, %v5896_v45, %v6785_v61 }
 0xac1   : > { %6491 = vmatpush.msrb.mxu3 %v14839_v8  ;;  %6995 = vrot.lane.b32.xlu2 %v6846_v55, %s11267_s15  ;;  %v6784_v8 = vmul.f32 0.1, %v5876_v62  ;;  %v5995_v44 = vpop.f32.mrf.mxu1 }
 0xac2   : > { %6509 = vmatpush.msrb.mxu2 %v14908_v37  ;;  %6529 = vmatpush.msra.mxu0 %v14936_v40 }
 0xac3   : > { %6472 = vmatpush.msra.mxu1 %v14853_v23  ;;  %6492 = vmatpush.msrb.mxu3 %v14857_v47  ;;  %v17099_v23 = vld [vmem:[#allocation30_spill] sm:$0xff]  ;;  %v15023_v47 = vunpack.i.h.bf16 %v10872_v29 }
 0xac4   : > { %9849 = vmatpush.msk.msrb.mxu2 %vm4889_vm14, %v13927_v54  ;;  %9853 = vmatpush.msk.msra.mxu0 %vm4889_vm14, %v17097_v32 }
 0xac5   : > { %9842 = vmatpush.msk.msra.mxu1 %vm4889_vm14, %v13935_v28  ;;  %9846 = vmatpush.msk.msrb.mxu3 %vm4889_vm14, %v13948_v12  ;;  %v14989_v28 = vunpack.i.l.bf16 %v14847_v48  ;;  %v14994_v12 = vunpack.i.h.bf16 %v14847_v48  ;;  %v15007_v48 = vunpack.i.h.bf16 %v10882_v63 }
 0xac6   : > { %9843 = vmatmul.msk.f32.vlgmr.msra.gmra.mxu1 %vm1095_vm11, %v14585_v35  ;;  %9847 = vmatmul.msk.f32.vlgmr.msrb.gmra.mxu3 %vm1095_vm11, %v14585_v35 }
 0xac7   : > { %6511 = vmatpush.msrb.mxu2 %v14895_v5  ;;  %6531 = vmatpush.msra.mxu0 %v14889_v60  ;;  %v15055_v60 = vunpack.i.h.bf16 %v10887_v46  ;;  %v10877_v5 = vpop.permute.xlu0 %10876 }
 0xac8   : > { %6545 = vmatpush.msrb.mxu1 %v14979_v10  ;;  %6565 = vmatpush.msra.mxu3 %v14973_v27  ;;  %v15074_v25 = vunpack.i.h.bf16 %v10877_v5 }
 0xac9   : > { %6997 = vrot.lane.b32.xlu0 %v6847_v6, %s11267_s15  ;;  %6512 = vmatpush.msrb.mxu2 %v14904_v22  ;;  %v6851_v22 = vsel %vm6723_vm4, %v5936_v9, %v6787_v33  ;;  %v6055_v55 = vpop.f32.mrf.mxu0 }
 0xaca   : > { %6532 = vmatpush.msra.mxu0 %v14908_v37  ;;  %6546 = vmatpush.msrb.mxu1 %v14989_v28  ;;  %v15070_v37 = vunpack.i.l.bf16 %v10877_v5  ;;  %v6056_v45 = vadd.f32 %v6055_v55, %v17080_v58 }
 0xacb   : > { %6566 = vmatpush.msra.mxu3 %v14994_v12  ;;  %7001 = vrot.lane.b32.xlu2 %v6849_v14, %s11267_s15 }
 0xacc   : > { %9850 = vmatpush.msk.msrb.mxu2 %vm4889_vm14, %v13941_v3  ;;  %9854 = vmatpush.msk.msra.mxu0 %vm4889_vm14, %v13927_v54  ;;  %v6848_v3 = vsel %vm6720_vm3, %v5876_v62, %v6784_v8  ;;  %v15019_v54 = vunpack.i.l.bf16 %v10872_v29  ;;  %v6793_v61 = vmul.f32 0.1, %v6056_v45  ;;  %vm6729_vm12 = vcmp.ge.f32.partialorder %v6056_v45, 0.0  ;;  %v11201_v8 = vld [vmem:[%s16950_s5] sm:$0xff] }
 0xacd   : > { %9856 = vmatpush.msk.msrb.mxu1 %vm4889_vm14, %v17099_v23  ;;  %9860 = vmatpush.msk.msra.mxu3 %vm4889_vm14, %v13987_v56 }
 0xace   : > { %9851 = vmatmul.msk.f32.vlgmr.msrb.gmra.mxu2 %vm1095_vm11, %v14585_v35  ;;  %9855 = vmatmul.msk.f32.vlgmr.msra.gmra.mxu0 %vm1095_vm11, %v14585_v35 }
 0xacf   : > { %6585 = vmatpush.msra.mxu2 %v15009_v43  ;;  %6605 = vmatpush.msrb.mxu0 %v15007_v48 }
 0xad0   : > { %6548 = vmatpush.msrb.mxu1 %v14922_v36  ;;  %6568 = vmatpush.msra.mxu3 %v14979_v10 }
 0xad1   : > { %6999 = vrot.lane.b32.xlu1 %v6848_v3, %s11267_s15  ;;  %6586 = vmatpush.msra.mxu2 %v15019_v54 }
 0xad2   : > { %6606 = vmatpush.msrb.mxu0 %v15023_v47  ;;  %6549 = vmatpush.msrb.mxu1 %v14941_v41 }
 0xad3   : > { %6569 = vmatpush.msra.mxu3 %v14989_v28  ;;  %9864 = vmatpush.msk.msra.mxu2 %vm4889_vm14, %v13991_v59 }
 0xad4   : > { %9868 = vmatpush.msk.msrb.mxu0 %vm4889_vm14, %v17100_v38  ;;  %9857 = vmatpush.msk.msrb.mxu1 %vm4889_vm14, %v17098_v20 }
 0xad5   : > { %9861 = vmatpush.msk.msra.mxu3 %vm4889_vm14, %v17099_v23  ;;  %6588 = vmatpush.msra.mxu2 %v14973_v27 }
 0xad6   : > { %6608 = vmatpush.msrb.mxu0 %v15009_v43  ;;  %6551 = vmatpush.msrb.mxu1 %v14925_v11  ;;  %v6852_v11 = vsel %vm6724_vm6, %v5956_v4, %v6788_v26  ;;  %v6075_v7 = vpop.f32.mrf.mxu1 }
 0xad7   : > { %6571 = vmatpush.msra.mxu3 %v14922_v36  ;;  %7003 = vrot.lane.b32.xlu0 %v6850_v53, %s11267_s15  ;;  %v5996_v36 = vadd.f32 %v5995_v44, %v17080_v58 }
 0xad8   : > { %6589 = vmatpush.msra.mxu2 %v14994_v12  ;;  %6609 = vmatpush.msrb.mxu0 %v15019_v54 }
 0xad9   : > { %6552 = vmatpush.msrb.mxu1 %v14936_v40  ;;  %6572 = vmatpush.msra.mxu3 %v14941_v41  ;;  %v6790_v40 = vmul.f32 0.1, %v5996_v36  ;;  %v6035_v41 = vpop.f32.mrf.mxu2  ;;  %vm6726_vm7 = vcmp.ge.f32.partialorder %v5996_v36, 0.0 }
 0xada   : > { %9865 = vmatpush.msk.msra.mxu2 %vm4889_vm14, %v13987_v56  ;;  %9869 = vmatpush.msk.msrb.mxu0 %vm4889_vm14, %v13991_v59 }
 0xadb   : > { %9858 = vmatpush.msk.msrb.mxu1 %vm4889_vm14, %v17097_v32  ;;  %9862 = vmatpush.msk.msra.mxu3 %vm4889_vm14, %v17098_v20  ;;  %v17103_v32 = vld [vmem:[#allocation29_spill] sm:$0xff]  ;;  %v6036_v20 = vadd.f32 %v6035_v41, %v17080_v58  ;;  %v6854_v15 = vsel %vm6726_vm7, %v5996_v36, %v6790_v40 }
 0xadc   : > { %9859 = vmatmul.msk.f32.vlgmr.msrb.gmra.mxu1 %vm1095_vm11, %v14585_v35  ;;  %9863 = vmatmul.msk.f32.vlgmr.msra.gmra.mxu3 %vm1095_vm11, %v14585_v35 }
 0xadd   : > { %6591 = vmatpush.msra.mxu2 %v14979_v10  ;;  %6611 = vmatpush.msrb.mxu0 %v14973_v27  ;;  %v6792_v21 = vmul.f32 0.1, %v6036_v20  ;;  %vm6728_vm10 = vcmp.ge.f32.partialorder %v6036_v20, 0.0  ;;  %v6135_v14 = vpop.f32.mrf.mxu0 }
 0xade   : > { %6625 = vmatpush.msra.mxu1 %v15061_v57  ;;  %6645 = vmatpush.msrb.mxu3 %v15055_v60 }
 0xadf   : > { %7005 = vrot.lane.b32.xlu1 %v6851_v22, %s11267_s15  ;;  %6592 = vmatpush.msra.mxu2 %v14989_v28  ;;  %v6856_v62 = vsel %vm6728_vm10, %v6036_v20, %v6792_v21  ;;  %v6857_v28 = vsel %vm6729_vm12, %v6056_v45, %v6793_v61  ;;  %v15179_v21 = vpop.permute.xlu0 %6955 }
 0xae0   : > { %6612 = vmatpush.msrb.mxu0 %v14994_v12  ;;  %6626 = vmatpush.msra.mxu1 %v15070_v37 }
 0xae1   : > { %6646 = vmatpush.msrb.mxu3 %v15074_v25  ;;  %7009 = vrot.lane.b32.xlu0 %v6853_v42, %s11267_s15 }
 0xae2   : > { %9866 = vmatpush.msk.msra.mxu2 %vm4889_vm14, %v17099_v23  ;;  %9870 = vmatpush.msk.msrb.mxu0 %vm4889_vm14, %v13987_v56  ;;  %v6015_v56 = vpop.f32.mrf.mxu3 }
 0xae3   : > { %9872 = vmatpush.msk.msra.mxu1 %vm4889_vm14, %v14047_v34  ;;  %9876 = vmatpush.msk.msrb.mxu3 %vm4889_vm14, %v14034_v24  ;;  %v6016_v50 = vadd.f32 %v6015_v56, %v17080_v58  ;;  %v6115_v10 = vpop.f32.mrf.mxu2 }
 0xae4   : > { %9867 = vmatmul.msk.f32.vlgmr.msra.gmra.mxu2 %vm1095_vm11, %v14585_v35  ;;  %9871 = vmatmul.msk.f32.vlgmr.msrb.gmra.mxu0 %vm1095_vm11, %v14585_v35 }
 0xae5   : > { %6665 = vmatpush.msrb.mxu2 %v14771_v16  ;;  %6685 = vmatpush.msra.mxu0 %v17101_v49  ;;  %v6791_v31 = vmul.f32 0.1, %v6016_v50  ;;  %vm6727_vm9 = vcmp.ge.f32.partialorder %v6016_v50, 0.0 }
 0xae6   : > { %6628 = vmatpush.msra.mxu1 %v15007_v48  ;;  %6648 = vmatpush.msrb.mxu3 %v15061_v57 }
 0xae7   : > { %7007 = vrot.lane.b32.xlu2 %v6852_v11, %s11267_s15  ;;  %6666 = vmatpush.msrb.mxu2 %v14790_v39 }
 0xae8   : > { %6686 = vmatpush.msra.mxu0 %v17102_v19  ;;  %6629 = vmatpush.msra.mxu1 %v15023_v47 }
 0xae9   : > { %6649 = vmatpush.msrb.mxu3 %v15070_v37  ;;  %9880 = vmatpush.msk.msrb.mxu2 %vm4889_vm14, %v17103_v32 }
 0xaea   : > { %9884 = vmatpush.msk.msra.mxu0 %vm4889_vm14, %v17104_v17  ;;  %9873 = vmatpush.msk.msra.mxu1 %vm4889_vm14, %v17100_v38  ;;  %v6095_v27 = vpop.f32.mrf.mxu3 }
 0xaeb   : > { %9877 = vmatpush.msk.msrb.mxu3 %vm4889_vm14, %v14047_v34  ;;  %6668 = vmatpush.msrb.mxu2 %v15055_v60  ;;  %v6096_v6 = vadd.f32 %v6095_v27, %v17080_v58  ;;  %v15181_v27 = vpop.permute.xlu2 %6959 }
 0xaec   : > { %6688 = vmatpush.msra.mxu0 %v14771_v16  ;;  %6631 = vmatpush.msra.mxu1 %v15009_v43  ;;  %v6855_v16 = vsel %vm6727_vm9, %v6016_v50, %v6791_v31 }
 0xaed   : > { %6651 = vmatpush.msrb.mxu3 %v15007_v48  ;;  %7011 = vrot.lane.b32.xlu1 %v6854_v15, %s11267_s15  ;;  %v6795_v2 = vmul.f32 0.1, %v6096_v6  ;;  %vm6731_vm2 = vcmp.ge.f32.partialorder %v6096_v6, 0.0 }
 0xaee   : > { %6669 = vmatpush.msrb.mxu2 %v15074_v25  ;;  %6689 = vmatpush.msra.mxu0 %v14790_v39  ;;  %v6076_v39 = vadd.f32 %v6075_v7, %v17080_v58 }
 0xaef   : > { %6632 = vmatpush.msra.mxu1 %v15019_v54  ;;  %6652 = vmatpush.msrb.mxu3 %v15023_v47  ;;  %v6859_v48 = vsel %vm6731_vm2, %v6096_v6, %v6795_v2 }
 0xaf0   : > { %9881 = vmatpush.msk.msrb.mxu2 %vm4889_vm14, %v14034_v24  ;;  %9885 = vmatpush.msk.msra.mxu0 %vm4889_vm14, %v17103_v32  ;;  %v6794_v12 = vmul.f32 0.1, %v6076_v39  ;;  %vm6730_vm13 = vcmp.ge.f32.partialorder %v6076_v39, 0.0 }
 0xaf1   : > { %9874 = vmatpush.msk.msra.mxu1 %vm4889_vm14, %v13991_v59  ;;  %9878 = vmatpush.msk.msrb.mxu3 %vm4889_vm14, %v17100_v38  ;;  %v6116_v59 = vadd.f32 %v6115_v10, %v17080_v58 }
 0xaf2   : > { %9875 = vmatmul.msk.f32.vlgmr.msra.gmra.mxu1 %vm1095_vm11, %v14585_v35  ;;  %9879 = vmatmul.msk.f32.vlgmr.msrb.gmra.mxu3 %vm1095_vm11, %v14585_v35  ;;  %v6155_v35 = vpop.f32.mrf.mxu1  ;;  %v6175_v29 = vpop.f32.mrf.mxu3  ;;  %v6858_v1 = vsel %vm6730_vm13, %v6076_v39, %v6794_v12 }
 0xaf3   : > { %6671 = vmatpush.msrb.mxu2 %v15061_v57  ;;  %6691 = vmatpush.msra.mxu0 %v15055_v60  ;;  %v6796_v63 = vmul.f32 0.1, %v6116_v59  ;;  %vm6732_vm15 = vcmp.ge.f32.partialorder %v6116_v59, 0.0  ;;  %v6156_v43 = vadd.f32 %v6155_v35, %v17080_v58  ;;  %v6215_v13 = vpop.f32.mrf.mxu0  ;;  %v15189_v12 = vpop.permute.xlu2 %6965 }
 0xaf4   : > { %7013 = vrot.lane.b32.xlu2 %v6855_v16, %s11267_s15  ;;  %7015 = vrot.lane.b32.xlu0 %v6856_v62, %s11267_s15  ;;  %v6216_v46 = vadd.f32 %v6215_v13, %v17080_v58 }
 0xaf5   : > { %6672 = vmatpush.msrb.mxu2 %v15070_v37  ;;  %6692 = vmatpush.msra.mxu0 %v15074_v25  ;;  %v6860_v23 = vsel %vm6732_vm15, %v6116_v59, %v6796_v63  ;;  %v6798_v3 = vmul.f32 0.1, %v6156_v43  ;;  %vm6734_vm1 = vcmp.ge.f32.partialorder %v6156_v43, 0.0  ;;  %v6958_v63 = vpop.permute.xlu1 %6957 }
 0xaf6   : > { %7017 = vrot.lane.b32.xlu1 %v6857_v28, %s11267_s15  ;;  %v6801_v60 = vmul.f32 0.1, %v6216_v46  ;;  %vm6737_vm5 = vcmp.ge.f32.partialorder %v6216_v46, 0.0  ;;  %v15187_v28 = vpop.permute.xlu0 %6961 }
 0xaf7   : > { %9882 = vmatpush.msk.msrb.mxu2 %vm4889_vm14, %v14047_v34  ;;  %9886 = vmatpush.msk.msra.mxu0 %vm4889_vm14, %v14034_v24  ;;  %v6136_v34 = vadd.f32 %v6135_v14, %v17080_v58  ;;  %v6176_v24 = vadd.f32 %v6175_v29, %v17080_v58  ;;  %v6862_v38 = vsel %vm6734_vm1, %v6156_v43, %v6798_v3 }
 0xaf8   : > { %9883 = vmatmul.msk.f32.vlgmr.msrb.gmra.mxu2 %vm1095_vm11, %v11201_v8  ;;  %9887 = vmatmul.msk.f32.vlgmr.msra.gmra.mxu0 %vm1095_vm11, %v11201_v8  ;;  %v6865_v37 = vsel %vm6737_vm5, %v6216_v46, %v6801_v60 }
 0xaf9   : > { %v6195_v54 = vpop.f32.mrf.mxu2  ;;  %v6797_v47 = vmul.f32 0.1, %v6136_v34  ;;  %v6799_v18 = vmul.f32 0.1, %v6176_v24  ;;  %vm6733_vm3 = vcmp.ge.f32.partialorder %v6136_v34, 0.0  ;;  %vm6735_vm8 = vcmp.ge.f32.partialorder %v6176_v24, 0.0 }
 0xafa   : > { %v6196_v9 = vadd.f32 %v6195_v54, %v17080_v58 }
 0xafb   : > { %v6861_v0 = vsel %vm6733_vm3, %v6136_v34, %v6797_v47  ;;  %v6863_v30 = vsel %vm6735_vm8, %v6176_v24, %v6799_v18 }
 0xafc   : > { %7019 = vrot.lane.b32.xlu2 %v6858_v1, %s11267_s15  ;;  %7021 = vrot.lane.b32.xlu0 %v6859_v48, %s11267_s15  ;;  %v6800_v52 = vmul.f32 0.1, %v6196_v9  ;;  %vm6736_vm4 = vcmp.ge.f32.partialorder %v6196_v9, 0.0  ;;  %v15195_v1 = vpop.permute.xlu2 %6971 }
 0xafd   : > { %v6964_v34 = vpop.permute.xlu1 %6963 }
 0xafe   : > { %7023 = vrot.lane.b32.xlu1 %v6860_v23, %s11267_s15  ;;  %v6864_v51 = vsel %vm6736_vm4, %v6196_v9, %v6800_v52  ;;  %v15193_v29 = vpop.permute.xlu0 %6967 }
 0xb01   : > { %v6235_v53 = vpop.f32.mrf.mxu1 }
 0xb02   : > { %v6236_v33 = vadd.f32 %v6235_v53, %v17080_v58 }
 0xb04   : > { %7025 = vrot.lane.b32.xlu2 %v6861_v0, %s11267_s15  ;;  %7027 = vrot.lane.b32.xlu0 %v6862_v38, %s11267_s15  ;;  %v6802_v5 = vmul.f32 0.1, %v6236_v33  ;;  %vm6738_vm6 = vcmp.ge.f32.partialorder %v6236_v33, 0.0  ;;  %v15203_v9 = vpop.permute.xlu2 %6977  ;;  %v15206_v0 = vsel %vm477_vm0, 0.0, %v6964_v34 }
 0xb05   : > { %v6970_v52 = vpop.permute.xlu1 %6969  ;;  %v15215_v60 = vsel %vm4889_vm14, %v15206_v0, 0.0 }
 0xb06   : > { %7029 = vrot.lane.b32.xlu1 %v6863_v30, %s11267_s15  ;;  %v6866_v25 = vsel %vm6738_vm6, %v6236_v33, %v6802_v5  ;;  %v15200_v18 = vpop.permute.xlu0 %6973  ;;  %v15211_v33 = vsel %vm477_vm0, 0.0, %v6958_v63 }
 0xb07   : > { %v6255_v57 = vpop.f32.mrf.mxu3 }
 0xb08   : > { %v6256_v4 = vadd.f32 %v6255_v57, %v17080_v58 }
 0xb09   : > { %v6295_v22 = vpop.f32.mrf.mxu0 }
 0xb0a   : > { %v6296_v44 = vadd.f32 %v6295_v22, %v17080_v58  ;;  %v6803_v26 = vmul.f32 0.1, %v6256_v4  ;;  %vm6739_vm7 = vcmp.ge.f32.partialorder %v6256_v4, 0.0 }
 0xb0c   : > { %7033 = vrot.lane.b32.xlu0 %v6865_v37, %s11267_s15  ;;  %7031 = vrot.lane.b32.xlu2 %v6864_v51, %s11267_s15  ;;  %v6805_v11 = vmul.f32 0.1, %v6296_v44  ;;  %v6867_v56 = vsel %vm6739_vm7, %v6256_v4, %v6803_v26  ;;  %vm6741_vm9 = vcmp.ge.f32.partialorder %v6296_v44, 0.0  ;;  %v7212_v51 = vsel %vm4889_vm14, %v15211_v33, 0.0  ;;  %v15223_v37 = vpop.permute.xlu2 %6983 }
 0xb0d   : > { %v10895_v22 = vpack.i.bf16 %v15215_v60, %v7212_v51  ;;  %v15227_v26 = vpop.permute.xlu1 %6975 }
 0xb0e   : > { %7035 = vrot.lane.b32.xlu1 %v6866_v25, %s11267_s15  ;;  %v6869_v50 = vsel %vm6741_vm9, %v6296_v44, %v6805_v11  ;;  %v15217_v57 = vpop.permute.xlu0 %6979 }
 0xb0f   : > { %v6275_v42 = vpop.f32.mrf.mxu2 }
 0xb10   : > { %v6276_v36 = vadd.f32 %v6275_v42, %v17080_v58 }
 0xb12   : > { %vm6740_vm10 = vcmp.ge.f32.partialorder %v6276_v36, 0.0  ;;  %v6804_v40 = vmul.f32 0.1, %v6276_v36 }
 0xb14   : > { %7037 = vrot.lane.b32.xlu2 %v6867_v56, %s11267_s15  ;;  %v6868_v41 = vsel %vm6740_vm10, %v6276_v36, %v6804_v40  ;;  %v15232_v40 = vpop.permute.xlu2 %6989 }
 0xb15   : > { %7039 = vrot.lane.b32.xlu0 %v6868_v41, %s11267_s15 }
 0xb16   : > { %7041 = vrot.lane.b32.xlu1 %v6869_v50, %s11267_s15  ;;  %v15229_v11 = vpop.permute.xlu0 %6985  ;;  %v15237_v50 = vsel %vm477_vm0, 0.0, %v15179_v21 }
 0xb17   : > { %v6315_v32 = vpop.f32.mrf.mxu1 }
 0xb18   : > { %v6316_v20 = vadd.f32 %v6315_v32, %v17080_v58  ;;  %v15239_v32 = vpop.permute.xlu1 %6981 }
 0xb1a   : > { %vm6742_vm12 = vcmp.ge.f32.partialorder %v6316_v20, 0.0  ;;  %v6806_v55 = vmul.f32 0.1, %v6316_v20 }
 0xb1c   : > { %v6870_v15 = vsel %vm6742_vm12, %v6316_v20, %v6806_v55 }
 0xb1d   : > { %v6335_v31 = vpop.f32.mrf.mxu3  ;;  %7043 = vrot.lane.b32.xlu2 %v6870_v15, %s11267_s15  ;;  %v15243_v15 = vsel %vm4889_vm14, %v15237_v50, 0.0 }
 0xb1e   : > { %v6336_v45 = vadd.f32 %v6335_v31, %v17080_v58  ;;  %v10890_v31 = vpack.i.bf16 %v7212_v51, %v15243_v15 }
 0xb1f   : > { %v6375_v7 = vpop.f32.mrf.mxu0 }
 0xb20   : > { %v6376_v16 = vadd.f32 %v6375_v7, %v17080_v58  ;;  %vm6743_vm13 = vcmp.ge.f32.partialorder %v6336_v45, 0.0  ;;  %v6807_v10 = vmul.f32 0.1, %v6336_v45 }
 0xb22   : > { %vm6745_vm2 = vcmp.ge.f32.partialorder %v6376_v16, 0.0  ;;  %v6809_v61 = vmul.f32 0.1, %v6376_v16  ;;  %v6871_v39 = vsel %vm6743_vm13, %v6336_v45, %v6807_v10  ;;  %v15251_v10 = vpop.permute.xlu2 %6995 }
 0xb23   : > { %7045 = vrot.lane.b32.xlu0 %v6871_v39, %s11267_s15 }
 0xb24   : > { %v6873_v62 = vsel %vm6745_vm2, %v6376_v16, %v6809_v61 }
 0xb25   : > { %v6355_v6 = vpop.f32.mrf.mxu2  ;;  %7049 = vrot.lane.b32.xlu2 %v6873_v62, %s11267_s15 }
 0xb26   : > { %v6356_v59 = vadd.f32 %v6355_v6, %v17080_v58  ;;  %v15254_v6 = vpop.permute.xlu1 %6987 }
 0xb28   : > { %vm6744_vm15 = vcmp.ge.f32.partialorder %v6356_v59, 0.0  ;;  %v6808_v2 = vmul.f32 0.1, %v6356_v59 }
 0xb2a   : > { %v6872_v35 = vsel %vm6744_vm15, %v6356_v59, %v6808_v2  ;;  %v15270_v34 = vpop.permute.xlu2 %7001 }
 0xb2b   : > { %7047 = vrot.lane.b32.xlu1 %v6872_v35, %s11267_s15  ;;  %v15259_v35 = vsel %vm477_vm0, 0.0, %v15193_v29 }
 0xb2d   : > { %v6395_v8 = vpop.f32.mrf.mxu1  ;;  %v15248_v16 = vpop.permute.xlu0 %6991 }
 0xb2e   : > { %v6396_v14 = vadd.f32 %v6395_v8, %v17080_v58 }
 0xb30   : > { %vm6746_vm1 = vcmp.ge.f32.partialorder %v6396_v14, 0.0  ;;  %v6810_v48 = vmul.f32 0.1, %v6396_v14 }
 0xb32   : > { %v6874_v43 = vsel %vm6746_vm1, %v6396_v14, %v6810_v48  ;;  %v15266_v48 = vsel %vm477_vm0, 0.0, %v6970_v52 }
 0xb33   : > { %v6415_v23 = vpop.f32.mrf.mxu3  ;;  %7051 = vrot.lane.b32.xlu0 %v6874_v43, %s11267_s15  ;;  %v7217_v43 = vsel %vm4889_vm14, %v15259_v35, 0.0  ;;  %v7218_v29 = vsel %vm4889_vm14, %v15266_v48, 0.0 }
 0xb34   : > { %v6416_v24 = vadd.f32 %v6415_v23, %v17080_v58 }
 0xb35   : > { %v6455_v3 = vpop.f32.mrf.mxu0 }
 0xb36   : > { %v6456_v54 = vadd.f32 %v6455_v3, %v17080_v58  ;;  %vm6747_vm3 = vcmp.ge.f32.partialorder %v6416_v24, 0.0  ;;  %v6811_v47 = vmul.f32 0.1, %v6416_v24  ;;  %v15276_v3 = vsel %vm477_vm0, 0.0, %v15187_v28 }
 0xb37   : > { %v7214_v28 = vsel %vm4889_vm14, %v15276_v3, 0.0 }
 0xb38   : > { %vm6749_vm8 = vcmp.ge.f32.partialorder %v6456_v54, 0.0  ;;  %v6813_v13 = vmul.f32 0.1, %v6456_v54  ;;  %v6875_v38 = vsel %vm6747_vm3, %v6416_v24, %v6811_v47  ;;  %v15278_v47 = vpop.permute.xlu1 %6993 }
 0xb39   : > { %7053 = vrot.lane.b32.xlu1 %v6875_v38, %s11267_s15 }
 0xb3a   : > { %v6877_v53 = vsel %vm6749_vm8, %v6456_v54, %v6813_v13  ;;  %v10920_v54 = vpack.i.bf16 %v7218_v29, %v7217_v43 }
 0xb3b   : > { %v6435_v46 = vpop.f32.mrf.mxu2  ;;  %7057 = vrot.lane.b32.xlu0 %v6877_v53, %s11267_s15  ;;  %v15261_v63 = vpop.permute.xlu0 %6997  ;;  %v15284_v53 = vsel %vm477_vm0, 0.0, %v15181_v27  ;;  %v15298_v27 = vsel %vm477_vm0, 0.0, %v15189_v12 }
 0xb3c   : > { %v6436_v30 = vadd.f32 %v6435_v46, %v17080_v58  ;;  %v7213_v52 = vsel %vm4889_vm14, %v15284_v53, 0.0 }
 0xb3e   : > { %vm6748_vm4 = vcmp.ge.f32.partialorder %v6436_v30, 0.0  ;;  %v6812_v5 = vmul.f32 0.1, %v6436_v30 }
 0xb40   : > { %v6876_v4 = vsel %vm6748_vm4, %v6436_v30, %v6812_v5  ;;  %vm9079_vm4 = vcmask 1042434  }
 0xb41   : > { %7055 = vrot.lane.b32.xlu2 %v6876_v4, %s11267_s15  ;;  %v15293_v5 = vpop.permute.xlu2 %7007  ;;  %v10900_v4 = vpack.i.bf16 %v7214_v28, %v7213_v52  ;;  %v15343_v52 = vsel %vm477_vm0, 0.0, %v15227_v26  ;;  %v15357_v26 = vsel %vm477_vm0, 0.0, %v15195_v1  ;;  %v15372_v1 = vsel %vm477_vm0, 0.0, %v15217_v57 }
 0xb43   : > { %v6475_v25 = vpop.f32.mrf.mxu1  ;;  %10896 = vrot.lane.b32.xlu0 %v10895_v22, %s11270_s22  ;;  %v15300_v22 = vpop.permute.xlu1 %6999 }
 0xb44   : > { %v6476_v44 = vadd.f32 %v6475_v25, %v17080_v58 }
 0xb46   : > { %vm6750_vm5 = vcmp.ge.f32.partialorder %v6476_v44, 0.0  ;;  %v6814_v42 = vmul.f32 0.1, %v6476_v44 }
 0xb48   : > { %v6878_v36 = vsel %vm6750_vm5, %v6476_v44, %v6814_v42  ;;  %v7216_v42 = vsel %vm4889_vm14, %v15298_v27, 0.0  ;;  %vm9082_vm5 = vcmask 1043459  }
 0xb49   : > { %v6495_v56 = vpop.f32.mrf.mxu3  ;;  %7059 = vrot.lane.b32.xlu1 %v6878_v36, %s11267_s15  ;;  %v15286_v46 = vpop.permute.xlu0 %7003  ;;  %v10905_v36 = vpack.i.bf16 %v7216_v42, %v15215_v60 }
 0xb4a   : > { %v6496_v41 = vadd.f32 %v6495_v56, %v17080_v58 }
 0xb4b   : > { %v6535_v20 = vpop.f32.mrf.mxu0 }
 0xb4c   : > { %vm6751_vm6 = vcmp.ge.f32.partialorder %v6496_v41, 0.0  ;;  %v6815_v55 = vmul.f32 0.1, %v6496_v41  ;;  %v6536_v7 = vadd.f32 %v6535_v20, %v17080_v58 }
 0xb4e   : > { %v6879_v45 = vsel %vm6751_vm6, %v6496_v41, %v6815_v55  ;;  %v6817_v39 = vmul.f32 0.1, %v6536_v7  ;;  %vm6753_vm9 = vcmp.ge.f32.partialorder %v6536_v7, 0.0  ;;  %v15310_v41 = vpop.permute.xlu2 %7013  ;;  %vm9085_vm6 = vcmask 1044484  }
 0xb4f   : > { %7061 = vrot.lane.b32.xlu2 %v6879_v45, %s11267_s15 }
 0xb50   : > { %v6881_v2 = vsel %vm6753_vm9, %v6536_v7, %v6817_v39  ;;  %vm9091_vm9 = vcmask 1046534  }
 0xb51   : > { %v6515_v21 = vpop.f32.mrf.mxu2  ;;  %10891 = vrot.lane.b32.xlu1 %v10890_v31, %s11269_s16  ;;  %v15313_v55 = vpop.permute.xlu1 %7005 }
 0xb52   : > { %v6516_v61 = vadd.f32 %v6515_v21, %v17080_v58 }
 0xb53   : > { %v15308_v56 = vpop.permute.xlu0 %7009 }
 0xb54   : > { %vm6752_vm7 = vcmp.ge.f32.partialorder %v6516_v61, 0.0  ;;  %v6816_v62 = vmul.f32 0.1, %v6516_v61 }
 0xb56   : > { %v6880_v59 = vsel %vm6752_vm7, %v6516_v61, %v6816_v62  ;;  %v15320_v61 = vpop.permute.xlu2 %7019  ;;  %v10915_v62 = vpack.i.bf16 %v7216_v42, %v15243_v15  ;;  %vm9088_vm7 = vcmask 1045509  }
 0xb57   : > { %7063 = vrot.lane.b32.xlu0 %v6880_v59, %s11267_s15 }
 0xb59   : > { %v6555_v8 = vpop.f32.mrf.mxu1  ;;  %7065 = vrot.lane.b32.xlu1 %v6881_v2, %s11267_s15 }
 0xb5a   : > { %v6556_v14 = vadd.f32 %v6555_v8, %v17080_v58 }
 0xb5c   : > { %vm6754_vm10 = vcmp.ge.f32.partialorder %v6556_v14, 0.0  ;;  %v6818_v23 = vmul.f32 0.1, %v6556_v14 }
 0xb5e   : > { %v6882_v24 = vsel %vm6754_vm10, %v6556_v14, %v6818_v23  ;;  %vm9094_vm10 = vcmask 1047559  }
 0xb5f   : > { %v6575_v13 = vpop.f32.mrf.mxu3  ;;  %7067 = vrot.lane.b32.xlu2 %v6882_v24, %s11267_s15  ;;  %v15327_v23 = vpop.permute.xlu1 %7011 }
 0xb60   : > { %v6576_v38 = vadd.f32 %v6575_v13, %v17080_v58  ;;  %v15332_v13 = vsel %vm477_vm0, 0.0, %v15200_v18 }
 0xb61   : > { %10921 = vrot.lane.b32.xlu1 %v10920_v54, %s11269_s16  ;;  %v6615_v20 = vpop.f32.mrf.mxu0  ;;  %v7220_v18 = vsel %vm4889_vm14, %v15332_v13, 0.0 }
 0xb62   : > { %vm6755_vm12 = vcmp.ge.f32.partialorder %v6576_v38, 0.0  ;;  %v6819_v30 = vmul.f32 0.1, %v6576_v38  ;;  %v6616_v8 = vadd.f32 %v6615_v20, %v17080_v58 }
 0xb64   : > { %v6883_v51 = vsel %vm6755_vm12, %v6576_v38, %v6819_v30  ;;  %vm6757_vm3 = vcmp.ge.f32.partialorder %v6616_v8, 0.0  ;;  %v15339_v30 = vsel %vm477_vm0, 0.0, %v15203_v9  ;;  %v7221_v9 = vsel %vm4889_vm14, %v15343_v52, 0.0 }
 0xb65   : > { %7069 = vrot.lane.b32.xlu0 %v6883_v51, %s11267_s15  ;;  %vm9202_vm12 = vcmask 523264  }
 0xb66   : > { %v15318_v21 = vpop.permute.xlu0 %7015 }
 0xb67   : > { %v6595_v25 = vpop.f32.mrf.mxu2  ;;  %10901 = vrot.lane.b32.xlu2 %v10900_v4, %s11269_s16 }
 0xb68   : > { %v6596_v44 = vadd.f32 %v6595_v25, %v17080_v58  ;;  %v7222_v25 = vsel %vm4889_vm14, %v15339_v30, 0.0  ;;  %v15359_v42 = vpop.permute.xlu1 %7017 }
 0xb69   : > { %10931 = vrot.lane.b32.xlu1 %v10920_v54, %s11270_s22  ;;  %v6821_v54 = vmul.f32 0.1, %v6616_v8 }
 0xb6a   : > { %v6820_v12 = vmul.f32 0.1, %v6596_v44  ;;  %vm6756_vm13 = vcmp.ge.f32.partialorder %v6596_v44, 0.0 }
 0xb6b   : > { %v6885_v51 = vsel %vm6757_vm3, %v6616_v8, %v6821_v54 }
 0xb6c   : > { %v6884_v7 = vsel %vm6756_vm13, %v6596_v44, %v6820_v12  ;;  %v10935_v44 = vpack.i.bf16 %v7220_v18, %v7222_v25  ;;  %v15363_v12 = vsel %vm477_vm0, 0.0, %v15239_v32 }
 0xb6d   : > { %10906 = vrot.lane.b32.xlu0 %v10905_v36, %s11269_s16  ;;  %v10940_v36 = vpack.i.bf16 %v7222_v25, %v7221_v9 }
 0xb6e   : > { %v15334_v38 = vpop.permute.xlu0 %7021 }
 0xb6f   : > { %v6635_v31 = vpop.f32.mrf.mxu1  ;;  %10911 = vrot.lane.b32.xlu2 %v10900_v4, %s11270_s22  ;;  %v15348_v4 = vpop.permute.xlu2 %7025 }
 0xb70   : > { %v6636_v45 = vadd.f32 %v6635_v31, %v17080_v58 }
 0xb71   : > { %7071 = vrot.lane.b32.xlu1 %v6884_v7, %s11267_s15 }
 0xb72   : > { %vm6758_vm2 = vcmp.ge.f32.partialorder %v6636_v45, 0.0  ;;  %v6822_v60 = vmul.f32 0.1, %v6636_v45 }
 0xb74   : > { %v6886_v39 = vsel %vm6758_vm2, %v6636_v45, %v6822_v60  ;;  %v7219_v45 = vsel %vm4889_vm14, %v15357_v26, 0.0  ;;  %v7224_v60 = vsel %vm4889_vm14, %v15363_v12, 0.0 }
 0xb75   : > { %v6695_v59 = vpop.f32.mrf.mxu0  ;;  %v6655_v2 = vpop.f32.mrf.mxu3  ;;  %7075 = vrot.lane.b32.xlu0 %v6886_v39, %s11267_s15  ;;  %v10925_v7 = vpack.i.bf16 %v7220_v18, %v7219_v45  ;;  %v10950_v57 = vpack.i.bf16 %v7221_v9, %v7219_v45 }
 0xb76   : > { %v6696_v14 = vadd.f32 %v6695_v59, %v17080_v58  ;;  %v6656_v43 = vadd.f32 %v6655_v2, %v17080_v58  ;;  %v15365_v31 = vpop.permute.xlu0 %7027  ;;  %v15383_v2 = vpop.permute.xlu1 %7023 }
 0xb77   : > { %10916 = vrot.lane.b32.xlu2 %v10915_v62, %s11270_s22  ;;  %v15378_v39 = vpop.permute.xlu2 %7031  ;;  %v7223_v62 = vsel %vm4889_vm14, %v15372_v1, 0.0 }
 0xb78   : > { %v6825_v29 = vmul.f32 0.1, %v6696_v14  ;;  %vm6759_vm15 = vcmp.ge.f32.partialorder %v6656_v43, 0.0  ;;  %v6823_v24 = vmul.f32 0.1, %v6656_v43  ;;  %vm6761_vm1 = vcmp.ge.f32.partialorder %v6696_v14, 0.0 }
 0xb79   : > { %v10945_v59 = vpack.i.bf16 %v7224_v60, %v7223_v62 }
 0xb7a   : > { %v6887_v15 = vsel %vm6759_vm15, %v6656_v43, %v6823_v24  ;;  %v6889_v28 = vsel %vm6761_vm1, %v6696_v14, %v6825_v29  ;;  %v15387_v14 = vsel %vm477_vm0, 0.0, %v15248_v16  ;;  %v15396_v43 = vsel %vm477_vm0, 0.0, %v15278_v47 }
 0xb7b   : > { %7077 = vrot.lane.b32.xlu1 %v6887_v15, %s11267_s15  ;;  %v6675_v20 = vpop.f32.mrf.mxu2  ;;  %v7229_v24 = vsel %vm4889_vm14, %v15387_v14, 0.0  ;;  %v7230_v15 = vsel %vm4889_vm14, %v15396_v43, 0.0  ;;  %v15412_v47 = vsel %vm477_vm0, 0.0, %v15223_v37  ;;  %v15428_v37 = vsel %vm477_vm0, 0.0, %v15232_v40 }
 0xb7c   : > { %v6676_v32 = vadd.f32 %v6675_v20, %v17080_v58  ;;  %v15392_v58 = vsel %vm477_vm0, 0.0, %v15229_v11  ;;  %v7225_v25 = vsel %vm4889_vm14, %v15412_v47, 0.0 }
 0xb7d   : > { %7081 = vrot.lane.b32.xlu0 %v6889_v28, %s11267_s15  ;;  %v7226_v11 = vsel %vm4889_vm14, %v15392_v58, 0.0  ;;  %v10980_v28 = vpack.i.bf16 %v7230_v15, %v7229_v24  ;;  %v10970_v40 = vpack.i.bf16 %v7225_v25, %v7223_v62  ;;  %v15460_v62 = vsel %vm477_vm0, 0.0, %v15308_v56 }
 0xb7e   : > { %v6824_v8 = vmul.f32 0.1, %v6676_v32  ;;  %vm6760_vm8 = vcmp.ge.f32.partialorder %v6676_v32, 0.0  ;;  %v15398_v29 = vpop.permute.xlu0 %7033  ;;  %v15414_v18 = vpop.permute.xlu1 %7029  ;;  %v10960_v9 = vpack.i.bf16 %v7226_v11, %v7225_v25  ;;  %v15471_v25 = vsel %vm477_vm0, 0.0, %v15313_v55 }
 0xb7f   : > { %7073 = vrot.lane.b32.xlu2 %v6885_v51, %s11267_s15  ;;  %v15403_v54 = vpop.permute.xlu2 %7037  ;;  %v10955_v51 = vpack.i.bf16 %v7224_v60, %v7226_v11  ;;  %v7238_v56 = vsel %vm4889_vm14, %v15460_v62, 0.0  ;;  %v7236_v55 = vsel %vm4889_vm14, %v15471_v25, 0.0 }
 0xb80   : > { %v6888_v16 = vsel %vm6760_vm8, %v6676_v32, %v6824_v8  ;;  %v15446_v8 = vsel %vm477_vm0, 0.0, %v15270_v34 }
 0xb83   : > { %10936 = vrot.lane.b32.xlu1 %v10935_v44, %s11270_s22  ;;  %v15421_v44 = vsel %vm477_vm0, 0.0, %v15254_v6  ;;  %v7228_v6 = vsel %vm4889_vm14, %v15428_v37, 0.0 }
 0xb84   : > { %v7227_v45 = vsel %vm4889_vm14, %v15421_v44, 0.0 }
 0xb85   : > { %10941 = vrot.lane.b32.xlu0 %v10940_v36, %s11269_s16  ;;  %v10965_v32 = vpack.i.bf16 %v7228_v6, %v7227_v45 }
 0xb86   : > { %v15435_v60 = vpop.permute.xlu1 %7035 }
 0xb87   : > { %10926 = vrot.lane.b32.xlu2 %v10925_v7, %s11269_s16  ;;  %v15424_v36 = vpop.permute.xlu0 %7039  ;;  %v15430_v20 = vpop.permute.xlu2 %7043  ;;  %v10985_v7 = vpack.i.bf16 %v7229_v24, %v7227_v45  ;;  %v15480_v45 = vsel %vm477_vm0, 0.0, %v15251_v10 }
 0xb8b   : > { %10946 = vrot.lane.b32.xlu1 %v10945_v59, %s11269_s16  ;;  %v15441_v59 = vsel %vm477_vm0, 0.0, %v15261_v63  ;;  %v7234_v63 = vsel %vm4889_vm14, %v15446_v8, 0.0 }
 0xb8c   : > { %v7232_v24 = vsel %vm4889_vm14, %v15441_v59, 0.0 }
 0xb8d   : > { %10951 = vrot.lane.b32.xlu0 %v10950_v57, %s11270_s22 }
 0xb8e   : > { %v15462_v34 = vpop.permute.xlu1 %7041 }
 0xb8f   : > { %7079 = vrot.lane.b32.xlu2 %v6888_v16, %s11267_s15  ;;  %v10990_v16 = vpack.i.bf16 %v7232_v24, %v7234_v63  ;;  %v15456_v11 = vpop.permute.xlu2 %7049  ;;  %v15500_v24 = vsel %vm477_vm0, 0.0, %v15293_v5 }
 0xb90   : > { %17106 = vst [vmem:[#allocation11_spill] sm:$0xff] %v15500_v24 }
 0xb93   : > { %10981 = vrot.lane.b32.xlu1 %v10980_v28, %s11269_s16  ;;  %v10975_v28 = vpack.i.bf16 %v7228_v6, %v7230_v15  ;;  %v11015_v15 = vpack.i.bf16 %v7236_v55, %v7238_v56  ;;  %v7231_v6 = vsel %vm4889_vm14, %v15480_v45, 0.0  ;;  %v15521_v55 = vsel %vm477_vm0, 0.0, %v15327_v23 }
 0xb94   : > { %17108 = vst [vmem:[#allocation8_spill] sm:$0xff] %v15521_v55  ;;  %v7239_v23 = vsel %vm4889_vm14, %v15521_v55, 0.0 }
 0xb95   : > { %10956 = vrot.lane.b32.xlu0 %v10955_v51, %s11270_s22  ;;  %v15449_v57 = vpop.permute.xlu0 %7045  ;;  %v15467_v51 = vsel %vm477_vm0, 0.0, %v15300_v22 }
 0xb96   : > { %v7233_v22 = vsel %vm4889_vm14, %v15467_v51, 0.0 }
 0xb97   : > { %10961 = vrot.lane.b32.xlu2 %v10960_v9, %s11269_s16 }
 0xb9b   : > { %10986 = vrot.lane.b32.xlu1 %v10985_v7, %s11270_s22  ;;  %v15487_v7 = vpop.permute.xlu2 %7055 }
 0xb9d   : > { %10966 = vrot.lane.b32.xlu0 %v10965_v32, %s11269_s16  ;;  %v11000_v32 = vpack.i.bf16 %v7233_v22, %v7231_v6  ;;  %v15495_v10 = vpop.permute.xlu1 %7047  ;;  %v15514_v22 = vsel %vm477_vm0, 0.0, %v15318_v21  ;;  %v15525_v6 = vsel %vm477_vm0, 0.0, %v15359_v42 }
 0xb9e   : > { %17107 = vst [vmem:[#allocation6_spill] sm:$0xff] %v15514_v22  ;;  %v7242_v42 = vsel %vm4889_vm14, %v15525_v6, 0.0 }
 0xb9f   : > { %10971 = vrot.lane.b32.xlu2 %v10970_v40, %s11270_s22  ;;  %v15493_v40 = vsel %vm477_vm0, 0.0, %v15286_v46  ;;  %v7237_v46 = vsel %vm4889_vm14, %v15500_v24, 0.0  ;;  %17109 = vst [vmem:[#allocation7_spill] sm:$0xff] %v15525_v6  ;;  %v15536_v24 = vsel %vm477_vm0, 0.0, %v15310_v41  ;;  %v15558_v6 = vsel %vm477_vm0, 0.0, %v15320_v61 }
 0xba0   : > { %17105 = vst [vmem:[#allocation12_spill] sm:$0xff] %v15493_v40 }
 0xba1   : > { %17110 = vst [vmem:[#allocation13_spill] sm:$0xff] %v15536_v24 }
 0xba2   : > { %17112 = vst [vmem:[#allocation18_spill] sm:$0xff] %v15558_v6 }
 0xba3   : > { %10991 = vrot.lane.b32.xlu1 %v10990_v16, %s11270_s22 }
 0xba5   : > { %10996 = vrot.lane.b32.xlu0 %v10990_v16, %s11269_s16  ;;  %v15474_v9 = vpop.permute.xlu0 %7051  ;;  %v7235_v16 = vsel %vm4889_vm14, %v15493_v40, 0.0 }
 0xba7   : > { %10976 = vrot.lane.b32.xlu2 %v10975_v28, %s11270_s22  ;;  %v11020_v28 = vpack.i.bf16 %v7237_v46, %v7235_v16  ;;  %v7241_v16 = vsel %vm4889_vm14, %v15514_v22, 0.0 }
 0xba9   : > { %v15510_v56 = vpop.permute.xlu2 %7061 }
 0xbab   : > { %11016 = vrot.lane.b32.xlu1 %v11015_v15, %s11269_s16  ;;  %v15516_v5 = vpop.permute.xlu1 %7053 }
 0xbad   : > { %11001 = vrot.lane.b32.xlu0 %v11000_v32, %s11270_s22  ;;  %v15503_v63 = vpop.permute.xlu0 %7057 }
 0xbaf   : > { %11006 = vrot.lane.b32.xlu2 %v11000_v32, %s11269_s16 }
 0xbb3   : > { %11021 = vrot.lane.b32.xlu1 %v11020_v28, %s11270_s22 }
 0xbb5   : > { %11011 = vrot.lane.b32.xlu0 %v11015_v15, %s11270_s22  ;;  %v10897_v32 = vpop.permute.xlu0 %10896  ;;  %v11045_v15 = vpack.i.bf16 %v7241_v16, %v7239_v23  ;;  %v15562_v16 = vsel %vm477_vm0, 0.0, %v15334_v38 }
 0xbb6   : > { %v15530_v21 = vunpack.i.h.bf16 %v10897_v32  ;;  %v15532_v46 = vunpack.i.l.bf16 %v10897_v32  ;;  %v7240_v32 = vsel %vm4889_vm14, %v15536_v24, 0.0  ;;  %17113 = vst [vmem:[#allocation19_spill] sm:$0xff] %v15562_v16  ;;  %v7244_v61 = vsel %vm4889_vm14, %v15562_v16, 0.0 }
 0xbb7   : > { %11026 = vrot.lane.b32.xlu2 %v11020_v28, %s11269_s16  ;;  %v11030_v41 = vpack.i.bf16 %v7240_v32, %v7242_v42  ;;  %v15551_v28 = vsel %vm477_vm0, 0.0, %v15383_v2  ;;  %v15569_v2 = vsel %vm477_vm0, 0.0, %v15348_v4  ;;  %v7243_v42 = vsel %vm4889_vm14, %v15558_v6, 0.0 }
 0xbb8   : > { %7738 = vmatpush.msrb.mxu1 %v15532_v46  ;;  %7798 = vmatpush.msrb.mxu0 %v15530_v21  ;;  %17111 = vst [vmem:[#allocation15_spill] sm:$0xff] %v15551_v28  ;;  %v7245_v23 = vsel %vm4889_vm14, %v15551_v28, 0.0  ;;  %v7246_v24 = vsel %vm4889_vm14, %v15569_v2, 0.0  ;;  %v15580_v28 = vsel %vm477_vm0, 0.0, %v15398_v29  ;;  %v15585_v6 = vsel %vm477_vm0, 0.0, %v15414_v18 }
 0xbb9   : > { %v15545_v22 = vpop.permute.xlu2 %7067  ;;  %17114 = vst [vmem:[#allocation17_spill] sm:$0xff] %v15569_v2  ;;  %v11065_v32 = vpack.i.bf16 %v7245_v23, %v7243_v42  ;;  %v11055_v40 = vpack.i.bf16 %v7244_v61, %v7246_v24  ;;  %v7250_v23 = vsel %vm4889_vm14, %v15580_v28, 0.0  ;;  %v7248_v29 = vsel %vm4889_vm14, %v15585_v6, 0.0 }
 0xbba   : > { %17115 = vst [vmem:[#allocation9_spill] sm:$0xff] %v15580_v28  ;;  %v11075_v24 = vpack.i.bf16 %v7248_v29, %v7250_v23  ;;  %v15601_v2 = vsel %vm477_vm0, 0.0, %v15365_v31  ;;  %v15614_v23 = vsel %vm477_vm0, 0.0, %v15378_v39  ;;  %v15639_v16 = vsel %vm477_vm0, 0.0, %v15403_v54 }
 0xbbb   : > { %11046 = vrot.lane.b32.xlu1 %v11045_v15, %s11269_s16  ;;  %v15554_v55 = vpop.permute.xlu1 %7059  ;;  %17116 = vst [vmem:[#allocation10_spill] sm:$0xff] %v15585_v6  ;;  %v7247_v31 = vsel %vm4889_vm14, %v15601_v2, 0.0 }
 0xbbc   : > { %17117 = vst [vmem:[#allocation20_spill] sm:$0xff] %v15601_v2  ;;  %v15634_v2 = vsel %vm477_vm0, 0.0, %v15462_v34 }
 0xbbd   : > { %11031 = vrot.lane.b32.xlu0 %v11030_v41, %s11270_s22  ;;  %17118 = vst [vmem:[#allocation24_spill] sm:$0xff] %v15614_v23  ;;  %v7254_v34 = vsel %vm4889_vm14, %v15634_v2, 0.0 }
 0xbbe   : > { %17119 = vst [vmem:[#allocation23_spill] sm:$0xff] %v15634_v2  ;;  %v15672_v2 = vsel %vm477_vm0, 0.0, %v15449_v57 }
 0xbbf   : > { %11036 = vrot.lane.b32.xlu2 %v11030_v41, %s11269_s16  ;;  %v7256_v57 = vsel %vm4889_vm14, %v15672_v2, 0.0 }
 0xbc1   : > { %v10902_v38 = vpop.permute.xlu2 %10901 }
 0xbc2   : > { %v15608_v6 = vunpack.i.l.bf16 %v10902_v38 }
 0xbc3   : > { %11066 = vrot.lane.b32.xlu1 %v11065_v32, %s11269_s16  ;;  %v10892_v4 = vpop.permute.xlu1 %10891 }
 0xbc4   : > { %v10894_v41 = vunpack.i.h.bf16 %v10892_v4 }
 0xbc5   : > { %11056 = vrot.lane.b32.xlu0 %v11055_v40, %s11269_s16 }
 0xbc6   : > { %7739 = vmatpush.msrb.mxu1 %v10894_v41 }
 0xbc7   : > { %11041 = vrot.lane.b32.xlu2 %v11045_v15, %s11270_s22  ;;  %v15606_v15 = vunpack.i.h.bf16 %v10902_v38  ;;  %v7249_v38 = vsel %vm4889_vm14, %v15614_v23, 0.0  ;;  %v10893_v23 = vunpack.i.l.bf16 %v10892_v4  ;;  %v15653_v4 = vsel %vm477_vm0, 0.0, %v15435_v60 }
 0xbc8   : > { %9888 = vmatpush.msk.msrb.mxu1 %vm4889_vm14, %v15211_v33  ;;  %v11080_v39 = vpack.i.bf16 %v7249_v38, %v7247_v31  ;;  %v15643_v31 = vsel %vm477_vm0, 0.0, %v15424_v36  ;;  %v7252_v36 = vsel %vm4889_vm14, %v15639_v16, 0.0  ;;  %v7251_v60 = vsel %vm4889_vm14, %v15653_v4, 0.0 }
 0xbc9   : > { %v10912_v42 = vpop.permute.xlu2 %10911  ;;  %v15621_v29 = vpop.permute.xlu0 %7063  ;;  %17120 = vst [vmem:[#allocation16_spill] sm:$0xff] %v15643_v31  ;;  %v7253_v38 = vsel %vm4889_vm14, %v15643_v31, 0.0 }
 0xbca   : > { %v15595_v61 = vunpack.i.h.bf16 %v10912_v42  ;;  %v15597_v18 = vunpack.i.l.bf16 %v10912_v42 }
 0xbcb   : > { %11076 = vrot.lane.b32.xlu1 %v11075_v24, %s11269_s16  ;;  %v15604_v28 = vpop.permute.xlu1 %7065 }
 0xbcc   : > { %7758 = vmatpush.msra.mxu3 %v15597_v18  ;;  %7778 = vmatpush.msra.mxu2 %v15595_v61 }
 0xbcd   : > { %11061 = vrot.lane.b32.xlu0 %v11065_v32, %s11270_s22 }
 0xbce   : > { %7759 = vmatpush.msra.mxu3 %v15608_v6  ;;  %7779 = vmatpush.msra.mxu2 %v15606_v15 }
 0xbcf   : > { %11051 = vrot.lane.b32.xlu2 %v11055_v40, %s11270_s22 }
 0xbd0   : > { %9892 = vmatpush.msk.msra.mxu3 %vm4889_vm14, %v15284_v53  ;;  %9896 = vmatpush.msk.msra.mxu2 %vm4889_vm14, %v15276_v3 }
 0xbd1   : > { %v10917_v32 = vpop.permute.xlu2 %10916 }
 0xbd2   : > { %v10918_v42 = vunpack.i.l.bf16 %v10917_v32  ;;  %7761 = vmatpush.msra.mxu3 %v15532_v46  ;;  %7781 = vmatpush.msra.mxu2 %v15597_v18 }
 0xbd3   : > { %11081 = vrot.lane.b32.xlu1 %v11080_v39, %s11270_s22  ;;  %v10922_v40 = vpop.permute.xlu1 %10921 }
 0xbd4   : > { %7741 = vmatpush.msrb.mxu1 %v10918_v42  ;;  %7762 = vmatpush.msra.mxu3 %v10894_v41 }
 0xbd5   : > { %7782 = vmatpush.msra.mxu2 %v15608_v6  ;;  %11086 = vrot.lane.b32.xlu0 %v11080_v39, %s11269_s16  ;;  %v11090_v39 = vpack.i.bf16 %v7252_v36, %v7254_v34  ;;  %v15686_v34 = vunpack.i.h.bf16 %v10917_v32 }
 0xbd6   : > { %7742 = vmatpush.msrb.mxu1 %v10893_v23  ;;  %9893 = vmatpush.msk.msra.mxu3 %vm4889_vm14, %v15211_v33 }
 0xbd7   : > { %9897 = vmatpush.msk.msra.mxu2 %vm4889_vm14, %v15284_v53  ;;  %11071 = vrot.lane.b32.xlu2 %v11075_v24, %s11270_s22  ;;  %v15658_v54 = vpop.permute.xlu0 %7069  ;;  %v11105_v24 = vpack.i.bf16 %v7253_v38, %v7251_v60  ;;  %v15709_v38 = vunpack.i.h.bf16 %v10922_v40  ;;  %v15732_v60 = vsel %vm477_vm0, 0.0, %v15503_v63  ;;  %v15749_v63 = vsel %vm477_vm0, 0.0, %v15516_v5 }
 0xbd8   : > { %9889 = vmatpush.msk.msrb.mxu1 %vm4889_vm14, %v15237_v50  ;;  %7764 = vmatpush.msra.mxu3 %v10918_v42 }
 0xbd9   : > { %7784 = vmatpush.msra.mxu2 %v15532_v46 }
 0xbda   : > { %7744 = vmatpush.msrb.mxu1 %v17101_v49  ;;  %7765 = vmatpush.msra.mxu3 %v10893_v23  ;;  %v15684_v23 = vsel %vm477_vm0, 0.0, %v15456_v11 }
 0xbdb   : > { %7785 = vmatpush.msra.mxu2 %v10894_v41  ;;  %11091 = vrot.lane.b32.xlu1 %v11090_v39, %s11270_s22  ;;  %v10932_v31 = vpop.permute.xlu1 %10931  ;;  %v15693_v41 = vunpack.i.l.bf16 %v10922_v40  ;;  %v7258_v11 = vsel %vm4889_vm14, %v15684_v23, 0.0  ;;  %v15725_v40 = vsel %vm477_vm0, 0.0, %v15495_v10 }
 0xbdc   : > { %7745 = vmatpush.msrb.mxu1 %v17102_v19  ;;  %9894 = vmatpush.msk.msra.mxu3 %vm4889_vm14, %v15237_v50  ;;  %v15678_v46 = vunpack.i.h.bf16 %v10932_v31  ;;  %v15680_v42 = vunpack.i.l.bf16 %v10932_v31  ;;  %v15701_v50 = vld [vmem:[%s16951_s6] sm:$0x1]  ;;  %v11110_v36 = vpack.i.bf16 %v7256_v57, %v7258_v11  ;;  %v15738_v57 = vsel %vm477_vm0, 0.0, %v15430_v20 }
 0xbdd   : > { %9898 = vmatpush.msk.msra.mxu2 %vm4889_vm14, %v15211_v33  ;;  %11106 = vrot.lane.b32.xlu0 %v11105_v24, %s11269_s16  ;;  %v7262_v20 = vsel %vm4889_vm14, %v15732_v60, 0.0  ;;  %v7260_v11 = vsel %vm4889_vm14, %v15749_v63, 0.0 }
 0xbde   : > { %9890 = vmatpush.msk.msrb.mxu1 %vm4889_vm14, %v17104_v17  ;;  %7838 = vmatpush.msrb.mxu3 %v15680_v42  ;;  %v11135_v17 = vpack.i.bf16 %v7260_v11, %v7262_v20 }
 0xbdf   : > { %11096 = vrot.lane.b32.xlu2 %v11090_v39, %s11269_s16  ;;  %v10907_v33 = vpop.permute.xlu0 %10906  ;;  %7858 = vmatpush.msrb.mxu2 %v15678_v46 }
 0xbe0   : > { %7818 = vmatpush.msra.mxu1 %v15686_v34  ;;  %v10909_v32 = vunpack.i.h.bf16 %v10907_v33  ;;  %v10908_v31 = vunpack.i.l.bf16 %v10907_v33  ;;  %7839 = vmatpush.msrb.mxu3 %v15693_v41  ;;  %v7257_v33 = vsel %vm4889_vm14, %v15725_v40, 0.0 }
 0xbe1   : > { %9891 = vmatmul.msk.f32.vlgmr.msrb.gmra.mxu1 %vm1095_vm11, %v15701_v50  ;;  %9899 = vmatmul.msk.f32.vlgmr.msra.gmra.mxu2 %vm1095_vm11, %v15701_v50 }
 0xbe2   : > { %7799 = vmatpush.msrb.mxu0 %v10908_v31  ;;  %7819 = vmatpush.msra.mxu1 %v10909_v32 }
 0xbe3   : > { %7859 = vmatpush.msrb.mxu2 %v15709_v38  ;;  %11111 = vrot.lane.b32.xlu1 %v11110_v36, %s11270_s22  ;;  %v15717_v39 = vpop.permute.xlu1 %7071 }
 0xbe4   : > { %9900 = vmatpush.msk.msrb.mxu0 %vm4889_vm14, %v15206_v0  ;;  %9904 = vmatpush.msk.msra.mxu1 %vm4889_vm14, %v15298_v27 }
 0xbe5   : > { %11116 = vrot.lane.b32.xlu0 %v11110_v36, %s11269_s16  ;;  %9908 = vmatpush.msk.msrb.mxu3 %vm4889_vm14, %v15259_v35  ;;  %v15764_v36 = vpop.permute.xlu2 %7073 }
 0xbe6   : > { %7801 = vmatpush.msrb.mxu0 %v15595_v61  ;;  %7821 = vmatpush.msra.mxu1 %v15530_v21 }
 0xbe7   : > { %11101 = vrot.lane.b32.xlu2 %v11105_v24, %s11270_s22  ;;  %v15741_v10 = vpop.permute.xlu0 %7075  ;;  %9912 = vmatpush.msk.msrb.mxu2 %vm4889_vm14, %v15266_v48  ;;  %v7255_v24 = vsel %vm4889_vm14, %v15738_v57, 0.0 }
 0xbe8   : > { %7802 = vmatpush.msrb.mxu0 %v15606_v15  ;;  %7822 = vmatpush.msra.mxu1 %v10908_v31  ;;  %v11120_v5 = vpack.i.bf16 %v7257_v33, %v7255_v24  ;;  %v15776_v33 = vsel %vm477_vm0, 0.0, %v15474_v9 }
 0xbe9   : > { %7841 = vmatpush.msrb.mxu3 %v15686_v34  ;;  %7861 = vmatpush.msrb.mxu2 %v15680_v42  ;;  %v7259_v9 = vsel %vm4889_vm14, %v15776_v33, 0.0 }
 0xbea   : > { %9901 = vmatpush.msk.msrb.mxu0 %vm4889_vm14, %v15276_v3  ;;  %9905 = vmatpush.msk.msra.mxu1 %vm4889_vm14, %v15206_v0 }
 0xbeb   : > { %7842 = vmatpush.msrb.mxu3 %v10909_v32  ;;  %7862 = vmatpush.msrb.mxu2 %v15693_v41 }
 0xbec   : > { %7804 = vmatpush.msrb.mxu0 %v15597_v18  ;;  %7824 = vmatpush.msra.mxu1 %v15595_v61  ;;  %v15787_v18 = vsel %vm477_vm0, 0.0, %v15487_v7 }
 0xbed   : > { %11121 = vrot.lane.b32.xlu0 %v11120_v5, %s11270_s22  ;;  %9909 = vmatpush.msk.msrb.mxu3 %vm4889_vm14, %v15298_v27  ;;  %v15772_v19 = vpop.permute.xlu1 %7077  ;;  %v7261_v7 = vsel %vm4889_vm14, %v15787_v18, 0.0 }
 0xbee   : > { %9913 = vmatpush.msk.msrb.mxu2 %vm4889_vm14, %v15259_v35  ;;  %11136 = vrot.lane.b32.xlu1 %v11135_v17, %s11269_s16 }
 0xbef   : > { %7805 = vmatpush.msrb.mxu0 %v15608_v6  ;;  %7825 = vmatpush.msra.mxu1 %v15606_v15  ;;  %v15783_v61 = vpop.permute.xlu0 %7081  ;;  %v11140_v6 = vpack.i.bf16 %v7261_v7, %v7259_v9  ;;  %v15815_v15 = vsel %vm477_vm0, 0.0, %v15621_v29  ;;  %v15862_v9 = vsel %vm477_vm0, 0.0, %v15717_v39 }
 0xbf0   : > { %11126 = vrot.lane.b32.xlu2 %v11120_v5, %s11269_s16  ;;  %7844 = vmatpush.msrb.mxu3 %v15530_v21 }
 0xbf1   : > { %7864 = vmatpush.msrb.mxu2 %v15686_v34  ;;  %9902 = vmatpush.msk.msrb.mxu0 %vm4889_vm14, %v15284_v53  ;;  %v15808_v53 = vsel %vm477_vm0, 0.0, %v15604_v28  ;;  %v15826_v28 = vsel %vm477_vm0, 0.0, %v15510_v56  ;;  %v7265_v56 = vsel %vm4889_vm14, %v15815_v15, 0.0 }
 0xbf2   : > { %9906 = vmatpush.msk.msra.mxu1 %vm4889_vm14, %v15276_v3  ;;  %7845 = vmatpush.msrb.mxu3 %v10908_v31  ;;  %v10927_v3 = vpop.permute.xlu2 %10926  ;;  %v7266_v29 = vsel %vm4889_vm14, %v15808_v53, 0.0 }
 0xbf3   : > { %7865 = vmatpush.msrb.mxu2 %v10909_v32  ;;  %9895 = vmatmul.msk.f32.vlgmr.msra.gmra.mxu3 %vm1095_vm11, %v15701_v50  ;;  %v15836_v32 = vunpack.i.h.bf16 %v10927_v3 }
 0xbf4   : > { %9910 = vmatpush.msk.msrb.mxu3 %vm4889_vm14, %v15206_v0  ;;  %9903 = vmatmul.msk.f32.vlgmr.msrb.gmra.mxu0 %vm1095_vm11, %v15701_v50 }
 0xbf5   : > { %9914 = vmatpush.msk.msrb.mxu2 %vm4889_vm14, %v15298_v27  ;;  %11131 = vrot.lane.b32.xlu0 %v11135_v17, %s11270_s22  ;;  %v10937_v21 = vpop.permute.xlu1 %10936  ;;  %v15832_v17 = vsel %vm477_vm0, 0.0, %v15554_v55  ;;  %v7264_v55 = vsel %vm4889_vm14, %v15826_v28, 0.0 }
 0xbf6   : > { %11141 = vrot.lane.b32.xlu1 %v11140_v6, %s11270_s22  ;;  %v15818_v0 = vunpack.i.h.bf16 %v10937_v21  ;;  %v15820_v34 = vunpack.i.l.bf16 %v10937_v21  ;;  %9915 = vmatmul.msk.f32.vlgmr.msrb.gmra.mxu2 %vm1095_vm11, %v15701_v50  ;;  %v7263_v20 = vsel %vm4889_vm14, %v15832_v17, 0.0  ;;  %v11150_v24 = vpack.i.bf16 %v7264_v55, %v7266_v29 }
 0xbf7   : > { %v10942_v27 = vpop.permute.xlu0 %10941  ;;  %9907 = vmatmul.msk.f32.vlgmr.msra.gmra.mxu1 %vm1095_vm11, %v15701_v50  ;;  %v11165_v5 = vpack.i.bf16 %v7265_v56, %v7263_v20  ;;  %v7269_v55 = vsel %vm4889_vm14, %v15862_v9, 0.0  ;;  %v10928_v20 = vunpack.i.l.bf16 %v10927_v3  ;;  %v15888_v3 = vsel %vm477_vm0, 0.0, %v15764_v36 }
 0xbf8   : > { %11146 = vrot.lane.b32.xlu2 %v11140_v6, %s11269_s16  ;;  %7898 = vmatpush.msrb.mxu1 %v15818_v0  ;;  %v15842_v31 = vunpack.i.h.bf16 %v10942_v27  ;;  %v15867_v6 = vsel %vm477_vm0, 0.0, %v15545_v22  ;;  %v15876_v49 = vunpack.i.l.bf16 %v10942_v27  ;;  %v15900_v27 = vsel %vm477_vm0, 0.0, %v15658_v54 }
 0xbf9   : > { %7938 = vmatpush.msra.mxu2 %v15820_v34  ;;  %v7267_v39 = vsel %vm4889_vm14, %v15867_v6, 0.0  ;;  %v7270_v36 = vsel %vm4889_vm14, %v15888_v3, 0.0 }
 0xbfa   : > { %7899 = vmatpush.msrb.mxu1 %v15836_v32  ;;  %v7080_v21 = vpop.permute.xlu2 %7079  ;;  %v11185_v22 = vpack.i.bf16 %v7269_v55, %v7267_v39  ;;  %v15913_v39 = vsel %vm477_vm0, 0.0, %v15741_v10 }
 0xbfb   : > { %7939 = vmatpush.msra.mxu2 %v15842_v31  ;;  %9911 = vmatmul.msk.f32.vlgmr.msrb.gmra.mxu3 %vm1095_vm11, %v15701_v50 }
 0xbfc   : > { %9920 = vmatpush.msk.msrb.mxu1 %vm4889_vm14, %v15332_v13 }
 0xbfd   : > { %11151 = vrot.lane.b32.xlu0 %v11150_v24, %s11270_s22  ;;  %9928 = vmatpush.msk.msra.mxu2 %vm4889_vm14, %v15339_v30  ;;  %v15858_v11 = vpop.permute.xlu1 %10946 }
 0xbfe   : > { %11166 = vrot.lane.b32.xlu1 %v11165_v5, %s11269_s16 }
 0xbff   : > { %v10952_v7 = vpop.permute.xlu0 %10951 }
 0xc00   : > { %11156 = vrot.lane.b32.xlu2 %v11150_v24, %s11269_s16  ;;  %v15870_v29 = vunpack.i.h.bf16 %v10952_v7  ;;  %v10953_v56 = vunpack.i.l.bf16 %v10952_v7  ;;  %v15903_v7 = vsel %vm477_vm0, 0.0, %v7080_v21 }
 0xc01   : > { %17121 = vst [vmem:[#allocation14_spill] sm:$0xff] %v15903_v7  ;;  %v7273_v21 = vsel %vm4889_vm14, %v15903_v7, 0.0 }
 0xc02   : > { %7878 = vmatpush.msra.mxu0 %v10953_v56  ;;  %7901 = vmatpush.msrb.mxu1 %v10953_v56  ;;  %v10962_v55 = vpop.permute.xlu2 %10961 }
 0xc03   : > { %7918 = vmatpush.msra.mxu3 %v15870_v29  ;;  %7941 = vmatpush.msra.mxu2 %v15870_v29 }
 0xc04   : > { %7879 = vmatpush.msra.mxu0 %v10928_v20  ;;  %7902 = vmatpush.msrb.mxu1 %v10928_v20 }
 0xc05   : > { %7919 = vmatpush.msra.mxu3 %v15876_v49  ;;  %7942 = vmatpush.msra.mxu2 %v15876_v49  ;;  %v15882_v24 = vpop.permute.xlu1 %10981 }
 0xc06   : > { %11176 = vrot.lane.b32.xlu0 %v11185_v22, %s11270_s22  ;;  %11186 = vrot.lane.b32.xlu1 %v11185_v22, %s11269_s16 }
 0xc07   : > { %9916 = vmatpush.msk.msra.mxu0 %vm4889_vm14, %v15357_v26  ;;  %9921 = vmatpush.msk.msrb.mxu1 %vm4889_vm14, %v15357_v26  ;;  %v10957_v54 = vpop.permute.xlu0 %10956 }
 0xc08   : > { %9924 = vmatpush.msk.msra.mxu3 %vm4889_vm14, %v15343_v52  ;;  %9929 = vmatpush.msk.msra.mxu2 %vm4889_vm14, %v15343_v52  ;;  %v10959_v22 = vunpack.i.h.bf16 %v10957_v54  ;;  %v15934_v7 = vunpack.i.l.bf16 %v10957_v54 }
 0xc09   : > { %11161 = vrot.lane.b32.xlu2 %v11165_v5, %s11270_s22  ;;  %7881 = vmatpush.msra.mxu0 %v15678_v46  ;;  %v7268_v5 = vsel %vm4889_vm14, %v15900_v27, 0.0 }
 0xc0a   : > { %7904 = vmatpush.msrb.mxu1 %v15678_v46  ;;  %7921 = vmatpush.msra.mxu3 %v15818_v0  ;;  %v11180_v46 = vpack.i.bf16 %v7268_v5, %v7270_v36 }
 0xc0b   : > { %7944 = vmatpush.msra.mxu2 %v15818_v0  ;;  %7882 = vmatpush.msra.mxu0 %v15709_v38  ;;  %v7271_v0 = vsel %vm4889_vm14, %v15913_v39, 0.0 }
 0xc0c   : > { %7905 = vmatpush.msrb.mxu1 %v15709_v38  ;;  %7922 = vmatpush.msra.mxu3 %v15836_v32  ;;  %v11190_v38 = vpack.i.bf16 %v7273_v21, %v7271_v0 }
 0xc0d   : > { %7945 = vmatpush.msra.mxu2 %v15836_v32  ;;  %9917 = vmatpush.msk.msra.mxu0 %vm4889_vm14, %v15266_v48  ;;  %v15926_v10 = vpop.permute.xlu1 %10986  ;;  %v10949_v32 = vunpack.i.h.bf16 %v15858_v11 }
 0xc0e   : > { %9922 = vmatpush.msk.msrb.mxu1 %vm4889_vm14, %v15266_v48  ;;  %9925 = vmatpush.msk.msra.mxu3 %vm4889_vm14, %v15332_v13  ;;  %v15944_v48 = vunpack.i.h.bf16 %v10962_v55  ;;  %v10988_v0 = vunpack.i.l.bf16 %v15926_v10 }
 0xc0f   : > { %9930 = vmatpush.msk.msra.mxu2 %vm4889_vm14, %v15332_v13  ;;  %11181 = vrot.lane.b32.xlu0 %v11180_v46, %s11269_s16  ;;  %v10972_v13 = vpop.permute.xlu2 %10971  ;;  %v10967_v5 = vpop.permute.xlu0 %10966 }
 0xc10   : > { %9931 = vmatmul.msk.f32.vlgmr.msra.gmra.mxu2 %vm1095_vm11, %v15701_v50  ;;  %7978 = vmatpush.msra.mxu1 %v10959_v22 }
 0xc11   : > { %8018 = vmatpush.msrb.mxu2 %v15934_v7  ;;  %11191 = vrot.lane.b32.xlu1 %v11190_v38, %s11270_s22 }
 0xc12   : > { %7884 = vmatpush.msra.mxu0 %v15680_v42  ;;  %7924 = vmatpush.msra.mxu3 %v10953_v56  ;;  %v10973_v42 = vunpack.i.l.bf16 %v10972_v13  ;;  %v15970_v56 = vsel %vm477_vm0, 0.0, %v15783_v61 }
 0xc13   : > { %11171 = vrot.lane.b32.xlu2 %v11180_v46, %s11270_s22  ;;  %7979 = vmatpush.msra.mxu1 %v10949_v32  ;;  %v10969_v46 = vunpack.i.h.bf16 %v10967_v5 }
 0xc14   : > { %8019 = vmatpush.msrb.mxu2 %v15944_v48  ;;  %7885 = vmatpush.msra.mxu0 %v15693_v41  ;;  %v15962_v41 = vunpack.i.h.bf16 %v10972_v13 }
 0xc15   : > { %7925 = vmatpush.msra.mxu3 %v10928_v20  ;;  %9936 = vmatpush.msk.msra.mxu1 %vm4889_vm14, %v15363_v12  ;;  %v15952_v36 = vpop.permute.xlu1 %10991  ;;  %v7274_v20 = vsel %vm4889_vm14, %v15970_v56, 0.0 }
 0xc16   : > { %9944 = vmatpush.msk.msrb.mxu2 %vm4889_vm14, %v15392_v58  ;;  %9918 = vmatpush.msk.msra.mxu0 %vm4889_vm14, %v15259_v35  ;;  %v10948_v35 = vunpack.i.l.bf16 %v15858_v11  ;;  %v15994_v11 = vsel %vm477_vm0, 0.0, %v15772_v19  ;;  %v406_v19 = vld [vmem:[%s16952_s7 + $0x28] sm:$0xff]  ;;  %vm9076_vm0 = vcmask 1041409  }
 0xc17   : > { %9926 = vmatpush.msk.msra.mxu3 %vm4889_vm14, %v15357_v26  ;;  %9919 = vmatmul.msk.f32.vlgmr.msra.gmra.mxu0 %vm1095_vm11, %v15701_v50  ;;  %v15973_v26 = vunpack.i.l.bf16 %v10962_v55  ;;  %v10977_v55 = vpop.permute.xlu2 %10976  ;;  %v7272_v54 = vsel %vm4889_vm14, %v15994_v11, 0.0 }
 0xc18   : > { %9923 = vmatmul.msk.f32.vlgmr.msrb.gmra.mxu1 %vm1095_vm11, %v15701_v50  ;;  %9927 = vmatmul.msk.f32.vlgmr.msra.gmra.mxu3 %vm1095_vm11, %v15701_v50  ;;  %v16018_v21 = vunpack.i.l.bf16 %v10977_v55 }
 0xc19   : > { %7958 = vmatpush.msrb.mxu0 %v10973_v42  ;;  %7981 = vmatpush.msra.mxu1 %v10973_v42 }
 0xc1a   : > { %7998 = vmatpush.msrb.mxu3 %v15962_v41  ;;  %8021 = vmatpush.msrb.mxu2 %v15962_v41 }
 0xc1b   : > { %11196 = vrot.lane.b32.xlu0 %v11190_v38, %s11269_s16  ;;  %7959 = vmatpush.msrb.mxu0 %v10948_v35 }
 0xc1c   : > { %7982 = vmatpush.msra.mxu1 %v10948_v35  ;;  %7999 = vmatpush.msrb.mxu3 %v15973_v26 }
 0xc1d   : > { %8022 = vmatpush.msrb.mxu2 %v15973_v26  ;;  %7717 = vrot.lane.b32.xlu1 %v7274_v20, %s11269_s16  ;;  %v15983_v61 = vpop.permute.xlu1 %11016 }
 0xc1e   : > { %7720 = vrot.lane.b32.xlu2 %v7274_v20, %s11270_s22  ;;  %9932 = vmatpush.msk.msrb.mxu0 %vm4889_vm14, %v15372_v1  ;;  %v11019_v20 = vunpack.i.h.bf16 %v15983_v61 }
 0xc1f   : > { %9937 = vmatpush.msk.msra.mxu1 %vm4889_vm14, %v15372_v1  ;;  %9940 = vmatpush.msk.msrb.mxu3 %vm4889_vm14, %v15412_v47 }
 0xc20   : > { %9945 = vmatpush.msk.msrb.mxu2 %vm4889_vm14, %v15412_v47  ;;  %7961 = vmatpush.msrb.mxu0 %v15820_v34 }
 0xc21   : > { %7984 = vmatpush.msra.mxu1 %v15820_v34  ;;  %8001 = vmatpush.msrb.mxu3 %v10959_v22 }
 0xc22   : > { %8024 = vmatpush.msrb.mxu2 %v10959_v22  ;;  %7962 = vmatpush.msrb.mxu0 %v15842_v31  ;;  %v16051_v22 = vunpack.i.l.bf16 %v15882_v24 }
 0xc23   : > { %7985 = vmatpush.msra.mxu1 %v15842_v31  ;;  %8002 = vmatpush.msrb.mxu3 %v10949_v32  ;;  %v10979_v31 = vunpack.i.h.bf16 %v10977_v55  ;;  %v16147_v55 = vunpack.i.l.bf16 %v15983_v61 }
 0xc24   : > { %8025 = vmatpush.msrb.mxu2 %v10949_v32  ;;  %7460 = vrot.lane.b32.xlu0 %v7272_v54, %s11269_s16  ;;  %s9212_s16 = scalar_lea.sflag [#allocation3], %s377_s25 }
 0xc25   : > { %9933 = vmatpush.msk.msrb.mxu0 %vm4889_vm14, %v15339_v30  ;;  %9938 = vmatpush.msk.msra.mxu1 %vm4889_vm14, %v15339_v30  ;;  %v16012_v34 = vpop.permute.xlu1 %11021  ;;  %v16025_v30 = vunpack.i.h.bf16 %v15882_v24  ;;  %v10994_v24 = vunpack.i.h.bf16 %v15952_v36 }
 0xc26   : > { %9941 = vmatpush.msk.msrb.mxu3 %vm4889_vm14, %v15363_v12  ;;  %9946 = vmatpush.msk.msrb.mxu2 %vm4889_vm14, %v15363_v12 }
 0xc27   : > { %7725 = vperm.xlu1 %10318, %v406_v19   ;;  %9939 = vmatmul.msk.f32.vlgmr.msra.gmra.mxu1 %vm1095_vm11, %v15701_v50 }
 0xc28   : > { %9947 = vmatmul.msk.f32.vlgmr.msrb.gmra.mxu2 %vm1095_vm11, %v15701_v50  ;;  %8058 = vmatpush.msrb.mxu1 %v10979_v31 }
 0xc29   : > { %8098 = vmatpush.msra.mxu2 %v16018_v21  ;;  %7649 = vrot.lane.b32.xlu2 %v7272_v54, %s11270_s22  ;;  %v16165_v54 = vunpack.i.h.bf16 %v16012_v34  ;;  %s11217_s22 = sshra.s32 %s9227_s21, 4  ;;  %s11218_s22 = int_to_ptr.hbm [resolvable:$true] %s11217_s22 }
 0xc2a   : > { %7964 = vmatpush.msrb.mxu0 %v15870_v29  ;;  %8004 = vmatpush.msrb.mxu3 %v10973_v42  ;;  %v16044_v29 = vunpack.i.h.bf16 %v15926_v10  ;;  %v16077_v10 = vunpack.i.l.bf16 %v15952_v36  ;;  %s11219_s29 = scalar_lea.hbm %s11218_s22, 64  ;;  %p11224_p0 = scmp.lt.s32.totalorder %s11218_s22, %s16956_s11 }
 0xc2b   : > { %8059 = vmatpush.msrb.mxu1 %v10969_v46  ;;  %8099 = vmatpush.msra.mxu2 %v16025_v30  ;;  %p11220_p11 = scmp.ne.s32.totalorder %s11218_s22, %s11219_s29  ;;  %p11225_p1 = scmp.lt.s32.totalorder %s11223_s13, %s11219_s29 }
 0xc2c   : > { %7965 = vmatpush.msrb.mxu0 %v15876_v49  ;;  %8005 = vmatpush.msrb.mxu3 %v10948_v35  ;;  %v10968_v49 = vunpack.i.l.bf16 %v10967_v5 }
 0xc2d   : > { %9952 = vmatpush.msk.msrb.mxu1 %vm4889_vm14, %v15428_v37  ;;  %9960 = vmatpush.msk.msra.mxu2 %vm4889_vm14, %v15396_v43  ;;  %v16036_v12 = vpop.permute.xlu1 %11046  ;;  %p11221_p12 = pnand %p11220_p11, %p11372_p5  ;;  %p11226_p2 = por %p11225_p1, %p11224_p0 }
 0xc2e   : > { %9934 = vmatpush.msk.msrb.mxu0 %vm4889_vm14, %v15343_v52  ;;  %9942 = vmatpush.msk.msrb.mxu3 %vm4889_vm14, %v15372_v1  ;;  %v10997_v52 = vpop.permute.xlu0 %10996 }
 0xc2f   : > { %9935 = vmatmul.msk.f32.vlgmr.msrb.gmra.mxu0 %vm1095_vm11, %v15701_v50  ;;  %9943 = vmatmul.msk.f32.vlgmr.msrb.gmra.mxu3 %vm1095_vm11, %v15701_v50  ;;  %v16087_v38 = vunpack.i.l.bf16 %v10997_v52  ;;  %p11222_p13 = pneg %p11221_p12 }
 0xc30   : > { %8038 = vmatpush.msra.mxu0 %v10988_v0  ;;  %8061 = vmatpush.msrb.mxu1 %v10988_v0 }
 0xc31   : > { %8078 = vmatpush.msra.mxu3 %v16044_v29  ;;  %8101 = vmatpush.msra.mxu2 %v16044_v29  ;;  %p11227_p3 = pnand %p11226_p2, %p11222_p13 }
 0xc32   : > { %8039 = vmatpush.msra.mxu0 %v10968_v49  ;;  %8062 = vmatpush.msrb.mxu1 %v10968_v49 }
 0xc33   : > { %8079 = vmatpush.msra.mxu3 %v16051_v22  ;;  %8102 = vmatpush.msra.mxu2 %v16051_v22 }
 0xc34   : > { %9948 = vmatpush.msk.msra.mxu0 %vm4889_vm14, %v15421_v44  ;;  %9953 = vmatpush.msk.msrb.mxu1 %vm4889_vm14, %v15421_v44 }
 0xc35   : > { %9956 = vmatpush.msk.msra.mxu3 %vm4889_vm14, %v15387_v14  ;;  %9961 = vmatpush.msk.msra.mxu2 %vm4889_vm14, %v15387_v14  ;;  %v16065_v1 = vpop.permute.xlu1 %11066 }
 0xc36   : > { %8041 = vmatpush.msra.mxu0 %v15934_v7  ;;  %8064 = vmatpush.msrb.mxu1 %v15934_v7  ;;  %v10999_v7 = vunpack.i.h.bf16 %v10997_v52  ;;  %v11002_v32 = vpop.permute.xlu0 %11001 }
 0xc37   : > { %8081 = vmatpush.msra.mxu3 %v10979_v31  ;;  %8104 = vmatpush.msra.mxu2 %v10979_v31  ;;  %v16103_v13 = vunpack.i.h.bf16 %v11002_v32 }
 0xc38   : > { %8042 = vmatpush.msra.mxu0 %v15944_v48  ;;  %8065 = vmatpush.msrb.mxu1 %v15944_v48  ;;  %v11003_v48 = vunpack.i.l.bf16 %v11002_v32  ;;  %v17127_v32 = vld [vmem:[#allocation6_spill] sm:$0xff] }
 0xc39   : > { %8082 = vmatpush.msra.mxu3 %v10969_v46  ;;  %8105 = vmatpush.msra.mxu2 %v10969_v46 }
 0xc3a   : > { %9949 = vmatpush.msk.msra.mxu0 %vm4889_vm14, %v15392_v58  ;;  %9954 = vmatpush.msk.msrb.mxu1 %vm4889_vm14, %v15392_v58 }
 0xc3b   : > { %9957 = vmatpush.msk.msra.mxu3 %vm4889_vm14, %v15428_v37  ;;  %9962 = vmatpush.msk.msra.mxu2 %vm4889_vm14, %v15428_v37  ;;  %v11007_v37 = vpop.permute.xlu2 %11006 }
 0xc3c   : > { %9955 = vmatmul.msk.f32.vlgmr.msrb.gmra.mxu1 %vm1095_vm11, %v15701_v50  ;;  %9963 = vmatmul.msk.f32.vlgmr.msra.gmra.mxu2 %vm1095_vm11, %v15701_v50  ;;  %v11008_v36 = vunpack.i.l.bf16 %v11007_v37  ;;  %v16109_v42 = vunpack.i.h.bf16 %v11007_v37 }
 0xc3d   : > { %8138 = vmatpush.msra.mxu1 %v10994_v24  ;;  %8178 = vmatpush.msrb.mxu2 %v16077_v10  ;;  %v16090_v58 = vpop.permute.xlu1 %11076 }
 0xc3e   : > { %8044 = vmatpush.msra.mxu0 %v15962_v41  ;;  %8084 = vmatpush.msra.mxu3 %v10988_v0 }
 0xc3f   : > { %8139 = vmatpush.msra.mxu1 %v10999_v7  ;;  %8179 = vmatpush.msrb.mxu2 %v16087_v38 }
 0xc40   : > { %8045 = vmatpush.msra.mxu0 %v15973_v26  ;;  %8085 = vmatpush.msra.mxu3 %v10968_v49  ;;  %v17124_v49 = vld [vmem:[#allocation13_spill] sm:$0xff] }
 0xc41   : > { %9968 = vmatpush.msk.msra.mxu1 %vm4889_vm14, %v15441_v59  ;;  %9976 = vmatpush.msk.msrb.mxu2 %vm4889_vm14, %v15446_v8 }
 0xc42   : > { %9950 = vmatpush.msk.msra.mxu0 %vm4889_vm14, %v15412_v47  ;;  %9958 = vmatpush.msk.msra.mxu3 %vm4889_vm14, %v15421_v44  ;;  %v11012_v44 = vpop.permute.xlu0 %11011 }
 0xc43   : > { %9951 = vmatmul.msk.f32.vlgmr.msra.gmra.mxu0 %vm1095_vm11, %v15701_v50  ;;  %9959 = vmatmul.msk.f32.vlgmr.msra.gmra.mxu3 %vm1095_vm11, %v15701_v50  ;;  %v11014_v35 = vunpack.i.h.bf16 %v11012_v44  ;;  %v16135_v26 = vunpack.i.l.bf16 %v11012_v44 }
 0xc44   : > { %8118 = vmatpush.msrb.mxu0 %v11003_v48  ;;  %8141 = vmatpush.msra.mxu1 %v11003_v48 }
 0xc45   : > { %8158 = vmatpush.msrb.mxu3 %v16103_v13  ;;  %8181 = vmatpush.msrb.mxu2 %v16103_v13  ;;  %v16113_v47 = vpop.permute.xlu1 %11081 }
 0xc46   : > { %8119 = vmatpush.msrb.mxu0 %v11008_v36  ;;  %8142 = vmatpush.msra.mxu1 %v11008_v36 }
 0xc47   : > { %8159 = vmatpush.msrb.mxu3 %v16109_v42  ;;  %8182 = vmatpush.msrb.mxu2 %v16109_v42 }
 0xc48   : > { %9964 = vmatpush.msk.msrb.mxu0 %vm4889_vm14, %v15480_v45  ;;  %9969 = vmatpush.msk.msra.mxu1 %vm4889_vm14, %v15480_v45 }
 0xc49   : > { %9972 = vmatpush.msk.msrb.mxu3 %vm4889_vm14, %v15467_v51  ;;  %9977 = vmatpush.msk.msrb.mxu2 %vm4889_vm14, %v15467_v51 }
 0xc4a   : > { %8121 = vmatpush.msrb.mxu0 %v16018_v21  ;;  %8144 = vmatpush.msra.mxu1 %v16018_v21  ;;  %v11032_v5 = vpop.permute.xlu0 %11031 }
 0xc4b   : > { %8161 = vmatpush.msrb.mxu3 %v10994_v24  ;;  %8184 = vmatpush.msrb.mxu2 %v10994_v24  ;;  %v16195_v46 = vunpack.i.l.bf16 %v11032_v5 }
 0xc4c   : > { %8122 = vmatpush.msrb.mxu0 %v16025_v30  ;;  %8145 = vmatpush.msra.mxu1 %v16025_v30  ;;  %v11034_v30 = vunpack.i.h.bf16 %v11032_v5  ;;  %v16325_v5 = vunpack.i.l.bf16 %v16090_v58 }
 0xc4d   : > { %8162 = vmatpush.msrb.mxu3 %v10999_v7  ;;  %8185 = vmatpush.msrb.mxu2 %v10999_v7  ;;  %v16129_v41 = vpop.permute.xlu1 %11091  ;;  %v16229_v7 = vunpack.i.h.bf16 %v16036_v12 }
 0xc4e   : > { %9965 = vmatpush.msk.msrb.mxu0 %vm4889_vm14, %v15396_v43  ;;  %9970 = vmatpush.msk.msra.mxu1 %vm4889_vm14, %v15396_v43  ;;  %v11027_v43 = vpop.permute.xlu2 %11026 }
 0xc4f   : > { %9973 = vmatpush.msk.msrb.mxu3 %vm4889_vm14, %v15441_v59  ;;  %9978 = vmatpush.msk.msrb.mxu2 %vm4889_vm14, %v15441_v59  ;;  %v11023_v59 = vunpack.i.l.bf16 %v16012_v34  ;;  %v11028_v19 = vunpack.i.l.bf16 %v11027_v43  ;;  %v16171_v31 = vunpack.i.h.bf16 %v11027_v43  ;;  %v17123_v34 = vld [vmem:[#allocation11_spill] sm:$0xff]  ;;  %v11068_v43 = vunpack.i.l.bf16 %v16065_v1 }
 0xc50   : > { %9971 = vmatmul.msk.f32.vlgmr.msra.gmra.mxu1 %vm1095_vm11, %v15701_v50  ;;  %9979 = vmatmul.msk.f32.vlgmr.msrb.gmra.mxu2 %vm1095_vm11, %v15701_v50 }
 0xc51   : > { %8218 = vmatpush.msrb.mxu1 %v11014_v35  ;;  %8258 = vmatpush.msra.mxu2 %v16135_v26 }
 0xc52   : > { %8124 = vmatpush.msrb.mxu0 %v16044_v29  ;;  %8164 = vmatpush.msrb.mxu3 %v11003_v48 }
 0xc53   : > { %8219 = vmatpush.msrb.mxu1 %v11019_v20  ;;  %8259 = vmatpush.msra.mxu2 %v16147_v55 }
 0xc54   : > { %8125 = vmatpush.msrb.mxu0 %v16051_v22  ;;  %8165 = vmatpush.msrb.mxu3 %v11008_v36  ;;  %v17125_v22 = vld [vmem:[#allocation7_spill] sm:$0xff] }
 0xc55   : > { %9984 = vmatpush.msk.msrb.mxu1 %vm4889_vm14, %v15471_v25  ;;  %9992 = vmatpush.msk.msra.mxu2 %vm4889_vm14, %v15460_v62  ;;  %v16162_v61 = vpop.permute.xlu1 %11111 }
 0xc56   : > { %9966 = vmatpush.msk.msrb.mxu0 %vm4889_vm14, %v15387_v14  ;;  %9974 = vmatpush.msk.msrb.mxu3 %vm4889_vm14, %v15480_v45  ;;  %v17122_v14 = vld [vmem:[#allocation12_spill] sm:$0xff]  ;;  %v11037_v45 = vpop.permute.xlu2 %11036 }
 0xc57   : > { %9967 = vmatmul.msk.f32.vlgmr.msrb.gmra.mxu0 %vm1095_vm11, %v15701_v50  ;;  %9975 = vmatmul.msk.f32.vlgmr.msrb.gmra.mxu3 %vm1095_vm11, %v15701_v50  ;;  %v11039_v0 = vunpack.i.h.bf16 %v11037_v45  ;;  %v16205_v29 = vunpack.i.l.bf16 %v11037_v45 }
 0xc58   : > { %8198 = vmatpush.msra.mxu0 %v11023_v59  ;;  %8221 = vmatpush.msrb.mxu1 %v11023_v59 }
 0xc59   : > { %8238 = vmatpush.msra.mxu3 %v16165_v54  ;;  %8261 = vmatpush.msra.mxu2 %v16165_v54 }
 0xc5a   : > { %8199 = vmatpush.msra.mxu0 %v11028_v19  ;;  %8222 = vmatpush.msrb.mxu1 %v11028_v19 }
 0xc5b   : > { %8239 = vmatpush.msra.mxu3 %v16171_v31  ;;  %8262 = vmatpush.msra.mxu2 %v16171_v31 }
 0xc5c   : > { %9980 = vmatpush.msk.msra.mxu0 %vm4889_vm14, %v17122_v14  ;;  %9985 = vmatpush.msk.msrb.mxu1 %vm4889_vm14, %v17122_v14 }
 0xc5d   : > { %9988 = vmatpush.msk.msra.mxu3 %vm4889_vm14, %v17123_v34  ;;  %9993 = vmatpush.msk.msra.mxu2 %vm4889_vm14, %v17123_v34 }
 0xc5e   : > { %8201 = vmatpush.msra.mxu0 %v16077_v10  ;;  %8224 = vmatpush.msrb.mxu1 %v16077_v10  ;;  %v11048_v10 = vunpack.i.l.bf16 %v16036_v12 }
 0xc5f   : > { %8241 = vmatpush.msra.mxu3 %v11014_v35  ;;  %8264 = vmatpush.msra.mxu2 %v11014_v35  ;;  %v17128_v35 = vld [vmem:[#allocation19_spill] sm:$0xff] }
 0xc60   : > { %8202 = vmatpush.msra.mxu0 %v16087_v38  ;;  %8225 = vmatpush.msrb.mxu1 %v16087_v38  ;;  %v16189_v21 = vpop.permute.xlu1 %11136  ;;  %v11057_v38 = vpop.permute.xlu0 %11056 }
 0xc61   : > { %8242 = vmatpush.msra.mxu3 %v11019_v20  ;;  %8265 = vmatpush.msra.mxu2 %v11019_v20  ;;  %v11059_v36 = vunpack.i.h.bf16 %v11057_v38 }
 0xc62   : > { %9981 = vmatpush.msk.msra.mxu0 %vm4889_vm14, %v15446_v8  ;;  %9986 = vmatpush.msk.msrb.mxu1 %vm4889_vm14, %v15446_v8  ;;  %v11042_v8 = vpop.permute.xlu2 %11041 }
 0xc63   : > { %9989 = vmatpush.msk.msra.mxu3 %vm4889_vm14, %v15471_v25  ;;  %9994 = vmatpush.msk.msra.mxu2 %vm4889_vm14, %v15471_v25  ;;  %v11043_v52 = vunpack.i.l.bf16 %v11042_v8  ;;  %v16221_v24 = vunpack.i.h.bf16 %v11042_v8 }
 0xc64   : > { %9987 = vmatmul.msk.f32.vlgmr.msrb.gmra.mxu1 %vm1095_vm11, %v15701_v50  ;;  %9995 = vmatmul.msk.f32.vlgmr.msra.gmra.mxu2 %vm1095_vm11, %v15701_v50 }
 0xc65   : > { %8298 = vmatpush.msra.mxu1 %v11034_v30  ;;  %8338 = vmatpush.msrb.mxu2 %v16195_v46 }
 0xc66   : > { %8204 = vmatpush.msra.mxu0 %v16103_v13  ;;  %8244 = vmatpush.msra.mxu3 %v11023_v59  ;;  %v16287_v59 = vunpack.i.h.bf16 %v16065_v1 }
 0xc67   : > { %8299 = vmatpush.msra.mxu1 %v11039_v0  ;;  %8339 = vmatpush.msrb.mxu2 %v16205_v29 }
 0xc68   : > { %8205 = vmatpush.msra.mxu0 %v16109_v42  ;;  %8245 = vmatpush.msra.mxu3 %v11028_v19  ;;  %v16211_v25 = vpop.permute.xlu1 %11141  ;;  %v16263_v42 = vunpack.i.l.bf16 %v11057_v38  ;;  %v17131_v19 = vld [vmem:[#allocation15_spill] sm:$0xff]  ;;  %v17135_v38 = vld [vmem:[#allocation24_spill] sm:$0xff] }
 0xc69   : > { %10000 = vmatpush.msk.msra.mxu1 %vm4889_vm14, %v17124_v49  ;;  %10008 = vmatpush.msk.msrb.mxu2 %vm4889_vm14, %v17125_v22 }
 0xc6a   : > { %9982 = vmatpush.msk.msra.mxu0 %vm4889_vm14, %v15467_v51  ;;  %9990 = vmatpush.msk.msra.mxu3 %vm4889_vm14, %v17122_v14  ;;  %v17126_v51 = vld [vmem:[#allocation8_spill] sm:$0xff]  ;;  %v11052_v37 = vpop.permute.xlu2 %11051 }
 0xc6b   : > { %9983 = vmatmul.msk.f32.vlgmr.msra.gmra.mxu0 %vm1095_vm11, %v15701_v50  ;;  %9991 = vmatmul.msk.f32.vlgmr.msra.gmra.mxu3 %vm1095_vm11, %v15701_v50  ;;  %v11054_v48 = vunpack.i.h.bf16 %v11052_v37  ;;  %v16253_v13 = vunpack.i.l.bf16 %v11052_v37 }
 0xc6c   : > { %8278 = vmatpush.msrb.mxu0 %v11043_v52  ;;  %8301 = vmatpush.msra.mxu1 %v11043_v52 }
 0xc6d   : > { %8318 = vmatpush.msrb.mxu3 %v16221_v24  ;;  %8341 = vmatpush.msrb.mxu2 %v16221_v24 }
 0xc6e   : > { %8279 = vmatpush.msrb.mxu0 %v11048_v10  ;;  %8302 = vmatpush.msra.mxu1 %v11048_v10 }
 0xc6f   : > { %8319 = vmatpush.msrb.mxu3 %v16229_v7  ;;  %8342 = vmatpush.msrb.mxu2 %v16229_v7 }
 0xc70   : > { %9996 = vmatpush.msk.msrb.mxu0 %vm4889_vm14, %v17126_v51  ;;  %10001 = vmatpush.msk.msra.mxu1 %vm4889_vm14, %v17126_v51  ;;  %v16243_v12 = vpop.permute.xlu1 %11166 }
 0xc71   : > { %10004 = vmatpush.msk.msrb.mxu3 %vm4889_vm14, %v17127_v32  ;;  %10009 = vmatpush.msk.msrb.mxu2 %vm4889_vm14, %v17127_v32  ;;  %v7808_v8 = vpop.f32.mrf.mxu0 }
 0xc72   : > { %8281 = vmatpush.msrb.mxu0 %v16135_v26  ;;  %8304 = vmatpush.msra.mxu1 %v16135_v26  ;;  %v17129_v26 = vld [vmem:[#allocation17_spill] sm:$0xff] }
 0xc73   : > { %8321 = vmatpush.msrb.mxu3 %v11034_v30  ;;  %8344 = vmatpush.msrb.mxu2 %v11034_v30 }
 0xc74   : > { %8282 = vmatpush.msrb.mxu0 %v16147_v55  ;;  %8305 = vmatpush.msra.mxu1 %v16147_v55 }
 0xc75   : > { %8322 = vmatpush.msrb.mxu3 %v11039_v0  ;;  %8345 = vmatpush.msrb.mxu2 %v11039_v0  ;;  %v17132_v0 = vld [vmem:[#allocation10_spill] sm:$0xff] }
 0xc76   : > { %9997 = vmatpush.msk.msrb.mxu0 %vm4889_vm14, %v15460_v62  ;;  %10002 = vmatpush.msk.msra.mxu1 %vm4889_vm14, %v15460_v62  ;;  %v11062_v62 = vpop.permute.xlu0 %11061 }
 0xc77   : > { %10005 = vmatpush.msk.msrb.mxu3 %vm4889_vm14, %v17124_v49  ;;  %10010 = vmatpush.msk.msrb.mxu2 %vm4889_vm14, %v17124_v49  ;;  %v11063_v20 = vunpack.i.l.bf16 %v11062_v62  ;;  %v16279_v55 = vunpack.i.h.bf16 %v11062_v62  ;;  %v16339_v49 = vunpack.i.l.bf16 %v16113_v47 }
 0xc78   : > { %10003 = vmatmul.msk.f32.vlgmr.msra.gmra.mxu1 %vm1095_vm11, %v15701_v50  ;;  %10011 = vmatmul.msk.f32.vlgmr.msrb.gmra.mxu2 %vm1095_vm11, %v15701_v50  ;;  %v16268_v44 = vpop.permute.xlu1 %11186 }
 0xc79   : > { %8378 = vmatpush.msrb.mxu1 %v11054_v48  ;;  %8418 = vmatpush.msra.mxu2 %v16253_v13 }
 0xc7a   : > { %8284 = vmatpush.msrb.mxu0 %v16165_v54  ;;  %8324 = vmatpush.msrb.mxu3 %v11043_v52  ;;  %v17130_v54 = vld [vmem:[#allocation18_spill] sm:$0xff]  ;;  %v16346_v52 = vunpack.i.h.bf16 %v16113_v47  ;;  %v17134_v47 = vld [vmem:[#allocation20_spill] sm:$0xff] }
 0xc7b   : > { %8379 = vmatpush.msrb.mxu1 %v11059_v36  ;;  %8419 = vmatpush.msra.mxu2 %v16263_v42 }
 0xc7c   : > { %8285 = vmatpush.msrb.mxu0 %v16171_v31  ;;  %8325 = vmatpush.msrb.mxu3 %v11048_v10  ;;  %v11072_v31 = vpop.permute.xlu2 %11071 }
 0xc7d   : > { %10016 = vmatpush.msk.msrb.mxu1 %vm4889_vm14, %v17128_v35  ;;  %10024 = vmatpush.msk.msra.mxu2 %vm4889_vm14, %v17129_v26  ;;  %v11074_v14 = vunpack.i.h.bf16 %v11072_v31  ;;  %v16311_v45 = vunpack.i.l.bf16 %v11072_v31 }
 0xc7e   : > { %9998 = vmatpush.msk.msrb.mxu0 %vm4889_vm14, %v17123_v34  ;;  %10006 = vmatpush.msk.msrb.mxu3 %vm4889_vm14, %v17126_v51  ;;  %v16322_v34 = vunpack.i.h.bf16 %v16090_v58  ;;  %v17133_v58 = vld [vmem:[#allocation9_spill] sm:$0xff] }
 0xc7f   : > { %9999 = vmatmul.msk.f32.vlgmr.msrb.gmra.mxu0 %vm1095_vm11, %v15701_v50  ;;  %10007 = vmatmul.msk.f32.vlgmr.msrb.gmra.mxu3 %vm1095_vm11, %v15701_v50 }
 0xc80   : > { %8358 = vmatpush.msra.mxu0 %v11063_v20  ;;  %8381 = vmatpush.msrb.mxu1 %v11063_v20 }
 0xc81   : > { %8398 = vmatpush.msra.mxu3 %v16279_v55  ;;  %8421 = vmatpush.msra.mxu2 %v16279_v55 }
 0xc82   : > { %8359 = vmatpush.msra.mxu0 %v11068_v43  ;;  %8382 = vmatpush.msrb.mxu1 %v11068_v43 }
 0xc83   : > { %8399 = vmatpush.msra.mxu3 %v16287_v59  ;;  %8422 = vmatpush.msra.mxu2 %v16287_v59  ;;  %v16301_v1 = vpop.permute.xlu1 %11191 }
 0xc84   : > { %10012 = vmatpush.msk.msra.mxu0 %vm4889_vm14, %v17130_v54  ;;  %10017 = vmatpush.msk.msrb.mxu1 %vm4889_vm14, %v17130_v54  ;;  %v11097_v51 = vpop.permute.xlu2 %11096 }
 0xc85   : > { %10020 = vmatpush.msk.msra.mxu3 %vm4889_vm14, %v17131_v19  ;;  %10025 = vmatpush.msk.msra.mxu2 %vm4889_vm14, %v17131_v19 }
 0xc86   : > { %8361 = vmatpush.msra.mxu0 %v16195_v46  ;;  %8384 = vmatpush.msrb.mxu1 %v16195_v46  ;;  %v11087_v46 = vpop.permute.xlu0 %11086 }
 0xc87   : > { %8401 = vmatpush.msra.mxu3 %v11054_v48  ;;  %8424 = vmatpush.msra.mxu2 %v11054_v48  ;;  %v16357_v10 = vunpack.i.l.bf16 %v11087_v46 }
 0xc88   : > { %8362 = vmatpush.msra.mxu0 %v16205_v29  ;;  %8385 = vmatpush.msrb.mxu1 %v16205_v29  ;;  %v7768_v29 = vpop.f32.mrf.mxu3 }
 0xc89   : > { %8402 = vmatpush.msra.mxu3 %v11059_v36  ;;  %8425 = vmatpush.msra.mxu2 %v11059_v36 }
 0xc8a   : > { %10013 = vmatpush.msk.msra.mxu0 %vm4889_vm14, %v17125_v22  ;;  %10018 = vmatpush.msk.msrb.mxu1 %vm4889_vm14, %v17125_v22  ;;  %v7788_v22 = vpop.f32.mrf.mxu2 }
 0xc8b   : > { %10021 = vmatpush.msk.msra.mxu3 %vm4889_vm14, %v17128_v35  ;;  %10026 = vmatpush.msk.msra.mxu2 %vm4889_vm14, %v17128_v35 }
 0xc8c   : > { %10019 = vmatmul.msk.f32.vlgmr.msrb.gmra.mxu1 %vm1095_vm11, %v15701_v50  ;;  %10027 = vmatmul.msk.f32.vlgmr.msra.gmra.mxu2 %vm1095_vm11, %v15701_v50  ;;  %v7748_v50 = vpop.f32.mrf.mxu1 }
 0xc8d   : > { %8458 = vmatpush.msra.mxu1 %v11074_v14  ;;  %8498 = vmatpush.msrb.mxu2 %v16311_v45 }
 0xc8e   : > { %8364 = vmatpush.msra.mxu0 %v16221_v24  ;;  %8404 = vmatpush.msra.mxu3 %v11063_v20  ;;  %v16351_v24 = vld [vmem:[%s16951_s6] sm:$0x1] }
 0xc8f   : > { %8459 = vmatpush.msra.mxu1 %v16322_v34  ;;  %8499 = vmatpush.msrb.mxu2 %v16325_v5  ;;  %v16331_v30 = vpop.permute.xlu1 %7717 }
 0xc90   : > { %8365 = vmatpush.msra.mxu0 %v16229_v7  ;;  %8405 = vmatpush.msra.mxu3 %v11068_v43  ;;  %v16361_v7 = vunpack.i.h.bf16 %v11087_v46  ;;  %v7848_v62 = vpop.f32.mrf.mxu3 }
 0xc91   : > { %10032 = vmatpush.msk.msra.mxu1 %vm4889_vm14, %v17132_v0  ;;  %10040 = vmatpush.msk.msrb.mxu2 %vm4889_vm14, %v17133_v58 }
 0xc92   : > { %10014 = vmatpush.msk.msra.mxu0 %vm4889_vm14, %v17127_v32  ;;  %10022 = vmatpush.msk.msra.mxu3 %vm4889_vm14, %v17130_v54 }
 0xc93   : > { %10015 = vmatmul.msk.f32.vlgmr.msra.gmra.mxu0 %vm1095_vm11, %v16351_v24  ;;  %10023 = vmatmul.msk.f32.vlgmr.msra.gmra.mxu3 %vm1095_vm11, %v16351_v24 }
 0xc94   : > { %8438 = vmatpush.msrb.mxu0 %v16339_v49  ;;  %8461 = vmatpush.msra.mxu1 %v16339_v49  ;;  %v7828_v37 = vpop.f32.mrf.mxu1  ;;  %v7888_v43 = vpop.f32.mrf.mxu0 }
 0xc95   : > { %8478 = vmatpush.msrb.mxu3 %v16346_v52  ;;  %8501 = vmatpush.msrb.mxu2 %v16346_v52 }
 0xc96   : > { %8439 = vmatpush.msrb.mxu0 %v16357_v10  ;;  %8462 = vmatpush.msra.mxu1 %v16357_v10 }
 0xc97   : > { %8479 = vmatpush.msrb.mxu3 %v16361_v7  ;;  %8502 = vmatpush.msrb.mxu2 %v16361_v7 }
 0xc98   : > { %10028 = vmatpush.msk.msrb.mxu0 %vm4889_vm14, %v17134_v47  ;;  %10033 = vmatpush.msk.msra.mxu1 %vm4889_vm14, %v17134_v47 }
 0xc99   : > { %10036 = vmatpush.msk.msrb.mxu3 %vm4889_vm14, %v17135_v38  ;;  %10041 = vmatpush.msk.msrb.mxu2 %vm4889_vm14, %v17135_v38  ;;  %v16377_v32 = vpop.permute.xlu1 %7725 }
 0xc9a   : > { %8441 = vmatpush.msrb.mxu0 %v16253_v13  ;;  %8464 = vmatpush.msra.mxu1 %v16253_v13  ;;  %v7769_v48 = vadd.f32 %v7768_v29, %v16377_v32  ;;  %v7789_v36 = vadd.f32 %v7788_v22, %v16377_v32  ;;  %v7809_v35 = vadd.f32 %v7808_v8, %v16377_v32  ;;  %v7868_v13 = vpop.f32.mrf.mxu2  ;;  %v16391_v29 = vunpack.i.h.bf16 %v16129_v41 }
 0xc9b   : > { %8481 = vmatpush.msrb.mxu3 %v11074_v14  ;;  %8504 = vmatpush.msrb.mxu2 %v11074_v14  ;;  %v7829_v20 = vadd.f32 %v7828_v37, %v16377_v32  ;;  %v7749_v54 = vadd.f32 %v7748_v50, %v16377_v32  ;;  %v7849_v31 = vadd.f32 %v7848_v62, %v16377_v32  ;;  %v16403_v37 = vunpack.i.l.bf16 %v16129_v41 }
 0xc9c   : > { %8442 = vmatpush.msrb.mxu0 %v16263_v42  ;;  %8465 = vmatpush.msra.mxu1 %v16263_v42  ;;  %v9075_v46 = vrot.slane %v7769_v48, 7  ;;  %v9078_v14 = vrot.slane %v7789_v36, 6  ;;  %v7869_v8 = vadd.f32 %v7868_v13, %v16377_v32  ;;  %v7889_v42 = vadd.f32 %v7888_v43, %v16377_v32  ;;  %v11102_v13 = vpop.permute.xlu2 %11101 }
 0xc9d   : > { %8482 = vmatpush.msrb.mxu3 %v16322_v34  ;;  %8505 = vmatpush.msrb.mxu2 %v16322_v34  ;;  %v9081_v22 = vrot.slane %v7809_v35, 5  ;;  %v9084_v34 = vrot.slane %v7829_v20, 4  ;;  %v11099_v48 = vunpack.i.h.bf16 %v11097_v51  ;;  %v9087_v36 = vrot.slane %v7849_v31, 3 }
 0xc9e   : > { %10029 = vmatpush.msk.msrb.mxu0 %vm4889_vm14, %v17129_v26  ;;  %10034 = vmatpush.msk.msra.mxu1 %vm4889_vm14, %v17129_v26  ;;  %v9077_v50 = vsel %vm9076_vm0, %v9075_v46, %v7749_v54  ;;  %v16419_v62 = vunpack.i.l.bf16 %v11097_v51  ;;  %v9090_v35 = vrot.slane %v7869_v8, 2  ;;  %v9093_v43 = vrot.slane %v7889_v42, 1  ;;  %v11107_v51 = vpop.permute.xlu0 %11106  ;;  %v7908_v8 = vpop.f32.mrf.mxu1 }
 0xc9f   : > { %10037 = vmatpush.msk.msrb.mxu3 %vm4889_vm14, %v17132_v0  ;;  %10042 = vmatpush.msk.msrb.mxu2 %vm4889_vm14, %v17132_v0  ;;  %v9080_v26 = vsel %vm9079_vm4, %v9078_v14, %v9077_v50  ;;  %v16451_v46 = vunpack.i.h.bf16 %v11107_v51  ;;  %v7928_v14 = vpop.f32.mrf.mxu3  ;;  %v16477_v50 = vunpack.i.h.bf16 %v16162_v61 }
 0xca0   : > { %10035 = vmatmul.msk.f32.vlgmr.msra.gmra.mxu1 %vm1095_vm11, %v16351_v24  ;;  %10043 = vmatmul.msk.f32.vlgmr.msrb.gmra.mxu2 %vm1095_vm11, %v16351_v24  ;;  %v9083_v41 = vsel %vm9082_vm5, %v9081_v22, %v9080_v26  ;;  %v7929_v42 = vadd.f32 %v7928_v14, %v16377_v32 }
 0xca1   : > { %8538 = vmatpush.msrb.mxu1 %v16391_v29  ;;  %8578 = vmatpush.msra.mxu2 %v16403_v37  ;;  %v9086_v0 = vsel %vm9085_vm6, %v9084_v34, %v9083_v41  ;;  %v7909_v41 = vadd.f32 %v7908_v8, %v16377_v32 }
 0xca2   : > { %8444 = vmatpush.msrb.mxu0 %v16279_v55  ;;  %8484 = vmatpush.msrb.mxu3 %v16339_v49  ;;  %v9089_v20 = vsel %vm9088_vm7, %v9087_v36, %v9086_v0  ;;  %v17136_v55 = vld [vmem:[#allocation23_spill] sm:$0xff]  ;;  %v11103_v49 = vunpack.i.l.bf16 %v11102_v13  ;;  %v7948_v22 = vpop.f32.mrf.mxu2 }
 0xca3   : > { %8539 = vmatpush.msrb.mxu1 %v11099_v48  ;;  %8579 = vmatpush.msra.mxu2 %v16419_v62  ;;  %v9092_v54 = vsel %vm9091_vm9, %v9090_v35, %v9089_v20  ;;  %v7949_v34 = vadd.f32 %v7948_v22, %v16377_v32 }
 0xca4   : > { %8445 = vmatpush.msrb.mxu0 %v16287_v59  ;;  %8485 = vmatpush.msrb.mxu3 %v16357_v10  ;;  %v9095_v31 = vsel %vm9094_vm10, %v9093_v43, %v9092_v54  ;;  %v16445_v59 = vunpack.i.h.bf16 %v11102_v13  ;;  %v11108_v10 = vunpack.i.l.bf16 %v11107_v51  ;;  %v11127_v0 = vpop.permute.xlu2 %11126 }
 0xca5   : > { %10048 = vmatpush.msk.msrb.mxu1 %vm4889_vm14, %v15639_v16  ;;  %10056 = vmatpush.msk.msra.mxu2 %vm4889_vm14, %v17136_v55  ;;  %9203 = vst.msk [vmem:[%s16437_s30] sm:$0xff] %vm9202_vm12, %v9095_v31  ;;  %v9098_v13 = vrot.slane %v7949_v34, 6  ;;  %v11128_v31 = vunpack.i.l.bf16 %v11127_v0 }
 0xca6   : > { %10030 = vmatpush.msk.msrb.mxu0 %vm4889_vm14, %v17131_v19  ;;  %10038 = vmatpush.msk.msrb.mxu3 %vm4889_vm14, %v17134_v47  ;;  %v11117_v19 = vpop.permute.xlu0 %11116  ;;  %v17137_v47 = vld [vmem:[#allocation16_spill] sm:$0xff]  ;;  %v7988_v36 = vpop.f32.mrf.mxu1 }
 0xca7   : > { %10031 = vmatmul.msk.f32.vlgmr.msrb.gmra.mxu0 %vm1095_vm11, %v16351_v24  ;;  %10039 = vmatmul.msk.f32.vlgmr.msrb.gmra.mxu3 %vm1095_vm11, %v16351_v24 }
 0xca8   : > { %8518 = vmatpush.msra.mxu0 %v11103_v49  ;;  %8541 = vmatpush.msrb.mxu1 %v11103_v49 }
 0xca9   : > { %8558 = vmatpush.msra.mxu3 %v16445_v59  ;;  %8581 = vmatpush.msra.mxu2 %v16445_v59 }
 0xcaa   : > { %8519 = vmatpush.msra.mxu0 %v11108_v10  ;;  %8542 = vmatpush.msrb.mxu1 %v11108_v10 }
 0xcab   : > { %8559 = vmatpush.msra.mxu3 %v16451_v46  ;;  %8582 = vmatpush.msra.mxu2 %v16451_v46  ;;  %v8028_v54 = vpop.f32.mrf.mxu2 }
 0xcac   : > { %10044 = vmatpush.msk.msra.mxu0 %vm4889_vm14, %v15653_v4  ;;  %10049 = vmatpush.msk.msrb.mxu1 %vm4889_vm14, %v15653_v4  ;;  %v8029_v14 = vadd.f32 %v8028_v54, %v16377_v32 }
 0xcad   : > { %10052 = vmatpush.msk.msra.mxu3 %vm4889_vm14, %v17137_v47  ;;  %10057 = vmatpush.msk.msra.mxu2 %vm4889_vm14, %v17137_v47 }
 0xcae   : > { %8521 = vmatpush.msra.mxu0 %v16311_v45  ;;  %8544 = vmatpush.msrb.mxu1 %v16311_v45  ;;  %v7968_v45 = vpop.f32.mrf.mxu0 }
 0xcaf   : > { %8561 = vmatpush.msra.mxu3 %v16391_v29  ;;  %8584 = vmatpush.msra.mxu2 %v16391_v29  ;;  %v16480_v29 = vunpack.i.l.bf16 %v16162_v61  ;;  %v9096_v61 = vrot.slane %v7929_v42, 7  ;;  %v7969_v26 = vadd.f32 %v7968_v45, %v16377_v32 }
 0xcb0   : > { %8522 = vmatpush.msra.mxu0 %v16325_v5  ;;  %8545 = vmatpush.msrb.mxu1 %v16325_v5  ;;  %v16490_v5 = vunpack.i.h.bf16 %v11117_v19 }
 0xcb1   : > { %8562 = vmatpush.msra.mxu3 %v11099_v48  ;;  %8585 = vmatpush.msra.mxu2 %v11099_v48  ;;  %v11122_v48 = vpop.permute.xlu0 %11121  ;;  %v9097_v35 = vsel %vm9076_vm0, %v9096_v61, %v7909_v41  ;;  %v9106_v61 = vrot.slane %v8029_v14, 2 }
 0xcb2   : > { %10045 = vmatpush.msk.msra.mxu0 %vm4889_vm14, %v17133_v58  ;;  %10050 = vmatpush.msk.msrb.mxu1 %vm4889_vm14, %v17133_v58  ;;  %v16492_v58 = vunpack.i.l.bf16 %v11117_v19  ;;  %v11123_v43 = vunpack.i.l.bf16 %v11122_v48  ;;  %v16514_v51 = vunpack.i.h.bf16 %v11122_v48 }
 0xcb3   : > { %10053 = vmatpush.msk.msra.mxu3 %vm4889_vm14, %v15639_v16  ;;  %10058 = vmatpush.msk.msra.mxu2 %vm4889_vm14, %v15639_v16  ;;  %v8008_v16 = vpop.f32.mrf.mxu3 }
 0xcb4   : > { %10051 = vmatmul.msk.f32.vlgmr.msrb.gmra.mxu1 %vm1095_vm11, %v16351_v24  ;;  %10059 = vmatmul.msk.f32.vlgmr.msra.gmra.mxu2 %vm1095_vm11, %v16351_v24  ;;  %v8009_v20 = vadd.f32 %v8008_v16, %v16377_v32 }
 0xcb5   : > { %8618 = vmatpush.msra.mxu1 %v16477_v50  ;;  %8658 = vmatpush.msrb.mxu2 %v16480_v29 }
 0xcb6   : > { %8524 = vmatpush.msra.mxu0 %v16346_v52  ;;  %8564 = vmatpush.msra.mxu3 %v11103_v49  ;;  %v9100_v52 = vrot.slane %v7969_v26, 5  ;;  %v9099_v49 = vsel %vm9079_vm4, %v9098_v13, %v9097_v35 }
 0xcb7   : > { %8619 = vmatpush.msra.mxu1 %v16490_v5  ;;  %8659 = vmatpush.msrb.mxu2 %v16492_v58 }
 0xcb8   : > { %8525 = vmatpush.msra.mxu0 %v16361_v7  ;;  %8565 = vmatpush.msra.mxu3 %v11108_v10  ;;  %v7989_v7 = vadd.f32 %v7988_v36, %v16377_v32  ;;  %v9104_v10 = vrot.slane %v8009_v20, 3 }
 0xcb9   : > { %10064 = vmatpush.msk.msra.mxu1 %vm4889_vm14, %v15672_v2  ;;  %10072 = vmatpush.msk.msrb.mxu2 %vm4889_vm14, %v15684_v23  ;;  %v11132_v34 = vpop.permute.xlu0 %11131 }
 0xcba   : > { %10046 = vmatpush.msk.msra.mxu0 %vm4889_vm14, %v17135_v38  ;;  %10054 = vmatpush.msk.msra.mxu3 %vm4889_vm14, %v15653_v4  ;;  %v16521_v38 = vunpack.i.h.bf16 %v11127_v0  ;;  %v9101_v4 = vsel %vm9082_vm5, %v9100_v52, %v9099_v49  ;;  %v9102_v19 = vrot.slane %v7989_v7, 4 }
 0xcbb   : > { %10047 = vmatmul.msk.f32.vlgmr.msra.gmra.mxu0 %vm1095_vm11, %v16351_v24  ;;  %10055 = vmatmul.msk.f32.vlgmr.msra.gmra.mxu3 %vm1095_vm11, %v16351_v24 }
 0xcbc   : > { %8598 = vmatpush.msrb.mxu0 %v11123_v43  ;;  %8621 = vmatpush.msra.mxu1 %v11123_v43  ;;  %v9103_v8 = vsel %vm9085_vm6, %v9102_v19, %v9101_v4 }
 0xcbd   : > { %8638 = vmatpush.msrb.mxu3 %v16514_v51  ;;  %8661 = vmatpush.msrb.mxu2 %v16514_v51  ;;  %v9105_v45 = vsel %vm9088_vm7, %v9104_v10, %v9103_v8 }
 0xcbe   : > { %8599 = vmatpush.msrb.mxu0 %v11128_v31  ;;  %8622 = vmatpush.msra.mxu1 %v11128_v31  ;;  %v9107_v16 = vsel %vm9091_vm9, %v9106_v61, %v9105_v45 }
 0xcbf   : > { %8639 = vmatpush.msrb.mxu3 %v16521_v38  ;;  %8662 = vmatpush.msrb.mxu2 %v16521_v38  ;;  %v8108_v52 = vpop.f32.mrf.mxu2 }
 0xcc0   : > { %10060 = vmatpush.msk.msrb.mxu0 %vm4889_vm14, %v15738_v57  ;;  %10065 = vmatpush.msk.msra.mxu1 %vm4889_vm14, %v15738_v57  ;;  %v8048_v42 = vpop.f32.mrf.mxu0  ;;  %v8109_v13 = vadd.f32 %v8108_v52, %v16377_v32 }
 0xcc1   : > { %10068 = vmatpush.msk.msrb.mxu3 %vm4889_vm14, %v15725_v40  ;;  %10073 = vmatpush.msk.msrb.mxu2 %vm4889_vm14, %v15725_v40  ;;  %v8049_v22 = vadd.f32 %v8048_v42, %v16377_v32  ;;  %v11152_v41 = vpop.permute.xlu0 %11151  ;;  %v11168_v42 = vunpack.i.l.bf16 %v16243_v12 }
 0xcc2   : > { %8601 = vmatpush.msrb.mxu0 %v16403_v37  ;;  %8624 = vmatpush.msra.mxu1 %v16403_v37  ;;  %v11134_v37 = vunpack.i.h.bf16 %v11132_v34  ;;  %v16613_v0 = vunpack.i.h.bf16 %v11152_v41  ;;  %v16615_v35 = vunpack.i.l.bf16 %v11152_v41  ;;  %v9112_v19 = vrot.slane %v8109_v13, 6 }
 0xcc3   : > { %8641 = vmatpush.msrb.mxu3 %v16477_v50  ;;  %8664 = vmatpush.msrb.mxu2 %v16477_v50  ;;  %v9108_v26 = vrot.slane %v8049_v22, 1  ;;  %v16556_v50 = vunpack.i.l.bf16 %v11132_v34 }
 0xcc4   : > { %8602 = vmatpush.msrb.mxu0 %v16419_v62  ;;  %8625 = vmatpush.msra.mxu1 %v16419_v62  ;;  %v11139_v62 = vunpack.i.h.bf16 %v16189_v21 }
 0xcc5   : > { %8642 = vmatpush.msrb.mxu3 %v16490_v5  ;;  %8665 = vmatpush.msrb.mxu2 %v16490_v5  ;;  %v9109_v48 = vsel %vm9094_vm10, %v9108_v26, %v9107_v16  ;;  %v11147_v5 = vpop.permute.xlu2 %11146 }
 0xcc6   : > { %10061 = vmatpush.msk.msrb.mxu0 %vm4889_vm14, %v17136_v55  ;;  %10066 = vmatpush.msk.msra.mxu1 %vm4889_vm14, %v17136_v55  ;;  %9204 = vst.msk [vmem:[%s16437_s30 + $0x8] sm:$0xff] %vm9202_vm12, %v9109_v48  ;;  %v16568_v55 = vunpack.i.l.bf16 %v16189_v21  ;;  %v16584_v21 = vunpack.i.h.bf16 %v16211_v25 }
 0xcc7   : > { %10069 = vmatpush.msk.msrb.mxu3 %vm4889_vm14, %v15672_v2  ;;  %10074 = vmatpush.msk.msrb.mxu2 %vm4889_vm14, %v15672_v2  ;;  %v11143_v2 = vunpack.i.l.bf16 %v16211_v25  ;;  %v8088_v25 = vpop.f32.mrf.mxu3 }
 0xcc8   : > { %10067 = vmatmul.msk.f32.vlgmr.msra.gmra.mxu1 %vm1095_vm11, %v16351_v24  ;;  %10075 = vmatmul.msk.f32.vlgmr.msrb.gmra.mxu2 %vm1095_vm11, %v16351_v24  ;;  %v8089_v36 = vadd.f32 %v8088_v25, %v16377_v32 }
 0xcc9   : > { %8698 = vmatpush.msrb.mxu1 %v11134_v37  ;;  %8738 = vmatpush.msra.mxu2 %v16556_v50  ;;  %v11177_v45 = vpop.permute.xlu0 %11176 }
 0xcca   : > { %8604 = vmatpush.msrb.mxu0 %v16445_v59  ;;  %8644 = vmatpush.msrb.mxu3 %v11123_v43  ;;  %v11148_v59 = vunpack.i.l.bf16 %v11147_v5  ;;  %v9110_v20 = vrot.slane %v8089_v36, 7 }
 0xccb   : > { %8699 = vmatpush.msrb.mxu1 %v11139_v62  ;;  %8739 = vmatpush.msra.mxu2 %v16568_v55 }
 0xccc   : > { %8605 = vmatpush.msrb.mxu0 %v16451_v46  ;;  %8645 = vmatpush.msrb.mxu3 %v11128_v31  ;;  %v16590_v46 = vunpack.i.h.bf16 %v11147_v5 }
 0xccd   : > { %10080 = vmatpush.msk.msrb.mxu1 %vm4889_vm14, %v15749_v63  ;;  %10088 = vmatpush.msk.msra.mxu2 %vm4889_vm14, %v15732_v60 }
 0xcce   : > { %10062 = vmatpush.msk.msrb.mxu0 %vm4889_vm14, %v17137_v47  ;;  %10070 = vmatpush.msk.msrb.mxu3 %vm4889_vm14, %v15738_v57  ;;  %v11157_v57 = vpop.permute.xlu2 %11156  ;;  %v8068_v47 = vpop.f32.mrf.mxu1 }
 0xccf   : > { %10063 = vmatmul.msk.f32.vlgmr.msrb.gmra.mxu0 %vm1095_vm11, %v16351_v24  ;;  %10071 = vmatmul.msk.f32.vlgmr.msrb.gmra.mxu3 %vm1095_vm11, %v16351_v24  ;;  %v8069_v54 = vadd.f32 %v8068_v47, %v16377_v32 }
 0xcd0   : > { %8678 = vmatpush.msra.mxu0 %v11143_v2  ;;  %8701 = vmatpush.msrb.mxu1 %v11143_v2 }
 0xcd1   : > { %8718 = vmatpush.msra.mxu3 %v16584_v21  ;;  %8741 = vmatpush.msra.mxu2 %v16584_v21  ;;  %v9111_v49 = vsel %vm9076_vm0, %v9110_v20, %v8069_v54  ;;  %v11182_v25 = vpop.permute.xlu0 %11181 }
 0xcd2   : > { %8679 = vmatpush.msra.mxu0 %v11148_v59  ;;  %8702 = vmatpush.msrb.mxu1 %v11148_v59  ;;  %v16703_v41 = vunpack.i.l.bf16 %v11182_v25 }
 0xcd3   : > { %8719 = vmatpush.msra.mxu3 %v16590_v46  ;;  %8742 = vmatpush.msra.mxu2 %v16590_v46  ;;  %v8188_v8 = vpop.f32.mrf.mxu2 }
 0xcd4   : > { %10076 = vmatpush.msk.msra.mxu0 %vm4889_vm14, %v15776_v33  ;;  %10081 = vmatpush.msk.msrb.mxu1 %vm4889_vm14, %v15776_v33  ;;  %v8189_v34 = vadd.f32 %v8188_v8, %v16377_v32 }
 0xcd5   : > { %10084 = vmatpush.msk.msra.mxu3 %vm4889_vm14, %v15787_v18  ;;  %10089 = vmatpush.msk.msra.mxu2 %vm4889_vm14, %v15787_v18 }
 0xcd6   : > { %8681 = vmatpush.msra.mxu0 %v16480_v29  ;;  %8704 = vmatpush.msrb.mxu1 %v16480_v29  ;;  %v8128_v29 = vpop.f32.mrf.mxu0  ;;  %v11162_v7 = vpop.permute.xlu2 %11161 }
 0xcd7   : > { %8721 = vmatpush.msra.mxu3 %v11134_v37  ;;  %8744 = vmatpush.msra.mxu2 %v11134_v37  ;;  %v8129_v43 = vadd.f32 %v8128_v29, %v16377_v32  ;;  %v8148_v31 = vpop.f32.mrf.mxu1  ;;  %v11163_v10 = vunpack.i.l.bf16 %v11162_v7  ;;  %v16649_v14 = vunpack.i.h.bf16 %v11162_v7 }
 0xcd8   : > { %8682 = vmatpush.msra.mxu0 %v16492_v58  ;;  %8705 = vmatpush.msrb.mxu1 %v16492_v58  ;;  %v16625_v58 = vunpack.i.h.bf16 %v11157_v57 }
 0xcd9   : > { %8722 = vmatpush.msra.mxu3 %v11139_v62  ;;  %8745 = vmatpush.msra.mxu2 %v11139_v62  ;;  %v9120_v62 = vrot.slane %v8189_v34, 2 }
 0xcda   : > { %10077 = vmatpush.msk.msra.mxu0 %vm4889_vm14, %v15684_v23  ;;  %10082 = vmatpush.msk.msrb.mxu1 %vm4889_vm14, %v15684_v23  ;;  %v16627_v23 = vunpack.i.l.bf16 %v11157_v57 }
 0xcdb   : > { %10085 = vmatpush.msk.msra.mxu3 %vm4889_vm14, %v15749_v63  ;;  %10090 = vmatpush.msk.msra.mxu2 %vm4889_vm14, %v15749_v63  ;;  %v8168_v63 = vpop.f32.mrf.mxu3 }
 0xcdc   : > { %10083 = vmatmul.msk.f32.vlgmr.msrb.gmra.mxu1 %vm1095_vm11, %v16351_v24  ;;  %10091 = vmatmul.msk.f32.vlgmr.msra.gmra.mxu2 %vm1095_vm11, %v16351_v24  ;;  %v8169_v4 = vadd.f32 %v8168_v63, %v16377_v32 }
 0xcdd   : > { %8778 = vmatpush.msra.mxu1 %v16613_v0  ;;  %8818 = vmatpush.msrb.mxu2 %v16615_v35 }
 0xcde   : > { %8684 = vmatpush.msra.mxu0 %v16514_v51  ;;  %8724 = vmatpush.msra.mxu3 %v11143_v2  ;;  %v9114_v51 = vrot.slane %v8129_v43, 5  ;;  %v9118_v61 = vrot.slane %v8169_v4, 3  ;;  %v11172_v2 = vpop.permute.xlu2 %11171  ;;  %v16778_v4 = vunpack.i.h.bf16 %v16301_v1 }
 0xcdf   : > { %8779 = vmatpush.msra.mxu1 %v16625_v58  ;;  %8819 = vmatpush.msrb.mxu2 %v16627_v23  ;;  %v16693_v47 = vunpack.i.l.bf16 %v11172_v2 }
 0xce0   : > { %8685 = vmatpush.msra.mxu0 %v16521_v38  ;;  %8725 = vmatpush.msra.mxu3 %v11148_v59  ;;  %v8149_v38 = vadd.f32 %v8148_v31, %v16377_v32  ;;  %v11193_v31 = vunpack.i.l.bf16 %v16301_v1 }
 0xce1   : > { %10096 = vmatpush.msk.msra.mxu1 %vm4889_vm14, %v15826_v28  ;;  %10104 = vmatpush.msk.msrb.mxu2 %vm4889_vm14, %v15808_v53  ;;  %v8228_v36 = vpop.f32.mrf.mxu1 }
 0xce2   : > { %10078 = vmatpush.msk.msra.mxu0 %vm4889_vm14, %v15725_v40  ;;  %10086 = vmatpush.msk.msra.mxu3 %vm4889_vm14, %v15776_v33  ;;  %v9113_v40 = vsel %vm9079_vm4, %v9112_v19, %v9111_v49  ;;  %v16658_v33 = vunpack.i.h.bf16 %v16243_v12  ;;  %v9116_v26 = vrot.slane %v8149_v38, 4  ;;  %v8229_v43 = vadd.f32 %v8228_v36, %v16377_v32 }
 0xce3   : > { %10079 = vmatmul.msk.f32.vlgmr.msra.gmra.mxu0 %vm1095_vm11, %v16351_v24  ;;  %10087 = vmatmul.msk.f32.vlgmr.msra.gmra.mxu3 %vm1095_vm11, %v16351_v24  ;;  %v9115_v22 = vsel %vm9082_vm5, %v9114_v51, %v9113_v40  ;;  %v17138_v40 = vld [vmem:[#allocation14_spill] sm:$0xff] }
 0xce4   : > { %8758 = vmatpush.msrb.mxu0 %v11163_v10  ;;  %8781 = vmatpush.msra.mxu1 %v11163_v10  ;;  %v9117_v12 = vsel %vm9085_vm6, %v9116_v26, %v9115_v22 }
 0xce5   : > { %8798 = vmatpush.msrb.mxu3 %v16649_v14  ;;  %8821 = vmatpush.msrb.mxu2 %v16649_v14  ;;  %v9119_v48 = vsel %vm9088_vm7, %v9118_v61, %v9117_v12 }
 0xce6   : > { %8759 = vmatpush.msrb.mxu0 %v11168_v42  ;;  %8782 = vmatpush.msra.mxu1 %v11168_v42  ;;  %v9121_v59 = vsel %vm9091_vm9, %v9120_v62, %v9119_v48 }
 0xce7   : > { %8799 = vmatpush.msrb.mxu3 %v16658_v33  ;;  %8822 = vmatpush.msrb.mxu2 %v16658_v33 }
 0xce8   : > { %10092 = vmatpush.msk.msrb.mxu0 %vm4889_vm14, %v15832_v17  ;;  %10097 = vmatpush.msk.msra.mxu1 %vm4889_vm14, %v15832_v17  ;;  %v8208_v16 = vpop.f32.mrf.mxu0 }
 0xce9   : > { %10100 = vmatpush.msk.msrb.mxu3 %vm4889_vm14, %v15815_v15  ;;  %10105 = vmatpush.msk.msrb.mxu2 %vm4889_vm14, %v15815_v15  ;;  %v8209_v37 = vadd.f32 %v8208_v16, %v16377_v32  ;;  %v17141_v16 = vld [vmem:[#allocation5_spill] sm:$0xff] }
 0xcea   : > { %8761 = vmatpush.msrb.mxu0 %v16556_v50  ;;  %8784 = vmatpush.msra.mxu1 %v16556_v50  ;;  %v11174_v50 = vunpack.i.h.bf16 %v11172_v2 }
 0xceb   : > { %8801 = vmatpush.msrb.mxu3 %v16613_v0  ;;  %8824 = vmatpush.msrb.mxu2 %v16613_v0  ;;  %v9122_v5 = vrot.slane %v8209_v37, 1 }
 0xcec   : > { %8762 = vmatpush.msrb.mxu0 %v16568_v55  ;;  %8785 = vmatpush.msra.mxu1 %v16568_v55  ;;  %v11184_v55 = vunpack.i.h.bf16 %v11182_v25 }
 0xced   : > { %8802 = vmatpush.msrb.mxu3 %v16625_v58  ;;  %8825 = vmatpush.msrb.mxu2 %v16625_v58  ;;  %v9123_v57 = vsel %vm9094_vm10, %v9122_v5, %v9121_v59 }
 0xcee   : > { %10093 = vmatpush.msk.msrb.mxu0 %vm4889_vm14, %v15732_v60  ;;  %10098 = vmatpush.msk.msra.mxu1 %vm4889_vm14, %v15732_v60  ;;  %9205 = vst.msk [vmem:[%s16437_s30 + $0x10] sm:$0xff] %vm9202_vm12, %v9123_v57  ;;  %v11178_v60 = vunpack.i.l.bf16 %v11177_v45 }
 0xcef   : > { %10101 = vmatpush.msk.msrb.mxu3 %vm4889_vm14, %v15826_v28  ;;  %10106 = vmatpush.msk.msrb.mxu2 %vm4889_vm14, %v15826_v28  ;;  %v16717_v28 = vunpack.i.h.bf16 %v11177_v45 }
 0xcf0   : > { %10099 = vmatmul.msk.f32.vlgmr.msra.gmra.mxu1 %vm1095_vm11, %v16351_v24  ;;  %10107 = vmatmul.msk.f32.vlgmr.msrb.gmra.mxu2 %vm1095_vm11, %v16351_v24 }
 0xcf1   : > { %8858 = vmatpush.msrb.mxu1 %v11174_v50  ;;  %8898 = vmatpush.msra.mxu2 %v16693_v47 }
 0xcf2   : > { %8764 = vmatpush.msrb.mxu0 %v16584_v21  ;;  %8804 = vmatpush.msrb.mxu3 %v11163_v10  ;;  %v11188_v21 = vunpack.i.l.bf16 %v16268_v44 }
 0xcf3   : > { %8859 = vmatpush.msrb.mxu1 %v11184_v55  ;;  %8899 = vmatpush.msra.mxu2 %v16703_v41 }
 0xcf4   : > { %8765 = vmatpush.msrb.mxu0 %v16590_v46  ;;  %8805 = vmatpush.msrb.mxu3 %v11168_v42  ;;  %v16725_v46 = vunpack.i.h.bf16 %v16268_v44  ;;  %v8248_v44 = vpop.f32.mrf.mxu3 }
 0xcf5   : > { %10112 = vmatpush.msk.msrb.mxu1 %vm4889_vm14, %v15900_v27  ;;  %10120 = vmatpush.msk.msra.mxu2 %vm4889_vm14, %v15888_v3  ;;  %v8249_v29 = vadd.f32 %v8248_v44, %v16377_v32  ;;  %v8308_v13 = vpop.f32.mrf.mxu1 }
 0xcf6   : > { %10094 = vmatpush.msk.msrb.mxu0 %vm4889_vm14, %v15787_v18  ;;  %10102 = vmatpush.msk.msrb.mxu3 %vm4889_vm14, %v15832_v17  ;;  %v16729_v18 = vpop.permute.xlu2 %7720  ;;  %v11197_v17 = vpop.permute.xlu0 %11196  ;;  %v8309_v51 = vadd.f32 %v8308_v13, %v16377_v32 }
 0xcf7   : > { %10095 = vmatmul.msk.f32.vlgmr.msrb.gmra.mxu0 %vm1095_vm11, %v16351_v24  ;;  %10103 = vmatmul.msk.f32.vlgmr.msrb.gmra.mxu3 %vm1095_vm11, %v16351_v24  ;;  %v9124_v58 = vrot.slane %v8249_v29, 7  ;;  %v11198_v19 = vunpack.i.l.bf16 %v11197_v17  ;;  %v11199_v38 = vunpack.i.h.bf16 %v11197_v17 }
 0xcf8   : > { %8838 = vmatpush.msra.mxu0 %v11178_v60  ;;  %8861 = vmatpush.msrb.mxu1 %v11178_v60 }
 0xcf9   : > { %8878 = vmatpush.msra.mxu3 %v16717_v28  ;;  %8901 = vmatpush.msra.mxu2 %v16717_v28  ;;  %v9125_v63 = vsel %vm9076_vm0, %v9124_v58, %v8229_v43 }
 0xcfa   : > { %8839 = vmatpush.msra.mxu0 %v11188_v21  ;;  %8862 = vmatpush.msrb.mxu1 %v11188_v21 }
 0xcfb   : > { %8879 = vmatpush.msra.mxu3 %v16725_v46  ;;  %8902 = vmatpush.msra.mxu2 %v16725_v46 }
 0xcfc   : > { %10108 = vmatpush.msk.msra.mxu0 %vm4889_vm14, %v15867_v6  ;;  %10113 = vmatpush.msk.msrb.mxu1 %vm4889_vm14, %v15867_v6  ;;  %v8288_v0 = vpop.f32.mrf.mxu0 }
 0xcfd   : > { %10116 = vmatpush.msk.msra.mxu3 %vm4889_vm14, %v15862_v9  ;;  %10121 = vmatpush.msk.msra.mxu2 %vm4889_vm14, %v15862_v9 }
 0xcfe   : > { %8841 = vmatpush.msra.mxu0 %v16615_v35  ;;  %8864 = vmatpush.msrb.mxu1 %v16615_v35  ;;  %v8268_v35 = vpop.f32.mrf.mxu2  ;;  %v7650_v52 = vpop.permute.xlu2 %7649 }
 0xcff   : > { %8881 = vmatpush.msra.mxu3 %v11174_v50  ;;  %8904 = vmatpush.msra.mxu2 %v11174_v50  ;;  %v8269_v20 = vadd.f32 %v8268_v35, %v16377_v32 }
 0xd00   : > { %8842 = vmatpush.msra.mxu0 %v16627_v23  ;;  %8865 = vmatpush.msrb.mxu1 %v16627_v23  ;;  %v7461_v23 = vpop.permute.xlu0 %7460 }
 0xd01   : > { %8882 = vmatpush.msra.mxu3 %v11184_v55  ;;  %8905 = vmatpush.msra.mxu2 %v11184_v55  ;;  %v9126_v49 = vrot.slane %v8269_v20, 6 }
 0xd02   : > { %10109 = vmatpush.msk.msra.mxu0 %vm4889_vm14, %v15808_v53  ;;  %10114 = vmatpush.msk.msrb.mxu1 %vm4889_vm14, %v15808_v53  ;;  %v8289_v53 = vadd.f32 %v8288_v0, %v16377_v32 }
 0xd03   : > { %10117 = vmatpush.msk.msra.mxu3 %vm4889_vm14, %v15900_v27  ;;  %10122 = vmatpush.msk.msra.mxu2 %vm4889_vm14, %v15900_v27  ;;  %v8328_v27 = vpop.f32.mrf.mxu3 }
 0xd04   : > { %10115 = vmatmul.msk.f32.vlgmr.msrb.gmra.mxu1 %vm1095_vm11, %v16351_v24  ;;  %10123 = vmatmul.msk.f32.vlgmr.msra.gmra.mxu2 %vm1095_vm11, %v16351_v24  ;;  %v9128_v7 = vrot.slane %v8289_v53, 5  ;;  %v8329_v54 = vadd.f32 %v8328_v27, %v16377_v32 }
 0xd05   : > { %8938 = vmatpush.msra.mxu1 %v7650_v52  ;;  %8978 = vmatpush.msrb.mxu2 %v16729_v18 }
 0xd06   : > { %8844 = vmatpush.msra.mxu0 %v16649_v14  ;;  %8884 = vmatpush.msra.mxu3 %v11178_v60  ;;  %v8348_v10 = vpop.f32.mrf.mxu2  ;;  %v9132_v1 = vrot.slane %v8329_v54, 3  ;;  %v9130_v14 = vrot.slane %v8309_v51, 4 }
 0xd07   : > { %8939 = vmatpush.msra.mxu1 %v7461_v23  ;;  %8979 = vmatpush.msrb.mxu2 %v16331_v30  ;;  %v8349_v8 = vadd.f32 %v8348_v10, %v16377_v32 }
 0xd08   : > { %8845 = vmatpush.msra.mxu0 %v16658_v33  ;;  %8885 = vmatpush.msra.mxu3 %v11188_v21 }
 0xd09   : > { %10128 = vmatpush.msk.msra.mxu1 %vm4889_vm14, %v15994_v11  ;;  %10136 = vmatpush.msk.msrb.mxu2 %vm4889_vm14, %v15970_v56  ;;  %v9134_v61 = vrot.slane %v8349_v8, 2 }
 0xd0a   : > { %10110 = vmatpush.msk.msra.mxu0 %vm4889_vm14, %v15815_v15  ;;  %10118 = vmatpush.msk.msra.mxu3 %vm4889_vm14, %v15867_v6  ;;  %v9127_v15 = vsel %vm9079_vm4, %v9126_v49, %v9125_v63 }
 0xd0b   : > { %10111 = vmatmul.msk.f32.vlgmr.msra.gmra.mxu0 %vm1095_vm11, %v16351_v24  ;;  %10119 = vmatmul.msk.f32.vlgmr.msra.gmra.mxu3 %vm1095_vm11, %v16351_v24  ;;  %v9129_v6 = vsel %vm9082_vm5, %v9128_v7, %v9127_v15 }
 0xd0c   : > { %8918 = vmatpush.msrb.mxu0 %v11193_v31  ;;  %8941 = vmatpush.msra.mxu1 %v11193_v31  ;;  %v9131_v42 = vsel %vm9085_vm6, %v9130_v14, %v9129_v6 }
 0xd0d   : > { %8958 = vmatpush.msrb.mxu3 %v16778_v4  ;;  %8981 = vmatpush.msrb.mxu2 %v16778_v4  ;;  %v9133_v33 = vsel %vm9088_vm7, %v9132_v1, %v9131_v42 }
 0xd0e   : > { %8919 = vmatpush.msrb.mxu0 %v11198_v19  ;;  %8942 = vmatpush.msra.mxu1 %v11198_v19  ;;  %v9135_v34 = vsel %vm9091_vm9, %v9134_v61, %v9133_v33 }
 0xd0f   : > { %8959 = vmatpush.msrb.mxu3 %v11199_v38  ;;  %8982 = vmatpush.msrb.mxu2 %v11199_v38  ;;  %v8428_v62 = vpop.f32.mrf.mxu2 }
 0xd10   : > { %10124 = vmatpush.msk.msrb.mxu0 %vm4889_vm14, %v15913_v39  ;;  %10129 = vmatpush.msk.msra.mxu1 %vm4889_vm14, %v15913_v39  ;;  %v8368_v45 = vpop.f32.mrf.mxu0  ;;  %v8429_v59 = vadd.f32 %v8428_v62, %v16377_v32 }
 0xd11   : > { %10132 = vmatpush.msk.msrb.mxu3 %vm4889_vm14, %v17138_v40  ;;  %10137 = vmatpush.msk.msrb.mxu2 %vm4889_vm14, %v17138_v40  ;;  %v8369_v22 = vadd.f32 %v8368_v45, %v16377_v32 }
 0xd12   : > { %8921 = vmatpush.msrb.mxu0 %v16693_v47  ;;  %8944 = vmatpush.msra.mxu1 %v16693_v47  ;;  %v9140_v55 = vrot.slane %v8429_v59, 6 }
 0xd13   : > { %8961 = vmatpush.msrb.mxu3 %v7650_v52  ;;  %8984 = vmatpush.msrb.mxu2 %v7650_v52  ;;  %v9136_v26 = vrot.slane %v8369_v22, 1 }
 0xd14   : > { %8922 = vmatpush.msrb.mxu0 %v16703_v41  ;;  %8945 = vmatpush.msra.mxu1 %v16703_v41 }
 0xd15   : > { %8962 = vmatpush.msrb.mxu3 %v7461_v23  ;;  %8985 = vmatpush.msrb.mxu2 %v7461_v23  ;;  %v9137_v12 = vsel %vm9094_vm10, %v9136_v26, %v9135_v34 }
 0xd16   : > { %10125 = vmatpush.msk.msrb.mxu0 %vm4889_vm14, %v15888_v3  ;;  %10130 = vmatpush.msk.msra.mxu1 %vm4889_vm14, %v15888_v3  ;;  %9206 = vst.msk [vmem:[%s16437_s30 + $0x18] sm:$0xff] %vm9202_vm12, %v9137_v12  ;;  %v17139_v3 = vld [vmem:[#allocation27_spill] sm:$0xff]  ;;  %v8408_v48 = vpop.f32.mrf.mxu3 }
 0xd17   : > { %10133 = vmatpush.msk.msrb.mxu3 %vm4889_vm14, %v15994_v11  ;;  %10138 = vmatpush.msk.msrb.mxu2 %vm4889_vm14, %v15994_v11  ;;  %v17140_v11 = vld [vmem:[#allocation28_spill] sm:$0xff] }
 0xd18   : > { %10131 = vmatmul.msk.f32.vlgmr.msra.gmra.mxu1 %vm1095_vm11, %v16351_v24  ;;  %10139 = vmatmul.msk.f32.vlgmr.msrb.gmra.mxu2 %vm1095_vm11, %v16351_v24 }
 0xd19   : > { %8924 = vmatpush.msrb.mxu0 %v16717_v28  ;;  %8964 = vmatpush.msrb.mxu3 %v11193_v31 }
 0xd1b   : > { %8925 = vmatpush.msrb.mxu0 %v16725_v46  ;;  %8965 = vmatpush.msrb.mxu3 %v11198_v19 }
 0xd1d   : > { %10126 = vmatpush.msk.msrb.mxu0 %vm4889_vm14, %v15862_v9  ;;  %10134 = vmatpush.msk.msrb.mxu3 %vm4889_vm14, %v15913_v39  ;;  %v8388_v9 = vpop.f32.mrf.mxu1  ;;  %v8409_v39 = vadd.f32 %v8408_v48, %v16377_v32 }
 0xd1e   : > { %10127 = vmatmul.msk.f32.vlgmr.msrb.gmra.mxu0 %vm1095_vm11, %v16351_v24  ;;  %10135 = vmatmul.msk.f32.vlgmr.msrb.gmra.mxu3 %vm1095_vm11, %v16351_v24  ;;  %v8389_v25 = vadd.f32 %v8388_v9, %v16377_v32 }
 0xd1f   : > { %8998 = vmatpush.msra.mxu0 %v17139_v3  ;;  %v9138_v5 = vrot.slane %v8409_v39, 7 }
 0xd21   : > { %8999 = vmatpush.msra.mxu0 %v17140_v11 }
 0xd23   : > { %10140 = vmatpush.msk.msra.mxu0 %vm4889_vm14, %v17141_v16  ;;  %v8508_v60 = vpop.f32.mrf.mxu2 }
 0xd24   : > { %v8448_v37 = vpop.f32.mrf.mxu0  ;;  %v8509_v17 = vadd.f32 %v8508_v60, %v16377_v32 }
 0xd25   : > { %9001 = vmatpush.msra.mxu0 %v16729_v18  ;;  %v8449_v2 = vadd.f32 %v8448_v37, %v16377_v32 }
 0xd26   : > { %v9148_v0 = vrot.slane %v8509_v17, 2 }
 0xd27   : > { %9002 = vmatpush.msra.mxu0 %v16331_v30  ;;  %v8468_v30 = vpop.f32.mrf.mxu1  ;;  %v9142_v50 = vrot.slane %v8449_v2, 5 }
 0xd28   : > { %v8469_v41 = vadd.f32 %v8468_v30, %v16377_v32 }
 0xd29   : > { %10141 = vmatpush.msk.msra.mxu0 %vm4889_vm14, %v15970_v56  ;;  %v9139_v56 = vsel %vm9076_vm0, %v9138_v5, %v8389_v25 }
 0xd2a   : > { %v8488_v57 = vpop.f32.mrf.mxu3  ;;  %v9141_v28 = vsel %vm9079_vm4, %v9140_v55, %v9139_v56  ;;  %v9144_v18 = vrot.slane %v8469_v41, 4 }
 0xd2b   : > { %9004 = vmatpush.msra.mxu0 %v16778_v4  ;;  %v8489_v47 = vadd.f32 %v8488_v57, %v16377_v32  ;;  %v9143_v21 = vsel %vm9082_vm5, %v9142_v50, %v9141_v28 }
 0xd2d   : > { %9005 = vmatpush.msra.mxu0 %v11199_v38  ;;  %v9146_v46 = vrot.slane %v8489_v47, 3 }
 0xd2f   : > { %10142 = vmatpush.msk.msra.mxu0 %vm4889_vm14, %v17138_v40 }
 0xd30   : > { %10143 = vmatmul.msk.f32.vlgmr.msra.gmra.mxu0 %vm1095_vm11, %v16351_v24  ;;  %v9145_v24 = vsel %vm9085_vm6, %v9144_v18, %v9143_v21 }
 0xd31   : > { %v9147_v36 = vsel %vm9088_vm7, %v9146_v46, %v9145_v24  ;;  %v8548_v23 = vpop.f32.mrf.mxu1 }
 0xd32   : > { %v9149_v52 = vsel %vm9091_vm9, %v9148_v0, %v9147_v36  ;;  %v8549_v31 = vadd.f32 %v8548_v23, %v16377_v32 }
 0xd37   : > { %v8588_v43 = vpop.f32.mrf.mxu2 }
 0xd38   : > { %v8528_v44 = vpop.f32.mrf.mxu0  ;;  %v8589_v7 = vadd.f32 %v8588_v43, %v16377_v32 }
 0xd39   : > { %v8529_v29 = vadd.f32 %v8528_v44, %v16377_v32 }
 0xd3a   : > { %v9154_v19 = vrot.slane %v8589_v7, 6 }
 0xd3b   : > { %v9150_v35 = vrot.slane %v8529_v29, 1 }
 0xd3d   : > { %v9151_v58 = vsel %vm9094_vm10, %v9150_v35, %v9149_v52 }
 0xd3e   : > { %9207 = vst.msk [vmem:[%s16437_s30 + $0x20] sm:$0xff] %vm9202_vm12, %v9151_v58  ;;  %v8568_v53 = vpop.f32.mrf.mxu3 }
 0xd3f   : > { %v8569_v20 = vadd.f32 %v8568_v53, %v16377_v32 }
 0xd41   : > { %v9152_v13 = vrot.slane %v8569_v20, 7 }
 0xd43   : > { %v9153_v51 = vsel %vm9076_vm0, %v9152_v13, %v8549_v31 }
 0xd44   : > { %v9155_v6 = vsel %vm9079_vm4, %v9154_v19, %v9153_v51 }
 0xd45   : > { %v8628_v49 = vpop.f32.mrf.mxu1 }
 0xd46   : > { %v8629_v15 = vadd.f32 %v8628_v49, %v16377_v32 }
 0xd48   : > { %v9158_v8 = vrot.slane %v8629_v15, 4 }
 0xd4b   : > { %v8668_v38 = vpop.f32.mrf.mxu2 }
 0xd4c   : > { %v8608_v27 = vpop.f32.mrf.mxu0  ;;  %v8669_v42 = vadd.f32 %v8668_v38, %v16377_v32 }
 0xd4d   : > { %v8609_v63 = vadd.f32 %v8608_v27, %v16377_v32 }
 0xd4e   : > { %v9162_v61 = vrot.slane %v8669_v42, 2 }
 0xd4f   : > { %v9156_v4 = vrot.slane %v8609_v63, 5 }
 0xd51   : > { %v9157_v1 = vsel %vm9082_vm5, %v9156_v4, %v9155_v6 }
 0xd52   : > { %v8648_v54 = vpop.f32.mrf.mxu3  ;;  %v9159_v45 = vsel %vm9085_vm6, %v9158_v8, %v9157_v1 }
 0xd53   : > { %v8649_v10 = vadd.f32 %v8648_v54, %v16377_v32 }
 0xd55   : > { %v9160_v14 = vrot.slane %v8649_v10, 3 }
 0xd57   : > { %v9161_v33 = vsel %vm9088_vm7, %v9160_v14, %v9159_v45 }
 0xd58   : > { %v9163_v34 = vsel %vm9091_vm9, %v9162_v61, %v9161_v33 }
 0xd59   : > { %v8708_v11 = vpop.f32.mrf.mxu1 }
 0xd5a   : > { %v8709_v2 = vadd.f32 %v8708_v11, %v16377_v32 }
 0xd5f   : > { %v8748_v9 = vpop.f32.mrf.mxu2 }
 0xd60   : > { %v8688_v40 = vpop.f32.mrf.mxu0  ;;  %v8749_v62 = vadd.f32 %v8748_v9, %v16377_v32 }
 0xd61   : > { %v8689_v22 = vadd.f32 %v8688_v40, %v16377_v32 }
 0xd62   : > { %v9168_v56 = vrot.slane %v8749_v62, 6 }
 0xd63   : > { %v9164_v26 = vrot.slane %v8689_v22, 1 }
 0xd65   : > { %v9165_v12 = vsel %vm9094_vm10, %v9164_v26, %v9163_v34 }
 0xd66   : > { %9208 = vst.msk [vmem:[%s16437_s30 + $0x28] sm:$0xff] %vm9202_vm12, %v9165_v12  ;;  %v8728_v3 = vpop.f32.mrf.mxu3 }
 0xd67   : > { %v8729_v16 = vadd.f32 %v8728_v3, %v16377_v32 }
 0xd69   : > { %v9166_v39 = vrot.slane %v8729_v16, 7 }
 0xd6b   : > { %v9167_v57 = vsel %vm9076_vm0, %v9166_v39, %v8709_v2 }
 0xd6c   : > { %v9169_v55 = vsel %vm9079_vm4, %v9168_v56, %v9167_v57 }
 0xd6d   : > { %v8788_v59 = vpop.f32.mrf.mxu1 }
 0xd6e   : > { %v8789_v50 = vadd.f32 %v8788_v59, %v16377_v32 }
 0xd70   : > { %v9172_v28 = vrot.slane %v8789_v50, 4 }
 0xd73   : > { %v8828_v47 = vpop.f32.mrf.mxu2 }
 0xd74   : > { %v8768_v48 = vpop.f32.mrf.mxu0  ;;  %v8829_v21 = vadd.f32 %v8828_v47, %v16377_v32 }
 0xd75   : > { %v8769_v37 = vadd.f32 %v8768_v48, %v16377_v32 }
 0xd76   : > { %v9176_v44 = vrot.slane %v8829_v21, 2 }
 0xd77   : > { %v9170_v25 = vrot.slane %v8769_v37, 5 }
 0xd79   : > { %v9171_v41 = vsel %vm9082_vm5, %v9170_v25, %v9169_v55 }
 0xd7a   : > { %v8808_v5 = vpop.f32.mrf.mxu3  ;;  %v9173_v46 = vsel %vm9085_vm6, %v9172_v28, %v9171_v41 }
 0xd7b   : > { %v8809_v30 = vadd.f32 %v8808_v5, %v16377_v32 }
 0xd7d   : > { %v9174_v60 = vrot.slane %v8809_v30, 3 }
 0xd7f   : > { %v9175_v17 = vsel %vm9088_vm7, %v9174_v60, %v9173_v46 }
 0xd80   : > { %v9177_v29 = vsel %vm9091_vm9, %v9176_v44, %v9175_v17 }
 0xd81   : > { %v8868_v52 = vpop.f32.mrf.mxu1 }
 0xd82   : > { %v8869_v63 = vadd.f32 %v8868_v52, %v16377_v32 }
 0xd87   : > { %v8908_v23 = vpop.f32.mrf.mxu2 }
 0xd88   : > { %v8848_v18 = vpop.f32.mrf.mxu0  ;;  %v8909_v43 = vadd.f32 %v8908_v23, %v16377_v32 }
 0xd89   : > { %v8849_v24 = vadd.f32 %v8848_v18, %v16377_v32 }
 0xd8a   : > { %v9182_v51 = vrot.slane %v8909_v43, 6 }
 0xd8b   : > { %v9178_v36 = vrot.slane %v8849_v24, 1 }
 0xd8d   : > { %v9179_v0 = vsel %vm9094_vm10, %v9178_v36, %v9177_v29 }
 0xd8e   : > { %9209 = vst.msk [vmem:[%s16437_s30 + $0x30] sm:$0xff] %vm9202_vm12, %v9179_v0  ;;  %v8888_v35 = vpop.f32.mrf.mxu3 }
 0xd8f   : > { %v8889_v58 = vadd.f32 %v8888_v35, %v16377_v32 }
 0xd91   : > { %v9180_v20 = vrot.slane %v8889_v58, 7 }
 0xd93   : > { %v9181_v54 = vsel %vm9076_vm0, %v9180_v20, %v8869_v63 }
 0xd94   : > { %v9183_v19 = vsel %vm9079_vm4, %v9182_v51, %v9181_v54 }
 0xd95   : > { %v8948_v7 = vpop.f32.mrf.mxu1 }
 0xd96   : > { %v8949_v4 = vadd.f32 %v8948_v7, %v16377_v32 }
 0xd98   : > { %v9186_v6 = vrot.slane %v8949_v4, 4 }
 0xd9b   : > { %v8928_v53 = vpop.f32.mrf.mxu0  ;;  %v8988_v10 = vpop.f32.mrf.mxu2 }
 0xd9c   : > { %v8929_v27 = vadd.f32 %v8928_v53, %v16377_v32  ;;  %v8989_v1 = vadd.f32 %v8988_v10, %v16377_v32 }
 0xd9e   : > { %v9184_v31 = vrot.slane %v8929_v27, 5  ;;  %v9190_v40 = vrot.slane %v8989_v1, 2 }
 0xda0   : > { %v9185_v15 = vsel %vm9082_vm5, %v9184_v31, %v9183_v19 }
 0xda1   : > { %v8968_v13 = vpop.f32.mrf.mxu3  ;;  %v9187_v14 = vsel %vm9085_vm6, %v9186_v6, %v9185_v15 }
 0xda2   : > { %v8969_v49 = vadd.f32 %v8968_v13, %v16377_v32 }
 0xda4   : > { %v9188_v38 = vrot.slane %v8969_v49, 3 }
 0xda6   : > { %v9189_v42 = vsel %vm9088_vm7, %v9188_v38, %v9187_v14 }
 0xda7   : > { %v9191_v22 = vsel %vm9091_vm9, %v9190_v40, %v9189_v42 }
 0xdad   : > { %v9008_v8 = vpop.f32.mrf.mxu0 }
 0xdae   : > { %v9009_v45 = vadd.f32 %v9008_v8, %v16377_v32 }
 0xdb0   : > { %v9192_v33 = vrot.slane %v9009_v45, 1 }
 0xdb2   : > { %v9193_v61 = vsel %vm9094_vm10, %v9192_v33, %v9191_v22 }
 0xdb3   : > { %9210 = vst.msk [vmem:[%s16437_s30 + $0x38] sm:$0xff] %vm9202_vm12, %v9193_v61 }
 0xdb4   : > { %11230 = shalt.err (!%p11227_p3)
}
 0xdb5   : > { %s11272_s25 = smov 128   ;;  %s11273_s30 = smov 8  }
 0xdb6   : > { %10151 = dma.vmem_to_hbm [thread:$0]  (%p11372_p5), %s9225_s24, 1024, %s9227_s21, %s9212_s16, %s11272_s25, %s11272_s25, %s11273_s30  }
 0xdb7 PF: > { %p10157_p4 = scmp.ge.s32.totalorder %s11265_s20, 2  ;;  %s9241_s12 = sand.u32 1, %s11253_s17  }
 0xdb8   : > { %s9242_s0 = scalar_lea.sflag [#allocation3], %s9241_s12 }
 0xdb9   : > { %p10154_p7 = pnand %p10157_p4, %p11376_p6 }
 0xdbb   : > { %p10155_p8 = pneg %p10154_p7 }
 0xdbd   : > { %11248 = dma.done.wait (%p10155_p8), %s9242_s0, 1024  }
 0xdbe   : > { %11250 = vsyncadd (%p10155_p8), %s9242_s0, 4294966272  ;;  %p21_p9 = scmp.ge.s32.totalorder %s11359_s23, 4   ;;  %s17142_s17 = smov %s11257_s18 }
 0xdbf   : > { %s17143_s18 = smov %s11261_s19  ;;  %s17144_s19 = smov %s11370_s26 }
 0xdc0   : > { %s17145_s20 = smov %s11359_s23  ;;  %23 = sbr.rel (!%p21_p9) target bundleno = 5 (0x5), region = 99 }
 0xdc5   :  { %9248 = vsyncpa [#allocation3], 1 }
 0xdc6   :  { %9250 = vsyncpa [#allocation3 + $0x1], 1 }

</bundles_post_ra>
